<compile_context>
chip_gen: v7x
topology: tpu7x:2x2x1
jax: 0.10.0
libtpu: 0.0.40
codegen_flags: <defaults>
</compile_context>

<pallas_src>
import functools
import math

import numpy as np
import jax
import jax.numpy as jnp
from jax.experimental import pallas as pl
from jax.experimental.pallas import tpu as pltpu


def _round_up(x, m):
    return (x + m - 1) // m * m


# ---------------------------------------------------------------------------
# Pallas kernel 1: stride-1 conv as ONE matmul per block (kh folded into K)
# ---------------------------------------------------------------------------
def _conv_kernel(x_ref, t_ref, b_ref, o_ref, *, oh_p, act):
    nb, hs_p, wcp = x_ref.shape
    owo = o_ref.shape[-1]
    xv = x_ref[...]                                           # (nb, hs_p, wcp) bf16
    # shift-stacked input: 3 H-taps concatenated along the (128-aligned) lane dim
    stk = jnp.concatenate([xv[:, q:q + oh_p, :] for q in range(3)], axis=-1)
    acc = jnp.dot(stk.reshape(nb * oh_p, 3 * wcp), t_ref[...],
                  preferred_element_type=jnp.float32)
    acc = acc + b_ref[...]                                    # f32 epilogue
    if act == "relu":
        acc = jnp.maximum(acc, 0.0)
    o_ref[...] = acc.reshape(nb, oh_p, owo).astype(o_ref.dtype)


def _conv_ll_kernel(x_ref, t_ref, b_ref, xt_ref, mt_ref, o_ref, ll_ref, *, oh_p):
    # Last decoder layer: same conv + fused masked Bernoulli log-likelihood.
    nb, hs_p, wcp = x_ref.shape
    owo = o_ref.shape[-1]
    xv = x_ref[...]
    stk = jnp.concatenate([xv[:, q:q + oh_p, :] for q in range(3)], axis=-1)
    logits = jnp.dot(stk.reshape(nb * oh_p, 3 * wcp), t_ref[...],
                     preferred_element_type=jnp.float32) + b_ref[...]
    logits = logits.reshape(nb, oh_p, owo)
    o_ref[...] = logits
    # Bernoulli(logits=l).log_prob(x) = x*l - softplus(l); mask kills padded
    # rows/cols so the sum equals the 28x28 masked sum.
    lp = xt_ref[...] * logits - jnp.logaddexp(logits, 0.0)
    ps = jnp.sum(lp * mt_ref[...], axis=2, keepdims=True)     # (nb, oh_p, 1)
    ll_ref[...] = jnp.sum(ps, axis=1, keepdims=True)          # (nb, 1, 1)


def conv_rows(x3, t, b2, oh_p, act, out_dtype, nb_target, x_ll=None, m_ll=None):
    n, hs_p, wcp = x3.shape
    owo = t.shape[1]
    assert t.shape[0] == 3 * wcp

    if x_ll is None:
        nb = max(1, min(nb_target, n))
        n_pad = _round_up(n, nb)
        if n_pad != n:
            x3 = jnp.pad(x3, ((0, n_pad - n), (0, 0), (0, 0)))
        out = pl.pallas_call(
            functools.partial(_conv_kernel, oh_p=oh_p, act=act),
            out_shape=jax.ShapeDtypeStruct((n_pad, oh_p, owo), out_dtype),
            grid=(n_pad // nb,),
            in_specs=[
                pl.BlockSpec((nb, hs_p, wcp), lambda i: (i, 0, 0)),
                pl.BlockSpec((3 * wcp, owo), lambda i: (0, 0)),
                pl.BlockSpec((1, owo), lambda i: (0, 0)),
            ],
            out_specs=pl.BlockSpec((nb, oh_p, owo), lambda i: (i, 0, 0)),
            compiler_params=pltpu.CompilerParams(
                dimension_semantics=("parallel",)),
        )(x3, t, b2)
        return out[:n]

    # fused log-likelihood variant: one block == one importance sample k over
    # the full batch B, so x/mask broadcast with a constant index_map.
    nb = nb_target
    assert n % nb == 0 and nb == x_ll.shape[0]
    out, ll = pl.pallas_call(
        functools.partial(_conv_ll_kernel, oh_p=oh_p),
        out_shape=(jax.ShapeDtypeStruct((n, oh_p, owo), out_dtype),
                   jax.ShapeDtypeStruct((n, 1, 1), jnp.float32)),
        grid=(n // nb,),
        in_specs=[
            pl.BlockSpec((nb, hs_p, wcp), lambda i: (i, 0, 0)),
            pl.BlockSpec((3 * wcp, owo), lambda i: (0, 0)),
            pl.BlockSpec((1, owo), lambda i: (0, 0)),
            pl.BlockSpec((nb, oh_p, owo), lambda i: (0, 0, 0)),
            pl.BlockSpec((nb, oh_p, owo), lambda i: (0, 0, 0)),
        ],
        out_specs=(pl.BlockSpec((nb, oh_p, owo), lambda i: (i, 0, 0)),
                   pl.BlockSpec((nb, 1, 1), lambda i: (i, 0, 0))),
        compiler_params=pltpu.CompilerParams(
            dimension_semantics=("parallel",)),
    )(x3, t, b2, x_ll, m_ll)
    return out, ll


def conv2d_s2d(x_nhwc, t, b2, oh, ow, o_ch, act, nb, out_dtype=jnp.bfloat16):
    """5x5 / stride-2 / pad-2 Conv2d: space-to-depth (permutation) + one fused
    tap-folded matmul kernel."""
    n, h, w, c = x_nhwc.shape
    ws = ow + 2
    oh_p = _round_up(oh, 8)
    hs_p = oh_p + 2
    wcp = t.shape[0] // 3
    xp = jnp.pad(x_nhwc, ((0, 0), (2, 2 * hs_p - h - 2), (2, 2 * ws - w - 2), (0, 0)))
    xs = xp.reshape(n, hs_p, 2, ws, 2, c).transpose(0, 1, 3, 2, 4, 5)
    xs = xs.reshape(n, hs_p, ws * 4 * c)
    if wcp != ws * 4 * c:
        xs = jnp.pad(xs, ((0, 0), (0, 0), (0, wcp - ws * 4 * c)))
    out = conv_rows(xs, t, b2, oh_p, act, out_dtype, nb)      # (n, oh_p, ow*o_ch)
    return out[:, :oh, :].reshape(n, oh, ow, o_ch)


def conv_transpose2d_phase(x_nhwc, t, b2, c_out, h_out, w_out, act, nb,
                           out_dtype=jnp.bfloat16, x_ll=None, m_ll=None):
    """5x5 / stride-2 / pad-2 ConvTranspose2d via output-phase (subpixel)
    decomposition: one stride-1 conv producing 4*c_out channels on the
    un-dilated input, then a depth-to-space interleave + crop."""
    n, h, w, c = x_nhwc.shape
    oh_p = _round_up(h, 8)
    hs_p = oh_p + 2
    wcp = t.shape[0] // 3
    xp = jnp.pad(x_nhwc, ((0, 0), (1, hs_p - h - 1), (1, 1), (0, 0)))
    xp = xp.reshape(n, hs_p, (w + 2) * c)
    if wcp != (w + 2) * c:
        xp = jnp.pad(xp, ((0, 0), (0, 0), (0, wcp - (w + 2) * c)))

    if x_ll is None:
        raw = conv_rows(xp, t, b2, oh_p, act, out_dtype, nb)
        ll = None
    else:
        raw, ll = conv_rows(xp, t, b2, oh_p, act, out_dtype, nb, x_ll, m_ll)

    out = raw[:, :h, :].reshape(n, h, w, 2, 2, c_out).transpose(0, 1, 3, 2, 4, 5)
    out = out.reshape(n, 2 * h, 2 * w, c_out)[:, :h_out, :w_out, :]
    if x_ll is None:
        return out
    return out, ll


# ---------------------------------------------------------------------------
# Pallas kernel 2: fused 2-layer MLP, tiled over rows (parallel grid)
# ---------------------------------------------------------------------------
def _mlp2_kernel(x_ref, w1_ref, b1_ref, w2_ref, b2_ref, o_ref, *, act2):
    h = jnp.dot(x_ref[...], w1_ref[...], preferred_element_type=jnp.float32)
    h = jnp.maximum(h + b1_ref[...], 0.0)                     # f32 epilogue
    o = jnp.dot(h.astype(w2_ref.dtype), w2_ref[...],
                preferred_element_type=jnp.float32) + b2_ref[...]
    if act2 == "relu":
        o = jnp.maximum(o, 0.0)
    o_ref[...] = o.astype(o_ref.dtype)


def mlp2(x, w1, b1, w2, b2, act2, out_dtype, mb=256):
    m, k_in = x.shape
    n_out = w2.shape[1]
    mb = max(8, min(mb, _round_up(m, 8)))
    m_pad = _round_up(m, mb)
    if m_pad != m:
        x = jnp.pad(x, ((0, m_pad - m), (0, 0)))
    out = pl.pallas_call(
        functools.partial(_mlp2_kernel, act2=act2),
        out_shape=jax.ShapeDtypeStruct((m_pad, n_out), out_dtype),
        grid=(m_pad // mb,),
        in_specs=[
            pl.BlockSpec((mb, k_in), lambda i: (i, 0)),
            pl.BlockSpec(w1.shape, lambda i: (0, 0)),
            pl.BlockSpec(b1.shape, lambda i: (0, 0)),
            pl.BlockSpec(w2.shape, lambda i: (0, 0)),
            pl.BlockSpec(b2.shape, lambda i: (0, 0)),
        ],
        out_specs=pl.BlockSpec((mb, n_out), lambda i: (i, 0)),
        compiler_params=pltpu.CompilerParams(dimension_semantics=("parallel",)),
    )(x, w1, b1, w2, b2)
    return out[:m]


# ---------------------------------------------------------------------------
# Pallas kernel 3: Gaussian KL + IWAE logsumexp bound (tiny, one invocation)
# ---------------------------------------------------------------------------
def _iwae_kernel(ll_ref, z_ref, mu_ref, lv_ref, kl_ref, bound_ref, *, beta, log_k):
    z = z_ref[...]                                            # (K, B, L)
    mu = mu_ref[...]                                          # (B, L)
    lv = lv_ref[...]
    # log q(z|x) - log p(z);  q = N(mu, exp(0.5*lv)), p = N(0, 1)
    kl = jnp.sum(0.5 * z * z - 0.5 * lv - 0.5 * (z - mu) ** 2 * jnp.exp(-lv),
                 axis=-1)                                     # (K, B)
    kl_ref[...] = kl
    bnd = ll_ref[...] - beta * kl                             # (K, B)
    m = jnp.max(bnd, axis=0, keepdims=True)                   # (1, B)
    lse = m + jnp.log(jnp.sum(jnp.exp(bnd - m), axis=0, keepdims=True))
    bound_ref[...] = jnp.mean(lse - log_k, axis=1, keepdims=True)   # (1, 1)


def iwae_kl_bound(ll_kb, z, mu, lv, beta, K):
    Kk, B, L = z.shape
    kl, bound = pl.pallas_call(
        functools.partial(_iwae_kernel, beta=float(beta), log_k=math.log(K)),
        out_shape=(jax.ShapeDtypeStruct((Kk, B), jnp.float32),
                   jax.ShapeDtypeStruct((1, 1), jnp.float32)),
        grid=(1,),
        in_specs=[
            pl.BlockSpec((Kk, B), lambda i: (0, 0)),
            pl.BlockSpec((Kk, B, L), lambda i: (0, 0, 0)),
            pl.BlockSpec((B, L), lambda i: (0, 0)),
            pl.BlockSpec((B, L), lambda i: (0, 0)),
        ],
        out_specs=(pl.BlockSpec((Kk, B), lambda i: (0, 0)),
                   pl.BlockSpec((1, 1), lambda i: (0, 0))),
    )(ll_kb, z, mu, lv)
    return kl, bound[0, 0]


# ---------------------------------------------------------------------------
# One-time weight preprocessing (hoisted out of the forward pass)
# ---------------------------------------------------------------------------
def _toeplitz_cat(w3, ow, wcp):
    # w3: (3, 3, Cs, O) -> concatenated-tap Toeplitz: (3*wcp, ow*O)
    kh, kw, cs, o = w3.shape
    ws = ow + kw - 1
    ts = np.zeros((kh, ws, cs, ow, o), np.float32)
    for j in range(ow):
        for qj in range(kw):
            ts[:, j + qj, :, j, :] = w3[:, qj, :, :]
    ts = ts.reshape(kh, ws * cs, ow * o)
    t = np.zeros((kh, wcp, ow * o), np.float32)
    t[:, :ws * cs, :] = ts
    return t.reshape(kh * wcp, ow * o)


def _fold_enc_conv(w, b, ow):
    # Conv2d weight (O, C, 5, 5), stride 2, pad 2 -> space-to-depth 3x3 weights,
    # Toeplitz-folded in W and concatenated over the 3 H-taps.
    w = np.asarray(w, np.float32)
    o_ch, c, kk, _ = w.shape
    w3 = np.zeros((3, 3, 2, 2, c, o_ch), np.float32)
    for qi in range(3):
        for ri in range(2):
            di = 2 * qi + ri
            if di >= kk:
                continue
            for qj in range(3):
                for rj in range(2):
                    dj = 2 * qj + rj
                    if dj >= kk:
                        continue
                    w3[qi, qj, ri, rj] = w[:, :, di, dj].T        # (C, O)
    w3 = w3.reshape(3, 3, 4 * c, o_ch)
    wcp = _round_up((ow + 2) * 4 * c, 128)
    t = _toeplitz_cat(w3, ow, wcp)
    b2 = np.tile(np.asarray(b, np.float32), ow)[None, :]
    return jnp.asarray(t, jnp.bfloat16), jnp.asarray(b2, jnp.float32)


def _fold_dec_convT(wt, b, ow):
    # ConvTranspose2d weight (Cin, Cout, 5, 5), stride 2, pad 2 -> phase
    # (subpixel) sub-kernels as a 3x3 conv with 4*Cout channels, tap-folded.
    wt = np.asarray(wt, np.float32)
    cin, cout, kk, _ = wt.shape
    w3 = np.zeros((3, 3, cin, 2, 2, cout), np.float32)
    for qh in range(3):
        for pi in range(2):
            di = pi - 2 * qh + 4
            if not (0 <= di < kk):
                continue
            for qw in range(3):
                for pj in range(2):
                    dj = pj - 2 * qw + 4
                    if not (0 <= dj < kk):
                        continue
                    w3[qh, qw, :, pi, pj, :] = wt[:, :, di, dj]
    w3 = w3.reshape(3, 3, cin, 4 * cout)
    wcp = _round_up((ow + 2) * cin, 128)
    t = _toeplitz_cat(w3, ow, wcp)
    b2 = np.tile(np.asarray(b, np.float32), 4 * ow)[None, :]
    return jnp.asarray(t, jnp.bfloat16), jnp.asarray(b2, jnp.float32)


def init_params(key, latent_dim):
    """Raw parameters in PyTorch layouts (deterministic init)."""
    ks = iter(jax.random.split(key, 32))

    def init(shape, fan_in):
        return jax.random.normal(next(ks), shape, jnp.float32) / math.sqrt(fan_in)

    p = {}
    p["enc_c1_w"] = init((16, 1, 5, 5), 25);    p["enc_c1_b"] = init((16,), 25)
    p["enc_c2_w"] = init((32, 16, 5, 5), 400);  p["enc_c2_b"] = init((32,), 400)
    p["enc_c3_w"] = init((32, 32, 5, 5), 800);  p["enc_c3_b"] = init((32,), 800)
    p["enc_fc1_w"] = init((256, 512), 512);     p["enc_fc1_b"] = init((256,), 512)
    p["enc_fc2_w"] = init((2 * latent_dim, 256), 256)
    p["enc_fc2_b"] = init((2 * latent_dim,), 256)
    p["dec_fc1_w"] = init((256, latent_dim), latent_dim)
    p["dec_fc1_b"] = init((256,), latent_dim)
    p["dec_fc2_w"] = init((512, 256), 256);     p["dec_fc2_b"] = init((512,), 256)
    p["dec_ct1_w"] = init((32, 32, 5, 5), 800); p["dec_ct1_b"] = init((32,), 800)
    p["dec_ct2_w"] = init((32, 16, 5, 5), 800); p["dec_ct2_b"] = init((16,), 800)
    p["dec_ct3_w"] = init((16, 1, 5, 5), 400);  p["dec_ct3_b"] = init((1,), 400)
    return p


def prepare_params(p, latent_dim):
    """Fold/pre-transpose everything once; bf16 conv weights, f32 biases."""
    prep = {}
    prep["enc1_T"], prep["enc1_b"] = _fold_enc_conv(p["enc_c1_w"], p["enc_c1_b"], 14)
    prep["enc2_T"], prep["enc2_b"] = _fold_enc_conv(p["enc_c2_w"], p["enc_c2_b"], 7)
    prep["enc3_T"], prep["enc3_b"] = _fold_enc_conv(p["enc_c3_w"], p["enc_c3_b"], 4)

    # enc_fc1: torch (256,512), in-features ordered NCHW (c,h,w) -> NHWC rows.
    w1 = np.asarray(p["enc_fc1_w"], np.float32).T                   # (512, 256)
    w1 = w1.reshape(32, 4, 4, 256).transpose(1, 2, 0, 3).reshape(512, 256)
    prep["efc1_w"] = jnp.asarray(w1, jnp.bfloat16)
    prep["efc1_b"] = jnp.asarray(np.asarray(p["enc_fc1_b"], np.float32)[None, :])
    # enc_fc2 kept in f32 (mu / log_var path).
    prep["efc2_w"] = jnp.asarray(np.asarray(p["enc_fc2_w"], np.float32).T)
    prep["efc2_b"] = jnp.asarray(np.asarray(p["enc_fc2_b"], np.float32)[None, :])

    prep["dfc1_w"] = jnp.asarray(np.asarray(p["dec_fc1_w"], np.float32).T,
                                 jnp.bfloat16)                      # (L, 256)
    prep["dfc1_b"] = jnp.asarray(np.asarray(p["dec_fc1_b"], np.float32)[None, :])
    # dec_fc2: out features ordered NCHW (c,h,w) -> permute columns to NHWC.
    w2 = np.asarray(p["dec_fc2_w"], np.float32).T                   # (256, 512)
    w2 = w2.reshape(256, 32, 4, 4).transpose(0, 2, 3, 1).reshape(256, 512)
    b2 = np.asarray(p["dec_fc2_b"], np.float32).reshape(32, 4, 4)
    b2 = b2.transpose(1, 2, 0).reshape(512)
    prep["dfc2_w"] = jnp.asarray(w2, jnp.bfloat16)
    prep["dfc2_b"] = jnp.asarray(b2[None, :])

    prep["dct1_T"], prep["dct1_b"] = _fold_dec_convT(p["dec_ct1_w"], p["dec_ct1_b"], 4)
    prep["dct2_T"], prep["dct2_b"] = _fold_dec_convT(p["dec_ct2_w"], p["dec_ct2_b"], 7)
    prep["dct3_T"], prep["dct3_b"] = _fold_dec_convT(p["dec_ct3_w"], p["dec_ct3_b"], 14)
    return prep


# ---------------------------------------------------------------------------
# ConvVAE forward
# ---------------------------------------------------------------------------
def conv_vae_forward(prep, x, mask, eps_key, *, latent_dim, K=20, beta=1.0):
    B = x.shape[0]
    L = latent_dim
    cdt = jnp.bfloat16

    # ---- Encoder: 3 fused conv kernels + one fused 2-layer MLP -------------
    h = jnp.transpose(x, (0, 2, 3, 1)).astype(cdt)                  # NHWC
    h = conv2d_s2d(h, prep["enc1_T"], prep["enc1_b"], 14, 14, 16, "relu", nb=16)
    h = conv2d_s2d(h, prep["enc2_T"], prep["enc2_b"], 7, 7, 32, "relu", nb=32)
    h = conv2d_s2d(h, prep["enc3_T"], prep["enc3_b"], 4, 4, 32, "relu", nb=32)
    h = h.reshape(B, 4 * 4 * 32)                                    # NHWC order
    enc_out = mlp2(h, prep["efc1_w"], prep["efc1_b"],
                   prep["efc2_w"], prep["efc2_b"], "none", jnp.float32)
    mu, log_var = enc_out[:, :L], enc_out[:, L:]

    # ---- reparameterized sample (XLA glue; rsample has no kernel form) -----
    eps = jax.random.normal(eps_key, (K, B, L), jnp.float32)
    z = mu[None] + jnp.exp(0.5 * log_var)[None] * eps               # (K, B, L)

    # ---- Decoder: fused MLP + 3 phase-decomposed conv-transpose kernels ----
    d = mlp2(z.reshape(K * B, L).astype(cdt),
             prep["dfc1_w"], prep["dfc1_b"],
             prep["dfc2_w"], prep["dfc2_b"], "relu", cdt, mb=256)
    d = d.reshape(K * B, 4, 4, 32)                                  # NHWC
    d = conv_transpose2d_phase(d, prep["dct1_T"], prep["dct1_b"], 32, 7, 7,
                               "relu", nb=32)
    d = conv_transpose2d_phase(d, prep["dct2_T"], prep["dct2_b"], 16, 14, 14,
                               "relu", nb=32)

    # x / mask permuted once (tiny, B x 784) into the last layer's raw phase
    # layout; padded rows carry mask=0 so they contribute nothing.
    def to_phase(a):
        a = a.reshape(B, 14, 2, 14, 2).transpose(0, 1, 3, 2, 4).reshape(B, 14, 56)
        return jnp.pad(a, ((0, 0), (0, 2), (0, 0))).astype(jnp.float32)

    x_ph = to_phase(x.reshape(B, 28, 28))
    m_ph = to_phase(mask.reshape(B, 28, 28))

    # Last layer: conv-transpose + fused masked Bernoulli log-likelihood.
    logits_nhwc, ll = conv_transpose2d_phase(
        d, prep["dct3_T"], prep["dct3_b"], 1, 28, 28, "none", nb=B,
        out_dtype=jnp.float32, x_ll=x_ph, m_ll=m_ph)
    logits = logits_nhwc.reshape(K, B, 28, 28)
    ll_kb = ll.reshape(K, B)

    # ---- Gaussian KL + IWAE logsumexp bound (single tiny kernel) -----------
    kl_kb, bound = iwae_kl_bound(ll_kb, z, mu, log_var, beta, K)

    return {
        "q_mean": mu,
        "q_log_var": log_var,
        "latents": z,
        "output_logits": logits,     # parameters of Bernoulli(logits=...)
        "kl": kl_kb,                 # (K, B)
        "likelihood": ll_kb,         # (K, B)
        "iwae_bound": bound,
    }


if __name__ == "__main__":
    latent_dim = 16
    B, K = 2, 4

    key = jax.random.PRNGKey(0)
    k_param, k_x, k_mask, k_eps = jax.random.split(key, 4)

    raw_params = init_params(k_param, latent_dim)
    prep = prepare_params(raw_params, latent_dim)

    x = (jax.random.uniform(k_x, (B, 1, 28, 28)) > 0.5).astype(jnp.float32)
    mask = (jax.random.uniform(k_mask, (B, 1, 28, 28)) > 0.2).astype(jnp.float32)

    fwd = jax.jit(functools.partial(conv_vae_forward,
                                    latent_dim=latent_dim, K=K, beta=1.0))
    out = fwd(prep, x, mask, k_eps)
    jax.block_until_ready(out)
    print("KERNEL_OK")
</pallas_src>

<mosaic_0001>
module attributes {stable_mosaic.version = 11 : i64} {
  func.func @_conv_kernel(%arg0: i32, %arg1: memref<2x18x128xbf16, #tpu.memory_space<vmem>>, %arg2: memref<384x224xbf16, #tpu.memory_space<vmem>>, %arg3: memref<1x224xf32, #tpu.memory_space<vmem>>, %arg4: memref<2x16x224xbf16, #tpu.memory_space<vmem>>) attributes {dimension_semantics = [#tpu.dimension_semantics<parallel>], iteration_bounds = array<i64: 1>, scalar_prefetch = 0 : i64, scratch_operands = 0 : i64, tpu.core_type = #tpu.core_type<tc>, window_params = [{transform_indices = @transform_0, window_bounds = array<i64: 2, 18, 128>}, {pipeline_mode = #tpu.pipeline_mode<synchronous>, transform_indices = @transform_1, window_bounds = array<i64: 384, 224>}, {pipeline_mode = #tpu.pipeline_mode<synchronous>, transform_indices = @transform_2, window_bounds = array<i64: 1, 224>}, {transform_indices = @transform_3, window_bounds = array<i64: 2, 16, 224>}]} {
    %c0 = arith.constant 0 : index
    %c0_0 = arith.constant 0 : index
    %c0_1 = arith.constant 0 : index
    %0 = vector.load %arg1[%c0, %c0_0, %c0_1] : memref<2x18x128xbf16, #tpu.memory_space<vmem>>, vector<2x18x128xbf16>
    %1 = vector.extract_strided_slice %0 {offsets = [0, 0, 0], sizes = [2, 16, 128], strides = [1, 1, 1]} : vector<2x18x128xbf16> to vector<2x16x128xbf16>
    %2 = vector.extract_strided_slice %0 {offsets = [0, 1, 0], sizes = [2, 16, 128], strides = [1, 1, 1]} : vector<2x18x128xbf16> to vector<2x16x128xbf16>
    %3 = vector.extract_strided_slice %0 {offsets = [0, 2, 0], sizes = [2, 16, 128], strides = [1, 1, 1]} : vector<2x18x128xbf16> to vector<2x16x128xbf16>
    %4 = tpu.concatenate %1, %2, %3 in 2 : vector<2x16x128xbf16>, vector<2x16x128xbf16>, vector<2x16x128xbf16> -> vector<2x16x384xbf16>
    %5 = vector.shape_cast %4 : vector<2x16x384xbf16> to vector<32x384xbf16>
    %c0_2 = arith.constant 0 : index
    %c0_3 = arith.constant 0 : index
    %6 = vector.load %arg2[%c0_2, %c0_3] : memref<384x224xbf16, #tpu.memory_space<vmem>>, vector<384x224xbf16>
    %cst = arith.constant dense<0.000000e+00> : vector<32x224xf32>
    %7 = tpu.matmul %5, %6, %cst {dimension_numbers = #tpu.dot_dimension_numbers<[1], [0], [0], [1], [0, 0, 1, 1], [], []>} : vector<32x384xbf16>, vector<384x224xbf16>, vector<32x224xf32> -> vector<32x224xf32>
    %c0_4 = arith.constant 0 : index
    %c0_5 = arith.constant 0 : index
    %8 = vector.load %arg3[%c0_4, %c0_5] : memref<1x224xf32, #tpu.memory_space<vmem>>, vector<1x224xf32>
    %9 = vector.broadcast %8 : vector<1x224xf32> to vector<32x224xf32>
    %10 = arith.addf %7, %9 : vector<32x224xf32>
    %cst_6 = arith.constant 0.000000e+00 : f32
    %11 = vector.broadcast %cst_6 : f32 to vector<32x224xf32>
    %12 = arith.maximumf %10, %11 : vector<32x224xf32>
    %13 = vector.shape_cast %12 : vector<32x224xf32> to vector<2x16x224xf32>
    %14 = arith.truncf %13 : vector<2x16x224xf32> to vector<2x16x224xbf16>
    %c0_7 = arith.constant 0 : index
    %c0_8 = arith.constant 0 : index
    %c0_9 = arith.constant 0 : index
    %15 = vector.load %arg4[%c0_7, %c0_8, %c0_9] : memref<2x16x224xbf16, #tpu.memory_space<vmem>>, vector<2x16x224xbf16>
    tpu.vector_store %arg4[%c0_7, %c0_8, %c0_9], %14 {strides = array<i32>} : memref<2x16x224xbf16, #tpu.memory_space<vmem>>, vector<2x16x224xbf16>,
    return
  }
  func.func @transform_0(%arg0: i32) -> (i32, i32, i32) {
    %c0_i32 = arith.constant 0 : i32
    %c0_i32_0 = arith.constant 0 : i32
    %c0_i32_1 = arith.constant 0 : i32
    return %arg0, %c0_i32, %c0_i32_0 : i32, i32, i32
  }
  func.func @transform_1(%arg0: i32) -> (i32, i32) {
    %c0_i32 = arith.constant 0 : i32
    %c0_i32_0 = arith.constant 0 : i32
    %c0_i32_1 = arith.constant 0 : i32
    return %c0_i32, %c0_i32_0 : i32, i32
  }
  func.func @transform_2(%arg0: i32) -> (i32, i32) {
    %c0_i32 = arith.constant 0 : i32
    %c0_i32_0 = arith.constant 0 : i32
    %c0_i32_1 = arith.constant 0 : i32
    return %c0_i32, %c0_i32_0 : i32, i32
  }
  func.func @transform_3(%arg0: i32) -> (i32, i32, i32) {
    %c0_i32 = arith.constant 0 : i32
    %c0_i32_0 = arith.constant 0 : i32
    %c0_i32_1 = arith.constant 0 : i32
    return %arg0, %c0_i32, %c0_i32_0 : i32, i32, i32
  }
}

module attributes {stable_mosaic.version = 11 : i64} {
  func.func @_conv_kernel(%arg0: i32, %arg1: memref<2x10x640xbf16, #tpu.memory_space<vmem>>, %arg2: memref<1920x224xbf16, #tpu.memory_space<vmem>>, %arg3: memref<1x224xf32, #tpu.memory_space<vmem>>, %arg4: memref<2x8x224xbf16, #tpu.memory_space<vmem>>) attributes {dimension_semantics = [#tpu.dimension_semantics<parallel>], iteration_bounds = array<i64: 1>, scalar_prefetch = 0 : i64, scratch_operands = 0 : i64, tpu.core_type = #tpu.core_type<tc>, window_params = [{transform_indices = @transform_0, window_bounds = array<i64: 2, 10, 640>}, {pipeline_mode = #tpu.pipeline_mode<synchronous>, transform_indices = @transform_1, window_bounds = array<i64: 1920, 224>}, {pipeline_mode = #tpu.pipeline_mode<synchronous>, transform_indices = @transform_2, window_bounds = array<i64: 1, 224>}, {transform_indices = @transform_3, window_bounds = array<i64: 2, 8, 224>}]} {
    %c0 = arith.constant 0 : index
    %c0_0 = arith.constant 0 : index
    %c0_1 = arith.constant 0 : index
    %0 = vector.load %arg1[%c0, %c0_0, %c0_1] : memref<2x10x640xbf16, #tpu.memory_space<vmem>>, vector<2x10x640xbf16>
    %1 = vector.extract_strided_slice %0 {offsets = [0, 0, 0], sizes = [2, 8, 640], strides = [1, 1, 1]} : vector<2x10x640xbf16> to vector<2x8x640xbf16>
    %2 = vector.extract_strided_slice %0 {offsets = [0, 1, 0], sizes = [2, 8, 640], strides = [1, 1, 1]} : vector<2x10x640xbf16> to vector<2x8x640xbf16>
    %3 = vector.extract_strided_slice %0 {offsets = [0, 2, 0], sizes = [2, 8, 640], strides = [1, 1, 1]} : vector<2x10x640xbf16> to vector<2x8x640xbf16>
    %4 = tpu.concatenate %1, %2, %3 in 2 : vector<2x8x640xbf16>, vector<2x8x640xbf16>, vector<2x8x640xbf16> -> vector<2x8x1920xbf16>
    %5 = vector.shape_cast %4 : vector<2x8x1920xbf16> to vector<16x1920xbf16>
    %c0_2 = arith.constant 0 : index
    %c0_3 = arith.constant 0 : index
    %6 = vector.load %arg2[%c0_2, %c0_3] : memref<1920x224xbf16, #tpu.memory_space<vmem>>, vector<1920x224xbf16>
    %cst = arith.constant dense<0.000000e+00> : vector<16x224xf32>
    %7 = tpu.matmul %5, %6, %cst {dimension_numbers = #tpu.dot_dimension_numbers<[1], [0], [0], [1], [0, 0, 1, 1], [], []>} : vector<16x1920xbf16>, vector<1920x224xbf16>, vector<16x224xf32> -> vector<16x224xf32>
    %c0_4 = arith.constant 0 : index
    %c0_5 = arith.constant 0 : index
    %8 = vector.load %arg3[%c0_4, %c0_5] : memref<1x224xf32, #tpu.memory_space<vmem>>, vector<1x224xf32>
    %9 = vector.broadcast %8 : vector<1x224xf32> to vector<16x224xf32>
    %10 = arith.addf %7, %9 : vector<16x224xf32>
    %cst_6 = arith.constant 0.000000e+00 : f32
    %11 = vector.broadcast %cst_6 : f32 to vector<16x224xf32>
    %12 = arith.maximumf %10, %11 : vector<16x224xf32>
    %13 = vector.shape_cast %12 : vector<16x224xf32> to vector<2x8x224xf32>
    %14 = arith.truncf %13 : vector<2x8x224xf32> to vector<2x8x224xbf16>
    %c0_7 = arith.constant 0 : index
    %c0_8 = arith.constant 0 : index
    %c0_9 = arith.constant 0 : index
    %15 = vector.load %arg4[%c0_7, %c0_8, %c0_9] : memref<2x8x224xbf16, #tpu.memory_space<vmem>>, vector<2x8x224xbf16>
    tpu.vector_store %arg4[%c0_7, %c0_8, %c0_9], %14 {strides = array<i32>} : memref<2x8x224xbf16, #tpu.memory_space<vmem>>, vector<2x8x224xbf16>,
    return
  }
  func.func @transform_0(%arg0: i32) -> (i32, i32, i32) {
    %c0_i32 = arith.constant 0 : i32
    %c0_i32_0 = arith.constant 0 : i32
    %c0_i32_1 = arith.constant 0 : i32
    return %arg0, %c0_i32, %c0_i32_0 : i32, i32, i32
  }
  func.func @transform_1(%arg0: i32) -> (i32, i32) {
    %c0_i32 = arith.constant 0 : i32
    %c0_i32_0 = arith.constant 0 : i32
    %c0_i32_1 = arith.constant 0 : i32
    return %c0_i32, %c0_i32_0 : i32, i32
  }
  func.func @transform_2(%arg0: i32) -> (i32, i32) {
    %c0_i32 = arith.constant 0 : i32
    %c0_i32_0 = arith.constant 0 : i32
    %c0_i32_1 = arith.constant 0 : i32
    return %c0_i32, %c0_i32_0 : i32, i32
  }
  func.func @transform_3(%arg0: i32) -> (i32, i32, i32) {
    %c0_i32 = arith.constant 0 : i32
    %c0_i32_0 = arith.constant 0 : i32
    %c0_i32_1 = arith.constant 0 : i32
    return %arg0, %c0_i32, %c0_i32_0 : i32, i32, i32
  }
}

module attributes {stable_mosaic.version = 11 : i64} {
  func.func @_conv_kernel(%arg0: i32, %arg1: memref<2x10x768xbf16, #tpu.memory_space<vmem>>, %arg2: memref<2304x128xbf16, #tpu.memory_space<vmem>>, %arg3: memref<1x128xf32, #tpu.memory_space<vmem>>, %arg4: memref<2x8x128xbf16, #tpu.memory_space<vmem>>) attributes {dimension_semantics = [#tpu.dimension_semantics<parallel>], iteration_bounds = array<i64: 1>, scalar_prefetch = 0 : i64, scratch_operands = 0 : i64, tpu.core_type = #tpu.core_type<tc>, window_params = [{transform_indices = @transform_0, window_bounds = array<i64: 2, 10, 768>}, {pipeline_mode = #tpu.pipeline_mode<synchronous>, transform_indices = @transform_1, window_bounds = array<i64: 2304, 128>}, {pipeline_mode = #tpu.pipeline_mode<synchronous>, transform_indices = @transform_2, window_bounds = array<i64: 1, 128>}, {transform_indices = @transform_3, window_bounds = array<i64: 2, 8, 128>}]} {
    %c0 = arith.constant 0 : index
    %c0_0 = arith.constant 0 : index
    %c0_1 = arith.constant 0 : index
    %0 = vector.load %arg1[%c0, %c0_0, %c0_1] : memref<2x10x768xbf16, #tpu.memory_space<vmem>>, vector<2x10x768xbf16>
    %1 = vector.extract_strided_slice %0 {offsets = [0, 0, 0], sizes = [2, 8, 768], strides = [1, 1, 1]} : vector<2x10x768xbf16> to vector<2x8x768xbf16>
    %2 = vector.extract_strided_slice %0 {offsets = [0, 1, 0], sizes = [2, 8, 768], strides = [1, 1, 1]} : vector<2x10x768xbf16> to vector<2x8x768xbf16>
    %3 = vector.extract_strided_slice %0 {offsets = [0, 2, 0], sizes = [2, 8, 768], strides = [1, 1, 1]} : vector<2x10x768xbf16> to vector<2x8x768xbf16>
    %4 = tpu.concatenate %1, %2, %3 in 2 : vector<2x8x768xbf16>, vector<2x8x768xbf16>, vector<2x8x768xbf16> -> vector<2x8x2304xbf16>
    %5 = vector.shape_cast %4 : vector<2x8x2304xbf16> to vector<16x2304xbf16>
    %c0_2 = arith.constant 0 : index
    %c0_3 = arith.constant 0 : index
    %6 = vector.load %arg2[%c0_2, %c0_3] : memref<2304x128xbf16, #tpu.memory_space<vmem>>, vector<2304x128xbf16>
    %cst = arith.constant dense<0.000000e+00> : vector<16x128xf32>
    %7 = tpu.matmul %5, %6, %cst {dimension_numbers = #tpu.dot_dimension_numbers<[1], [0], [0], [1], [0, 0, 1, 1], [], []>} : vector<16x2304xbf16>, vector<2304x128xbf16>, vector<16x128xf32> -> vector<16x128xf32>
    %c0_4 = arith.constant 0 : index
    %c0_5 = arith.constant 0 : index
    %8 = vector.load %arg3[%c0_4, %c0_5] : memref<1x128xf32, #tpu.memory_space<vmem>>, vector<1x128xf32>
    %9 = vector.broadcast %8 : vector<1x128xf32> to vector<16x128xf32>
    %10 = arith.addf %7, %9 : vector<16x128xf32>
    %cst_6 = arith.constant 0.000000e+00 : f32
    %11 = vector.broadcast %cst_6 : f32 to vector<16x128xf32>
    %12 = arith.maximumf %10, %11 : vector<16x128xf32>
    %13 = vector.shape_cast %12 : vector<16x128xf32> to vector<2x8x128xf32>
    %14 = arith.truncf %13 : vector<2x8x128xf32> to vector<2x8x128xbf16>
    %c0_7 = arith.constant 0 : index
    %c0_8 = arith.constant 0 : index
    %c0_9 = arith.constant 0 : index
    %15 = vector.load %arg4[%c0_7, %c0_8, %c0_9] : memref<2x8x128xbf16, #tpu.memory_space<vmem>>, vector<2x8x128xbf16>
    tpu.vector_store %arg4[%c0_7, %c0_8, %c0_9], %14 {strides = array<i32>} : memref<2x8x128xbf16, #tpu.memory_space<vmem>>, vector<2x8x128xbf16>,
    return
  }
  func.func @transform_0(%arg0: i32) -> (i32, i32, i32) {
    %c0_i32 = arith.constant 0 : i32
    %c0_i32_0 = arith.constant 0 : i32
    %c0_i32_1 = arith.constant 0 : i32
    return %arg0, %c0_i32, %c0_i32_0 : i32, i32, i32
  }
  func.func @transform_1(%arg0: i32) -> (i32, i32) {
    %c0_i32 = arith.constant 0 : i32
    %c0_i32_0 = arith.constant 0 : i32
    %c0_i32_1 = arith.constant 0 : i32
    return %c0_i32, %c0_i32_0 : i32, i32
  }
  func.func @transform_2(%arg0: i32) -> (i32, i32) {
    %c0_i32 = arith.constant 0 : i32
    %c0_i32_0 = arith.constant 0 : i32
    %c0_i32_1 = arith.constant 0 : i32
    return %c0_i32, %c0_i32_0 : i32, i32
  }
  func.func @transform_3(%arg0: i32) -> (i32, i32, i32) {
    %c0_i32 = arith.constant 0 : i32
    %c0_i32_0 = arith.constant 0 : i32
    %c0_i32_1 = arith.constant 0 : i32
    return %arg0, %c0_i32, %c0_i32_0 : i32, i32, i32
  }
}

module attributes {stable_mosaic.version = 11 : i64} {
  func.func @_mlp2_kernel(%arg0: i32, %arg1: memref<8x512xbf16, #tpu.memory_space<vmem>>, %arg2: memref<512x256xbf16, #tpu.memory_space<vmem>>, %arg3: memref<1x256xf32, #tpu.memory_space<vmem>>, %arg4: memref<256x32xf32, #tpu.memory_space<vmem>>, %arg5: memref<1x32xf32, #tpu.memory_space<vmem>>, %arg6: memref<8x32xf32, #tpu.memory_space<vmem>>) attributes {dimension_semantics = [#tpu.dimension_semantics<parallel>], iteration_bounds = array<i64: 1>, scalar_prefetch = 0 : i64, scratch_operands = 0 : i64, tpu.core_type = #tpu.core_type<tc>, window_params = [{transform_indices = @transform_0, window_bounds = array<i64: 8, 512>}, {pipeline_mode = #tpu.pipeline_mode<synchronous>, transform_indices = @transform_1, window_bounds = array<i64: 512, 256>}, {pipeline_mode = #tpu.pipeline_mode<synchronous>, transform_indices = @transform_2, window_bounds = array<i64: 1, 256>}, {pipeline_mode = #tpu.pipeline_mode<synchronous>, transform_indices = @transform_3, window_bounds = array<i64: 256, 32>}, {pipeline_mode = #tpu.pipeline_mode<synchronous>, transform_indices = @transform_4, window_bounds = array<i64: 1, 32>}, {transform_indices = @transform_5, window_bounds = array<i64: 8, 32>}]} {
    %c0 = arith.constant 0 : index
    %c0_0 = arith.constant 0 : index
    %0 = vector.load %arg1[%c0, %c0_0] : memref<8x512xbf16, #tpu.memory_space<vmem>>, vector<8x512xbf16>
    %c0_1 = arith.constant 0 : index
    %c0_2 = arith.constant 0 : index
    %1 = vector.load %arg2[%c0_1, %c0_2] : memref<512x256xbf16, #tpu.memory_space<vmem>>, vector<512x256xbf16>
    %cst = arith.constant dense<0.000000e+00> : vector<8x256xf32>
    %2 = tpu.matmul %0, %1, %cst {dimension_numbers = #tpu.dot_dimension_numbers<[1], [0], [0], [1], [0, 0, 1, 1], [], []>} : vector<8x512xbf16>, vector<512x256xbf16>, vector<8x256xf32> -> vector<8x256xf32>
    %c0_3 = arith.constant 0 : index
    %c0_4 = arith.constant 0 : index
    %3 = vector.load %arg3[%c0_3, %c0_4] : memref<1x256xf32, #tpu.memory_space<vmem>>, vector<1x256xf32>
    %4 = vector.broadcast %3 : vector<1x256xf32> to vector<8x256xf32>
    %5 = arith.addf %2, %4 : vector<8x256xf32>
    %cst_5 = arith.constant 0.000000e+00 : f32
    %6 = vector.broadcast %cst_5 : f32 to vector<8x256xf32>
    %7 = arith.maximumf %5, %6 : vector<8x256xf32>
    %c0_6 = arith.constant 0 : index
    %c0_7 = arith.constant 0 : index
    %8 = vector.load %arg4[%c0_6, %c0_7] : memref<256x32xf32, #tpu.memory_space<vmem>>, vector<256x32xf32>
    %cst_8 = arith.constant dense<0.000000e+00> : vector<8x32xf32>
    %9 = tpu.matmul %7, %8, %cst_8 {dimension_numbers = #tpu.dot_dimension_numbers<[1], [0], [0], [1], [0, 0, 1, 1], [], []>} : vector<8x256xf32>, vector<256x32xf32>, vector<8x32xf32> -> vector<8x32xf32>
    %c0_9 = arith.constant 0 : index
    %c0_10 = arith.constant 0 : index
    %10 = vector.load %arg5[%c0_9, %c0_10] : memref<1x32xf32, #tpu.memory_space<vmem>>, vector<1x32xf32>
    %11 = vector.broadcast %10 : vector<1x32xf32> to vector<8x32xf32>
    %12 = arith.addf %9, %11 : vector<8x32xf32>
    %c0_11 = arith.constant 0 : index
    %c0_12 = arith.constant 0 : index
    %13 = vector.load %arg6[%c0_11, %c0_12] : memref<8x32xf32, #tpu.memory_space<vmem>>, vector<8x32xf32>
    tpu.vector_store %arg6[%c0_11, %c0_12], %12 {strides = array<i32>} : memref<8x32xf32, #tpu.memory_space<vmem>>, vector<8x32xf32>,
    return
  }
  func.func @transform_0(%arg0: i32) -> (i32, i32) {
    %c0_i32 = arith.constant 0 : i32
    %c0_i32_0 = arith.constant 0 : i32
    return %arg0, %c0_i32 : i32, i32
  }
  func.func @transform_1(%arg0: i32) -> (i32, i32) {
    %c0_i32 = arith.constant 0 : i32
    %c0_i32_0 = arith.constant 0 : i32
    %c0_i32_1 = arith.constant 0 : i32
    return %c0_i32, %c0_i32_0 : i32, i32
  }
  func.func @transform_2(%arg0: i32) -> (i32, i32) {
    %c0_i32 = arith.constant 0 : i32
    %c0_i32_0 = arith.constant 0 : i32
    %c0_i32_1 = arith.constant 0 : i32
    return %c0_i32, %c0_i32_0 : i32, i32
  }
  func.func @transform_3(%arg0: i32) -> (i32, i32) {
    %c0_i32 = arith.constant 0 : i32
    %c0_i32_0 = arith.constant 0 : i32
    %c0_i32_1 = arith.constant 0 : i32
    return %c0_i32, %c0_i32_0 : i32, i32
  }
  func.func @transform_4(%arg0: i32) -> (i32, i32) {
    %c0_i32 = arith.constant 0 : i32
    %c0_i32_0 = arith.constant 0 : i32
    %c0_i32_1 = arith.constant 0 : i32
    return %c0_i32, %c0_i32_0 : i32, i32
  }
  func.func @transform_5(%arg0: i32) -> (i32, i32) {
    %c0_i32 = arith.constant 0 : i32
    %c0_i32_0 = arith.constant 0 : i32
    return %arg0, %c0_i32 : i32, i32
  }
}

module attributes {stable_mosaic.version = 11 : i64} {
  func.func @_mlp2_kernel(%arg0: i32, %arg1: memref<8x16xbf16, #tpu.memory_space<vmem>>, %arg2: memref<16x256xbf16, #tpu.memory_space<vmem>>, %arg3: memref<1x256xf32, #tpu.memory_space<vmem>>, %arg4: memref<256x512xbf16, #tpu.memory_space<vmem>>, %arg5: memref<1x512xf32, #tpu.memory_space<vmem>>, %arg6: memref<8x512xbf16, #tpu.memory_space<vmem>>) attributes {dimension_semantics = [#tpu.dimension_semantics<parallel>], iteration_bounds = array<i64: 1>, scalar_prefetch = 0 : i64, scratch_operands = 0 : i64, tpu.core_type = #tpu.core_type<tc>, window_params = [{transform_indices = @transform_0, window_bounds = array<i64: 8, 16>}, {pipeline_mode = #tpu.pipeline_mode<synchronous>, transform_indices = @transform_1, window_bounds = array<i64: 16, 256>}, {pipeline_mode = #tpu.pipeline_mode<synchronous>, transform_indices = @transform_2, window_bounds = array<i64: 1, 256>}, {pipeline_mode = #tpu.pipeline_mode<synchronous>, transform_indices = @transform_3, window_bounds = array<i64: 256, 512>}, {pipeline_mode = #tpu.pipeline_mode<synchronous>, transform_indices = @transform_4, window_bounds = array<i64: 1, 512>}, {transform_indices = @transform_5, window_bounds = array<i64: 8, 512>}]} {
    %c0 = arith.constant 0 : index
    %c0_0 = arith.constant 0 : index
    %0 = vector.load %arg1[%c0, %c0_0] : memref<8x16xbf16, #tpu.memory_space<vmem>>, vector<8x16xbf16>
    %c0_1 = arith.constant 0 : index
    %c0_2 = arith.constant 0 : index
    %1 = vector.load %arg2[%c0_1, %c0_2] : memref<16x256xbf16, #tpu.memory_space<vmem>>, vector<16x256xbf16>
    %cst = arith.constant dense<0.000000e+00> : vector<8x256xf32>
    %2 = tpu.matmul %0, %1, %cst {dimension_numbers = #tpu.dot_dimension_numbers<[1], [0], [0], [1], [0, 0, 1, 1], [], []>} : vector<8x16xbf16>, vector<16x256xbf16>, vector<8x256xf32> -> vector<8x256xf32>
    %c0_3 = arith.constant 0 : index
    %c0_4 = arith.constant 0 : index
    %3 = vector.load %arg3[%c0_3, %c0_4] : memref<1x256xf32, #tpu.memory_space<vmem>>, vector<1x256xf32>
    %4 = vector.broadcast %3 : vector<1x256xf32> to vector<8x256xf32>
    %5 = arith.addf %2, %4 : vector<8x256xf32>
    %cst_5 = arith.constant 0.000000e+00 : f32
    %6 = vector.broadcast %cst_5 : f32 to vector<8x256xf32>
    %7 = arith.maximumf %5, %6 : vector<8x256xf32>
    %8 = arith.truncf %7 : vector<8x256xf32> to vector<8x256xbf16>
    %c0_6 = arith.constant 0 : index
    %c0_7 = arith.constant 0 : index
    %9 = vector.load %arg4[%c0_6, %c0_7] : memref<256x512xbf16, #tpu.memory_space<vmem>>, vector<256x512xbf16>
    %cst_8 = arith.constant dense<0.000000e+00> : vector<8x512xf32>
    %10 = tpu.matmul %8, %9, %cst_8 {dimension_numbers = #tpu.dot_dimension_numbers<[1], [0], [0], [1], [0, 0, 1, 1], [], []>} : vector<8x256xbf16>, vector<256x512xbf16>, vector<8x512xf32> -> vector<8x512xf32>
    %c0_9 = arith.constant 0 : index
    %c0_10 = arith.constant 0 : index
    %11 = vector.load %arg5[%c0_9, %c0_10] : memref<1x512xf32, #tpu.memory_space<vmem>>, vector<1x512xf32>
    %12 = vector.broadcast %11 : vector<1x512xf32> to vector<8x512xf32>
    %13 = arith.addf %10, %12 : vector<8x512xf32>
    %cst_11 = arith.constant 0.000000e+00 : f32
    %14 = vector.broadcast %cst_11 : f32 to vector<8x512xf32>
    %15 = arith.maximumf %13, %14 : vector<8x512xf32>
    %16 = arith.truncf %15 : vector<8x512xf32> to vector<8x512xbf16>
    %c0_12 = arith.constant 0 : index
    %c0_13 = arith.constant 0 : index
    %17 = vector.load %arg6[%c0_12, %c0_13] : memref<8x512xbf16, #tpu.memory_space<vmem>>, vector<8x512xbf16>
    tpu.vector_store %arg6[%c0_12, %c0_13], %16 {strides = array<i32>} : memref<8x512xbf16, #tpu.memory_space<vmem>>, vector<8x512xbf16>,
    return
  }
  func.func @transform_0(%arg0: i32) -> (i32, i32) {
    %c0_i32 = arith.constant 0 : i32
    %c0_i32_0 = arith.constant 0 : i32
    return %arg0, %c0_i32 : i32, i32
  }
  func.func @transform_1(%arg0: i32) -> (i32, i32) {
    %c0_i32 = arith.constant 0 : i32
    %c0_i32_0 = arith.constant 0 : i32
    %c0_i32_1 = arith.constant 0 : i32
    return %c0_i32, %c0_i32_0 : i32, i32
  }
  func.func @transform_2(%arg0: i32) -> (i32, i32) {
    %c0_i32 = arith.constant 0 : i32
    %c0_i32_0 = arith.constant 0 : i32
    %c0_i32_1 = arith.constant 0 : i32
    return %c0_i32, %c0_i32_0 : i32, i32
  }
  func.func @transform_3(%arg0: i32) -> (i32, i32) {
    %c0_i32 = arith.constant 0 : i32
    %c0_i32_0 = arith.constant 0 : i32
    %c0_i32_1 = arith.constant 0 : i32
    return %c0_i32, %c0_i32_0 : i32, i32
  }
  func.func @transform_4(%arg0: i32) -> (i32, i32) {
    %c0_i32 = arith.constant 0 : i32
    %c0_i32_0 = arith.constant 0 : i32
    %c0_i32_1 = arith.constant 0 : i32
    return %c0_i32, %c0_i32_0 : i32, i32
  }
  func.func @transform_5(%arg0: i32) -> (i32, i32) {
    %c0_i32 = arith.constant 0 : i32
    %c0_i32_0 = arith.constant 0 : i32
    return %arg0, %c0_i32 : i32, i32
  }
}

module attributes {stable_mosaic.version = 11 : i64} {
  func.func @_conv_kernel(%arg0: i32, %arg1: memref<8x10x256xbf16, #tpu.memory_space<vmem>>, %arg2: memref<768x512xbf16, #tpu.memory_space<vmem>>, %arg3: memref<1x512xf32, #tpu.memory_space<vmem>>, %arg4: memref<8x8x512xbf16, #tpu.memory_space<vmem>>) attributes {dimension_semantics = [#tpu.dimension_semantics<parallel>], iteration_bounds = array<i64: 1>, scalar_prefetch = 0 : i64, scratch_operands = 0 : i64, tpu.core_type = #tpu.core_type<tc>, window_params = [{transform_indices = @transform_0, window_bounds = array<i64: 8, 10, 256>}, {pipeline_mode = #tpu.pipeline_mode<synchronous>, transform_indices = @transform_1, window_bounds = array<i64: 768, 512>}, {pipeline_mode = #tpu.pipeline_mode<synchronous>, transform_indices = @transform_2, window_bounds = array<i64: 1, 512>}, {transform_indices = @transform_3, window_bounds = array<i64: 8, 8, 512>}]} {
    %c0 = arith.constant 0 : index
    %c0_0 = arith.constant 0 : index
    %c0_1 = arith.constant 0 : index
    %0 = vector.load %arg1[%c0, %c0_0, %c0_1] : memref<8x10x256xbf16, #tpu.memory_space<vmem>>, vector<8x10x256xbf16>
    %1 = vector.extract_strided_slice %0 {offsets = [0, 0, 0], sizes = [8, 8, 256], strides = [1, 1, 1]} : vector<8x10x256xbf16> to vector<8x8x256xbf16>
    %2 = vector.extract_strided_slice %0 {offsets = [0, 1, 0], sizes = [8, 8, 256], strides = [1, 1, 1]} : vector<8x10x256xbf16> to vector<8x8x256xbf16>
    %3 = vector.extract_strided_slice %0 {offsets = [0, 2, 0], sizes = [8, 8, 256], strides = [1, 1, 1]} : vector<8x10x256xbf16> to vector<8x8x256xbf16>
    %4 = tpu.concatenate %1, %2, %3 in 2 : vector<8x8x256xbf16>, vector<8x8x256xbf16>, vector<8x8x256xbf16> -> vector<8x8x768xbf16>
    %5 = vector.shape_cast %4 : vector<8x8x768xbf16> to vector<64x768xbf16>
    %c0_2 = arith.constant 0 : index
    %c0_3 = arith.constant 0 : index
    %6 = vector.load %arg2[%c0_2, %c0_3] : memref<768x512xbf16, #tpu.memory_space<vmem>>, vector<768x512xbf16>
    %cst = arith.constant dense<0.000000e+00> : vector<64x512xf32>
    %7 = tpu.matmul %5, %6, %cst {dimension_numbers = #tpu.dot_dimension_numbers<[1], [0], [0], [1], [0, 0, 1, 1], [], []>} : vector<64x768xbf16>, vector<768x512xbf16>, vector<64x512xf32> -> vector<64x512xf32>
    %c0_4 = arith.constant 0 : index
    %c0_5 = arith.constant 0 : index
    %8 = vector.load %arg3[%c0_4, %c0_5] : memref<1x512xf32, #tpu.memory_space<vmem>>, vector<1x512xf32>
    %9 = vector.broadcast %8 : vector<1x512xf32> to vector<64x512xf32>
    %10 = arith.addf %7, %9 : vector<64x512xf32>
    %cst_6 = arith.constant 0.000000e+00 : f32
    %11 = vector.broadcast %cst_6 : f32 to vector<64x512xf32>
    %12 = arith.maximumf %10, %11 : vector<64x512xf32>
    %13 = vector.shape_cast %12 : vector<64x512xf32> to vector<8x8x512xf32>
    %14 = arith.truncf %13 : vector<8x8x512xf32> to vector<8x8x512xbf16>
    %c0_7 = arith.constant 0 : index
    %c0_8 = arith.constant 0 : index
    %c0_9 = arith.constant 0 : index
    %15 = vector.load %arg4[%c0_7, %c0_8, %c0_9] : memref<8x8x512xbf16, #tpu.memory_space<vmem>>, vector<8x8x512xbf16>
    tpu.vector_store %arg4[%c0_7, %c0_8, %c0_9], %14 {strides = array<i32>} : memref<8x8x512xbf16, #tpu.memory_space<vmem>>, vector<8x8x512xbf16>,
    return
  }
  func.func @transform_0(%arg0: i32) -> (i32, i32, i32) {
    %c0_i32 = arith.constant 0 : i32
    %c0_i32_0 = arith.constant 0 : i32
    %c0_i32_1 = arith.constant 0 : i32
    return %arg0, %c0_i32, %c0_i32_0 : i32, i32, i32
  }
  func.func @transform_1(%arg0: i32) -> (i32, i32) {
    %c0_i32 = arith.constant 0 : i32
    %c0_i32_0 = arith.constant 0 : i32
    %c0_i32_1 = arith.constant 0 : i32
    return %c0_i32, %c0_i32_0 : i32, i32
  }
  func.func @transform_2(%arg0: i32) -> (i32, i32) {
    %c0_i32 = arith.constant 0 : i32
    %c0_i32_0 = arith.constant 0 : i32
    %c0_i32_1 = arith.constant 0 : i32
    return %c0_i32, %c0_i32_0 : i32, i32
  }
  func.func @transform_3(%arg0: i32) -> (i32, i32, i32) {
    %c0_i32 = arith.constant 0 : i32
    %c0_i32_0 = arith.constant 0 : i32
    %c0_i32_1 = arith.constant 0 : i32
    return %arg0, %c0_i32, %c0_i32_0 : i32, i32, i32
  }
}

module attributes {stable_mosaic.version = 11 : i64} {
  func.func @_conv_kernel(%arg0: i32, %arg1: memref<8x10x384xbf16, #tpu.memory_space<vmem>>, %arg2: memref<1152x448xbf16, #tpu.memory_space<vmem>>, %arg3: memref<1x448xf32, #tpu.memory_space<vmem>>, %arg4: memref<8x8x448xbf16, #tpu.memory_space<vmem>>) attributes {dimension_semantics = [#tpu.dimension_semantics<parallel>], iteration_bounds = array<i64: 1>, scalar_prefetch = 0 : i64, scratch_operands = 0 : i64, tpu.core_type = #tpu.core_type<tc>, window_params = [{transform_indices = @transform_0, window_bounds = array<i64: 8, 10, 384>}, {pipeline_mode = #tpu.pipeline_mode<synchronous>, transform_indices = @transform_1, window_bounds = array<i64: 1152, 448>}, {pipeline_mode = #tpu.pipeline_mode<synchronous>, transform_indices = @transform_2, window_bounds = array<i64: 1, 448>}, {transform_indices = @transform_3, window_bounds = array<i64: 8, 8, 448>}]} {
    %c0 = arith.constant 0 : index
    %c0_0 = arith.constant 0 : index
    %c0_1 = arith.constant 0 : index
    %0 = vector.load %arg1[%c0, %c0_0, %c0_1] : memref<8x10x384xbf16, #tpu.memory_space<vmem>>, vector<8x10x384xbf16>
    %1 = vector.extract_strided_slice %0 {offsets = [0, 0, 0], sizes = [8, 8, 384], strides = [1, 1, 1]} : vector<8x10x384xbf16> to vector<8x8x384xbf16>
    %2 = vector.extract_strided_slice %0 {offsets = [0, 1, 0], sizes = [8, 8, 384], strides = [1, 1, 1]} : vector<8x10x384xbf16> to vector<8x8x384xbf16>
    %3 = vector.extract_strided_slice %0 {offsets = [0, 2, 0], sizes = [8, 8, 384], strides = [1, 1, 1]} : vector<8x10x384xbf16> to vector<8x8x384xbf16>
    %4 = tpu.concatenate %1, %2, %3 in 2 : vector<8x8x384xbf16>, vector<8x8x384xbf16>, vector<8x8x384xbf16> -> vector<8x8x1152xbf16>
    %5 = vector.shape_cast %4 : vector<8x8x1152xbf16> to vector<64x1152xbf16>
    %c0_2 = arith.constant 0 : index
    %c0_3 = arith.constant 0 : index
    %6 = vector.load %arg2[%c0_2, %c0_3] : memref<1152x448xbf16, #tpu.memory_space<vmem>>, vector<1152x448xbf16>
    %cst = arith.constant dense<0.000000e+00> : vector<64x448xf32>
    %7 = tpu.matmul %5, %6, %cst {dimension_numbers = #tpu.dot_dimension_numbers<[1], [0], [0], [1], [0, 0, 1, 1], [], []>} : vector<64x1152xbf16>, vector<1152x448xbf16>, vector<64x448xf32> -> vector<64x448xf32>
    %c0_4 = arith.constant 0 : index
    %c0_5 = arith.constant 0 : index
    %8 = vector.load %arg3[%c0_4, %c0_5] : memref<1x448xf32, #tpu.memory_space<vmem>>, vector<1x448xf32>
    %9 = vector.broadcast %8 : vector<1x448xf32> to vector<64x448xf32>
    %10 = arith.addf %7, %9 : vector<64x448xf32>
    %cst_6 = arith.constant 0.000000e+00 : f32
    %11 = vector.broadcast %cst_6 : f32 to vector<64x448xf32>
    %12 = arith.maximumf %10, %11 : vector<64x448xf32>
    %13 = vector.shape_cast %12 : vector<64x448xf32> to vector<8x8x448xf32>
    %14 = arith.truncf %13 : vector<8x8x448xf32> to vector<8x8x448xbf16>
    %c0_7 = arith.constant 0 : index
    %c0_8 = arith.constant 0 : index
    %c0_9 = arith.constant 0 : index
    %15 = vector.load %arg4[%c0_7, %c0_8, %c0_9] : memref<8x8x448xbf16, #tpu.memory_space<vmem>>, vector<8x8x448xbf16>
    tpu.vector_store %arg4[%c0_7, %c0_8, %c0_9], %14 {strides = array<i32>} : memref<8x8x448xbf16, #tpu.memory_space<vmem>>, vector<8x8x448xbf16>,
    return
  }
  func.func @transform_0(%arg0: i32) -> (i32, i32, i32) {
    %c0_i32 = arith.constant 0 : i32
    %c0_i32_0 = arith.constant 0 : i32
    %c0_i32_1 = arith.constant 0 : i32
    return %arg0, %c0_i32, %c0_i32_0 : i32, i32, i32
  }
  func.func @transform_1(%arg0: i32) -> (i32, i32) {
    %c0_i32 = arith.constant 0 : i32
    %c0_i32_0 = arith.constant 0 : i32
    %c0_i32_1 = arith.constant 0 : i32
    return %c0_i32, %c0_i32_0 : i32, i32
  }
  func.func @transform_2(%arg0: i32) -> (i32, i32) {
    %c0_i32 = arith.constant 0 : i32
    %c0_i32_0 = arith.constant 0 : i32
    %c0_i32_1 = arith.constant 0 : i32
    return %c0_i32, %c0_i32_0 : i32, i32
  }
  func.func @transform_3(%arg0: i32) -> (i32, i32, i32) {
    %c0_i32 = arith.constant 0 : i32
    %c0_i32_0 = arith.constant 0 : i32
    %c0_i32_1 = arith.constant 0 : i32
    return %arg0, %c0_i32, %c0_i32_0 : i32, i32, i32
  }
}

module attributes {stable_mosaic.version = 11 : i64} {
  func.func @_conv_ll_kernel(%arg0: i32, %arg1: memref<2x18x256xbf16, #tpu.memory_space<vmem>>, %arg2: memref<768x56xbf16, #tpu.memory_space<vmem>>, %arg3: memref<1x56xf32, #tpu.memory_space<vmem>>, %arg4: memref<2x16x56xf32, #tpu.memory_space<vmem>>, %arg5: memref<2x16x56xf32, #tpu.memory_space<vmem>>, %arg6: memref<2x16x56xf32, #tpu.memory_space<vmem>>, %arg7: memref<2x1x1xf32, #tpu.memory_space<vmem>>) attributes {dimension_semantics = [#tpu.dimension_semantics<parallel>], iteration_bounds = array<i64: 4>, scalar_prefetch = 0 : i64, scratch_operands = 0 : i64, tpu.core_type = #tpu.core_type<tc>, window_params = [{transform_indices = @transform_0, window_bounds = array<i64: 2, 18, 256>}, {pipeline_mode = #tpu.pipeline_mode<synchronous>, transform_indices = @transform_1, window_bounds = array<i64: 768, 56>}, {pipeline_mode = #tpu.pipeline_mode<synchronous>, transform_indices = @transform_2, window_bounds = array<i64: 1, 56>}, {pipeline_mode = #tpu.pipeline_mode<synchronous>, transform_indices = @transform_3, window_bounds = array<i64: 2, 16, 56>}, {pipeline_mode = #tpu.pipeline_mode<synchronous>, transform_indices = @transform_4, window_bounds = array<i64: 2, 16, 56>}, {transform_indices = @transform_5, window_bounds = array<i64: 2, 16, 56>}, {transform_indices = @transform_6, window_bounds = array<i64: 2, 1, 1>}]} {
    %c0 = arith.constant 0 : index
    %c0_0 = arith.constant 0 : index
    %c0_1 = arith.constant 0 : index
    %0 = vector.load %arg1[%c0, %c0_0, %c0_1] : memref<2x18x256xbf16, #tpu.memory_space<vmem>>, vector<2x18x256xbf16>
    %1 = vector.extract_strided_slice %0 {offsets = [0, 0, 0], sizes = [2, 16, 256], strides = [1, 1, 1]} : vector<2x18x256xbf16> to vector<2x16x256xbf16>
    %2 = vector.extract_strided_slice %0 {offsets = [0, 1, 0], sizes = [2, 16, 256], strides = [1, 1, 1]} : vector<2x18x256xbf16> to vector<2x16x256xbf16>
    %3 = vector.extract_strided_slice %0 {offsets = [0, 2, 0], sizes = [2, 16, 256], strides = [1, 1, 1]} : vector<2x18x256xbf16> to vector<2x16x256xbf16>
    %4 = tpu.concatenate %1, %2, %3 in 2 : vector<2x16x256xbf16>, vector<2x16x256xbf16>, vector<2x16x256xbf16> -> vector<2x16x768xbf16>
    %5 = vector.shape_cast %4 : vector<2x16x768xbf16> to vector<32x768xbf16>
    %c0_2 = arith.constant 0 : index
    %c0_3 = arith.constant 0 : index
    %6 = vector.load %arg2[%c0_2, %c0_3] : memref<768x56xbf16, #tpu.memory_space<vmem>>, vector<768x56xbf16>
    %cst = arith.constant dense<0.000000e+00> : vector<32x56xf32>
    %7 = tpu.matmul %5, %6, %cst {dimension_numbers = #tpu.dot_dimension_numbers<[1], [0], [0], [1], [0, 0, 1, 1], [], []>} : vector<32x768xbf16>, vector<768x56xbf16>, vector<32x56xf32> -> vector<32x56xf32>
    %c0_4 = arith.constant 0 : index
    %c0_5 = arith.constant 0 : index
    %8 = vector.load %arg3[%c0_4, %c0_5] : memref<1x56xf32, #tpu.memory_space<vmem>>, vector<1x56xf32>
    %9 = vector.broadcast %8 : vector<1x56xf32> to vector<32x56xf32>
    %10 = arith.addf %7, %9 : vector<32x56xf32>
    %11 = vector.shape_cast %10 : vector<32x56xf32> to vector<2x16x56xf32>
    %c0_6 = arith.constant 0 : index
    %c0_7 = arith.constant 0 : index
    %c0_8 = arith.constant 0 : index
    %12 = vector.load %arg6[%c0_6, %c0_7, %c0_8] : memref<2x16x56xf32, #tpu.memory_space<vmem>>, vector<2x16x56xf32>
    tpu.vector_store %arg6[%c0_6, %c0_7, %c0_8], %11 {strides = array<i32>} : memref<2x16x56xf32, #tpu.memory_space<vmem>>, vector<2x16x56xf32>,
    %c0_9 = arith.constant 0 : index
    %c0_10 = arith.constant 0 : index
    %c0_11 = arith.constant 0 : index
    %13 = vector.load %arg4[%c0_9, %c0_10, %c0_11] : memref<2x16x56xf32, #tpu.memory_space<vmem>>, vector<2x16x56xf32>
    %14 = arith.mulf %13, %11 : vector<2x16x56xf32>
    %cst_12 = arith.constant 0.000000e+00 : f32
    %15 = vector.broadcast %cst_12 : f32 to vector<2x16x56xf32>
    %16 = arith.maximumf %11, %15 : vector<2x16x56xf32>
    %17 = vector.broadcast %cst_12 : f32 to vector<2x16x56xf32>
    %18 = arith.subf %11, %17 : vector<2x16x56xf32>
    %19 = arith.cmpf one, %18, %18 : vector<2x16x56xf32>
    %20 = vector.broadcast %cst_12 : f32 to vector<2x16x56xf32>
    %21 = arith.addf %11, %20 : vector<2x16x56xf32>
    %22 = math.absf %18 : vector<2x16x56xf32>
    %cst_13 = arith.constant 0.000000e+00 : f32
    %23 = vector.broadcast %cst_13 : f32 to vector<2x16x56xf32>
    %24 = arith.subf %23, %22 : vector<2x16x56xf32>
    %25 = math.exp %24 : vector<2x16x56xf32>
    %26 = math.log1p %25 : vector<2x16x56xf32>
    %27 = arith.addf %16, %26 : vector<2x16x56xf32>
    %28 = arith.select %19, %21, %27 : vector<2x16x56xi1>, vector<2x16x56xf32>
    %29 = arith.subf %14, %28 : vector<2x16x56xf32>
    %c0_14 = arith.constant 0 : index
    %c0_15 = arith.constant 0 : index
    %c0_16 = arith.constant 0 : index
    %30 = vector.load %arg5[%c0_14, %c0_15, %c0_16] : memref<2x16x56xf32, #tpu.memory_space<vmem>>, vector<2x16x56xf32>
    %31 = arith.mulf %29, %30 : vector<2x16x56xf32>
    %cst_17 = arith.constant dense<0.000000e+00> : vector<2x16xf32>
    %32 = vector.multi_reduction <add>, %31, %cst_17 [2] : vector<2x16x56xf32> to vector<2x16xf32>
    %33 = vector.shape_cast %32 : vector<2x16xf32> to vector<2x16x1xf32>
    %cst_18 = arith.constant dense<0.000000e+00> : vector<2x1xf32>
    %34 = vector.multi_reduction <add>, %33, %cst_18 [1] : vector<2x16x1xf32> to vector<2x1xf32>
    %35 = vector.shape_cast %34 : vector<2x1xf32> to vector<2x1x1xf32>
    %c0_19 = arith.constant 0 : index
    %c0_20 = arith.constant 0 : index
    %c0_21 = arith.constant 0 : index
    %36 = vector.load %arg7[%c0_19, %c0_20, %c0_21] : memref<2x1x1xf32, #tpu.memory_space<vmem>>, vector<2x1x1xf32>
    tpu.vector_store %arg7[%c0_19, %c0_20, %c0_21], %35 {strides = array<i32>} : memref<2x1x1xf32, #tpu.memory_space<vmem>>, vector<2x1x1xf32>,
    return
  }
  func.func @transform_0(%arg0: i32) -> (i32, i32, i32) {
    %c0_i32 = arith.constant 0 : i32
    %c0_i32_0 = arith.constant 0 : i32
    %c0_i32_1 = arith.constant 0 : i32
    return %arg0, %c0_i32, %c0_i32_0 : i32, i32, i32
  }
  func.func @transform_1(%arg0: i32) -> (i32, i32) {
    %c0_i32 = arith.constant 0 : i32
    %c0_i32_0 = arith.constant 0 : i32
    %c0_i32_1 = arith.constant 0 : i32
    return %c0_i32, %c0_i32_0 : i32, i32
  }
  func.func @transform_2(%arg0: i32) -> (i32, i32) {
    %c0_i32 = arith.constant 0 : i32
    %c0_i32_0 = arith.constant 0 : i32
    %c0_i32_1 = arith.constant 0 : i32
    return %c0_i32, %c0_i32_0 : i32, i32
  }
  func.func @transform_3(%arg0: i32) -> (i32, i32, i32) {
    %c0_i32 = arith.constant 0 : i32
    %c0_i32_0 = arith.constant 0 : i32
    %c0_i32_1 = arith.constant 0 : i32
    %c0_i32_2 = arith.constant 0 : i32
    return %c0_i32, %c0_i32_0, %c0_i32_1 : i32, i32, i32
  }
  func.func @transform_4(%arg0: i32) -> (i32, i32, i32) {
    %c0_i32 = arith.constant 0 : i32
    %c0_i32_0 = arith.constant 0 : i32
    %c0_i32_1 = arith.constant 0 : i32
    %c0_i32_2 = arith.constant 0 : i32
    return %c0_i32, %c0_i32_0, %c0_i32_1 : i32, i32, i32
  }
  func.func @transform_5(%arg0: i32) -> (i32, i32, i32) {
    %c0_i32 = arith.constant 0 : i32
    %c0_i32_0 = arith.constant 0 : i32
    %c0_i32_1 = arith.constant 0 : i32
    return %arg0, %c0_i32, %c0_i32_0 : i32, i32, i32
  }
  func.func @transform_6(%arg0: i32) -> (i32, i32, i32) {
    %c0_i32 = arith.constant 0 : i32
    %c0_i32_0 = arith.constant 0 : i32
    %c0_i32_1 = arith.constant 0 : i32
    return %arg0, %c0_i32, %c0_i32_0 : i32, i32, i32
  }
}

module attributes {stable_mosaic.version = 11 : i64} {
  func.func @_iwae_kernel(%arg0: i32, %arg1: memref<4x2xf32, #tpu.memory_space<vmem>>, %arg2: memref<4x2x16xf32, #tpu.memory_space<vmem>>, %arg3: memref<2x16xf32, #tpu.memory_space<vmem>>, %arg4: memref<2x16xf32, #tpu.memory_space<vmem>>, %arg5: memref<4x2xf32, #tpu.memory_space<vmem>>, %arg6: memref<1x1xf32, #tpu.memory_space<vmem>>) attributes {dimension_semantics = [#tpu.dimension_semantics<arbitrary>], iteration_bounds = array<i64: 1>, scalar_prefetch = 0 : i64, scratch_operands = 0 : i64, tpu.core_type = #tpu.core_type<tc>, window_params = [{pipeline_mode = #tpu.pipeline_mode<synchronous>, transform_indices = @transform_0, window_bounds = array<i64: 4, 2>}, {pipeline_mode = #tpu.pipeline_mode<synchronous>, transform_indices = @transform_1, window_bounds = array<i64: 4, 2, 16>}, {pipeline_mode = #tpu.pipeline_mode<synchronous>, transform_indices = @transform_2, window_bounds = array<i64: 2, 16>}, {pipeline_mode = #tpu.pipeline_mode<synchronous>, transform_indices = @transform_3, window_bounds = array<i64: 2, 16>}, {pipeline_mode = #tpu.pipeline_mode<synchronous>, transform_indices = @transform_4, window_bounds = array<i64: 4, 2>}, {pipeline_mode = #tpu.pipeline_mode<synchronous>, transform_indices = @transform_5, window_bounds = array<i64: 1, 1>}]} {
    %c0 = arith.constant 0 : index
    %c0_0 = arith.constant 0 : index
    %c0_1 = arith.constant 0 : index
    %0 = vector.load %arg2[%c0, %c0_0, %c0_1] : memref<4x2x16xf32, #tpu.memory_space<vmem>>, vector<4x2x16xf32>
    %c0_2 = arith.constant 0 : index
    %c0_3 = arith.constant 0 : index
    %1 = vector.load %arg3[%c0_2, %c0_3] : memref<2x16xf32, #tpu.memory_space<vmem>>, vector<2x16xf32>
    %c0_4 = arith.constant 0 : index
    %c0_5 = arith.constant 0 : index
    %2 = vector.load %arg4[%c0_4, %c0_5] : memref<2x16xf32, #tpu.memory_space<vmem>>, vector<2x16xf32>
    %cst = arith.constant 5.000000e-01 : f32
    %3 = vector.broadcast %cst : f32 to vector<4x2x16xf32>
    %4 = arith.mulf %3, %0 : vector<4x2x16xf32>
    %5 = arith.mulf %4, %0 : vector<4x2x16xf32>
    %cst_6 = arith.constant 5.000000e-01 : f32
    %6 = vector.broadcast %cst_6 : f32 to vector<2x16xf32>
    %7 = arith.mulf %6, %2 : vector<2x16xf32>
    %8 = vector.shape_cast %7 : vector<2x16xf32> to vector<1x2x16xf32>
    %9 = vector.broadcast %8 : vector<1x2x16xf32> to vector<4x2x16xf32>
    %10 = arith.subf %5, %9 : vector<4x2x16xf32>
    %11 = vector.shape_cast %1 : vector<2x16xf32> to vector<1x2x16xf32>
    %12 = vector.broadcast %11 : vector<1x2x16xf32> to vector<4x2x16xf32>
    %13 = arith.subf %0, %12 : vector<4x2x16xf32>
    %14 = arith.mulf %13, %13 : vector<4x2x16xf32>
    %cst_7 = arith.constant 5.000000e-01 : f32
    %15 = vector.broadcast %cst_7 : f32 to vector<4x2x16xf32>
    %16 = arith.mulf %15, %14 : vector<4x2x16xf32>
    %cst_8 = arith.constant 0.000000e+00 : f32
    %17 = vector.broadcast %cst_8 : f32 to vector<2x16xf32>
    %18 = arith.subf %17, %2 : vector<2x16xf32>
    %19 = math.exp %18 : vector<2x16xf32>
    %20 = vector.shape_cast %19 : vector<2x16xf32> to vector<1x2x16xf32>
    %21 = vector.broadcast %20 : vector<1x2x16xf32> to vector<4x2x16xf32>
    %22 = arith.mulf %16, %21 : vector<4x2x16xf32>
    %23 = arith.subf %10, %22 : vector<4x2x16xf32>
    %cst_9 = arith.constant dense<0.000000e+00> : vector<4x2xf32>
    %24 = vector.multi_reduction <add>, %23, %cst_9 [2] : vector<4x2x16xf32> to vector<4x2xf32>
    %c0_10 = arith.constant 0 : index
    %c0_11 = arith.constant 0 : index
    %25 = vector.load %arg5[%c0_10, %c0_11] : memref<4x2xf32, #tpu.memory_space<vmem>>, vector<4x2xf32>
    tpu.vector_store %arg5[%c0_10, %c0_11], %24 {strides = array<i32>} : memref<4x2xf32, #tpu.memory_space<vmem>>, vector<4x2xf32>,
    %c0_12 = arith.constant 0 : index
    %c0_13 = arith.constant 0 : index
    %26 = vector.load %arg1[%c0_12, %c0_13] : memref<4x2xf32, #tpu.memory_space<vmem>>, vector<4x2xf32>
    %cst_14 = arith.constant 1.000000e+00 : f32
    %27 = vector.broadcast %cst_14 : f32 to vector<4x2xf32>
    %28 = arith.mulf %27, %24 : vector<4x2xf32>
    %29 = arith.subf %26, %28 : vector<4x2xf32>
    %cst_15 = arith.constant dense<0xFF800000> : vector<2xf32>
    %30 = vector.multi_reduction <maximumf>, %29, %cst_15 [0] : vector<4x2xf32> to vector<2xf32>
    %31 = vector.shape_cast %30 : vector<2xf32> to vector<1x2xf32>
    %32 = vector.broadcast %31 : vector<1x2xf32> to vector<4x2xf32>
    %33 = arith.subf %29, %32 : vector<4x2xf32>
    %34 = math.exp %33 : vector<4x2xf32>
    %cst_16 = arith.constant dense<0.000000e+00> : vector<2xf32>
    %35 = vector.multi_reduction <add>, %34, %cst_16 [0] : vector<4x2xf32> to vector<2xf32>
    %36 = vector.shape_cast %35 : vector<2xf32> to vector<1x2xf32>
    %37 = math.log %36 : vector<1x2xf32>
    %38 = arith.addf %31, %37 : vector<1x2xf32>
    %cst_17 = arith.constant 1.38629436 : f32
    %39 = vector.broadcast %cst_17 : f32 to vector<1x2xf32>
    %40 = arith.subf %38, %39 : vector<1x2xf32>
    %cst_18 = arith.constant dense<0.000000e+00> : vector<1xf32>
    %41 = vector.multi_reduction <add>, %40, %cst_18 [1] : vector<1x2xf32> to vector<1xf32>
    %42 = vector.shape_cast %41 : vector<1xf32> to vector<1x1xf32>
    %cst_19 = arith.constant 2.000000e+00 : f32
    %43 = vector.broadcast %cst_19 : f32 to vector<1x1xf32>
    %44 = arith.divf %42, %43 : vector<1x1xf32>
    %c0_20 = arith.constant 0 : index
    %c0_21 = arith.constant 0 : index
    %45 = vector.load %arg6[%c0_20, %c0_21] : memref<1x1xf32, #tpu.memory_space<vmem>>, vector<1x1xf32>
    tpu.vector_store %arg6[%c0_20, %c0_21], %44 {strides = array<i32>} : memref<1x1xf32, #tpu.memory_space<vmem>>, vector<1x1xf32>,
    return
  }
  func.func @transform_0(%arg0: i32) -> (i32, i32) {
    %c0_i32 = arith.constant 0 : i32
    %c0_i32_0 = arith.constant 0 : i32
    %c0_i32_1 = arith.constant 0 : i32
    return %c0_i32, %c0_i32_0 : i32, i32
  }
  func.func @transform_1(%arg0: i32) -> (i32, i32, i32) {
    %c0_i32 = arith.constant 0 : i32
    %c0_i32_0 = arith.constant 0 : i32
    %c0_i32_1 = arith.constant 0 : i32
    %c0_i32_2 = arith.constant 0 : i32
    return %c0_i32, %c0_i32_0, %c0_i32_1 : i32, i32, i32
  }
  func.func @transform_2(%arg0: i32) -> (i32, i32) {
    %c0_i32 = arith.constant 0 : i32
    %c0_i32_0 = arith.constant 0 : i32
    %c0_i32_1 = arith.constant 0 : i32
    return %c0_i32, %c0_i32_0 : i32, i32
  }
  func.func @transform_3(%arg0: i32) -> (i32, i32) {
    %c0_i32 = arith.constant 0 : i32
    %c0_i32_0 = arith.constant 0 : i32
    %c0_i32_1 = arith.constant 0 : i32
    return %c0_i32, %c0_i32_0 : i32, i32
  }
  func.func @transform_4(%arg0: i32) -> (i32, i32) {
    %c0_i32 = arith.constant 0 : i32
    %c0_i32_0 = arith.constant 0 : i32
    %c0_i32_1 = arith.constant 0 : i32
    return %c0_i32, %c0_i32_0 : i32, i32
  }
  func.func @transform_5(%arg0: i32) -> (i32, i32) {
    %c0_i32 = arith.constant 0 : i32
    %c0_i32_0 = arith.constant 0 : i32
    %c0_i32_1 = arith.constant 0 : i32
    return %c0_i32, %c0_i32_0 : i32, i32
  }
}

</mosaic_0001>

<bundles_post_ra>
// kernel: conv_vae_forward.9
= control target key start
LH: loop header
LB: loop body
LE: loop exit
PB: predicated region body
PF: predicated region fallthrough
CT: control target
= control target key end

     0   :  { %8 = vsyncpa [#allocation3], 0  ;;  %s715_s12 = smov [#allocation2]   ;;  %s941_s0 = inlined_call_operand.vmem [shape: bf16[2,18,128], index: 0, kind: input, shape index: {}]   ;;  %s942_s1 = inlined_call_operand.vmem [shape: bf16[384,224], index: 1, kind: input, shape index: {}]   ;;  %s943_s2 = inlined_call_operand.hbm [shape: f32[1,224], index: 2, kind: input, shape index: {}]   ;;  %s944_s3 = inlined_call_operand.vmem [shape: bf16[2,16,224], index: 3, kind: output, shape index: {}]  }
   0x1   :  { %s19_s13 = sshll.u32 %s715_s12, 4  ;;  %s691_s16 = scalar_lea.hbm %s943_s2, 32  ;;  %s20_s13 = int_to_ptr.vmem [resolvable:$true] %s19_s13 }
   0x2   :  { %p692_p0 = scmp.ne.s32.totalorder %s943_s2, %s691_s16  ;;  %p695_p1 = scmp.lt.u32.totalorder %s691_s16, %s943_s2 }
   0x4   :  { %p697_p2 = pnand %p695_p1, %p692_p0 }
   0x6   :  { %700 = shalt.err (!%p697_p2)
}
   0x7   :  { %s701_s21 = scalar_lea.vmem %s20_s13, 32  ;;  %p706_p4 = scmp.lt.s32.totalorder %s20_s13, %s20_s13 }
   0x8   :  { %p702_p3 = scmp.ne.s32.totalorder %s20_s13, %s701_s21  ;;  %p707_p5 = scmp.lt.s32.totalorder %s701_s21, %s701_s21 }
   0xa   :  { %p708_p6 = por %p707_p5, %p706_p4 }
   0xc   :  { %p709_p7 = pnand %p708_p6, %p702_p3 }
   0xe   :  { %712 = shalt.err (!%p709_p7)
}
   0xf   :  { %22 = dma.hbm_to_vmem [thread:$0]  %s943_s2, 32, %s20_s13, [#allocation3]  }
  0x10   :  { %713 = dma.done.wait [#allocation3], 32  }
  0x11   :  { %714 = vsyncadd [#allocation3], 4294967264  ;;  %v716_v0 = vmov 0   ;;  %v615_v1 = vld [vmem:[%s942_s1 + $0x4] ss:$8 sps:$4 sm:$0xff]   ;;  %vm78_vm1 = vcmask 1046528  }
  0x12   :  { %472 = vmatprep.mubr.bf16.mxu0 %v716_v0  ;;  %v617_v2 = vld [vmem:[%s942_s1] ss:$8 sps:$4 sm:$0xff]   ;;  %387 = vmatprep.subr.bf16.mxu1 %v615_v1  ;;  %v618_v3 = vld [vmem:[%s942_s1 + $0x14] ss:$8 sps:$4 sm:$0xff]   ;;  %v620_v4 = vld [vmem:[%s942_s1 + $0x10] ss:$8 sps:$4 sm:$0xff]  }
  0x13   :  { %388 = vmatpush1.bf16.msra.mxu1 %v617_v2  ;;  %v621_v5 = vld [vmem:[%s942_s1 + $0x24] ss:$8 sps:$4 sm:$0xff]   ;;  %v623_v6 = vld [vmem:[%s942_s1 + $0x20] ss:$8 sps:$4 sm:$0xff]   ;;  %v624_v7 = vld [vmem:[%s942_s1 + $0x34] ss:$8 sps:$4 sm:$0xff]  }
  0x14   :  { %389 = vmatprep.subr.bf16.mxu1 %v618_v3  ;;  %v626_v8 = vld [vmem:[%s942_s1 + $0x30] ss:$8 sps:$4 sm:$0xff]   ;;  %v639_v9 = vld [vmem:[%s942_s1 + $0x104] ss:$8 sps:$4 sm:$0xff]   ;;  %v643_v11 = vld [vmem:[%s942_s1 + $0x100] ss:$8 sps:$4 sm:$0xff]  }
  0x15   :  { %v627_v10 = vld [vmem:[%s942_s1 + $0x44] ss:$8 sps:$4 sm:$0xff]   ;;  %440 = vmatprep.subr.bf16.mxu0 %v639_v9  ;;  %v645_v12 = vld [vmem:[%s942_s1 + $0x114] ss:$8 sps:$4 sm:$0xff]   ;;  %v629_v13 = vld [vmem:[%s942_s1 + $0x40] ss:$8 sps:$4 sm:$0xff]  }
  0x16   :  { %441 = vmatpush1.bf16.msra.mxu0 %v643_v11  ;;  %v630_v14 = vld [vmem:[%s942_s1 + $0x54] ss:$8 sps:$4 sm:$0xff]   ;;  %v649_v15 = vld [vmem:[%s942_s1 + $0x110] ss:$8 sps:$4 sm:$0xff]   ;;  %v651_v16 = vld [vmem:[%s942_s1 + $0x124] ss:$8 sps:$4 sm:$0xff]  }
  0x17   :  { %390 = vmatpush1.bf16.msra.mxu1 %v620_v4  ;;  %442 = vmatprep.subr.bf16.mxu0 %v645_v12  ;;  %v632_v17 = vld [vmem:[%s942_s1 + $0x50] ss:$8 sps:$4 sm:$0xff]   ;;  %v655_v18 = vld [vmem:[%s942_s1 + $0x120] ss:$8 sps:$4 sm:$0xff]   ;;  %v657_v19 = vld [vmem:[%s942_s1 + $0x134] ss:$8 sps:$4 sm:$0xff]  }
  0x18   :  { %391 = vmatprep.subr.bf16.mxu1 %v621_v5  ;;  %v633_v20 = vld [vmem:[%s942_s1 + $0x64] ss:$8 sps:$4 sm:$0xff]   ;;  %v661_v21 = vld [vmem:[%s942_s1 + $0x130] ss:$8 sps:$4 sm:$0xff]   ;;  %v635_v22 = vld [vmem:[%s942_s1 + $0x60] ss:$8 sps:$4 sm:$0xff]  }
  0x19   :  { %v663_v23 = vld [vmem:[%s942_s1 + $0x144] ss:$8 sps:$4 sm:$0xff]   ;;  %v636_v24 = vld [vmem:[%s942_s1 + $0x74] ss:$8 sps:$4 sm:$0xff]   ;;  %v638_v25 = vld [vmem:[%s942_s1 + $0x70] ss:$8 sps:$4 sm:$0xff]  }
  0x1a   :  { %443 = vmatpush1.bf16.msra.mxu0 %v649_v15  ;;  %v667_v26 = vld [vmem:[%s942_s1 + $0x140] ss:$8 sps:$4 sm:$0xff]   ;;  %v669_v27 = vld [vmem:[%s942_s1 + $0x154] ss:$8 sps:$4 sm:$0xff]   ;;  %v641_v28 = vld [vmem:[%s942_s1 + $0x84] ss:$8 sps:$4 sm:$0xff]  }
  0x1b   :  { %392 = vmatpush1.bf16.msra.mxu1 %v623_v6  ;;  %444 = vmatprep.subr.bf16.mxu0 %v651_v16  ;;  %v673_v29 = vld [vmem:[%s942_s1 + $0x150] ss:$8 sps:$4 sm:$0xff]   ;;  %v644_v30 = vld [vmem:[%s942_s1 + $0x80] ss:$8 sps:$4 sm:$0xff]   ;;  %v647_v31 = vld [vmem:[%s942_s1 + $0x94] ss:$8 sps:$4 sm:$0xff]  }
  0x1c   :  { %393 = vmatprep.subr.bf16.mxu1 %v624_v7  ;;  %v675_v32 = vld [vmem:[%s942_s1 + $0x164] ss:$8 sps:$4 sm:$0xff]   ;;  %v650_v33 = vld [vmem:[%s942_s1 + $0x90] ss:$8 sps:$4 sm:$0xff]   ;;  %v679_v36 = vld [vmem:[%s942_s1 + $0x160] ss:$8 sps:$4 sm:$0xff]  }
  0x1d   :  { %v852_v34 = vld [vmem:[%s941_s0] sm:$0xff]   ;;  %v688_v35 = vld [vmem:[%s941_s0 + $0x8] ss:$0 sps:$4 sm:$0x11]   ;;  %v681_v37 = vld [vmem:[%s942_s1 + $0x174] ss:$8 sps:$4 sm:$0xff]  }
  0x1e   :  { %445 = vmatpush1.bf16.msra.mxu0 %v655_v18  ;;  %v53_v38 = vshrl.u32 %v852_v34, 16  ;;  %v55_v39 = vshll.u32 %v852_v34, 16  ;;  %v60_v40 = vshll.u32 %v688_v35, 16  ;;  %v653_v41 = vld [vmem:[%s942_s1 + $0xa4] ss:$8 sps:$4 sm:$0xff]   ;;  %v79_v45 = vrot.slane %v852_v34, 1 }
  0x1f   :  { %394 = vmatpush1.bf16.msra.mxu1 %v626_v8  ;;  %446 = vmatprep.subr.bf16.mxu0 %v657_v19  ;;  %v685_v44 = vld [vmem:[%s942_s1 + $0x170] ss:$8 sps:$4 sm:$0xff]   ;;  %vm51_vm0 = vsmask.f32 7424  ;;  %v80_v46 = vrot.slane %v688_v35, 1  ;;  %vm525_vm2 = vcmask 1043456  }
  0x20   :  { %395 = vmatprep.subr.bf16.mxu1 %v627_v10  ;;  %v57_v42 = vrot.slane %v55_v39, 1  ;;  %v62_v43 = vrot.slane %v60_v40, 1  ;;  %v656_v47 = vld [vmem:[%s942_s1 + $0xa0] ss:$8 sps:$4 sm:$0xff]   ;;  %v659_v49 = vld [vmem:[%s942_s1 + $0xb4] ss:$8 sps:$4 sm:$0xff]  }
  0x21   :  { %v81_v51 = vsel %vm78_vm1, %v79_v45, %v80_v46  ;;  %v662_v52 = vld [vmem:[%s942_s1 + $0xb0] ss:$8 sps:$4 sm:$0xff]   ;;  %v665_v53 = vld [vmem:[%s942_s1 + $0xc4] ss:$8 sps:$4 sm:$0xff]   ;;  %v668_v58 = vld [vmem:[%s942_s1 + $0xc0] ss:$8 sps:$4 sm:$0xff]  }
  0x22   :  { %447 = vmatpush1.bf16.msra.mxu0 %v661_v21  ;;  %v58_v48 = vor.u32 %v57_v42, %v53_v38  ;;  %v689_v54 = vld [vmem:[%s941_s0 + $0xc] sm:$0xff]   ;;  %v690_v55 = vld [vmem:[%s941_s0 + $0x14] ss:$0 sps:$4 sm:$0x11]   ;;  %vm526_vm3 = vcmask 785412  }
  0x23   :  { %396 = vmatpush1.bf16.msra.mxu1 %v629_v13  ;;  %448 = vmatprep.subr.bf16.mxu0 %v663_v23  ;;  %v82_v56 = vrot.slane %v689_v54, 1  ;;  %v83_v57 = vrot.slane %v690_v55, 1  ;;  %v671_v59 = vld [vmem:[%s942_s1 + $0xd4] ss:$8 sps:$4 sm:$0xff]   ;;  %v674_v61 = vld [vmem:[%s942_s1 + $0xd0] ss:$8 sps:$4 sm:$0xff]   ;;  %v137_v13 = vlaneseq  ;;  %vm917_vm4 = vmor %vm526_vm3, %vm525_vm2 }
  0x24   :  { %397 = vmatprep.subr.bf16.mxu1 %v630_v14  ;;  %v63_v50 = vsel %vm51_vm0, %v58_v48, %v62_v43  ;;  %v677_v62 = vld [vmem:[%s942_s1 + $0xe4] ss:$8 sps:$4 sm:$0xff]   ;;  %v67_v63 = vshll.u32 %v689_v54, 16  ;;  %v683_v1 = vld [vmem:[%s942_s1 + $0xf4] ss:$8 sps:$4 sm:$0xff]   ;;  %v65_v2 = vshrl.u32 %v689_v54, 16 }
  0x25   :  { %419 = vmatprep.mubr.bf16.mxu1 %v63_v50  ;;  %v84_v60 = vsel %vm78_vm1, %v82_v56, %v83_v57  ;;  %v72_v4 = vshll.u32 %v690_v55, 16  ;;  %v686_v5 = vld [vmem:[%s942_s1 + $0xf0] ss:$8 sps:$4 sm:$0xff]   ;;  %v138_v16 = vshrl.u32 %v137_v13, 7 }
  0x26   :  { %449 = vmatpush1.bf16.msra.mxu0 %v667_v26  ;;  %v69_v3 = vrot.slane %v67_v63, 1 }
  0x27   :  { %398 = vmatpush1.bf16.msra.mxu1 %v632_v17  ;;  %450 = vmatprep.subr.bf16.mxu0 %v669_v27  ;;  %v74_v7 = vrot.slane %v72_v4, 1  ;;  %v139_v19 = vsub.s32 0, %v138_v16  ;;  %v143_v21 = vsub.s32 1, %v138_v16 }
  0x28   :  { %399 = vmatprep.subr.bf16.mxu1 %v633_v20  ;;  %v70_v6 = vor.u32 %v69_v3, %v65_v2  ;;  %v135_v20 = vld [vmem:[#allocation2] sm:$0x3] }
  0x29   :  { %v144_v23 = vrot.slane %v135_v20, %v143_v21 }
  0x2a   :  { %451 = vmatpush1.bf16.msra.mxu0 %v673_v29  ;;  %v75_v8 = vsel %vm51_vm0, %v70_v6, %v74_v7 }
  0x2b   :  { %400 = vmatpush1.bf16.msra.mxu1 %v635_v22  ;;  %452 = vmatprep.subr.bf16.mxu0 %v675_v32  ;;  %v140_v22 = vrot.slane %v135_v20, %v139_v19 }
  0x2c   :  { %401 = vmatprep.subr.bf16.mxu1 %v636_v24 }
  0x2e   :  { %453 = vmatpush1.bf16.msra.mxu0 %v679_v36 }
  0x2f   :  { %402 = vmatpush1.bf16.msra.mxu1 %v638_v25  ;;  %454 = vmatprep.subr.bf16.mxu0 %v681_v37 }
  0x30   :  { %403 = vmatprep.subr.bf16.mxu1 %v641_v28 }
  0x32   :  { %455 = vmatpush1.bf16.msra.mxu0 %v685_v44 }
  0x33   :  { %404 = vmatpush1.bf16.msra.mxu1 %v644_v30 }
  0x34   :  { %405 = vmatprep.subr.bf16.mxu1 %v647_v31 }
  0x35   :  { %473 = vmatmul.mubr.bf16.vlgmr.msra.gmra.mrb[0].mxu0 %v81_v51 }
  0x36   :  { %482 = vmatprep.mubr.bf16.mxu0 %v716_v0  ;;  %v680_v0 = vld [vmem:[%s942_s1 + $0xe0] ss:$8 sps:$4 sm:$0xff]  }
  0x37   :  { %406 = vmatpush1.bf16.msra.mxu1 %v650_v33 }
  0x38   :  { %407 = vmatprep.subr.bf16.mxu1 %v653_v41 }
  0x3b   :  { %408 = vmatpush1.bf16.msra.mxu1 %v656_v47 }
  0x3c   :  { %409 = vmatprep.subr.bf16.mxu1 %v659_v49 }
  0x3d   :  { %483 = vmatmul.mubr.bf16.gmra.mrb[4].mxu0 %v84_v60 }
  0x3f   :  { %410 = vmatpush1.bf16.msra.mxu1 %v662_v52 }
  0x40   :  { %411 = vmatprep.subr.bf16.mxu1 %v665_v53 }
  0x43   :  { %412 = vmatpush1.bf16.msra.mxu1 %v668_v58 }
  0x44   :  { %413 = vmatprep.subr.bf16.mxu1 %v671_v59 }
  0x47   :  { %414 = vmatpush1.bf16.msra.mxu1 %v674_v61 }
  0x48   :  { %415 = vmatprep.subr.bf16.mxu1 %v677_v62 }
  0x4b   :  { %416 = vmatpush1.bf16.msra.mxu1 %v680_v0 }
  0x4c   :  { %417 = vmatprep.subr.bf16.mxu1 %v683_v1 }
  0x4f   :  { %418 = vmatpush1.bf16.msra.mxu1 %v686_v5 }
  0x52   :  { %420 = vmatmul.mubr.bf16.vlgmr.msra.gmra.mrb[0].mxu1 %v852_v34 }
  0x53   :  { %429 = vmatprep.mubr.bf16.mxu1 %v75_v8 }
  0x5a   :  { %430 = vmatmul.mubr.bf16.gmra.mrb[4].mxu1 %v689_v54 }
 0x108   :  { %v474_v9 = vpop.f32.mrb[0].mxu0 }
 0x109   :  { %v476_v10 = vpop.f32.mrb[1].mxu0 }
 0x10a   :  { %v478_v11 = vpop.f32.mrb[2].mxu0 }
 0x10b   :  { %v480_v12 = vpop.f32.mrb[3].mxu0 }
 0x110   :  { %v484_v14 = vpop.f32.mrb[4].mxu0 }
 0x111   :  { %v486_v15 = vpop.f32.mrb[5].mxu0 }
 0x112   :  { %v488_v17 = vpop.f32.mrb[6].mxu0 }
 0x113   :  { %v490_v18 = vpop.f32.mrb[7].mxu0 }
 0x125   :  { %v421_v24 = vpop.f32.mrb[0].mxu1 }
 0x126   :  { %v422_v25 = vadd.f32 %v421_v24, %v140_v22  ;;  %v423_v26 = vpop.f32.mrb[1].mxu1 }
 0x127   :  { %v424_v27 = vadd.f32 %v423_v26, %v144_v23  ;;  %v425_v28 = vpop.f32.mrb[2].mxu1 }
 0x128   :  { %v475_v29 = vadd.f32 %v474_v9, %v422_v25  ;;  %v426_v30 = vadd.f32 %v425_v28, %v140_v22  ;;  %v427_v31 = vpop.f32.mrb[3].mxu1 }
 0x129   :  { %v477_v32 = vadd.f32 %v476_v10, %v424_v27  ;;  %v428_v33 = vadd.f32 %v427_v31, %v144_v23 }
 0x12a   :  { %v493_v34 = vmax.f32 %v475_v29, 0.0  ;;  %v479_v35 = vadd.f32 %v478_v11, %v426_v30 }
 0x12b   :  { %v494_v36 = vmax.f32 %v477_v32, 0.0  ;;  %v481_v37 = vadd.f32 %v480_v12, %v428_v33 }
 0x12c   :  { %v495_v39 = vmax.f32 %v479_v35, 0.0 }
 0x12d   :  { %v593_v40 = vpack.c.bf16 %v494_v36, %v493_v34  ;;  %v496_v41 = vmax.f32 %v481_v37, 0.0  ;;  %v431_v42 = vpop.f32.mrb[4].mxu1 }
 0x12e   :  { %v432_v43 = vadd.f32 %v431_v42, %v140_v22  ;;  %v433_v44 = vpop.f32.mrb[5].mxu1 }
 0x12f   :  { %528 = vst.msk [vmem:[%s944_s3] sm:$0xff] %vm917_vm4, %v593_v40  ;;  %v594_v45 = vpack.c.bf16 %v496_v41, %v495_v39  ;;  %v434_v46 = vadd.f32 %v433_v44, %v144_v23  ;;  %v435_v47 = vpop.f32.mrb[6].mxu1 }
 0x130   :  { %v485_v48 = vadd.f32 %v484_v14, %v432_v43  ;;  %v436_v49 = vadd.f32 %v435_v47, %v140_v22  ;;  %v437_v50 = vpop.f32.mrb[7].mxu1 }
 0x131   :  { %529 = vst.msk [vmem:[%s944_s3 + $0x8] sm:$0xff] %vm917_vm4, %v594_v45  ;;  %v487_v51 = vadd.f32 %v486_v15, %v434_v46  ;;  %v438_v52 = vadd.f32 %v437_v50, %v144_v23 }
 0x132   :  { %v497_v53 = vmax.f32 %v485_v48, 0.0  ;;  %v489_v54 = vadd.f32 %v488_v17, %v436_v49 }
 0x133   :  { %v498_v55 = vmax.f32 %v487_v51, 0.0  ;;  %v491_v56 = vadd.f32 %v490_v18, %v438_v52 }
 0x134   :  { %v499_v57 = vmax.f32 %v489_v54, 0.0 }
 0x135   :  { %v595_v58 = vpack.c.bf16 %v498_v55, %v497_v53  ;;  %v500_v59 = vmax.f32 %v491_v56, 0.0 }
 0x137   :  { %530 = vst.msk [vmem:[%s944_s3 + $0x10] sm:$0xff] %vm917_vm4, %v595_v58  ;;  %v596_v60 = vpack.c.bf16 %v500_v59, %v499_v57 }
 0x139   :  { %531 = vst.msk [vmem:[%s944_s3 + $0x18] sm:$0xff] %vm917_vm4, %v596_v60 }
 0x13a   :  { %536 = vsyncpa [#allocation3], 1 }

// kernel: conv_vae_forward.10
= control target key start
LH: loop header
LB: loop body
LE: loop exit
PB: predicated region body
PF: predicated region fallthrough
CT: control target
= control target key end

     0   :  { %vm2015_vm0 = vcmask 1043456   ;;  %vm2016_vm1 = vcmask 785412   ;;  %s3600_s1 = inlined_call_operand.vmem [shape: bf16[1920,224], index: 1, kind: input, shape index: {}]   ;;  %s3601_s0 = inlined_call_operand.vmem [shape: bf16[2,10,640], index: 0, kind: input, shape index: {}]   ;;  %s3602_s2 = inlined_call_operand.vmem [shape: f32[1,224], index: 2, kind: input, shape index: {}]   ;;  %s3603_s3 = inlined_call_operand.vmem [shape: bf16[2,8,224], index: 3, kind: output, shape index: {}]  }
   0x1   :  { %v2326_v0 = vld [vmem:[%s3600_s1 + $0x4] ss:$8 sps:$4 sm:$0xff]   ;;  %v2330_v2 = vld [vmem:[%s3600_s1] ss:$8 sps:$4 sm:$0xff]   ;;  %v2332_v4 = vld [vmem:[%s3600_s1 + $0x14] ss:$8 sps:$4 sm:$0xff]  }
   0x2   :  { %v2328_v1 = vld [vmem:[%s3600_s1 + $0x404] ss:$8 sps:$4 sm:$0xff]   ;;  %1651 = vmatprep.subr.bf16.mxu1 %v2326_v0  ;;  %v2331_v3 = vld [vmem:[%s3600_s1 + $0x400] ss:$8 sps:$4 sm:$0xff]   ;;  %v2334_v5 = vld [vmem:[%s3600_s1 + $0x414] ss:$8 sps:$4 sm:$0xff]  }
   0x3   :  { %1823 = vmatprep.subr.bf16.mxu0 %v2328_v1  ;;  %1652 = vmatpush1.bf16.msra.mxu1 %v2330_v2  ;;  %v2336_v6 = vld [vmem:[%s3600_s1 + $0x10] ss:$8 sps:$4 sm:$0xff]   ;;  %v2338_v8 = vld [vmem:[%s3600_s1 + $0x24] ss:$8 sps:$4 sm:$0xff]   ;;  %v2342_v10 = vld [vmem:[%s3600_s1 + $0x20] ss:$8 sps:$4 sm:$0xff]  }
   0x4   :  { %1824 = vmatpush1.bf16.msra.mxu0 %v2331_v3  ;;  %1653 = vmatprep.subr.bf16.mxu1 %v2332_v4  ;;  %v2337_v7 = vld [vmem:[%s3600_s1 + $0x410] ss:$8 sps:$4 sm:$0xff]   ;;  %v2340_v9 = vld [vmem:[%s3600_s1 + $0x424] ss:$8 sps:$4 sm:$0xff]   ;;  %v2343_v11 = vld [vmem:[%s3600_s1 + $0x420] ss:$8 sps:$4 sm:$0xff]  }
   0x5   :  { %1825 = vmatprep.subr.bf16.mxu0 %v2334_v5  ;;  %v2344_v12 = vld [vmem:[%s3600_s1 + $0x34] ss:$8 sps:$4 sm:$0xff]   ;;  %v2348_v14 = vld [vmem:[%s3600_s1 + $0x30] ss:$8 sps:$4 sm:$0xff]   ;;  %v2350_v16 = vld [vmem:[%s3600_s1 + $0x44] ss:$8 sps:$4 sm:$0xff]  }
   0x6   :  { %v2346_v13 = vld [vmem:[%s3600_s1 + $0x434] ss:$8 sps:$4 sm:$0xff]   ;;  %v2349_v15 = vld [vmem:[%s3600_s1 + $0x430] ss:$8 sps:$4 sm:$0xff]   ;;  %v2352_v17 = vld [vmem:[%s3600_s1 + $0x444] ss:$8 sps:$4 sm:$0xff]  }
   0x7   :  { %1654 = vmatpush1.bf16.msra.mxu1 %v2336_v6  ;;  %v2354_v18 = vld [vmem:[%s3600_s1 + $0x40] ss:$8 sps:$4 sm:$0xff]   ;;  %v2356_v20 = vld [vmem:[%s3600_s1 + $0x54] ss:$8 sps:$4 sm:$0xff]   ;;  %v2360_v22 = vld [vmem:[%s3600_s1 + $0x50] ss:$8 sps:$4 sm:$0xff]  }
   0x8   :  { %1826 = vmatpush1.bf16.msra.mxu0 %v2337_v7  ;;  %1655 = vmatprep.subr.bf16.mxu1 %v2338_v8  ;;  %v2355_v19 = vld [vmem:[%s3600_s1 + $0x440] ss:$8 sps:$4 sm:$0xff]   ;;  %v2358_v21 = vld [vmem:[%s3600_s1 + $0x454] ss:$8 sps:$4 sm:$0xff]   ;;  %v2361_v23 = vld [vmem:[%s3600_s1 + $0x450] ss:$8 sps:$4 sm:$0xff]  }
   0x9   :  { %1827 = vmatprep.subr.bf16.mxu0 %v2340_v9  ;;  %v2362_v24 = vld [vmem:[%s3600_s1 + $0x64] ss:$8 sps:$4 sm:$0xff]   ;;  %v2366_v26 = vld [vmem:[%s3600_s1 + $0x60] ss:$8 sps:$4 sm:$0xff]   ;;  %v2368_v28 = vld [vmem:[%s3600_s1 + $0x74] ss:$8 sps:$4 sm:$0xff]  }
   0xa   :  { %v2364_v25 = vld [vmem:[%s3600_s1 + $0x464] ss:$8 sps:$4 sm:$0xff]   ;;  %v2367_v27 = vld [vmem:[%s3600_s1 + $0x460] ss:$8 sps:$4 sm:$0xff]   ;;  %v2370_v29 = vld [vmem:[%s3600_s1 + $0x474] ss:$8 sps:$4 sm:$0xff]  }
   0xb   :  { %1656 = vmatpush1.bf16.msra.mxu1 %v2342_v10  ;;  %v2372_v30 = vld [vmem:[%s3600_s1 + $0x70] ss:$8 sps:$4 sm:$0xff]   ;;  %v2374_v32 = vld [vmem:[%s3600_s1 + $0x84] ss:$8 sps:$4 sm:$0xff]   ;;  %v2378_v34 = vld [vmem:[%s3600_s1 + $0x80] ss:$8 sps:$4 sm:$0xff]  }
   0xc   :  { %1828 = vmatpush1.bf16.msra.mxu0 %v2343_v11  ;;  %1657 = vmatprep.subr.bf16.mxu1 %v2344_v12  ;;  %v2373_v31 = vld [vmem:[%s3600_s1 + $0x470] ss:$8 sps:$4 sm:$0xff]   ;;  %v2376_v33 = vld [vmem:[%s3600_s1 + $0x484] ss:$8 sps:$4 sm:$0xff]   ;;  %v2379_v35 = vld [vmem:[%s3600_s1 + $0x480] ss:$8 sps:$4 sm:$0xff]  }
   0xd   :  { %1829 = vmatprep.subr.bf16.mxu0 %v2346_v13  ;;  %v2380_v36 = vld [vmem:[%s3600_s1 + $0x94] ss:$8 sps:$4 sm:$0xff]   ;;  %v2384_v38 = vld [vmem:[%s3600_s1 + $0x90] ss:$8 sps:$4 sm:$0xff]   ;;  %v2386_v40 = vld [vmem:[%s3600_s1 + $0xa4] ss:$8 sps:$4 sm:$0xff]  }
   0xe   :  { %v2382_v37 = vld [vmem:[%s3600_s1 + $0x494] ss:$8 sps:$4 sm:$0xff]   ;;  %v2385_v39 = vld [vmem:[%s3600_s1 + $0x490] ss:$8 sps:$4 sm:$0xff]   ;;  %v2388_v41 = vld [vmem:[%s3600_s1 + $0x4a4] ss:$8 sps:$4 sm:$0xff]  }
   0xf   :  { %1658 = vmatpush1.bf16.msra.mxu1 %v2348_v14  ;;  %v2390_v42 = vld [vmem:[%s3600_s1 + $0xa0] ss:$8 sps:$4 sm:$0xff]   ;;  %v2392_v44 = vld [vmem:[%s3600_s1 + $0xb4] ss:$8 sps:$4 sm:$0xff]   ;;  %v2396_v47 = vld [vmem:[%s3600_s1 + $0xb0] ss:$8 sps:$4 sm:$0xff]  }
  0x10   :  { %1830 = vmatpush1.bf16.msra.mxu0 %v2349_v15  ;;  %1659 = vmatprep.subr.bf16.mxu1 %v2350_v16  ;;  %v2391_v43 = vld [vmem:[%s3600_s1 + $0x4a0] ss:$8 sps:$4 sm:$0xff]   ;;  %v2394_v45 = vld [vmem:[%s3600_s1 + $0x4b4] ss:$8 sps:$4 sm:$0xff]   ;;  %v2397_v48 = vld [vmem:[%s3600_s1 + $0x4b0] ss:$8 sps:$4 sm:$0xff]  }
  0x11   :  { %1831 = vmatprep.subr.bf16.mxu0 %v2352_v17  ;;  %v2863_v46 = vld [vmem:[%s3601_s0] sm:$0xff]  ;;  %v2874_v49 = vld [vmem:[%s3601_s0 + $0x28] sm:$0xff]  ;;  %v2887_v53 = vld [vmem:[%s3601_s0 + $0x10] sm:$0xf] }
  0x12   :  { %v2398_v50 = vld [vmem:[%s3600_s1 + $0xc4] ss:$8 sps:$4 sm:$0xff]   ;;  %v2035_v52 = vcombine.high %v2863_v46, %v2874_v49  ;;  %v2402_v55 = vld [vmem:[%s3600_s1 + $0xc0] ss:$8 sps:$4 sm:$0xff]   ;;  %v2901_v57 = vld [vmem:[%s3601_s0 + $0x38] sm:$0xf] }
  0x13   :  { %1660 = vmatpush1.bf16.msra.mxu1 %v2354_v18  ;;  %v2400_v51 = vld [vmem:[%s3600_s1 + $0x4c4] ss:$8 sps:$4 sm:$0xff]   ;;  %v2403_v56 = vld [vmem:[%s3600_s1 + $0x4c0] ss:$8 sps:$4 sm:$0xff]   ;;  %v2404_v60 = vld [vmem:[%s3600_s1 + $0xd4] ss:$8 sps:$4 sm:$0xff]  }
  0x14   :  { %1832 = vmatpush1.bf16.msra.mxu0 %v2355_v19  ;;  %1661 = vmatprep.subr.bf16.mxu1 %v2356_v20  ;;  %v20_v54 = vld [vmem:[%s3601_s0 + $0x24] sm:$0x1]  ;;  %v26_v58 = vld [vmem:[%s3601_s0 + $0x4c] sm:$0x1]  ;;  %v2406_v61 = vld [vmem:[%s3600_s1 + $0x4d4] ss:$8 sps:$4 sm:$0xff]  }
  0x15   :  { %1833 = vmatprep.subr.bf16.mxu0 %v2358_v21  ;;  %v2907_v59 = vcombine.low %v2887_v53, %v20_v54  ;;  %v18_v62 = vld [vmem:[%s3601_s0 + $0x14] sm:$0x11]  ;;  %v24_v63 = vld [vmem:[%s3601_s0 + $0x3c] sm:$0x11]  ;;  %1683 = vmatprep.mubr.bf16.mxu1 %v2035_v52  ;;  %v2922_v0 = vcombine.low %v2901_v57, %v26_v58  ;;  %v2929_v3 = vld [vmem:[%s3601_s0 + $0x8] sm:$0xff] }
  0x16   :  { %v19_v4 = vld [vmem:[%s3601_s0 + $0x1c] sm:$0x11]  ;;  %v2937_v5 = vld [vmem:[%s3601_s0 + $0x30] sm:$0xff]  ;;  %v25_v8 = vld [vmem:[%s3601_s0 + $0x44] sm:$0x11]  ;;  %v2024_v14 = vcombine.low %v2863_v46, %v18_v62  ;;  %v2957_v15 = vcombine.low %v2874_v49, %v24_v63 }
  0x17   :  { %1662 = vmatpush1.bf16.msra.mxu1 %v2360_v22  ;;  %v98_v1 = vshrl.u32 %v2907_v59, 16  ;;  %v100_v2 = vshll.u32 %v2907_v59, 16  ;;  %v133_v6 = vshrl.u32 %v2922_v0, 16  ;;  %v135_v7 = vshll.u32 %v2922_v0, 16  ;;  %v2408_v13 = vld [vmem:[%s3600_s1 + $0xd0] ss:$8 sps:$4 sm:$0xff]   ;;  %vm2017_vm2 = vmor %vm2016_vm1, %vm2015_vm0 }
  0x18   :  { %1834 = vmatpush1.bf16.msra.mxu0 %v2361_v23  ;;  %1663 = vmatprep.subr.bf16.mxu1 %v2362_v24  ;;  %v2945_v9 = vcombine.high %v2929_v3, %v19_v4  ;;  %v2948_v11 = vcombine.high %v2937_v5, %v25_v8  ;;  %v2036_v12 = vcombine.low %v2929_v3, %v2937_v5  ;;  %v2409_v18 = vld [vmem:[%s3600_s1 + $0x4d0] ss:$8 sps:$4 sm:$0xff]   ;;  %v2410_v21 = vld [vmem:[%s3600_s1 + $0xe4] ss:$8 sps:$4 sm:$0xff]   ;;  %v2414_v24 = vld [vmem:[%s3600_s1 + $0xe0] ss:$8 sps:$4 sm:$0xff]  }
  0x19   :  { %1835 = vmatprep.subr.bf16.mxu0 %v2364_v25  ;;  %v102_v10 = vrot.slane %v100_v2, 1  ;;  %v137_v16 = vrot.slane %v135_v7, 1  ;;  %v2412_v22 = vld [vmem:[%s3600_s1 + $0x4e4] ss:$8 sps:$4 sm:$0xff]   ;;  %v3009_v52 = vcombine.low %v2929_v3, %v19_v4  ;;  %v3012_v54 = vcombine.low %v2937_v5, %v25_v8 }
  0x1a   :  { %v93_v17 = vshll.u32 %v2945_v9, 16  ;;  %v128_v20 = vshll.u32 %v2948_v11, 16  ;;  %v91_v25 = vshrl.u32 %v2945_v9, 16  ;;  %v147_v2 = vrot.slane %v2948_v11, 1 }
  0x1b   :  { %1664 = vmatpush1.bf16.msra.mxu1 %v2366_v26  ;;  %v103_v19 = vor.u32 %v102_v10, %v98_v1  ;;  %v138_v23 = vor.u32 %v137_v16, %v133_v6  ;;  %v142_v1 = vrot.slane %v2945_v9, 1  ;;  %v2038_v6 = vcombine.low %v2887_v53, %v2901_v57  ;;  %v2646_v53 = vld [vmem:[%s3600_s1 + $0x724] ss:$8 sps:$4 sm:$0xff]  }
  0x1c   :  { %1836 = vmatpush1.bf16.msra.mxu0 %v2367_v27  ;;  %1665 = vmatprep.subr.bf16.mxu1 %v2368_v28  ;;  %v95_v26 = vrot.slane %v93_v17, 1  ;;  %v126_v27 = vshrl.u32 %v2948_v11, 16  ;;  %v141_v7 = vrot.slane %v3009_v52, 1  ;;  %v2037_v8 = vcombine.high %v2929_v3, %v2937_v5  ;;  %v2446_v17 = vld [vmem:[%s3600_s1 + $0x124] ss:$8 sps:$4 sm:$0xff]  }
  0x1d   :  { %1837 = vmatprep.subr.bf16.mxu0 %v2370_v29  ;;  %v2043_v28 = vcombine.low %v103_v19, %v138_v23  ;;  %v130_v29 = vrot.slane %v128_v20, 1  ;;  %v3040_v10 = vcombine.low %v142_v1, %v147_v2  ;;  %v146_v11 = vrot.slane %v3012_v54, 1  ;;  %v2444_v19 = vld [vmem:[%s3600_s1 + $0x120] ss:$8 sps:$4 sm:$0xff]   ;;  %v2450_v23 = vld [vmem:[%s3600_s1 + $0x130] ss:$8 sps:$4 sm:$0xff]  }
  0x1e   :  { %v2447_v20 = vld [vmem:[%s3600_s1 + $0x520] ss:$8 sps:$4 sm:$0xff]   ;;  %v2500_v2 = vld [vmem:[%s3600_s1 + $0x1b4] ss:$8 sps:$4 sm:$0xff]   ;;  %v2547_v3 = vld [vmem:[%s3600_s1 + $0x624] ss:$8 sps:$4 sm:$0xff]  }
  0x1f   :  { %1666 = vmatpush1.bf16.msra.mxu1 %v2372_v30  ;;  %v139_v30 = vrot.slane %v2024_v14, 1  ;;  %1855 = vmatprep.mubr.bf16.mxu0 %v2043_v28  ;;  %v3051_v16 = vcombine.low %v141_v7, %v146_v11  ;;  %v2459_v28 = vld [vmem:[%s3600_s1 + $0x540] ss:$8 sps:$4 sm:$0xff]   ;;  %v2501_v7 = vld [vmem:[%s3600_s1 + $0x5b0] ss:$8 sps:$4 sm:$0xff]   ;;  %v2701_v57 = vmov 0  }
  0x20   :  { %1838 = vmatpush1.bf16.msra.mxu0 %v2373_v31  ;;  %1667 = vmatprep.subr.bf16.mxu1 %v2374_v32  ;;  %v144_v31 = vrot.slane %v2957_v15, 1  ;;  %v2415_v32 = vld [vmem:[%s3600_s1 + $0x4e0] ss:$8 sps:$4 sm:$0xff]  }
  0x21   :  { %1839 = vmatprep.subr.bf16.mxu0 %v2376_v33  ;;  %v2416_v33 = vld [vmem:[%s3600_s1 + $0xf4] ss:$8 sps:$4 sm:$0xff]   ;;  %v2495_v1 = vld [vmem:[%s3600_s1 + $0x5a0] ss:$8 sps:$4 sm:$0xff]  }
  0x22   :  { %v2504_v11 = vld [vmem:[%s3600_s1 + $0x1c0] ss:$8 sps:$4 sm:$0xff]  }
  0x23   :  { %1668 = vmatpush1.bf16.msra.mxu1 %v2378_v34  ;;  %v2418_v34 = vld [vmem:[%s3600_s1 + $0x4f4] ss:$8 sps:$4 sm:$0xff]   ;;  %v2542_v5 = vld [vmem:[%s3600_s1 + $0x220] ss:$8 sps:$4 sm:$0xff]  }
  0x24   :  { %1840 = vmatpush1.bf16.msra.mxu0 %v2379_v35  ;;  %1669 = vmatprep.subr.bf16.mxu1 %v2380_v36  ;;  %v2986_v35 = vcombine.high %v2863_v46, %v18_v62  ;;  %v2988_v36 = vcombine.low %v139_v30, %v144_v31  ;;  %v2432_v62 = vld [vmem:[%s3600_s1 + $0x500] ss:$8 sps:$4 sm:$0xff]   ;;  %v2467_v30 = vld [vmem:[%s3600_s1 + $0x554] ss:$8 sps:$4 sm:$0xff]   ;;  %v2462_v31 = vld [vmem:[%s3600_s1 + $0x150] ss:$8 sps:$4 sm:$0xff]  }
  0x25   :  { %1841 = vmatprep.subr.bf16.mxu0 %v2382_v37  ;;  %v2420_v37 = vld [vmem:[%s3600_s1 + $0xf0] ss:$8 sps:$4 sm:$0xff]  }
  0x27   :  { %1670 = vmatpush1.bf16.msra.mxu1 %v2384_v38  ;;  %v2994_v38 = vcombine.high %v2874_v49, %v24_v63 }
  0x28   :  { %1842 = vmatpush1.bf16.msra.mxu0 %v2385_v39  ;;  %1671 = vmatprep.subr.bf16.mxu1 %v2386_v40  ;;  %v2421_v39 = vld [vmem:[%s3600_s1 + $0x4f0] ss:$8 sps:$4 sm:$0xff]   ;;  %v96_v40 = vor.u32 %v95_v26, %v91_v25  ;;  %v2458_v25 = vld [vmem:[%s3600_s1 + $0x144] ss:$8 sps:$4 sm:$0xff]  }
  0x29   :  { %1843 = vmatprep.subr.bf16.mxu0 %v2388_v41  ;;  %v131_v41 = vor.u32 %v130_v29, %v126_v27  ;;  %v2461_v26 = vld [vmem:[%s3600_s1 + $0x544] ss:$8 sps:$4 sm:$0xff]   ;;  %v2456_v27 = vld [vmem:[%s3600_s1 + $0x140] ss:$8 sps:$4 sm:$0xff]   ;;  %v2464_v29 = vld [vmem:[%s3600_s1 + $0x154] ss:$8 sps:$4 sm:$0xff]  }
  0x2b   :  { %1672 = vmatpush1.bf16.msra.mxu1 %v2390_v42  ;;  %v72_v42 = vshll.u32 %v2024_v14, 16  ;;  %v2042_v58 = vcombine.low %v96_v40, %v131_v41  ;;  %v2476_v40 = vld [vmem:[%s3600_s1 + $0x174] ss:$8 sps:$4 sm:$0xff]  }
  0x2c   :  { %1844 = vmatpush1.bf16.msra.mxu0 %v2391_v43  ;;  %1673 = vmatprep.subr.bf16.mxu1 %v2392_v44  ;;  %v107_v43 = vshll.u32 %v2957_v15, 16  ;;  %v2429_v44 = vld [vmem:[%s3600_s1 + $0x104] ss:$8 sps:$4 sm:$0xff]   ;;  %v2479_v41 = vld [vmem:[%s3600_s1 + $0x574] ss:$8 sps:$4 sm:$0xff]  }
  0x2d   :  { %1845 = vmatprep.subr.bf16.mxu0 %v2394_v45  ;;  %v2434_v45 = vld [vmem:[%s3600_s1 + $0x504] ss:$8 sps:$4 sm:$0xff]  }
  0x2f   :  { %1674 = vmatpush1.bf16.msra.mxu1 %v2396_v47  ;;  %v140_v47 = vrot.slane %v2986_v35, 1 }
  0x30   :  { %1846 = vmatpush1.bf16.msra.mxu0 %v2397_v48  ;;  %1675 = vmatprep.subr.bf16.mxu1 %v2398_v50  ;;  %v70_v48 = vshrl.u32 %v2024_v14, 16  ;;  %v145_v50 = vrot.slane %v2994_v38, 1 }
  0x31   :  { %1847 = vmatprep.subr.bf16.mxu0 %v2400_v51  ;;  %v74_v51 = vrot.slane %v72_v42, 1  ;;  %v2474_v42 = vld [vmem:[%s3600_s1 + $0x170] ss:$8 sps:$4 sm:$0xff]  }
  0x32   :  { %v2045_v9 = vcombine.low %v140_v47, %v145_v50  ;;  %v2480_v47 = vld [vmem:[%s3600_s1 + $0x180] ss:$8 sps:$4 sm:$0xff]   ;;  %v148_v50 = vrot.slane %v2922_v0, 1  ;;  %v2489_v0 = vld [vmem:[%s3600_s1 + $0x590] ss:$8 sps:$4 sm:$0xff]  }
  0x33   :  { %1676 = vmatpush1.bf16.msra.mxu1 %v2402_v55  ;;  %v2427_v55 = vld [vmem:[%s3600_s1 + $0x100] ss:$8 sps:$4 sm:$0xff]   ;;  %v3023_v63 = vor.u32 %v74_v51, %v70_v48  ;;  %v143_v48 = vrot.slane %v2907_v59, 1  ;;  %v2486_v59 = vld [vmem:[%s3600_s1 + $0x190] ss:$8 sps:$4 sm:$0xff]  }
  0x34   :  { %1848 = vmatpush1.bf16.msra.mxu0 %v2403_v56  ;;  %1677 = vmatprep.subr.bf16.mxu1 %v2404_v60  ;;  %v2034_v56 = vcombine.low %v2863_v46, %v2874_v49  ;;  %v105_v60 = vshrl.u32 %v2957_v15, 16  ;;  %v2440_v46 = vld [vmem:[%s3600_s1 + $0x114] ss:$8 sps:$4 sm:$0xff]   ;;  %v2441_v15 = vld [vmem:[%s3600_s1 + $0x510] ss:$8 sps:$4 sm:$0xff]  }
  0x35   :  { %1849 = vmatprep.subr.bf16.mxu0 %v2406_v61  ;;  %v109_v61 = vrot.slane %v107_v43, 1  ;;  %v2443_v49 = vld [vmem:[%s3600_s1 + $0x514] ss:$8 sps:$4 sm:$0xff]   ;;  %v2477_v43 = vld [vmem:[%s3600_s1 + $0x570] ss:$8 sps:$4 sm:$0xff]  }
  0x36   :  { %v2483_v51 = vld [vmem:[%s3600_s1 + $0x580] ss:$8 sps:$4 sm:$0xff]  }
  0x37   :  { %1678 = vmatpush1.bf16.msra.mxu1 %v2408_v13  ;;  %v3033_v4 = vor.u32 %v109_v61, %v105_v60  ;;  %v2438_v13 = vld [vmem:[%s3600_s1 + $0x110] ss:$8 sps:$4 sm:$0xff]   ;;  %v2494_v60 = vld [vmem:[%s3600_s1 + $0x1a4] ss:$8 sps:$4 sm:$0xff]  }
  0x38   :  { %1850 = vmatpush1.bf16.msra.mxu0 %v2409_v18  ;;  %1679 = vmatprep.subr.bf16.mxu1 %v2410_v21  ;;  %v2449_v18 = vld [vmem:[%s3600_s1 + $0x524] ss:$8 sps:$4 sm:$0xff]   ;;  %v2452_v21 = vld [vmem:[%s3600_s1 + $0x134] ss:$8 sps:$4 sm:$0xff]  }
  0x39   :  { %1851 = vmatprep.subr.bf16.mxu0 %v2412_v22  ;;  %v2039_v14 = vcombine.low %v3023_v63, %v3033_v4  ;;  %v2455_v22 = vld [vmem:[%s3600_s1 + $0x534] ss:$8 sps:$4 sm:$0xff]   ;;  %v2497_v61 = vld [vmem:[%s3600_s1 + $0x5a4] ss:$8 sps:$4 sm:$0xff]   ;;  %v2548_v4 = vld [vmem:[%s3600_s1 + $0x230] ss:$8 sps:$4 sm:$0xff]  }
  0x3a   :  { %v2553_v63 = vld [vmem:[%s3600_s1 + $0x634] ss:$8 sps:$4 sm:$0xff]  }
  0x3b   :  { %1680 = vmatpush1.bf16.msra.mxu1 %v2414_v24  ;;  %v2453_v24 = vld [vmem:[%s3600_s1 + $0x530] ss:$8 sps:$4 sm:$0xff]  }
  0x3c   :  { %1852 = vmatpush1.bf16.msra.mxu0 %v2415_v32  ;;  %1681 = vmatprep.subr.bf16.mxu1 %v2416_v33  ;;  %v2465_v32 = vld [vmem:[%s3600_s1 + $0x550] ss:$8 sps:$4 sm:$0xff]   ;;  %v2470_v33 = vld [vmem:[%s3600_s1 + $0x164] ss:$8 sps:$4 sm:$0xff]  }
  0x3d   :  { %1853 = vmatprep.subr.bf16.mxu0 %v2418_v34  ;;  %v2473_v34 = vld [vmem:[%s3600_s1 + $0x564] ss:$8 sps:$4 sm:$0xff]  }
  0x3f   :  { %1682 = vmatpush1.bf16.msra.mxu1 %v2420_v37  ;;  %v2468_v37 = vld [vmem:[%s3600_s1 + $0x160] ss:$8 sps:$4 sm:$0xff]  }
  0x40   :  { %1854 = vmatpush1.bf16.msra.mxu0 %v2421_v39  ;;  %1694 = vmatprep.subr.bf16.mxu1 %v2429_v44  ;;  %v2471_v39 = vld [vmem:[%s3600_s1 + $0x560] ss:$8 sps:$4 sm:$0xff]   ;;  %v2482_v44 = vld [vmem:[%s3600_s1 + $0x184] ss:$8 sps:$4 sm:$0xff]  }
  0x41   :  { %1866 = vmatprep.subr.bf16.mxu0 %v2434_v45  ;;  %v2485_v45 = vld [vmem:[%s3600_s1 + $0x584] ss:$8 sps:$4 sm:$0xff]  }
  0x42   :  { %1684 = vmatmul.mubr.bf16.vlgmr.msra.gmra.mrb[0].mxu1 %v2034_v56  ;;  %v2491_v56 = vld [vmem:[%s3600_s1 + $0x594] ss:$8 sps:$4 sm:$0xff]  }
  0x43   :  { %1856 = vmatmul.mubr.bf16.vlgmr.msra.gmra.mrb[0].mxu0 %v2042_v58  ;;  %1695 = vmatpush1.bf16.msra.mxu1 %v2427_v55  ;;  %v2488_v55 = vld [vmem:[%s3600_s1 + $0x194] ss:$8 sps:$4 sm:$0xff]   ;;  %v3145_v58 = vcombine.low %v143_v48, %v148_v50  ;;  %v2559_v48 = vld [vmem:[%s3600_s1 + $0x644] ss:$8 sps:$4 sm:$0xff]   ;;  %v2554_v50 = vld [vmem:[%s3600_s1 + $0x240] ss:$8 sps:$4 sm:$0xff]  }
  0x44   :  { %1867 = vmatpush1.bf16.msra.mxu0 %v2432_v62  ;;  %1696 = vmatprep.subr.bf16.mxu1 %v2440_v46  ;;  %v2492_v62 = vld [vmem:[%s3600_s1 + $0x1a0] ss:$8 sps:$4 sm:$0xff]   ;;  %v2503_v46 = vld [vmem:[%s3600_s1 + $0x5b4] ss:$8 sps:$4 sm:$0xff]  }
  0x45   :  { %1868 = vmatprep.subr.bf16.mxu0 %v2443_v49  ;;  %1726 = vmatprep.mubr.bf16.mxu1 %v2037_v8  ;;  %v2498_v49 = vld [vmem:[%s3600_s1 + $0x1b0] ss:$8 sps:$4 sm:$0xff]   ;;  %v2506_v8 = vld [vmem:[%s3600_s1 + $0x1c4] ss:$8 sps:$4 sm:$0xff]  }
  0x46   :  { %1898 = vmatprep.mubr.bf16.mxu0 %v2045_v9  ;;  %v2509_v9 = vld [vmem:[%s3600_s1 + $0x5c4] ss:$8 sps:$4 sm:$0xff]  }
  0x47   :  { %1697 = vmatpush1.bf16.msra.mxu1 %v2438_v13  ;;  %v2507_v13 = vld [vmem:[%s3600_s1 + $0x5c0] ss:$8 sps:$4 sm:$0xff]  }
  0x48   :  { %1869 = vmatpush1.bf16.msra.mxu0 %v2441_v15  ;;  %1698 = vmatprep.subr.bf16.mxu1 %v2446_v17  ;;  %v2512_v15 = vld [vmem:[%s3600_s1 + $0x1d4] ss:$8 sps:$4 sm:$0xff]  }
  0x49   :  { %1870 = vmatprep.subr.bf16.mxu0 %v2449_v18  ;;  %v2515_v17 = vld [vmem:[%s3600_s1 + $0x5d4] ss:$8 sps:$4 sm:$0xff]   ;;  %v2510_v18 = vld [vmem:[%s3600_s1 + $0x1d0] ss:$8 sps:$4 sm:$0xff]  }
  0x4b   :  { %1699 = vmatpush1.bf16.msra.mxu1 %v2444_v19  ;;  %v2513_v19 = vld [vmem:[%s3600_s1 + $0x5d0] ss:$8 sps:$4 sm:$0xff]  }
  0x4c   :  { %1871 = vmatpush1.bf16.msra.mxu0 %v2447_v20  ;;  %1700 = vmatprep.subr.bf16.mxu1 %v2452_v21  ;;  %v2518_v20 = vld [vmem:[%s3600_s1 + $0x1e4] ss:$8 sps:$4 sm:$0xff]  }
  0x4d   :  { %1872 = vmatprep.subr.bf16.mxu0 %v2455_v22  ;;  %v2521_v21 = vld [vmem:[%s3600_s1 + $0x5e4] ss:$8 sps:$4 sm:$0xff]   ;;  %v2516_v22 = vld [vmem:[%s3600_s1 + $0x1e0] ss:$8 sps:$4 sm:$0xff]  }
  0x4f   :  { %1701 = vmatpush1.bf16.msra.mxu1 %v2450_v23  ;;  %v2519_v23 = vld [vmem:[%s3600_s1 + $0x5e0] ss:$8 sps:$4 sm:$0xff]  }
  0x50   :  { %1873 = vmatpush1.bf16.msra.mxu0 %v2453_v24  ;;  %1702 = vmatprep.subr.bf16.mxu1 %v2458_v25  ;;  %v2524_v24 = vld [vmem:[%s3600_s1 + $0x1f4] ss:$8 sps:$4 sm:$0xff]  }
  0x51   :  { %1874 = vmatprep.subr.bf16.mxu0 %v2461_v26  ;;  %v2527_v25 = vld [vmem:[%s3600_s1 + $0x5f4] ss:$8 sps:$4 sm:$0xff]   ;;  %v86_v26 = vshll.u32 %v3009_v52, 16 }
  0x53   :  { %1703 = vmatpush1.bf16.msra.mxu1 %v2456_v27  ;;  %v2522_v27 = vld [vmem:[%s3600_s1 + $0x1f0] ss:$8 sps:$4 sm:$0xff]  }
  0x54   :  { %1875 = vmatpush1.bf16.msra.mxu0 %v2459_v28  ;;  %1704 = vmatprep.subr.bf16.mxu1 %v2464_v29  ;;  %v121_v28 = vshll.u32 %v3012_v54, 16  ;;  %v2525_v29 = vld [vmem:[%s3600_s1 + $0x5f0] ss:$8 sps:$4 sm:$0xff]  }
  0x55   :  { %1876 = vmatprep.subr.bf16.mxu0 %v2467_v30  ;;  %v84_v30 = vshrl.u32 %v3009_v52, 16  ;;  %v2529_v52 = vld [vmem:[%s3600_s1 + $0x200] ss:$8 sps:$4 sm:$0xff]  }
  0x57   :  { %1705 = vmatpush1.bf16.msra.mxu1 %v2462_v31  ;;  %v88_v31 = vrot.slane %v86_v26, 1  ;;  %v2596_v26 = vld [vmem:[%s3600_s1 + $0x2b0] ss:$8 sps:$4 sm:$0xff]  }
  0x58   :  { %1877 = vmatpush1.bf16.msra.mxu0 %v2465_v32  ;;  %1706 = vmatprep.subr.bf16.mxu1 %v2470_v33  ;;  %v2531_v32 = vld [vmem:[%s3600_s1 + $0x204] ss:$8 sps:$4 sm:$0xff]  }
  0x59   :  { %1878 = vmatprep.subr.bf16.mxu0 %v2473_v34  ;;  %v2534_v33 = vld [vmem:[%s3600_s1 + $0x604] ss:$8 sps:$4 sm:$0xff]   ;;  %v119_v34 = vshrl.u32 %v3012_v54, 16  ;;  %v2538_v54 = vld [vmem:[%s3600_s1 + $0x214] ss:$8 sps:$4 sm:$0xff]  }
  0x5b   :  { %1707 = vmatpush1.bf16.msra.mxu1 %v2468_v37  ;;  %v3235_v37 = vor.u32 %v88_v31, %v84_v30  ;;  %v2602_v30 = vld [vmem:[%s3600_s1 + $0x2c0] ss:$8 sps:$4 sm:$0xff]  }
  0x5c   :  { %1879 = vmatpush1.bf16.msra.mxu0 %v2471_v39  ;;  %1708 = vmatprep.subr.bf16.mxu1 %v2476_v40  ;;  %v123_v39 = vrot.slane %v121_v28, 1  ;;  %v2532_v40 = vld [vmem:[%s3600_s1 + $0x600] ss:$8 sps:$4 sm:$0xff]   ;;  %v2604_v28 = vld [vmem:[%s3600_s1 + $0x2c4] ss:$8 sps:$4 sm:$0xff]  }
  0x5d   :  { %1880 = vmatprep.subr.bf16.mxu0 %v2479_v41  ;;  %v2605_v31 = vld [vmem:[%s3600_s1 + $0x6c0] ss:$8 sps:$4 sm:$0xff]  }
  0x5e   :  { %v3243_v41 = vor.u32 %v123_v39, %v119_v34  ;;  %v2608_v34 = vld [vmem:[%s3600_s1 + $0x2d0] ss:$8 sps:$4 sm:$0xff]  }
  0x5f   :  { %1709 = vmatpush1.bf16.msra.mxu1 %v2474_v42  ;;  %v2541_v42 = vld [vmem:[%s3600_s1 + $0x614] ss:$8 sps:$4 sm:$0xff]   ;;  %v2611_v39 = vld [vmem:[%s3600_s1 + $0x6d0] ss:$8 sps:$4 sm:$0xff]  }
  0x60   :  { %1881 = vmatpush1.bf16.msra.mxu0 %v2477_v43  ;;  %1710 = vmatprep.subr.bf16.mxu1 %v2482_v44  ;;  %v2041_v43 = vcombine.low %v3235_v37, %v3243_v41  ;;  %v2536_v44 = vld [vmem:[%s3600_s1 + $0x210] ss:$8 sps:$4 sm:$0xff]   ;;  %v2652_v37 = vld [vmem:[%s3600_s1 + $0x734] ss:$8 sps:$4 sm:$0xff]  }
  0x61   :  { %1882 = vmatprep.subr.bf16.mxu0 %v2485_v45  ;;  %v2539_v45 = vld [vmem:[%s3600_s1 + $0x610] ss:$8 sps:$4 sm:$0xff]  }
  0x62   :  { %v2647_v41 = vld [vmem:[%s3600_s1 + $0x330] ss:$8 sps:$4 sm:$0xff]  }
  0x63   :  { %1711 = vmatpush1.bf16.msra.mxu1 %v2480_v47  ;;  %v2544_v47 = vld [vmem:[%s3600_s1 + $0x224] ss:$8 sps:$4 sm:$0xff]  }
  0x64   :  { %1883 = vmatpush1.bf16.msra.mxu0 %v2483_v51  ;;  %1712 = vmatprep.subr.bf16.mxu1 %v2488_v55  ;;  %v2557_v51 = vld [vmem:[%s3600_s1 + $0x640] ss:$8 sps:$4 sm:$0xff]   ;;  %v2562_v55 = vld [vmem:[%s3600_s1 + $0x254] ss:$8 sps:$4 sm:$0xff]  }
  0x65   :  { %1884 = vmatprep.subr.bf16.mxu0 %v2491_v56  ;;  %v2565_v56 = vld [vmem:[%s3600_s1 + $0x654] ss:$8 sps:$4 sm:$0xff]  }
  0x67   :  { %1713 = vmatpush1.bf16.msra.mxu1 %v2486_v59  ;;  %v2560_v59 = vld [vmem:[%s3600_s1 + $0x250] ss:$8 sps:$4 sm:$0xff]  }
  0x68   :  { %1885 = vmatpush1.bf16.msra.mxu0 %v2489_v0  ;;  %1714 = vmatprep.subr.bf16.mxu1 %v2494_v60  ;;  %v2563_v0 = vld [vmem:[%s3600_s1 + $0x650] ss:$8 sps:$4 sm:$0xff]   ;;  %v2568_v60 = vld [vmem:[%s3600_s1 + $0x264] ss:$8 sps:$4 sm:$0xff]  }
  0x69   :  { %1886 = vmatprep.subr.bf16.mxu0 %v2497_v61  ;;  %v2571_v61 = vld [vmem:[%s3600_s1 + $0x664] ss:$8 sps:$4 sm:$0xff]  }
  0x6b   :  { %1715 = vmatpush1.bf16.msra.mxu1 %v2492_v62  ;;  %v2566_v62 = vld [vmem:[%s3600_s1 + $0x260] ss:$8 sps:$4 sm:$0xff]  }
  0x6c   :  { %1887 = vmatpush1.bf16.msra.mxu0 %v2495_v1  ;;  %1716 = vmatprep.subr.bf16.mxu1 %v2500_v2  ;;  %v2569_v1 = vld [vmem:[%s3600_s1 + $0x660] ss:$8 sps:$4 sm:$0xff]   ;;  %v2574_v2 = vld [vmem:[%s3600_s1 + $0x274] ss:$8 sps:$4 sm:$0xff]  }
  0x6d   :  { %1888 = vmatprep.subr.bf16.mxu0 %v2503_v46  ;;  %v2577_v46 = vld [vmem:[%s3600_s1 + $0x674] ss:$8 sps:$4 sm:$0xff]  }
  0x6f   :  { %1717 = vmatpush1.bf16.msra.mxu1 %v2498_v49  ;;  %v2572_v49 = vld [vmem:[%s3600_s1 + $0x270] ss:$8 sps:$4 sm:$0xff]  }
  0x70   :  { %1889 = vmatpush1.bf16.msra.mxu0 %v2501_v7  ;;  %1718 = vmatprep.subr.bf16.mxu1 %v2506_v8  ;;  %v2575_v7 = vld [vmem:[%s3600_s1 + $0x670] ss:$8 sps:$4 sm:$0xff]   ;;  %v2580_v8 = vld [vmem:[%s3600_s1 + $0x284] ss:$8 sps:$4 sm:$0xff]  }
  0x71   :  { %1890 = vmatprep.subr.bf16.mxu0 %v2509_v9  ;;  %v2583_v9 = vld [vmem:[%s3600_s1 + $0x684] ss:$8 sps:$4 sm:$0xff]  }
  0x73   :  { %1719 = vmatpush1.bf16.msra.mxu1 %v2504_v11  ;;  %v2578_v11 = vld [vmem:[%s3600_s1 + $0x280] ss:$8 sps:$4 sm:$0xff]  }
  0x74   :  { %1891 = vmatpush1.bf16.msra.mxu0 %v2507_v13  ;;  %1720 = vmatprep.subr.bf16.mxu1 %v2512_v15  ;;  %v2581_v13 = vld [vmem:[%s3600_s1 + $0x680] ss:$8 sps:$4 sm:$0xff]   ;;  %v2586_v15 = vld [vmem:[%s3600_s1 + $0x294] ss:$8 sps:$4 sm:$0xff]  }
  0x75   :  { %1892 = vmatprep.subr.bf16.mxu0 %v2515_v17  ;;  %v2589_v17 = vld [vmem:[%s3600_s1 + $0x694] ss:$8 sps:$4 sm:$0xff]  }
  0x77   :  { %1721 = vmatpush1.bf16.msra.mxu1 %v2510_v18  ;;  %v2584_v18 = vld [vmem:[%s3600_s1 + $0x290] ss:$8 sps:$4 sm:$0xff]  }
  0x78   :  { %1893 = vmatpush1.bf16.msra.mxu0 %v2513_v19  ;;  %1722 = vmatprep.subr.bf16.mxu1 %v2518_v20  ;;  %v2587_v19 = vld [vmem:[%s3600_s1 + $0x690] ss:$8 sps:$4 sm:$0xff]   ;;  %v2592_v20 = vld [vmem:[%s3600_s1 + $0x2a4] ss:$8 sps:$4 sm:$0xff]  }
  0x79   :  { %1894 = vmatprep.subr.bf16.mxu0 %v2521_v21  ;;  %v2595_v21 = vld [vmem:[%s3600_s1 + $0x6a4] ss:$8 sps:$4 sm:$0xff]  }
  0x7b   :  { %1723 = vmatpush1.bf16.msra.mxu1 %v2516_v22  ;;  %v2590_v22 = vld [vmem:[%s3600_s1 + $0x2a0] ss:$8 sps:$4 sm:$0xff]  }
  0x7c   :  { %1895 = vmatpush1.bf16.msra.mxu0 %v2519_v23  ;;  %1724 = vmatprep.subr.bf16.mxu1 %v2524_v24  ;;  %v2593_v23 = vld [vmem:[%s3600_s1 + $0x6a0] ss:$8 sps:$4 sm:$0xff]   ;;  %v2598_v24 = vld [vmem:[%s3600_s1 + $0x2b4] ss:$8 sps:$4 sm:$0xff]  }
  0x7d   :  { %1896 = vmatprep.subr.bf16.mxu0 %v2527_v25  ;;  %v2601_v25 = vld [vmem:[%s3600_s1 + $0x6b4] ss:$8 sps:$4 sm:$0xff]  }
  0x7f   :  { %1725 = vmatpush1.bf16.msra.mxu1 %v2522_v27  ;;  %v2599_v27 = vld [vmem:[%s3600_s1 + $0x6b0] ss:$8 sps:$4 sm:$0xff]  }
  0x80   :  { %1897 = vmatpush1.bf16.msra.mxu0 %v2525_v29  ;;  %1737 = vmatprep.subr.bf16.mxu1 %v2531_v32  ;;  %v2607_v29 = vld [vmem:[%s3600_s1 + $0x6c4] ss:$8 sps:$4 sm:$0xff]   ;;  %v2610_v32 = vld [vmem:[%s3600_s1 + $0x2d4] ss:$8 sps:$4 sm:$0xff]  }
  0x81   :  { %1909 = vmatprep.subr.bf16.mxu0 %v2534_v33  ;;  %v2613_v33 = vld [vmem:[%s3600_s1 + $0x6d4] ss:$8 sps:$4 sm:$0xff]  }
  0x82   :  { %1727 = vmatmul.mubr.bf16.vlgmr.msra.gmra.mrb[0].mxu1 %v2036_v12  ;;  %v2545_v12 = vld [vmem:[%s3600_s1 + $0x620] ss:$8 sps:$4 sm:$0xff]  }
  0x83   :  { %1899 = vmatmul.mubr.bf16.vlgmr.msra.gmra.mrb[0].mxu0 %v2988_v36  ;;  %1738 = vmatpush1.bf16.msra.mxu1 %v2529_v52  ;;  %v2550_v36 = vld [vmem:[%s3600_s1 + $0x234] ss:$8 sps:$4 sm:$0xff]   ;;  %v2616_v52 = vld [vmem:[%s3600_s1 + $0x2e4] ss:$8 sps:$4 sm:$0xff]  }
  0x84   :  { %1910 = vmatpush1.bf16.msra.mxu0 %v2532_v40  ;;  %1739 = vmatprep.subr.bf16.mxu1 %v2538_v54  ;;  %v2619_v40 = vld [vmem:[%s3600_s1 + $0x6e4] ss:$8 sps:$4 sm:$0xff]   ;;  %v2614_v54 = vld [vmem:[%s3600_s1 + $0x2e0] ss:$8 sps:$4 sm:$0xff]  }
  0x85   :  { %1911 = vmatprep.subr.bf16.mxu0 %v2541_v42  ;;  %1769 = vmatprep.mubr.bf16.mxu1 %v2039_v14  ;;  %v2556_v14 = vld [vmem:[%s3600_s1 + $0x244] ss:$8 sps:$4 sm:$0xff]   ;;  %v2617_v42 = vld [vmem:[%s3600_s1 + $0x6e0] ss:$8 sps:$4 sm:$0xff]  }
  0x86   :  { %1941 = vmatprep.mubr.bf16.mxu0 %v3040_v10  ;;  %v2551_v10 = vld [vmem:[%s3600_s1 + $0x630] ss:$8 sps:$4 sm:$0xff]  }
  0x87   :  { %1740 = vmatpush1.bf16.msra.mxu1 %v2536_v44  ;;  %v2622_v44 = vld [vmem:[%s3600_s1 + $0x2f4] ss:$8 sps:$4 sm:$0xff]  }
  0x88   :  { %1912 = vmatpush1.bf16.msra.mxu0 %v2539_v45  ;;  %1741 = vmatprep.subr.bf16.mxu1 %v2544_v47  ;;  %v2625_v45 = vld [vmem:[%s3600_s1 + $0x6f4] ss:$8 sps:$4 sm:$0xff]   ;;  %v2620_v47 = vld [vmem:[%s3600_s1 + $0x2f0] ss:$8 sps:$4 sm:$0xff]  }
  0x89   :  { %1913 = vmatprep.subr.bf16.mxu0 %v2547_v3  ;;  %v2623_v3 = vld [vmem:[%s3600_s1 + $0x6f0] ss:$8 sps:$4 sm:$0xff]  }
  0x8b   :  { %1742 = vmatpush1.bf16.msra.mxu1 %v2542_v5  ;;  %v2628_v5 = vld [vmem:[%s3600_s1 + $0x304] ss:$8 sps:$4 sm:$0xff]  }
  0x8c   :  { %1914 = vmatpush1.bf16.msra.mxu0 %v2545_v12  ;;  %1743 = vmatprep.subr.bf16.mxu1 %v2550_v36  ;;  %v2631_v12 = vld [vmem:[%s3600_s1 + $0x704] ss:$8 sps:$4 sm:$0xff]   ;;  %v2626_v36 = vld [vmem:[%s3600_s1 + $0x300] ss:$8 sps:$4 sm:$0xff]  }
  0x8d   :  { %1915 = vmatprep.subr.bf16.mxu0 %v2553_v63  ;;  %v2629_v63 = vld [vmem:[%s3600_s1 + $0x700] ss:$8 sps:$4 sm:$0xff]  }
  0x8f   :  { %1744 = vmatpush1.bf16.msra.mxu1 %v2548_v4  ;;  %v2637_v4 = vld [vmem:[%s3600_s1 + $0x314] ss:$8 sps:$4 sm:$0xff]  }
  0x90   :  { %1916 = vmatpush1.bf16.msra.mxu0 %v2551_v10  ;;  %1745 = vmatprep.subr.bf16.mxu1 %v2556_v14  ;;  %v2640_v10 = vld [vmem:[%s3600_s1 + $0x714] ss:$8 sps:$4 sm:$0xff]   ;;  %v2635_v14 = vld [vmem:[%s3600_s1 + $0x310] ss:$8 sps:$4 sm:$0xff]  }
  0x91   :  { %1917 = vmatprep.subr.bf16.mxu0 %v2559_v48  ;;  %v2638_v48 = vld [vmem:[%s3600_s1 + $0x710] ss:$8 sps:$4 sm:$0xff]  }
  0x93   :  { %1746 = vmatpush1.bf16.msra.mxu1 %v2554_v50  ;;  %v2643_v50 = vld [vmem:[%s3600_s1 + $0x324] ss:$8 sps:$4 sm:$0xff]  }
  0x94   :  { %1918 = vmatpush1.bf16.msra.mxu0 %v2557_v51  ;;  %1747 = vmatprep.subr.bf16.mxu1 %v2562_v55  ;;  %v2649_v51 = vld [vmem:[%s3600_s1 + $0x334] ss:$8 sps:$4 sm:$0xff]   ;;  %v2655_v55 = vld [vmem:[%s3600_s1 + $0x344] ss:$8 sps:$4 sm:$0xff]  }
  0x95   :  { %1919 = vmatprep.subr.bf16.mxu0 %v2565_v56  ;;  %v2658_v56 = vld [vmem:[%s3600_s1 + $0x744] ss:$8 sps:$4 sm:$0xff]  }
  0x97   :  { %1748 = vmatpush1.bf16.msra.mxu1 %v2560_v59  ;;  %v2653_v59 = vld [vmem:[%s3600_s1 + $0x340] ss:$8 sps:$4 sm:$0xff]  }
  0x98   :  { %1920 = vmatpush1.bf16.msra.mxu0 %v2563_v0  ;;  %1749 = vmatprep.subr.bf16.mxu1 %v2568_v60  ;;  %v2656_v0 = vld [vmem:[%s3600_s1 + $0x740] ss:$8 sps:$4 sm:$0xff]   ;;  %v2661_v60 = vld [vmem:[%s3600_s1 + $0x354] ss:$8 sps:$4 sm:$0xff]  }
  0x99   :  { %1921 = vmatprep.subr.bf16.mxu0 %v2571_v61  ;;  %v2664_v61 = vld [vmem:[%s3600_s1 + $0x754] ss:$8 sps:$4 sm:$0xff]  }
  0x9b   :  { %1750 = vmatpush1.bf16.msra.mxu1 %v2566_v62  ;;  %v2659_v62 = vld [vmem:[%s3600_s1 + $0x350] ss:$8 sps:$4 sm:$0xff]  }
  0x9c   :  { %1922 = vmatpush1.bf16.msra.mxu0 %v2569_v1  ;;  %1751 = vmatprep.subr.bf16.mxu1 %v2574_v2  ;;  %v2662_v1 = vld [vmem:[%s3600_s1 + $0x750] ss:$8 sps:$4 sm:$0xff]   ;;  %v2667_v2 = vld [vmem:[%s3600_s1 + $0x364] ss:$8 sps:$4 sm:$0xff]  }
  0x9d   :  { %1923 = vmatprep.subr.bf16.mxu0 %v2577_v46  ;;  %v2670_v46 = vld [vmem:[%s3600_s1 + $0x764] ss:$8 sps:$4 sm:$0xff]  }
  0x9f   :  { %1752 = vmatpush1.bf16.msra.mxu1 %v2572_v49  ;;  %v2665_v49 = vld [vmem:[%s3600_s1 + $0x360] ss:$8 sps:$4 sm:$0xff]  }
  0xa0   :  { %1924 = vmatpush1.bf16.msra.mxu0 %v2575_v7  ;;  %1753 = vmatprep.subr.bf16.mxu1 %v2580_v8  ;;  %v2668_v7 = vld [vmem:[%s3600_s1 + $0x760] ss:$8 sps:$4 sm:$0xff]   ;;  %v2673_v8 = vld [vmem:[%s3600_s1 + $0x374] ss:$8 sps:$4 sm:$0xff]  }
  0xa1   :  { %1925 = vmatprep.subr.bf16.mxu0 %v2583_v9  ;;  %v2676_v9 = vld [vmem:[%s3600_s1 + $0x774] ss:$8 sps:$4 sm:$0xff]  }
  0xa3   :  { %1754 = vmatpush1.bf16.msra.mxu1 %v2578_v11  ;;  %v2671_v11 = vld [vmem:[%s3600_s1 + $0x370] ss:$8 sps:$4 sm:$0xff]  }
  0xa4   :  { %1926 = vmatpush1.bf16.msra.mxu0 %v2581_v13  ;;  %1755 = vmatprep.subr.bf16.mxu1 %v2586_v15  ;;  %v2674_v13 = vld [vmem:[%s3600_s1 + $0x770] ss:$8 sps:$4 sm:$0xff]   ;;  %v2679_v15 = vld [vmem:[%s3600_s1 + $0x384] ss:$8 sps:$4 sm:$0xff]  }
  0xa5   :  { %1927 = vmatprep.subr.bf16.mxu0 %v2589_v17  ;;  %v2677_v17 = vld [vmem:[%s3600_s1 + $0x380] ss:$8 sps:$4 sm:$0xff]  }
  0xa7   :  { %1756 = vmatpush1.bf16.msra.mxu1 %v2584_v18  ;;  %v2682_v18 = vld [vmem:[%s3600_s1 + $0x394] ss:$8 sps:$4 sm:$0xff]  }
  0xa8   :  { %1928 = vmatpush1.bf16.msra.mxu0 %v2587_v19  ;;  %1757 = vmatprep.subr.bf16.mxu1 %v2592_v20  ;;  %v2680_v19 = vld [vmem:[%s3600_s1 + $0x390] ss:$8 sps:$4 sm:$0xff]   ;;  %v2685_v20 = vld [vmem:[%s3600_s1 + $0x3a4] ss:$8 sps:$4 sm:$0xff]  }
  0xa9   :  { %1929 = vmatprep.subr.bf16.mxu0 %v2595_v21  ;;  %v2683_v21 = vld [vmem:[%s3600_s1 + $0x3a0] ss:$8 sps:$4 sm:$0xff]  }
  0xab   :  { %1758 = vmatpush1.bf16.msra.mxu1 %v2590_v22  ;;  %v2686_v22 = vld [vmem:[%s3600_s1 + $0x3b0] ss:$8 sps:$4 sm:$0xff]  }
  0xac   :  { %1930 = vmatpush1.bf16.msra.mxu0 %v2593_v23  ;;  %1759 = vmatprep.subr.bf16.mxu1 %v2598_v24  ;;  %v2691_v23 = vld [vmem:[%s3600_s1 + $0x3c4] ss:$8 sps:$4 sm:$0xff]   ;;  %v2689_v24 = vld [vmem:[%s3600_s1 + $0x3c0] ss:$8 sps:$4 sm:$0xff]  }
  0xad   :  { %1931 = vmatprep.subr.bf16.mxu0 %v2601_v25  ;;  %v2694_v25 = vld [vmem:[%s3600_s1 + $0x3d4] ss:$8 sps:$4 sm:$0xff]  }
  0xaf   :  { %1760 = vmatpush1.bf16.msra.mxu1 %v2596_v26  ;;  %v79_v26 = vshll.u32 %v2986_v35, 16 }
  0xb0   :  { %1932 = vmatpush1.bf16.msra.mxu0 %v2599_v27  ;;  %1761 = vmatprep.subr.bf16.mxu1 %v2604_v28  ;;  %v114_v27 = vshll.u32 %v2994_v38, 16  ;;  %v2692_v28 = vld [vmem:[%s3600_s1 + $0x3d0] ss:$8 sps:$4 sm:$0xff]  }
  0xb1   :  { %1933 = vmatprep.subr.bf16.mxu0 %v2607_v29  ;;  %v2697_v29 = vld [vmem:[%s3600_s1 + $0x3e4] ss:$8 sps:$4 sm:$0xff]  }
  0xb3   :  { %1762 = vmatpush1.bf16.msra.mxu1 %v2602_v30  ;;  %v77_v30 = vshrl.u32 %v2986_v35, 16  ;;  %v2698_v35 = vld [vmem:[%s3600_s1 + $0x3f0] ss:$8 sps:$4 sm:$0xff]  }
  0xb4   :  { %1934 = vmatpush1.bf16.msra.mxu0 %v2605_v31  ;;  %1763 = vmatprep.subr.bf16.mxu1 %v2610_v32  ;;  %v81_v31 = vrot.slane %v79_v26, 1  ;;  %v112_v32 = vshrl.u32 %v2994_v38, 16 }
  0xb5   :  { %1935 = vmatprep.subr.bf16.mxu0 %v2613_v33  ;;  %v116_v33 = vrot.slane %v114_v27, 1 }
  0xb7   :  { %1764 = vmatpush1.bf16.msra.mxu1 %v2608_v34  ;;  %v2695_v34 = vld [vmem:[%s3600_s1 + $0x3e0] ss:$8 sps:$4 sm:$0xff]  }
  0xb8   :  { %1936 = vmatpush1.bf16.msra.mxu0 %v2611_v39  ;;  %1765 = vmatprep.subr.bf16.mxu1 %v2616_v52  ;;  %v2700_v39 = vld [vmem:[%s3600_s1 + $0x3f4] ss:$8 sps:$4 sm:$0xff]   ;;  %v82_v52 = vor.u32 %v81_v31, %v77_v30 }
  0xb9   :  { %1937 = vmatprep.subr.bf16.mxu0 %v2619_v40  ;;  %v117_v40 = vor.u32 %v116_v33, %v112_v32 }
  0xbb   :  { %1766 = vmatpush1.bf16.msra.mxu1 %v2614_v54  ;;  %v2040_v38 = vcombine.low %v82_v52, %v117_v40 }
  0xbc   :  { %1938 = vmatpush1.bf16.msra.mxu0 %v2617_v42  ;;  %1767 = vmatprep.subr.bf16.mxu1 %v2622_v44 }
  0xbd   :  { %1939 = vmatprep.subr.bf16.mxu0 %v2625_v45 }
  0xbf   :  { %1768 = vmatpush1.bf16.msra.mxu1 %v2620_v47  ;;  %v411_v47 = vlaneseq }
  0xc0   :  { %1940 = vmatpush1.bf16.msra.mxu0 %v2623_v3  ;;  %1780 = vmatprep.subr.bf16.mxu1 %v2628_v5 }
  0xc1   :  { %1952 = vmatprep.subr.bf16.mxu0 %v2631_v12  ;;  %v412_v3 = vshrl.u32 %v411_v47, 7  ;;  %v409_v12 = vld [vmem:[%s3602_s2] sm:$0x3] }
  0xc2   :  { %1770 = vmatmul.mubr.bf16.vlgmr.msra.gmra.mrb[0].mxu1 %v2038_v6  ;;  %v2641_v6 = vld [vmem:[%s3600_s1 + $0x320] ss:$8 sps:$4 sm:$0xff]  }
  0xc3   :  { %1942 = vmatmul.mubr.bf16.vlgmr.msra.gmra.mrb[0].mxu0 %v3051_v16  ;;  %1781 = vmatpush1.bf16.msra.mxu1 %v2626_v36  ;;  %v2644_v16 = vld [vmem:[%s3600_s1 + $0x720] ss:$8 sps:$4 sm:$0xff]   ;;  %v413_v5 = vsub.s32 0, %v412_v3  ;;  %v417_v36 = vsub.s32 1, %v412_v3 }
  0xc4   :  { %1953 = vmatpush1.bf16.msra.mxu0 %v2629_v63  ;;  %1782 = vmatprep.subr.bf16.mxu1 %v2637_v4 }
  0xc5   :  { %1954 = vmatprep.subr.bf16.mxu0 %v2640_v10  ;;  %1984 = vmatprep.mubr.bf16.mxu0 %v2701_v57  ;;  %v414_v63 = vrot.slane %v409_v12, %v413_v5  ;;  %v418_v4 = vrot.slane %v409_v12, %v417_v36 }
  0xc6   :  { %1812 = vmatprep.mubr.bf16.mxu1 %v2041_v43  ;;  %v2650_v43 = vld [vmem:[%s3600_s1 + $0x730] ss:$8 sps:$4 sm:$0xff]  }
  0xc7   :  { %1783 = vmatpush1.bf16.msra.mxu1 %v2635_v14 }
  0xc8   :  { %1955 = vmatpush1.bf16.msra.mxu0 %v2638_v48  ;;  %1784 = vmatprep.subr.bf16.mxu1 %v2643_v50 }
  0xc9   :  { %1956 = vmatprep.subr.bf16.mxu0 %v2646_v53 }
  0xcb   :  { %1785 = vmatpush1.bf16.msra.mxu1 %v2641_v6 }
  0xcc   :  { %1957 = vmatpush1.bf16.msra.mxu0 %v2644_v16  ;;  %1786 = vmatprep.subr.bf16.mxu1 %v2649_v51 }
  0xcd   :  { %1958 = vmatprep.subr.bf16.mxu0 %v2652_v37 }
  0xcf   :  { %1787 = vmatpush1.bf16.msra.mxu1 %v2647_v41 }
  0xd0   :  { %1959 = vmatpush1.bf16.msra.mxu0 %v2650_v43  ;;  %1788 = vmatprep.subr.bf16.mxu1 %v2655_v55 }
  0xd1   :  { %1960 = vmatprep.subr.bf16.mxu0 %v2658_v56 }
  0xd3   :  { %1789 = vmatpush1.bf16.msra.mxu1 %v2653_v59 }
  0xd4   :  { %1961 = vmatpush1.bf16.msra.mxu0 %v2656_v0  ;;  %1790 = vmatprep.subr.bf16.mxu1 %v2661_v60 }
  0xd5   :  { %1962 = vmatprep.subr.bf16.mxu0 %v2664_v61 }
  0xd7   :  { %1791 = vmatpush1.bf16.msra.mxu1 %v2659_v62 }
  0xd8   :  { %1963 = vmatpush1.bf16.msra.mxu0 %v2662_v1  ;;  %1792 = vmatprep.subr.bf16.mxu1 %v2667_v2 }
  0xd9   :  { %1964 = vmatprep.subr.bf16.mxu0 %v2670_v46 }
  0xdb   :  { %1793 = vmatpush1.bf16.msra.mxu1 %v2665_v49 }
  0xdc   :  { %1965 = vmatpush1.bf16.msra.mxu0 %v2668_v7  ;;  %1794 = vmatprep.subr.bf16.mxu1 %v2673_v8 }
  0xdd   :  { %1966 = vmatprep.subr.bf16.mxu0 %v2676_v9 }
  0xdf   :  { %1795 = vmatpush1.bf16.msra.mxu1 %v2671_v11 }
  0xe0   :  { %1967 = vmatpush1.bf16.msra.mxu0 %v2674_v13  ;;  %1796 = vmatprep.subr.bf16.mxu1 %v2679_v15 }
  0xe3   :  { %1985 = vmatmul.mubr.bf16.vlgmr.msra.gmra.mrb[0].mxu0 %v3145_v58  ;;  %1797 = vmatpush1.bf16.msra.mxu1 %v2677_v17  ;;  %v2688_v58 = vld [vmem:[%s3600_s1 + $0x3b4] ss:$8 sps:$4 sm:$0xff]  }
  0xe4   :  { %1798 = vmatprep.subr.bf16.mxu1 %v2682_v18 }
  0xe7   :  { %1799 = vmatpush1.bf16.msra.mxu1 %v2680_v19 }
  0xe8   :  { %1800 = vmatprep.subr.bf16.mxu1 %v2685_v20 }
  0xeb   :  { %1801 = vmatpush1.bf16.msra.mxu1 %v2683_v21 }
  0xec   :  { %1802 = vmatprep.subr.bf16.mxu1 %v2688_v58 }
  0xef   :  { %1803 = vmatpush1.bf16.msra.mxu1 %v2686_v22 }
  0xf0   :  { %1804 = vmatprep.subr.bf16.mxu1 %v2691_v23 }
  0xf3   :  { %1805 = vmatpush1.bf16.msra.mxu1 %v2689_v24 }
  0xf4   :  { %1806 = vmatprep.subr.bf16.mxu1 %v2694_v25 }
  0xf7   :  { %1807 = vmatpush1.bf16.msra.mxu1 %v2692_v28 }
  0xf8   :  { %1808 = vmatprep.subr.bf16.mxu1 %v2697_v29 }
  0xfb   :  { %1809 = vmatpush1.bf16.msra.mxu1 %v2695_v34 }
  0xfc   :  { %1810 = vmatprep.subr.bf16.mxu1 %v2700_v39 }
  0xff   :  { %1811 = vmatpush1.bf16.msra.mxu1 %v2698_v35 }
 0x102   :  { %1813 = vmatmul.mubr.bf16.vlgmr.msra.gmra.mrb[0].mxu1 %v2040_v38 }
 0x1b6   :  { %v1986_v54 = vpop.f32.mrb[0].mxu0 }
 0x1b7   :  { %v1988_v42 = vpop.f32.mrb[1].mxu0 }
 0x1b8   :  { %v1990_v44 = vpop.f32.mrb[2].mxu0 }
 0x1b9   :  { %v1992_v45 = vpop.f32.mrb[3].mxu0 }
 0x1d5   :  { %v1814_v10 = vpop.f32.mrb[0].mxu1 }
 0x1d6   :  { %v2293_v14 = vadd.f32 %v1814_v10, %v414_v63  ;;  %v1816_v48 = vpop.f32.mrb[1].mxu1 }
 0x1d7   :  { %v2295_v50 = vadd.f32 %v1816_v48, %v418_v4  ;;  %v1818_v53 = vpop.f32.mrb[2].mxu1 }
 0x1d8   :  { %v2294_v57 = vadd.f32 %v2293_v14, %v1986_v54  ;;  %v2297_v6 = vadd.f32 %v1818_v53, %v414_v63  ;;  %v1820_v16 = vpop.f32.mrb[3].mxu1 }
 0x1d9   :  { %v2296_v51 = vadd.f32 %v2295_v50, %v1988_v42  ;;  %v2299_v37 = vadd.f32 %v1820_v16, %v418_v4 }
 0x1da   :  { %v1995_v41 = vmax.f32 %v2294_v57, 0.0  ;;  %v2298_v43 = vadd.f32 %v2297_v6, %v1990_v44 }
 0x1db   :  { %v1996_v55 = vmax.f32 %v2296_v51, 0.0  ;;  %v2300_v56 = vadd.f32 %v2299_v37, %v1992_v45 }
 0x1dc   :  { %v1997_v59 = vmax.f32 %v2298_v43, 0.0 }
 0x1dd   :  { %v2291_v0 = vpack.c.bf16 %v1996_v55, %v1995_v41  ;;  %v1998_v60 = vmax.f32 %v2300_v56, 0.0 }
 0x1df   :  { %2018 = vst.msk [vmem:[%s3603_s3] sm:$0xff] %vm2017_vm2, %v2291_v0  ;;  %v2292_v61 = vpack.c.bf16 %v1998_v60, %v1997_v59 }
 0x1e1   :  { %2019 = vst.msk [vmem:[%s3603_s3 + $0x8] sm:$0xff] %vm2017_vm2, %v2292_v61 }

// kernel: conv_vae_forward.12
= control target key start
LH: loop header
LB: loop body
LE: loop exit
PB: predicated region body
PF: predicated region fallthrough
CT: control target
= control target key end

     0   :  { %vm625_vm0 = vcmask 261120   ;;  %s1210_s1 = inlined_call_operand.vmem [shape: bf16[512,256], index: 1, kind: input, shape index: {}]   ;;  %s1211_s0 = inlined_call_operand.vmem [shape: bf16[8,512], index: 0, kind: input, shape index: {}]   ;;  %s1212_s3 = inlined_call_operand.vmem [shape: f32[256,32], index: 3, kind: input, shape index: {}]   ;;  %s1213_s2 = inlined_call_operand.vmem [shape: f32[1,256], index: 2, kind: input, shape index: {}]   ;;  %s1214_s4 = inlined_call_operand.vmem [shape: f32[1,32], index: 4, kind: input, shape index: {}]   ;;  %s1215_s5 = inlined_call_operand.vmem [shape: f32[8,32], index: 5, kind: output, shape index: {}]  }
   0x1   :  { %v771_v0 = vld [vmem:[%s1210_s1 + $0x4] ss:$8 sps:$4 sm:$0xff]   ;;  %v775_v2 = vld [vmem:[%s1210_s1] ss:$8 sps:$4 sm:$0xff]   ;;  %v777_v4 = vld [vmem:[%s1210_s1 + $0x14] ss:$8 sps:$4 sm:$0xff]  }
   0x2   :  { %v773_v1 = vld [vmem:[%s1210_s1 + $0x104] ss:$8 sps:$4 sm:$0xff]   ;;  %432 = vmatprep.subr.bf16.mxu1 %v771_v0  ;;  %v776_v3 = vld [vmem:[%s1210_s1 + $0x100] ss:$8 sps:$4 sm:$0xff]   ;;  %v779_v5 = vld [vmem:[%s1210_s1 + $0x114] ss:$8 sps:$4 sm:$0xff]  }
   0x3   :  { %473 = vmatprep.subr.bf16.mxu0 %v773_v1  ;;  %433 = vmatpush1.bf16.msra.mxu1 %v775_v2  ;;  %v781_v6 = vld [vmem:[%s1210_s1 + $0x10] ss:$8 sps:$4 sm:$0xff]   ;;  %v783_v8 = vld [vmem:[%s1210_s1 + $0x24] ss:$8 sps:$4 sm:$0xff]   ;;  %v787_v10 = vld [vmem:[%s1210_s1 + $0x20] ss:$8 sps:$4 sm:$0xff]  }
   0x4   :  { %474 = vmatpush1.bf16.msra.mxu0 %v776_v3  ;;  %434 = vmatprep.subr.bf16.mxu1 %v777_v4  ;;  %v782_v7 = vld [vmem:[%s1210_s1 + $0x110] ss:$8 sps:$4 sm:$0xff]   ;;  %v785_v9 = vld [vmem:[%s1210_s1 + $0x124] ss:$8 sps:$4 sm:$0xff]   ;;  %v788_v11 = vld [vmem:[%s1210_s1 + $0x120] ss:$8 sps:$4 sm:$0xff]  }
   0x5   :  { %475 = vmatprep.subr.bf16.mxu0 %v779_v5  ;;  %v789_v12 = vld [vmem:[%s1210_s1 + $0x34] ss:$8 sps:$4 sm:$0xff]   ;;  %v793_v14 = vld [vmem:[%s1210_s1 + $0x30] ss:$8 sps:$4 sm:$0xff]   ;;  %v795_v16 = vld [vmem:[%s1210_s1 + $0x44] ss:$8 sps:$4 sm:$0xff]  }
   0x6   :  { %v791_v13 = vld [vmem:[%s1210_s1 + $0x134] ss:$8 sps:$4 sm:$0xff]   ;;  %v794_v15 = vld [vmem:[%s1210_s1 + $0x130] ss:$8 sps:$4 sm:$0xff]   ;;  %v797_v17 = vld [vmem:[%s1210_s1 + $0x144] ss:$8 sps:$4 sm:$0xff]  }
   0x7   :  { %435 = vmatpush1.bf16.msra.mxu1 %v781_v6  ;;  %v799_v18 = vld [vmem:[%s1210_s1 + $0x40] ss:$8 sps:$4 sm:$0xff]   ;;  %v801_v20 = vld [vmem:[%s1210_s1 + $0x54] ss:$8 sps:$4 sm:$0xff]   ;;  %v805_v22 = vld [vmem:[%s1210_s1 + $0x50] ss:$8 sps:$4 sm:$0xff]  }
   0x8   :  { %476 = vmatpush1.bf16.msra.mxu0 %v782_v7  ;;  %436 = vmatprep.subr.bf16.mxu1 %v783_v8  ;;  %v800_v19 = vld [vmem:[%s1210_s1 + $0x140] ss:$8 sps:$4 sm:$0xff]   ;;  %v803_v21 = vld [vmem:[%s1210_s1 + $0x154] ss:$8 sps:$4 sm:$0xff]   ;;  %v806_v23 = vld [vmem:[%s1210_s1 + $0x150] ss:$8 sps:$4 sm:$0xff]  }
   0x9   :  { %477 = vmatprep.subr.bf16.mxu0 %v785_v9  ;;  %v807_v24 = vld [vmem:[%s1210_s1 + $0x64] ss:$8 sps:$4 sm:$0xff]   ;;  %v811_v26 = vld [vmem:[%s1210_s1 + $0x60] ss:$8 sps:$4 sm:$0xff]   ;;  %v813_v28 = vld [vmem:[%s1210_s1 + $0x74] ss:$8 sps:$4 sm:$0xff]  }
   0xa   :  { %v809_v25 = vld [vmem:[%s1210_s1 + $0x164] ss:$8 sps:$4 sm:$0xff]   ;;  %v812_v27 = vld [vmem:[%s1210_s1 + $0x160] ss:$8 sps:$4 sm:$0xff]   ;;  %v815_v29 = vld [vmem:[%s1210_s1 + $0x174] ss:$8 sps:$4 sm:$0xff]  }
   0xb   :  { %437 = vmatpush1.bf16.msra.mxu1 %v787_v10  ;;  %v817_v30 = vld [vmem:[%s1210_s1 + $0x70] ss:$8 sps:$4 sm:$0xff]   ;;  %v819_v32 = vld [vmem:[%s1210_s1 + $0x84] ss:$8 sps:$4 sm:$0xff]   ;;  %v823_v34 = vld [vmem:[%s1210_s1 + $0x80] ss:$8 sps:$4 sm:$0xff]  }
   0xc   :  { %478 = vmatpush1.bf16.msra.mxu0 %v788_v11  ;;  %438 = vmatprep.subr.bf16.mxu1 %v789_v12  ;;  %v818_v31 = vld [vmem:[%s1210_s1 + $0x170] ss:$8 sps:$4 sm:$0xff]   ;;  %v821_v33 = vld [vmem:[%s1210_s1 + $0x184] ss:$8 sps:$4 sm:$0xff]   ;;  %v824_v35 = vld [vmem:[%s1210_s1 + $0x180] ss:$8 sps:$4 sm:$0xff]  }
   0xd   :  { %479 = vmatprep.subr.bf16.mxu0 %v791_v13  ;;  %v825_v36 = vld [vmem:[%s1210_s1 + $0x94] ss:$8 sps:$4 sm:$0xff]   ;;  %v829_v38 = vld [vmem:[%s1210_s1 + $0x90] ss:$8 sps:$4 sm:$0xff]   ;;  %v831_v40 = vld [vmem:[%s1210_s1 + $0xa4] ss:$8 sps:$4 sm:$0xff]  }
   0xe   :  { %v827_v37 = vld [vmem:[%s1210_s1 + $0x194] ss:$8 sps:$4 sm:$0xff]   ;;  %v830_v39 = vld [vmem:[%s1210_s1 + $0x190] ss:$8 sps:$4 sm:$0xff]   ;;  %v833_v41 = vld [vmem:[%s1210_s1 + $0x1a4] ss:$8 sps:$4 sm:$0xff]  }
   0xf   :  { %439 = vmatpush1.bf16.msra.mxu1 %v793_v14  ;;  %v835_v42 = vld [vmem:[%s1210_s1 + $0xa0] ss:$8 sps:$4 sm:$0xff]   ;;  %v837_v44 = vld [vmem:[%s1210_s1 + $0xb4] ss:$8 sps:$4 sm:$0xff]   ;;  %v841_v49 = vld [vmem:[%s1210_s1 + $0xb0] ss:$8 sps:$4 sm:$0xff]  }
  0x10   :  { %480 = vmatpush1.bf16.msra.mxu0 %v794_v15  ;;  %440 = vmatprep.subr.bf16.mxu1 %v795_v16  ;;  %v836_v43 = vld [vmem:[%s1210_s1 + $0x1a0] ss:$8 sps:$4 sm:$0xff]   ;;  %v839_v45 = vld [vmem:[%s1210_s1 + $0x1b4] ss:$8 sps:$4 sm:$0xff]   ;;  %v842_v50 = vld [vmem:[%s1210_s1 + $0x1b0] ss:$8 sps:$4 sm:$0xff]  }
  0x11   :  { %481 = vmatprep.subr.bf16.mxu0 %v797_v17  ;;  %v1042_v46 = vld [vmem:[%s1211_s0] sm:$0xff]  ;;  %v21_v48 = vld [vmem:[%s1211_s0 + $0x8] sm:$0xff]  ;;  %v849_v56 = vld [vmem:[%s1210_s1 + $0xd4] ss:$8 sps:$4 sm:$0xff]  }
  0x12   :  { %v632_v47 = vcombine.high %v1042_v46, %v1042_v46  ;;  %v634_v51 = vcombine.high %v21_v48, %v21_v48  ;;  %v843_v52 = vld [vmem:[%s1210_s1 + $0xc4] ss:$8 sps:$4 sm:$0xff]   ;;  %v847_v54 = vld [vmem:[%s1210_s1 + $0xc0] ss:$8 sps:$4 sm:$0xff]   ;;  %v851_v57 = vld [vmem:[%s1210_s1 + $0x1d4] ss:$8 sps:$4 sm:$0xff]   ;;  %v631_v11 = vcombine.low %v1042_v46, %v1042_v46  ;;  %v633_v12 = vcombine.low %v21_v48, %v21_v48 }
  0x13   :  { %441 = vmatpush1.bf16.msra.mxu1 %v799_v18  ;;  %v845_v53 = vld [vmem:[%s1210_s1 + $0x1c4] ss:$8 sps:$4 sm:$0xff]   ;;  %v848_v55 = vld [vmem:[%s1210_s1 + $0x1c0] ss:$8 sps:$4 sm:$0xff]   ;;  %v853_v58 = vld [vmem:[%s1210_s1 + $0xd0] ss:$8 sps:$4 sm:$0xff]  }
  0x14   :  { %482 = vmatpush1.bf16.msra.mxu0 %v800_v19  ;;  %442 = vmatprep.subr.bf16.mxu1 %v801_v20  ;;  %v854_v59 = vld [vmem:[%s1210_s1 + $0x1d0] ss:$8 sps:$4 sm:$0xff]   ;;  %v855_v60 = vld [vmem:[%s1210_s1 + $0xe4] ss:$8 sps:$4 sm:$0xff]   ;;  %v859_v62 = vld [vmem:[%s1210_s1 + $0xe0] ss:$8 sps:$4 sm:$0xff]  }
  0x15   :  { %483 = vmatprep.subr.bf16.mxu0 %v803_v21  ;;  %464 = vmatprep.mubr.bf16.mxu1 %v632_v47  ;;  %v857_v61 = vld [vmem:[%s1210_s1 + $0x1e4] ss:$8 sps:$4 sm:$0xff]   ;;  %v860_v63 = vld [vmem:[%s1210_s1 + $0x1e0] ss:$8 sps:$4 sm:$0xff]   ;;  %v861_v0 = vld [vmem:[%s1210_s1 + $0xf4] ss:$8 sps:$4 sm:$0xff]  }
  0x16   :  { %505 = vmatprep.mubr.bf16.mxu0 %v634_v51  ;;  %v863_v1 = vld [vmem:[%s1210_s1 + $0x1f4] ss:$8 sps:$4 sm:$0xff]   ;;  %v532_v2 = vld [vmem:[%s1212_s3 + $0x80] sm:$0xff]  ;;  %v533_v3 = vld [vmem:[%s1212_s3 + $0x88] sm:$0xff] }
  0x17   :  { %443 = vmatpush1.bf16.msra.mxu1 %v805_v22  ;;  %v865_v4 = vld [vmem:[%s1210_s1 + $0xf0] ss:$8 sps:$4 sm:$0xff]   ;;  %v735_v6 = vpack.c.bf16 %v533_v3, %v532_v2  ;;  %v516_v7 = vld [vmem:[%s1212_s3] sm:$0xff]  ;;  %v517_v8 = vld [vmem:[%s1212_s3 + $0x8] sm:$0xff] }
  0x18   :  { %484 = vmatpush1.bf16.msra.mxu0 %v806_v23  ;;  %444 = vmatprep.subr.bf16.mxu1 %v807_v24  ;;  %v866_v5 = vld [vmem:[%s1210_s1 + $0x1f0] ss:$8 sps:$4 sm:$0xff]   ;;  %v737_v13 = vpack.c.bf16 %v517_v8, %v516_v7  ;;  %v536_v17 = vld [vmem:[%s1212_s3 + $0xa0] sm:$0xff]  ;;  %v537_v18 = vld [vmem:[%s1212_s3 + $0xa8] sm:$0xff] }
  0x19   :  { %485 = vmatprep.subr.bf16.mxu0 %v809_v25  ;;  %v534_v9 = vld [vmem:[%s1212_s3 + $0x90] sm:$0xff]  ;;  %v535_v10 = vld [vmem:[%s1212_s3 + $0x98] sm:$0xff]  ;;  %v743_v20 = vpack.c.bf16 %v537_v18, %v536_v17  ;;  %v520_v21 = vld [vmem:[%s1212_s3 + $0x20] sm:$0xff] }
  0x1a   :  { %v739_v14 = vpack.c.bf16 %v535_v10, %v534_v9  ;;  %v518_v15 = vld [vmem:[%s1212_s3 + $0x10] sm:$0xff]  ;;  %v519_v16 = vld [vmem:[%s1212_s3 + $0x18] sm:$0xff]  ;;  %v521_v22 = vld [vmem:[%s1212_s3 + $0x28] sm:$0xff] }
  0x1b   :  { %445 = vmatpush1.bf16.msra.mxu1 %v811_v26  ;;  %v741_v19 = vpack.c.bf16 %v519_v16, %v518_v15  ;;  %v538_v23 = vld [vmem:[%s1212_s3 + $0xb0] sm:$0xff]  ;;  %v539_v24 = vld [vmem:[%s1212_s3 + $0xb8] sm:$0xff]  ;;  %v745_v25 = vpack.c.bf16 %v521_v22, %v520_v21  ;;  %v529_v46 = vld [vmem:[%s1212_s3 + $0x68] sm:$0xff] }
  0x1c   :  { %486 = vmatpush1.bf16.msra.mxu0 %v812_v27  ;;  %446 = vmatprep.subr.bf16.mxu1 %v813_v28  ;;  %v747_v26 = vpack.c.bf16 %v539_v24, %v538_v23  ;;  %v522_v27 = vld [vmem:[%s1212_s3 + $0x30] sm:$0xff]  ;;  %v523_v28 = vld [vmem:[%s1212_s3 + $0x38] sm:$0xff] }
  0x1d   :  { %487 = vmatprep.subr.bf16.mxu0 %v815_v29  ;;  %v540_v29 = vld [vmem:[%s1212_s3 + $0xc0] sm:$0xff]  ;;  %v546_v48 = vld [vmem:[%s1212_s3 + $0xf0] sm:$0xff] }
  0x1e   :  { %v530_v51 = vld [vmem:[%s1212_s3 + $0x70] sm:$0xff] }
  0x1f   :  { %447 = vmatpush1.bf16.msra.mxu1 %v817_v30  ;;  %v541_v30 = vld [vmem:[%s1212_s3 + $0xc8] sm:$0xff] }
  0x20   :  { %488 = vmatpush1.bf16.msra.mxu0 %v818_v31  ;;  %448 = vmatprep.subr.bf16.mxu1 %v819_v32  ;;  %v749_v31 = vpack.c.bf16 %v523_v28, %v522_v27  ;;  %v751_v32 = vpack.c.bf16 %v541_v30, %v540_v29 }
  0x21   :  { %489 = vmatprep.subr.bf16.mxu0 %v821_v33  ;;  %v524_v33 = vld [vmem:[%s1212_s3 + $0x40] sm:$0xff] }
  0x23   :  { %449 = vmatpush1.bf16.msra.mxu1 %v823_v34  ;;  %v525_v34 = vld [vmem:[%s1212_s3 + $0x48] sm:$0xff] }
  0x24   :  { %490 = vmatpush1.bf16.msra.mxu0 %v824_v35  ;;  %450 = vmatprep.subr.bf16.mxu1 %v825_v36  ;;  %v542_v35 = vld [vmem:[%s1212_s3 + $0xd0] sm:$0xff]  ;;  %v543_v36 = vld [vmem:[%s1212_s3 + $0xd8] sm:$0xff] }
  0x25   :  { %491 = vmatprep.subr.bf16.mxu0 %v827_v37  ;;  %v753_v37 = vpack.c.bf16 %v525_v34, %v524_v33 }
  0x27   :  { %451 = vmatpush1.bf16.msra.mxu1 %v829_v38  ;;  %v755_v38 = vpack.c.bf16 %v543_v36, %v542_v35 }
  0x28   :  { %492 = vmatpush1.bf16.msra.mxu0 %v830_v39  ;;  %452 = vmatprep.subr.bf16.mxu1 %v831_v40  ;;  %v526_v39 = vld [vmem:[%s1212_s3 + $0x50] sm:$0xff]  ;;  %v527_v40 = vld [vmem:[%s1212_s3 + $0x58] sm:$0xff] }
  0x29   :  { %493 = vmatprep.subr.bf16.mxu0 %v833_v41  ;;  %v757_v41 = vpack.c.bf16 %v527_v40, %v526_v39 }
  0x2b   :  { %453 = vmatpush1.bf16.msra.mxu1 %v835_v42  ;;  %v544_v42 = vld [vmem:[%s1212_s3 + $0xe0] sm:$0xff] }
  0x2c   :  { %494 = vmatpush1.bf16.msra.mxu0 %v836_v43  ;;  %454 = vmatprep.subr.bf16.mxu1 %v837_v44  ;;  %v545_v43 = vld [vmem:[%s1212_s3 + $0xe8] sm:$0xff] }
  0x2d   :  { %495 = vmatprep.subr.bf16.mxu0 %v839_v45  ;;  %v759_v44 = vpack.c.bf16 %v545_v43, %v544_v42  ;;  %v528_v45 = vld [vmem:[%s1212_s3 + $0x60] sm:$0xff] }
  0x2e   :  { %v761_v47 = vpack.c.bf16 %v529_v46, %v528_v45 }
  0x2f   :  { %455 = vmatpush1.bf16.msra.mxu1 %v841_v49  ;;  %v547_v49 = vld [vmem:[%s1212_s3 + $0xf8] sm:$0xff] }
  0x30   :  { %496 = vmatpush1.bf16.msra.mxu0 %v842_v50  ;;  %456 = vmatprep.subr.bf16.mxu1 %v843_v52  ;;  %v763_v50 = vpack.c.bf16 %v547_v49, %v546_v48  ;;  %v531_v52 = vld [vmem:[%s1212_s3 + $0x78] sm:$0xff] }
  0x31   :  { %497 = vmatprep.subr.bf16.mxu0 %v845_v53  ;;  %v765_v53 = vpack.c.bf16 %v531_v52, %v530_v51 }
  0x33   :  { %457 = vmatpush1.bf16.msra.mxu1 %v847_v54  ;;  %v88_v54 = vlaneseq }
  0x34   :  { %498 = vmatpush1.bf16.msra.mxu0 %v848_v55  ;;  %458 = vmatprep.subr.bf16.mxu1 %v849_v56 }
  0x35   :  { %499 = vmatprep.subr.bf16.mxu0 %v851_v57  ;;  %v89_v55 = vshrl.u32 %v88_v54, 7  ;;  %v86_v57 = vld [vmem:[%s1213_s2] sm:$0x3] }
  0x37   :  { %459 = vmatpush1.bf16.msra.mxu1 %v853_v58  ;;  %v90_v56 = vsub.s32 0, %v89_v55  ;;  %v94_v58 = vsub.s32 1, %v89_v55 }
  0x38   :  { %500 = vmatpush1.bf16.msra.mxu0 %v854_v59  ;;  %460 = vmatprep.subr.bf16.mxu1 %v855_v60 }
  0x39   :  { %501 = vmatprep.subr.bf16.mxu0 %v857_v61  ;;  %v91_v59 = vrot.slane %v86_v57, %v90_v56  ;;  %v95_v60 = vrot.slane %v86_v57, %v94_v58 }
  0x3b   :  { %461 = vmatpush1.bf16.msra.mxu1 %v859_v62 }
  0x3c   :  { %502 = vmatpush1.bf16.msra.mxu0 %v860_v63  ;;  %462 = vmatprep.subr.bf16.mxu1 %v861_v0 }
  0x3d   :  { %503 = vmatprep.subr.bf16.mxu0 %v863_v1 }
  0x3f   :  { %463 = vmatpush1.bf16.msra.mxu1 %v865_v4 }
  0x40   :  { %504 = vmatpush1.bf16.msra.mxu0 %v866_v5  ;;  %736 = vmatprep.subr.bf16.mxu1 %v735_v6 }
  0x42   :  { %465 = vmatmul.mubr.bf16.vlgmr.msra.gmra.mrb[0].mxu1 %v631_v11 }
  0x43   :  { %506 = vmatmul.mubr.bf16.vlgmr.msra.gmra.mrb[0].mxu0 %v633_v12  ;;  %738 = vmatpush3.bf16.msra.mxu1 %v737_v13  ;;  %v699_v12 = vld [vmem:[%s1214_s4] ss:$0 sm:$0xff] }
  0x44   :  { %740 = vmatprep.subr.bf16.mxu1 %v739_v14 }
  0x47   :  { %742 = vmatpush3.bf16.msra.mxu1 %v741_v19 }
  0x48   :  { %744 = vmatprep.subr.bf16.mxu1 %v743_v20 }
  0x4b   :  { %746 = vmatpush3.bf16.msra.mxu1 %v745_v25 }
  0x4c   :  { %748 = vmatprep.subr.bf16.mxu1 %v747_v26 }
  0x4f   :  { %750 = vmatpush3.bf16.msra.mxu1 %v749_v31 }
  0x50   :  { %752 = vmatprep.subr.bf16.mxu1 %v751_v32 }
  0x53   :  { %754 = vmatpush3.bf16.msra.mxu1 %v753_v37 }
  0x54   :  { %756 = vmatprep.subr.bf16.mxu1 %v755_v38 }
  0x57   :  { %758 = vmatpush3.bf16.msra.mxu1 %v757_v41 }
  0x58   :  { %760 = vmatprep.subr.bf16.mxu1 %v759_v44 }
  0x5b   :  { %762 = vmatpush3.bf16.msra.mxu1 %v761_v47 }
  0x5c   :  { %764 = vmatprep.subr.bf16.mxu1 %v763_v50 }
  0x5f   :  { %766 = vmatpush3.bf16.msra.mxu1 %v765_v53 }
 0x115   :  { %v466_v61 = vpop.f32.mrb[0].mxu1 }
 0x116   :  { %v507_v62 = vpop.f32.mrb[0].mxu0  ;;  %v467_v63 = vadd.f32 %v466_v61, %v91_v59  ;;  %v468_v0 = vpop.f32.mrb[1].mxu1 }
 0x117   :  { %v509_v1 = vpop.f32.mrb[1].mxu0  ;;  %v469_v2 = vadd.f32 %v468_v0, %v95_v60  ;;  %v470_v3 = vpop.f32.mrb[2].mxu1 }
 0x118   :  { %v511_v4 = vpop.f32.mrb[2].mxu0  ;;  %v508_v5 = vadd.f32 %v507_v62, %v467_v63  ;;  %v471_v6 = vpop.f32.mrb[3].mxu1 }
 0x119   :  { %v512_v7 = vpop.f32.mrb[3].mxu0  ;;  %v510_v8 = vadd.f32 %v509_v1, %v469_v2 }
 0x11a   :  { %v514_v10 = vmax.f32 %v508_v5, 0.0 }
 0x11b   :  { %v515_v9 = vmax.f32 %v510_v8, 0.0 }
 0x11d   :  { %619 = vmatprep.mubr.f32.mxu1 %v515_v9 }
 0x11e   :  { %620 = vmatmul.mubr.f32.vlgmr.msra.gmra.mrb[4].mxu1 %v514_v10 }
 0x1f1   :  { %v732_v11 = vpop.f32.mrb[4].mxu1 }
 0x1f2   :  { %v733_v13 = vpop.f32.mrb[5].mxu1 }
 0x1f3   :  { %v734_v14 = vadd.f32 %v733_v13, %v732_v11 }
 0x1f5   :  { %v622_v15 = vadd.f32 %v734_v14, %v699_v12 }
 0x1f7   :  { %626 = vst.msk [vmem:[%s1215_s5] sm:$0xff] %vm625_vm0, %v622_v15 }

// kernel: conv_vae_forward.11
= control target key start
LH: loop header
LB: loop body
LE: loop exit
PB: predicated region body
PF: predicated region fallthrough
CT: control target
= control target key end

     0   :  { %s2882_s1 = inlined_call_operand.vmem [shape: bf16[2304,128], index: 1, kind: input, shape index: {}]   ;;  %s2883_s0 = inlined_call_operand.vmem [shape: bf16[2,10,768], index: 0, kind: input, shape index: {}]   ;;  %s2884_s2 = inlined_call_operand.vmem [shape: f32[1,128], index: 2, kind: input, shape index: {}]   ;;  %s2885_s3 = inlined_call_operand.vmem [shape: bf16[2,8,128], index: 3, kind: output, shape index: {}]  }
   0x1   :  { %v2147_v0 = vld [vmem:[%s2882_s1 + $0x40] sm:$0xff]   ;;  %v2151_v4 = vld [vmem:[%s2882_s1 + $0x48] sm:$0xff]   ;;  %v2155_v8 = vld [vmem:[%s2882_s1 + $0x50] sm:$0xff]  }
   0x2   :  { %v2148_v1 = vld [vmem:[%s2882_s1] sm:$0xff]   ;;  %1949 = vmatprep.subr.bf16.mxu0 %v2147_v0  ;;  %v2152_v5 = vld [vmem:[%s2882_s1 + $0x8] sm:$0xff]   ;;  %v2156_v9 = vld [vmem:[%s2882_s1 + $0x10] sm:$0xff]  }
   0x3   :  { %v2149_v2 = vld [vmem:[%s2882_s1 + $0xc0] sm:$0xff]   ;;  %1950 = vmatpush3.bf16.msra.mxu0 %v2148_v1  ;;  %v2153_v6 = vld [vmem:[%s2882_s1 + $0xc8] sm:$0xff]   ;;  %v2157_v10 = vld [vmem:[%s2882_s1 + $0xd0] sm:$0xff]  }
   0x4   :  { %v2150_v3 = vld [vmem:[%s2882_s1 + $0x80] sm:$0xff]   ;;  %1971 = vmatprep.subr.bf16.mxu1 %v2149_v2  ;;  %1951 = vmatprep.subr.bf16.mxu0 %v2151_v4  ;;  %v2154_v7 = vld [vmem:[%s2882_s1 + $0x88] sm:$0xff]   ;;  %v2158_v11 = vld [vmem:[%s2882_s1 + $0x90] sm:$0xff]  }
   0x5   :  { %1972 = vmatpush3.bf16.msra.mxu1 %v2150_v3  ;;  %v2159_v12 = vld [vmem:[%s2882_s1 + $0x58] sm:$0xff]   ;;  %v2163_v16 = vld [vmem:[%s2882_s1 + $0x60] sm:$0xff]   ;;  %v2167_v20 = vld [vmem:[%s2882_s1 + $0x68] sm:$0xff]  }
   0x6   :  { %1973 = vmatprep.subr.bf16.mxu1 %v2153_v6  ;;  %v2160_v13 = vld [vmem:[%s2882_s1 + $0x18] sm:$0xff]   ;;  %v2164_v17 = vld [vmem:[%s2882_s1 + $0x20] sm:$0xff]   ;;  %v2168_v21 = vld [vmem:[%s2882_s1 + $0x28] sm:$0xff]  }
   0x7   :  { %1952 = vmatpush3.bf16.msra.mxu0 %v2152_v5  ;;  %v2161_v14 = vld [vmem:[%s2882_s1 + $0xd8] sm:$0xff]   ;;  %v2165_v18 = vld [vmem:[%s2882_s1 + $0xe0] sm:$0xff]   ;;  %v2169_v22 = vld [vmem:[%s2882_s1 + $0xe8] sm:$0xff]  }
   0x8   :  { %1953 = vmatprep.subr.bf16.mxu0 %v2155_v8  ;;  %v2162_v15 = vld [vmem:[%s2882_s1 + $0x98] sm:$0xff]   ;;  %v2166_v19 = vld [vmem:[%s2882_s1 + $0xa0] sm:$0xff]   ;;  %v2170_v23 = vld [vmem:[%s2882_s1 + $0xa8] sm:$0xff]  }
   0x9   :  { %1974 = vmatpush3.bf16.msra.mxu1 %v2154_v7  ;;  %v2171_v24 = vld [vmem:[%s2882_s1 + $0x70] sm:$0xff]   ;;  %v2175_v28 = vld [vmem:[%s2882_s1 + $0x78] sm:$0xff]   ;;  %v15_v31 = vld [vmem:[%s2883_s0] sm:$0xff] }
   0xa   :  { %1975 = vmatprep.subr.bf16.mxu1 %v2157_v10  ;;  %v2172_v25 = vld [vmem:[%s2882_s1 + $0x30] sm:$0xff]   ;;  %v2176_v29 = vld [vmem:[%s2882_s1 + $0x38] sm:$0xff]   ;;  %v24_v34 = vld [vmem:[%s2883_s0 + $0x48] sm:$0x11] }
   0xb   :  { %1954 = vmatpush3.bf16.msra.mxu0 %v2156_v9  ;;  %v2173_v26 = vld [vmem:[%s2882_s1 + $0xf0] sm:$0xff]   ;;  %v2177_v30 = vld [vmem:[%s2882_s1 + $0xf8] sm:$0xff]   ;;  %v2185_v40 = vld [vmem:[%s2882_s1 + $0x140] sm:$0xff]  }
   0xc   :  { %1955 = vmatprep.subr.bf16.mxu0 %v2159_v12  ;;  %v2174_v27 = vld [vmem:[%s2882_s1 + $0xb0] sm:$0xff]   ;;  %v18_v32 = vld [vmem:[%s2883_s0 + $0x18] sm:$0x11]  ;;  %v2447_v41 = vld [vmem:[%s2883_s0 + $0x8] sm:$0xff] }
   0xd   :  { %1976 = vmatpush3.bf16.msra.mxu1 %v2158_v11  ;;  %v21_v33 = vld [vmem:[%s2883_s0 + $0x30] sm:$0xff]  ;;  %v2434_v35 = vcombine.high %v15_v31, %v18_v32  ;;  %v2183_v38 = vld [vmem:[%s2882_s1 + $0xb8] sm:$0xff]   ;;  %v2191_v46 = vld [vmem:[%s2882_s1 + $0x100] sm:$0xff]   ;;  %v2480_v58 = vcombine.low %v15_v31, %v18_v32 }
   0xe   :  { %1977 = vmatprep.subr.bf16.mxu1 %v2161_v14  ;;  %v1783_v36 = vcombine.high %v15_v31, %v21_v33  ;;  %v1782_v37 = vcombine.low %v15_v31, %v21_v33  ;;  %v2439_v39 = vcombine.high %v21_v33, %v24_v34  ;;  %v2453_v43 = vld [vmem:[%s2883_s0 + $0x38] sm:$0xff]  ;;  %v2193_v49 = vld [vmem:[%s2882_s1 + $0x1c0] sm:$0xff]   ;;  %v2195_v53 = vld [vmem:[%s2882_s1 + $0x148] sm:$0xff]   ;;  %v2496_v1 = vcombine.low %v21_v33, %v24_v34 }
   0xf   :  { %1956 = vmatpush3.bf16.msra.mxu0 %v2160_v13  ;;  %v85_v42 = vshll.u32 %v2434_v35, 16  ;;  %v83_v44 = vshrl.u32 %v2434_v35, 16  ;;  %v1785_v45 = vcombine.high %v2447_v41, %v2453_v43  ;;  %v1784_v47 = vcombine.low %v2447_v41, %v2453_v43  ;;  %v2194_v51 = vld [vmem:[%s2882_s1 + $0x180] sm:$0xff]   ;;  %v2196_v54 = vld [vmem:[%s2882_s1 + $0x108] sm:$0xff]   ;;  %v2199_v62 = vld [vmem:[%s2882_s1 + $0x150] sm:$0xff]  }
  0x10   :  { %1957 = vmatprep.subr.bf16.mxu0 %v2163_v16  ;;  %1422 = vmatprep.mubr.bf16.mxu0 %v1783_v36  ;;  %v125_v48 = vshrl.u32 %v2439_v39, 16  ;;  %v127_v52 = vshll.u32 %v2439_v39, 16  ;;  %v2197_v57 = vld [vmem:[%s2882_s1 + $0x1c8] sm:$0xff]   ;;  %v2488_v61 = vld [vmem:[%s2883_s0 + $0x20] sm:$0x11]  ;;  %v2200_v63 = vld [vmem:[%s2882_s1 + $0x110] sm:$0xff]  }
  0x11   :  { %1978 = vmatpush3.bf16.msra.mxu1 %v2162_v15  ;;  %v87_v50 = vrot.slane %v85_v42, 1  ;;  %1463 = vmatprep.mubr.bf16.mxu1 %v1785_v45  ;;  %v2198_v59 = vld [vmem:[%s2882_s1 + $0x188] sm:$0xff]   ;;  %v2501_v2 = vld [vmem:[%s2883_s0 + $0x50] sm:$0x11]  ;;  %v78_v5 = vshll.u32 %v2480_v58, 16  ;;  %v2203_v6 = vld [vmem:[%s2882_s1 + $0x158] sm:$0xff]   ;;  %v2516_v8 = vcombine.high %v2447_v41, %v2488_v61 }
  0x12   :  { %1979 = vmatprep.subr.bf16.mxu1 %v2165_v18  ;;  %v129_v56 = vrot.slane %v127_v52, 1  ;;  %v2201_v3 = vld [vmem:[%s2882_s1 + $0x1d0] sm:$0xff]   ;;  %v76_v7 = vshrl.u32 %v2480_v58, 16  ;;  %v2204_v9 = vld [vmem:[%s2882_s1 + $0x118] sm:$0xff]   ;;  %v118_v10 = vshrl.u32 %v2496_v1, 16  ;;  %v120_v12 = vshll.u32 %v2496_v1, 16 }
  0x13   :  { %1958 = vmatpush3.bf16.msra.mxu0 %v2164_v17  ;;  %v88_v55 = vor.u32 %v87_v50, %v83_v44  ;;  %v2202_v4 = vld [vmem:[%s2882_s1 + $0x190] sm:$0xff]   ;;  %v2205_v11 = vld [vmem:[%s2882_s1 + $0x1d8] sm:$0xff]   ;;  %v2528_v13 = vcombine.high %v2453_v43, %v2501_v2  ;;  %v80_v15 = vrot.slane %v78_v5, 1  ;;  %v2207_v16 = vld [vmem:[%s2882_s1 + $0x160] sm:$0xff]   ;;  %v97_v17 = vshrl.u32 %v2516_v8, 16 }
  0x14   :  { %1959 = vmatprep.subr.bf16.mxu0 %v2167_v20  ;;  %v130_v60 = vor.u32 %v129_v56, %v125_v48  ;;  %v2206_v14 = vld [vmem:[%s2882_s1 + $0x198] sm:$0xff]   ;;  %v2208_v18 = vld [vmem:[%s2882_s1 + $0x120] sm:$0xff]   ;;  %v2215_v32 = vld [vmem:[%s2882_s1 + $0x170] sm:$0xff]   ;;  %v166_v33 = vrot.slane %v2439_v39, 1 }
  0x15   :  { %1980 = vmatpush3.bf16.msra.mxu1 %v2166_v19  ;;  %v99_v19 = vshll.u32 %v2516_v8, 16  ;;  %v2209_v20 = vld [vmem:[%s2882_s1 + $0x1e0] sm:$0xff]   ;;  %v2216_v34 = vld [vmem:[%s2882_s1 + $0x130] sm:$0xff]   ;;  %v2220_v44 = vld [vmem:[%s2882_s1 + $0x138] sm:$0xff]   ;;  %v81_v45 = vor.u32 %v80_v15, %v76_v7 }
  0x16   :  { %1981 = vmatprep.subr.bf16.mxu1 %v2169_v22  ;;  %v1789_v0 = vcombine.low %v88_v55, %v130_v60  ;;  %v2210_v22 = vld [vmem:[%s2882_s1 + $0x1a0] sm:$0xff]   ;;  %v2217_v36 = vld [vmem:[%s2882_s1 + $0x1f0] sm:$0xff]   ;;  %v2227_v55 = vld [vmem:[%s2882_s1 + $0x1b8] sm:$0xff]  }
  0x17   :  { %1960 = vmatpush3.bf16.msra.mxu0 %v2168_v21  ;;  %v122_v21 = vrot.slane %v120_v12, 1  ;;  %v2218_v39 = vld [vmem:[%s2882_s1 + $0x1b0] sm:$0xff]   ;;  %v23_v52 = vld [vmem:[%s2883_s0 + $0x40] sm:$0xff]  ;;  %v2236_v12 = vld [vmem:[%s2882_s1 + $0x288] sm:$0xff]  }
  0x18   :  { %1961 = vmatprep.subr.bf16.mxu0 %v2171_v24  ;;  %v2211_v24 = vld [vmem:[%s2882_s1 + $0x168] sm:$0xff]   ;;  %v17_v48 = vld [vmem:[%s2883_s0 + $0x10] sm:$0xff] }
  0x19   :  { %1982 = vmatpush3.bf16.msra.mxu1 %v2170_v23  ;;  %v141_v23 = vshll.u32 %v2528_v13, 16  ;;  %v1787_v56 = vcombine.high %v17_v48, %v23_v52 }
  0x1a   :  { %1983 = vmatprep.subr.bf16.mxu1 %v2173_v26  ;;  %v2212_v26 = vld [vmem:[%s2882_s1 + $0x128] sm:$0xff]  }
  0x1b   :  { %1962 = vmatpush3.bf16.msra.mxu0 %v2172_v25  ;;  %v139_v25 = vshrl.u32 %v2528_v13, 16  ;;  %v143_v31 = vrot.slane %v141_v23, 1  ;;  %v2242_v23 = vld [vmem:[%s2882_s1 + $0x218] sm:$0xff]  }
  0x1c   :  { %1963 = vmatprep.subr.bf16.mxu0 %v2175_v28  ;;  %v2213_v28 = vld [vmem:[%s2882_s1 + $0x1e8] sm:$0xff]  }
  0x1d   :  { %1984 = vmatpush3.bf16.msra.mxu1 %v2174_v27  ;;  %v101_v27 = vrot.slane %v99_v19, 1  ;;  %v144_v50 = vor.u32 %v143_v31, %v139_v25 }
  0x1e   :  { %1985 = vmatprep.subr.bf16.mxu1 %v2177_v30  ;;  %v2214_v30 = vld [vmem:[%s2882_s1 + $0x1a8] sm:$0xff]  }
  0x1f   :  { %1964 = vmatpush3.bf16.msra.mxu0 %v2176_v29  ;;  %v160_v29 = vrot.slane %v2434_v35, 1  ;;  %v159_v35 = vrot.slane %v2480_v58, 1  ;;  %v2229_v58 = vld [vmem:[%s2882_s1 + $0x240] sm:$0xff]  }
  0x20   :  { %1993 = vmatprep.subr.bf16.mxu0 %v2185_v40  ;;  %v2219_v40 = vld [vmem:[%s2882_s1 + $0x178] sm:$0xff]  }
  0x21   :  { %1986 = vmatpush3.bf16.msra.mxu1 %v2183_v38  ;;  %v165_v38 = vrot.slane %v2496_v1, 1  ;;  %v2231_v1 = vld [vmem:[%s2882_s1 + $0x2c0] sm:$0xff]  }
  0x22   :  { %1423 = vmatmul.mubr.bf16.vlgmr.msra.gmra.mrb[0].mxu0 %v1782_v37  ;;  %2015 = vmatprep.subr.bf16.mxu1 %v2193_v49  ;;  %v2573_v37 = vcombine.low %v160_v29, %v166_v33  ;;  %v102_v49 = vor.u32 %v101_v27, %v97_v17  ;;  %v2642_v17 = vcombine.low %v2447_v41, %v2488_v61  ;;  %v2240_v41 = vld [vmem:[%s2882_s1 + $0x290] sm:$0xff]  }
  0x23   :  { %1994 = vmatpush3.bf16.msra.mxu0 %v2191_v46  ;;  %v2582_v42 = vcombine.low %v159_v35, %v165_v38  ;;  %v123_v46 = vor.u32 %v122_v21, %v118_v10  ;;  %1504 = vmatprep.mubr.bf16.mxu0 %v1787_v56  ;;  %v2239_v21 = vld [vmem:[%s2882_s1 + $0x2d0] sm:$0xff]   ;;  %v2248_v38 = vld [vmem:[%s2882_s1 + $0x2a0] sm:$0xff]  }
  0x24   :  { %1464 = vmatmul.mubr.bf16.vlgmr.msra.gmra.mrb[0].mxu1 %v1784_v47  ;;  %1995 = vmatprep.subr.bf16.mxu0 %v2195_v53  ;;  %v2221_v47 = vld [vmem:[%s2882_s1 + $0x1f8] sm:$0xff]   ;;  %v2255_v56 = vld [vmem:[%s2882_s1 + $0x2f0] sm:$0xff]  }
  0x25   :  { %2016 = vmatpush3.bf16.msra.mxu1 %v2194_v51  ;;  %1545 = vmatprep.mubr.bf16.mxu1 %v1789_v0  ;;  %v20_v51 = vld [vmem:[%s2883_s0 + $0x28] sm:$0x11]  ;;  %v26_v53 = vld [vmem:[%s2883_s0 + $0x58] sm:$0x11] }
  0x26   :  { %2017 = vmatprep.subr.bf16.mxu1 %v2197_v57  ;;  %v1786_v57 = vcombine.low %v17_v48, %v23_v52  ;;  %v2610_v60 = vcombine.high %v23_v52, %v26_v53  ;;  %v1779_v25 = vcombine.low %v23_v52, %v26_v53  ;;  %v2254_v53 = vld [vmem:[%s2882_s1 + $0x230] sm:$0xff]  }
  0x27   :  { %1996 = vmatpush3.bf16.msra.mxu0 %v2196_v54  ;;  %v2602_v54 = vcombine.high %v17_v48, %v20_v51 }
  0x28   :  { %1997 = vmatprep.subr.bf16.mxu0 %v2199_v62  ;;  %v2230_v62 = vld [vmem:[%s2882_s1 + $0x200] sm:$0xff]   ;;  %v153_v5 = vshrl.u32 %v2610_v60, 16  ;;  %v155_v10 = vshll.u32 %v2610_v60, 16  ;;  %v169_v31 = vrot.slane %v1779_v25, 1 }
  0x29   :  { %2018 = vmatpush3.bf16.msra.mxu1 %v2198_v59  ;;  %v1788_v59 = vcombine.low %v81_v45, %v123_v46  ;;  %v111_v0 = vshrl.u32 %v2602_v54, 16  ;;  %v2250_v45 = vld [vmem:[%s2882_s1 + $0x228] sm:$0xff]   ;;  %v148_v46 = vshll.u32 %v1779_v25, 16 }
  0x2a   :  { %2019 = vmatprep.subr.bf16.mxu1 %v2201_v3  ;;  %v113_v3 = vshll.u32 %v2602_v54, 16  ;;  %v157_v15 = vrot.slane %v155_v10, 1  ;;  %v2262_v10 = vld [vmem:[%s2882_s1 + $0x300] sm:$0xff]  }
  0x2b   :  { %1998 = vmatpush3.bf16.msra.mxu0 %v2200_v63  ;;  %v1791_v63 = vcombine.low %v102_v49, %v144_v50  ;;  %v2252_v49 = vld [vmem:[%s2882_s1 + $0x2a8] sm:$0xff]   ;;  %v146_v50 = vshrl.u32 %v1779_v25, 16  ;;  %v2279_v25 = vld [vmem:[%s2882_s1 + $0x3e0] sm:$0xff]  }
  0x2c   :  { %1999 = vmatprep.subr.bf16.mxu0 %v2203_v6  ;;  %v2233_v6 = vld [vmem:[%s2882_s1 + $0x248] sm:$0xff]   ;;  %v115_v7 = vrot.slane %v113_v3, 1  ;;  %v158_v19 = vor.u32 %v157_v15, %v153_v5  ;;  %v2259_v3 = vld [vmem:[%s2882_s1 + $0x2f8] sm:$0xff]  }
  0x2d   :  { %2020 = vmatpush3.bf16.msra.mxu1 %v2202_v4  ;;  %v2232_v4 = vld [vmem:[%s2882_s1 + $0x280] sm:$0xff]   ;;  %v2260_v5 = vld [vmem:[%s2882_s1 + $0x2b8] sm:$0xff]   ;;  %v2266_v15 = vld [vmem:[%s2882_s1 + $0x308] sm:$0xff]  }
  0x2e   :  { %2021 = vmatprep.subr.bf16.mxu1 %v2205_v11  ;;  %v2235_v11 = vld [vmem:[%s2882_s1 + $0x2c8] sm:$0xff]  }
  0x2f   :  { %2000 = vmatpush3.bf16.msra.mxu0 %v2204_v9  ;;  %v2234_v9 = vld [vmem:[%s2882_s1 + $0x208] sm:$0xff]  }
  0x30   :  { %2001 = vmatprep.subr.bf16.mxu0 %v2207_v16  ;;  %v2237_v16 = vld [vmem:[%s2882_s1 + $0x250] sm:$0xff]  }
  0x31   :  { %2022 = vmatpush3.bf16.msra.mxu1 %v2206_v14  ;;  %v116_v14 = vor.u32 %v115_v7, %v111_v0  ;;  %v168_v7 = vrot.slane %v2528_v13, 1  ;;  %v2264_v13 = vld [vmem:[%s2882_s1 + $0x380] sm:$0xff]  }
  0x32   :  { %2023 = vmatprep.subr.bf16.mxu1 %v2209_v20  ;;  %v2649_v20 = vcombine.low %v2453_v43, %v2501_v2  ;;  %v90_v43 = vshrl.u32 %v2642_v17, 16  ;;  %v1773_v2 = vcombine.low %v17_v48, %v20_v51  ;;  %v2253_v51 = vld [vmem:[%s2882_s1 + $0x270] sm:$0xff]  }
  0x33   :  { %2002 = vmatpush3.bf16.msra.mxu0 %v2208_v18  ;;  %v2238_v18 = vld [vmem:[%s2882_s1 + $0x210] sm:$0xff]   ;;  %v1793_v61 = vcombine.low %v116_v14, %v158_v19  ;;  %v2265_v14 = vld [vmem:[%s2882_s1 + $0x348] sm:$0xff]  }
  0x34   :  { %2003 = vmatprep.subr.bf16.mxu0 %v2211_v24  ;;  %v92_v24 = vshll.u32 %v2642_v17, 16  ;;  %v134_v27 = vshll.u32 %v2649_v20, 16  ;;  %v163_v29 = vrot.slane %v1773_v2, 1  ;;  %v132_v33 = vshrl.u32 %v2649_v20, 16  ;;  %v2269_v19 = vld [vmem:[%s2882_s1 + $0x350] sm:$0xff]  }
  0x35   :  { %2024 = vmatpush3.bf16.msra.mxu1 %v2210_v22  ;;  %v2241_v22 = vld [vmem:[%s2882_s1 + $0x258] sm:$0xff]   ;;  %v104_v48 = vshrl.u32 %v1773_v2, 16 }
  0x36   :  { %2025 = vmatprep.subr.bf16.mxu1 %v2213_v28  ;;  %v2244_v28 = vld [vmem:[%s2882_s1 + $0x298] sm:$0xff]   ;;  %v94_v35 = vrot.slane %v92_v24, 1  ;;  %v2278_v24 = vld [vmem:[%s2882_s1 + $0x320] sm:$0xff]  }
  0x37   :  { %2004 = vmatpush3.bf16.msra.mxu0 %v2212_v26  ;;  %v2243_v26 = vld [vmem:[%s2882_s1 + $0x2d8] sm:$0xff]  }
  0x38   :  { %2005 = vmatprep.subr.bf16.mxu0 %v2215_v32  ;;  %v2246_v32 = vld [vmem:[%s2882_s1 + $0x220] sm:$0xff]  }
  0x39   :  { %2026 = vmatpush3.bf16.msra.mxu1 %v2214_v30  ;;  %v2245_v30 = vld [vmem:[%s2882_s1 + $0x260] sm:$0xff]  }
  0x3a   :  { %2027 = vmatprep.subr.bf16.mxu1 %v2217_v36  ;;  %v2682_v36 = vcombine.low %v163_v29, %v169_v31  ;;  %v2283_v29 = vld [vmem:[%s2882_s1 + $0x3e8] sm:$0xff]   ;;  %v2285_v31 = vld [vmem:[%s2882_s1 + $0x370] sm:$0xff]  }
  0x3b   :  { %2006 = vmatpush3.bf16.msra.mxu0 %v2216_v34  ;;  %v2247_v34 = vld [vmem:[%s2882_s1 + $0x2e0] sm:$0xff]  }
  0x3c   :  { %2007 = vmatprep.subr.bf16.mxu0 %v2219_v40  ;;  %v2249_v40 = vld [vmem:[%s2882_s1 + $0x268] sm:$0xff]  }
  0x3d   :  { %2028 = vmatpush3.bf16.msra.mxu1 %v2218_v39  ;;  %v136_v39 = vrot.slane %v134_v27, 1  ;;  %v2281_v27 = vld [vmem:[%s2882_s1 + $0x368] sm:$0xff]  }
  0x3e   :  { %2029 = vmatprep.subr.bf16.mxu1 %v2221_v47  ;;  %v2251_v47 = vld [vmem:[%s2882_s1 + $0x2e8] sm:$0xff]  }
  0x3f   :  { %2008 = vmatpush3.bf16.msra.mxu0 %v2220_v44  ;;  %v106_v44 = vshll.u32 %v1773_v2, 16  ;;  %v2276_v2 = vld [vmem:[%s2882_s1 + $0x398] sm:$0xff]  }
  0x40   :  { %2037 = vmatprep.subr.bf16.mxu0 %v2229_v58  ;;  %v95_v58 = vor.u32 %v94_v35, %v90_v43  ;;  %v2275_v43 = vld [vmem:[%s2882_s1 + $0x3d8] sm:$0xff]   ;;  %v2288_v35 = vld [vmem:[%s2882_s1 + $0x3b0] sm:$0xff]  }
  0x41   :  { %2030 = vmatpush3.bf16.msra.mxu1 %v2227_v55  ;;  %v108_v52 = vrot.slane %v106_v44, 1  ;;  %v150_v55 = vrot.slane %v148_v46, 1  ;;  %v2290_v44 = vld [vmem:[%s2882_s1 + $0x338] sm:$0xff]  }
  0x42   :  { %1505 = vmatmul.mubr.bf16.vlgmr.msra.gmra.mrb[4].mxu0 %v1786_v57  ;;  %2059 = vmatprep.subr.bf16.mxu1 %v2231_v1  ;;  %v2256_v57 = vld [vmem:[%s2882_s1 + $0x2b0] sm:$0xff]  }
  0x43   :  { %2038 = vmatpush3.bf16.msra.mxu0 %v2230_v62  ;;  %1586 = vmatprep.mubr.bf16.mxu0 %v1791_v63  ;;  %v2257_v62 = vld [vmem:[%s2882_s1 + $0x278] sm:$0xff]   ;;  %v109_v0 = vor.u32 %v108_v52, %v104_v48  ;;  %v151_v1 = vor.u32 %v150_v55, %v146_v50  ;;  %v2295_v48 = vld [vmem:[%s2882_s1 + $0x448] sm:$0xff]   ;;  %v2297_v50 = vld [vmem:[%s2882_s1 + $0x450] sm:$0xff]  }
  0x44   :  { %1546 = vmatmul.mubr.bf16.vlgmr.msra.gmra.mrb[4].mxu1 %v1788_v59  ;;  %2039 = vmatprep.subr.bf16.mxu0 %v2233_v6  ;;  %v137_v59 = vor.u32 %v136_v39, %v132_v33  ;;  %v2258_v63 = vld [vmem:[%s2882_s1 + $0x238] sm:$0xff]   ;;  %v2287_v33 = vld [vmem:[%s2882_s1 + $0x3f0] sm:$0xff]   ;;  %v2302_v55 = vld [vmem:[%s2882_s1 + $0x420] sm:$0xff]  }
  0x45   :  { %2060 = vmatpush3.bf16.msra.mxu1 %v2232_v4  ;;  %1627 = vmatprep.mubr.bf16.mxu1 %v1793_v61  ;;  %v162_v4 = vrot.slane %v2516_v8, 1  ;;  %v2263_v8 = vld [vmem:[%s2882_s1 + $0x3c0] sm:$0xff]   ;;  %v2273_v61 = vld [vmem:[%s2882_s1 + $0x358] sm:$0xff]  }
  0x46   :  { %2061 = vmatprep.subr.bf16.mxu1 %v2235_v11  ;;  %v1790_v6 = vcombine.low %v95_v58, %v137_v59  ;;  %v1792_v11 = vcombine.low %v109_v0, %v151_v1  ;;  %v2289_v39 = vld [vmem:[%s2882_s1 + $0x378] sm:$0xff]   ;;  %v2305_v58 = vld [vmem:[%s2882_s1 + $0x470] sm:$0xff]   ;;  %v1781_v1 = vld [vmem:[%s2884_s2] ss:$0 sm:$0xff] }
  0x47   :  { %2040 = vmatpush3.bf16.msra.mxu0 %v2234_v9  ;;  %v2261_v9 = vld [vmem:[%s2882_s1 + $0x340] sm:$0xff]   ;;  %v2300_v52 = vld [vmem:[%s2882_s1 + $0x418] sm:$0xff]   ;;  %v2306_v59 = vld [vmem:[%s2882_s1 + $0x430] sm:$0xff]  }
  0x48   :  { %2041 = vmatprep.subr.bf16.mxu0 %v2237_v16  ;;  %v2267_v16 = vld [vmem:[%s2882_s1 + $0x3c8] sm:$0xff]  }
  0x49   :  { %2062 = vmatpush3.bf16.msra.mxu1 %v2236_v12  ;;  %v1797_v12 = vcombine.low %v162_v4, %v168_v7 }
  0x4a   :  { %2063 = vmatprep.subr.bf16.mxu1 %v2239_v21  ;;  %v2271_v21 = vld [vmem:[%s2882_s1 + $0x3d0] sm:$0xff]  }
  0x4b   :  { %2042 = vmatpush3.bf16.msra.mxu0 %v2238_v18  ;;  %v2268_v18 = vld [vmem:[%s2882_s1 + $0x388] sm:$0xff]  }
  0x4c   :  { %2043 = vmatprep.subr.bf16.mxu0 %v2241_v22  ;;  %v2274_v22 = vld [vmem:[%s2882_s1 + $0x318] sm:$0xff]  }
  0x4d   :  { %2064 = vmatpush3.bf16.msra.mxu1 %v2240_v41  ;;  %v2272_v41 = vld [vmem:[%s2882_s1 + $0x390] sm:$0xff]  }
  0x4e   :  { %2065 = vmatprep.subr.bf16.mxu1 %v2243_v26  ;;  %v2280_v26 = vld [vmem:[%s2882_s1 + $0x3a0] sm:$0xff]  }
  0x4f   :  { %2044 = vmatpush3.bf16.msra.mxu0 %v2242_v23  ;;  %v2277_v23 = vld [vmem:[%s2882_s1 + $0x360] sm:$0xff]  }
  0x50   :  { %2045 = vmatprep.subr.bf16.mxu0 %v2245_v30  ;;  %v2284_v30 = vld [vmem:[%s2882_s1 + $0x3a8] sm:$0xff]  }
  0x51   :  { %2066 = vmatpush3.bf16.msra.mxu1 %v2244_v28  ;;  %v2282_v28 = vld [vmem:[%s2882_s1 + $0x328] sm:$0xff]  }
  0x52   :  { %2067 = vmatprep.subr.bf16.mxu1 %v2247_v34  ;;  %v161_v34 = vrot.slane %v2642_v17, 1  ;;  %v167_v17 = vrot.slane %v2649_v20, 1  ;;  %v2294_v20 = vld [vmem:[%s2882_s1 + $0x400] sm:$0xff]  }
  0x53   :  { %2046 = vmatpush3.bf16.msra.mxu0 %v2246_v32  ;;  %v2286_v32 = vld [vmem:[%s2882_s1 + $0x330] sm:$0xff]  }
  0x54   :  { %2047 = vmatprep.subr.bf16.mxu0 %v2249_v40  ;;  %v170_v40 = vrot.slane %v2610_v60, 1  ;;  %v2293_v60 = vld [vmem:[%s2882_s1 + $0x440] sm:$0xff]  }
  0x55   :  { %2068 = vmatpush3.bf16.msra.mxu1 %v2248_v38  ;;  %v164_v38 = vrot.slane %v2602_v54, 1  ;;  %v2291_v54 = vld [vmem:[%s2882_s1 + $0x3f8] sm:$0xff]  }
  0x56   :  { %2069 = vmatprep.subr.bf16.mxu1 %v2251_v47  ;;  %v1796_v47 = vcombine.low %v161_v34, %v167_v17 }
  0x57   :  { %2048 = vmatpush3.bf16.msra.mxu0 %v2250_v45  ;;  %v2292_v45 = vld [vmem:[%s2882_s1 + $0x3b8] sm:$0xff]   ;;  %v1799_v46 = vcombine.low %v164_v38, %v170_v40 }
  0x58   :  { %2049 = vmatprep.subr.bf16.mxu0 %v2253_v51  ;;  %v2298_v51 = vld [vmem:[%s2882_s1 + $0x410] sm:$0xff]  }
  0x59   :  { %2070 = vmatpush3.bf16.msra.mxu1 %v2252_v49  ;;  %v2296_v49 = vld [vmem:[%s2882_s1 + $0x408] sm:$0xff]  }
  0x5a   :  { %2071 = vmatprep.subr.bf16.mxu1 %v2255_v56  ;;  %v2303_v56 = vld [vmem:[%s2882_s1 + $0x468] sm:$0xff]  }
  0x5b   :  { %2050 = vmatpush3.bf16.msra.mxu0 %v2254_v53  ;;  %v2301_v53 = vld [vmem:[%s2882_s1 + $0x460] sm:$0xff]  }
  0x5c   :  { %2051 = vmatprep.subr.bf16.mxu0 %v2257_v62  ;;  %v2307_v62 = vld [vmem:[%s2882_s1 + $0x478] sm:$0xff]  }
  0x5d   :  { %2072 = vmatpush3.bf16.msra.mxu1 %v2256_v57  ;;  %v2304_v57 = vld [vmem:[%s2882_s1 + $0x428] sm:$0xff]  }
  0x5e   :  { %2073 = vmatprep.subr.bf16.mxu1 %v2259_v3 }
  0x5f   :  { %2052 = vmatpush3.bf16.msra.mxu0 %v2258_v63  ;;  %v2308_v63 = vld [vmem:[%s2882_s1 + $0x438] sm:$0xff]  }
  0x60   :  { %2081 = vmatprep.subr.bf16.mxu0 %v2261_v9 }
  0x61   :  { %2074 = vmatpush3.bf16.msra.mxu1 %v2260_v5 }
  0x62   :  { %1587 = vmatmul.mubr.bf16.vlgmr.msra.gmra.mrb[8].mxu0 %v1790_v6  ;;  %2103 = vmatprep.subr.bf16.mxu1 %v2263_v8 }
  0x63   :  { %2082 = vmatpush3.bf16.msra.mxu0 %v2262_v10  ;;  %1668 = vmatprep.mubr.bf16.mxu0 %v2573_v37  ;;  %v2270_v37 = vld [vmem:[%s2882_s1 + $0x310] sm:$0xff]  }
  0x64   :  { %1628 = vmatmul.mubr.bf16.vlgmr.msra.gmra.mrb[8].mxu1 %v1792_v11  ;;  %2083 = vmatprep.subr.bf16.mxu0 %v2265_v14 }
  0x65   :  { %2104 = vmatpush3.bf16.msra.mxu1 %v2264_v13  ;;  %1709 = vmatprep.mubr.bf16.mxu1 %v1797_v12 }
  0x66   :  { %2105 = vmatprep.subr.bf16.mxu1 %v2267_v16 }
  0x67   :  { %2084 = vmatpush3.bf16.msra.mxu0 %v2266_v15 }
  0x68   :  { %2085 = vmatprep.subr.bf16.mxu0 %v2269_v19 }
  0x69   :  { %2106 = vmatpush3.bf16.msra.mxu1 %v2268_v18 }
  0x6a   :  { %2107 = vmatprep.subr.bf16.mxu1 %v2271_v21 }
  0x6b   :  { %2086 = vmatpush3.bf16.msra.mxu0 %v2270_v37 }
  0x6c   :  { %2087 = vmatprep.subr.bf16.mxu0 %v2273_v61 }
  0x6d   :  { %2108 = vmatpush3.bf16.msra.mxu1 %v2272_v41 }
  0x6e   :  { %2109 = vmatprep.subr.bf16.mxu1 %v2275_v43 }
  0x6f   :  { %2088 = vmatpush3.bf16.msra.mxu0 %v2274_v22 }
  0x70   :  { %2089 = vmatprep.subr.bf16.mxu0 %v2277_v23 }
  0x71   :  { %2110 = vmatpush3.bf16.msra.mxu1 %v2276_v2 }
  0x72   :  { %2111 = vmatprep.subr.bf16.mxu1 %v2279_v25 }
  0x73   :  { %2090 = vmatpush3.bf16.msra.mxu0 %v2278_v24 }
  0x74   :  { %2091 = vmatprep.subr.bf16.mxu0 %v2281_v27 }
  0x75   :  { %2112 = vmatpush3.bf16.msra.mxu1 %v2280_v26 }
  0x76   :  { %2113 = vmatprep.subr.bf16.mxu1 %v2283_v29 }
  0x77   :  { %2092 = vmatpush3.bf16.msra.mxu0 %v2282_v28 }
  0x78   :  { %2093 = vmatprep.subr.bf16.mxu0 %v2285_v31 }
  0x79   :  { %2114 = vmatpush3.bf16.msra.mxu1 %v2284_v30 }
  0x7a   :  { %2115 = vmatprep.subr.bf16.mxu1 %v2287_v33 }
  0x7b   :  { %2094 = vmatpush3.bf16.msra.mxu0 %v2286_v32 }
  0x7c   :  { %2095 = vmatprep.subr.bf16.mxu0 %v2289_v39 }
  0x7d   :  { %2116 = vmatpush3.bf16.msra.mxu1 %v2288_v35 }
  0x7e   :  { %2117 = vmatprep.subr.bf16.mxu1 %v2291_v54 }
  0x7f   :  { %2096 = vmatpush3.bf16.msra.mxu0 %v2290_v44 }
  0x80   :  { %2125 = vmatprep.subr.bf16.mxu0 %v2293_v60 }
  0x81   :  { %2118 = vmatpush3.bf16.msra.mxu1 %v2292_v45 }
  0x82   :  { %1669 = vmatmul.mubr.bf16.vlgmr.msra.gmra.mrb[12].mxu0 %v2582_v42  ;;  %v2299_v42 = vld [vmem:[%s2882_s1 + $0x458] sm:$0xff]  }
  0x83   :  { %2126 = vmatpush3.bf16.msra.mxu0 %v2294_v20  ;;  %1750 = vmatprep.mubr.bf16.mxu0 %v1799_v46 }
  0x84   :  { %1710 = vmatmul.mubr.bf16.vlgmr.msra.gmra.mrb[12].mxu1 %v1796_v47  ;;  %2127 = vmatprep.subr.bf16.mxu0 %v2295_v48 }
  0x87   :  { %2128 = vmatpush3.bf16.msra.mxu0 %v2296_v49 }
  0x88   :  { %2129 = vmatprep.subr.bf16.mxu0 %v2297_v50 }
  0x8b   :  { %2130 = vmatpush3.bf16.msra.mxu0 %v2298_v51 }
  0x8c   :  { %2131 = vmatprep.subr.bf16.mxu0 %v2299_v42 }
  0x8f   :  { %2132 = vmatpush3.bf16.msra.mxu0 %v2300_v52 }
  0x90   :  { %2133 = vmatprep.subr.bf16.mxu0 %v2301_v53 }
  0x93   :  { %2134 = vmatpush3.bf16.msra.mxu0 %v2302_v55 }
  0x94   :  { %2135 = vmatprep.subr.bf16.mxu0 %v2303_v56 }
  0x97   :  { %2136 = vmatpush3.bf16.msra.mxu0 %v2304_v57 }
  0x98   :  { %2137 = vmatprep.subr.bf16.mxu0 %v2305_v58 }
  0x9b   :  { %2138 = vmatpush3.bf16.msra.mxu0 %v2306_v59 }
  0x9c   :  { %2139 = vmatprep.subr.bf16.mxu0 %v2307_v62 }
  0x9f   :  { %2140 = vmatpush3.bf16.msra.mxu0 %v2308_v63 }
  0xa2   :  { %1751 = vmatmul.mubr.bf16.vlgmr.msra.gmra.mrb[16].mxu0 %v2682_v36 }
  0xf5   :  { %v1965_v0 = vpop.f32.mrb[0].mxu0 }
  0xf6   :  { %v1966_v3 = vpop.f32.mrb[1].mxu0 }
  0xf7   :  { %v1967_v4 = vadd.f32 %v1966_v3, %v1965_v0  ;;  %v1968_v5 = vpop.f32.mrb[2].mxu0  ;;  %v1987_v9 = vpop.f32.mrb[0].mxu1 }
  0xf8   :  { %v1969_v6 = vpop.f32.mrb[3].mxu0  ;;  %v1988_v11 = vpop.f32.mrb[1].mxu1 }
  0xf9   :  { %v1425_v7 = vadd.f32 %v1967_v4, %v1781_v1  ;;  %v1970_v10 = vadd.f32 %v1969_v6, %v1968_v5  ;;  %v1989_v13 = vadd.f32 %v1988_v11, %v1987_v9  ;;  %v1990_v12 = vpop.f32.mrb[2].mxu1 }
  0xfa   :  { %v1991_v14 = vpop.f32.mrb[3].mxu1 }
  0xfb   :  { %v1428_v8 = vadd.f32 %v1970_v10, %v1781_v1  ;;  %v1466_v15 = vadd.f32 %v1989_v13, %v1425_v7  ;;  %v1992_v16 = vadd.f32 %v1991_v14, %v1990_v12 }
  0xfd   :  { %v1469_v36 = vadd.f32 %v1992_v16, %v1428_v8 }
 0x115   :  { %v2009_v18 = vpop.f32.mrb[4].mxu0 }
 0x116   :  { %v2010_v19 = vpop.f32.mrb[5].mxu0 }
 0x117   :  { %v2031_v37 = vpop.f32.mrb[4].mxu1  ;;  %v2011_v21 = vadd.f32 %v2010_v19, %v2009_v18  ;;  %v2012_v41 = vpop.f32.mrb[6].mxu0 }
 0x118   :  { %v2032_v61 = vpop.f32.mrb[5].mxu1  ;;  %v2013_v22 = vpop.f32.mrb[7].mxu0 }
 0x119   :  { %v2033_v43 = vadd.f32 %v2032_v61, %v2031_v37  ;;  %v2034_v2 = vpop.f32.mrb[6].mxu1  ;;  %v1507_v23 = vadd.f32 %v2011_v21, %v1466_v15  ;;  %v2014_v24 = vadd.f32 %v2013_v22, %v2012_v41 }
 0x11a   :  { %v2035_v25 = vpop.f32.mrb[7].mxu1 }
 0x11b   :  { %v2036_v26 = vadd.f32 %v2035_v25, %v2034_v2  ;;  %v1510_v27 = vadd.f32 %v2014_v24, %v1469_v36  ;;  %v1548_v28 = vadd.f32 %v2033_v43, %v1507_v23 }
 0x11d   :  { %v1551_v29 = vadd.f32 %v2036_v26, %v1510_v27 }
 0x135   :  { %v2053_v30 = vpop.f32.mrb[8].mxu0 }
 0x136   :  { %v2054_v31 = vpop.f32.mrb[9].mxu0 }
 0x137   :  { %v2055_v32 = vadd.f32 %v2054_v31, %v2053_v30  ;;  %v2056_v33 = vpop.f32.mrb[10].mxu0  ;;  %v2075_v34 = vpop.f32.mrb[8].mxu1 }
 0x138   :  { %v2057_v35 = vpop.f32.mrb[11].mxu0  ;;  %v2076_v38 = vpop.f32.mrb[9].mxu1 }
 0x139   :  { %v1589_v39 = vadd.f32 %v2055_v32, %v1548_v28  ;;  %v2058_v40 = vadd.f32 %v2057_v35, %v2056_v33  ;;  %v2077_v44 = vadd.f32 %v2076_v38, %v2075_v34  ;;  %v2078_v17 = vpop.f32.mrb[10].mxu1 }
 0x13a   :  { %v2079_v54 = vpop.f32.mrb[11].mxu1 }
 0x13b   :  { %v1592_v45 = vadd.f32 %v2058_v40, %v1551_v29  ;;  %v1630_v60 = vadd.f32 %v2077_v44, %v1589_v39  ;;  %v2080_v46 = vadd.f32 %v2079_v54, %v2078_v17 }
 0x13d   :  { %v1633_v20 = vadd.f32 %v2080_v46, %v1592_v45 }
 0x155   :  { %v2097_v47 = vpop.f32.mrb[12].mxu0 }
 0x156   :  { %v2098_v48 = vpop.f32.mrb[13].mxu0 }
 0x157   :  { %v2099_v49 = vadd.f32 %v2098_v48, %v2097_v47  ;;  %v2100_v50 = vpop.f32.mrb[14].mxu0  ;;  %v2119_v51 = vpop.f32.mrb[12].mxu1 }
 0x158   :  { %v2101_v42 = vpop.f32.mrb[15].mxu0  ;;  %v2120_v52 = vpop.f32.mrb[13].mxu1 }
 0x159   :  { %v1671_v53 = vadd.f32 %v2099_v49, %v1630_v60  ;;  %v2102_v55 = vadd.f32 %v2101_v42, %v2100_v50  ;;  %v2121_v56 = vadd.f32 %v2120_v52, %v2119_v51  ;;  %v2122_v57 = vpop.f32.mrb[14].mxu1 }
 0x15a   :  { %v2123_v58 = vpop.f32.mrb[15].mxu1 }
 0x15b   :  { %v1674_v59 = vadd.f32 %v2102_v55, %v1633_v20  ;;  %v1712_v62 = vadd.f32 %v2121_v56, %v1671_v53  ;;  %v2124_v63 = vadd.f32 %v2123_v58, %v2122_v57 }
 0x15d   :  { %v1715_v0 = vadd.f32 %v2124_v63, %v1674_v59 }
 0x175   :  { %v2141_v1 = vpop.f32.mrb[16].mxu0 }
 0x176   :  { %v2142_v3 = vpop.f32.mrb[17].mxu0 }
 0x177   :  { %v2143_v4 = vadd.f32 %v2142_v3, %v2141_v1  ;;  %v2144_v5 = vpop.f32.mrb[18].mxu0 }
 0x178   :  { %v2145_v6 = vpop.f32.mrb[19].mxu0 }
 0x179   :  { %v1753_v7 = vadd.f32 %v2143_v4, %v1712_v62  ;;  %v2146_v9 = vadd.f32 %v2145_v6, %v2144_v5 }
 0x17b   :  { %v1756_v10 = vadd.f32 %v2146_v9, %v1715_v0  ;;  %v1759_v11 = vmax.f32 %v1753_v7, 0.0 }
 0x17d   :  { %v1760_v8 = vmax.f32 %v1756_v10, 0.0 }
 0x17f   :  { %v1947_v13 = vpack.c.bf16 %v1760_v8, %v1759_v11 }
 0x181   :  { %1948 = vst [vmem:[%s2885_s3] sm:$0xff] %v1947_v13  }

// kernel: conv_vae_forward.13
= control target key start
LH: loop header
LB: loop body
LE: loop exit
PB: predicated region body
PF: predicated region fallthrough
CT: control target
= control target key end

     0   :  { %v780_v1 = vmov 0   ;;  %vm46_vm0 = vcmask 130048   ;;  %s1024_s1 = inlined_call_operand.vmem [shape: bf16[16,256], index: 1, kind: input, shape index: {}]   ;;  %s1025_s0 = inlined_call_operand.vmem [shape: bf16[8,16], index: 0, kind: input, shape index: {}]   ;;  %s1026_s3 = inlined_call_operand.vmem [shape: bf16[256,512], index: 3, kind: input, shape index: {}]   ;;  %s1027_s2 = inlined_call_operand.vmem [shape: f32[1,256], index: 2, kind: input, shape index: {}]   ;;  %s1028_s4 = inlined_call_operand.vmem [shape: f32[1,512], index: 4, kind: input, shape index: {}]   ;;  %s1029_s5 = inlined_call_operand.vmem [shape: bf16[8,512], index: 5, kind: output, shape index: {}]  }
   0x1   :  { %v681_v0 = vld [vmem:[%s1024_s1 + $0x4] ss:$8 sps:$4 sm:$0xff]   ;;  %82 = vmatprep.mubr.bf16.mxu0 %v780_v1  ;;  %v683_v2 = vld [vmem:[%s1024_s1] ss:$8 sps:$4 sm:$0xff]  }
   0x2   :  { %v21_v3 = vld [vmem:[%s1025_s0] sm:$0xf]  ;;  %50 = vmatprep.subr.bf16.mxu0 %v681_v0  ;;  %v684_v4 = vld [vmem:[%s1026_s3 + $0x4] ss:$16 sps:$4 sm:$0xff]   ;;  %v686_v5 = vld [vmem:[%s1026_s3 + $0x8] ss:$16 sps:$4 sm:$0xff]  }
   0x3   :  { %51 = vmatpush1.bf16.msra.mxu0 %v683_v2  ;;  %v688_v6 = vld [vmem:[%s1026_s3 + $0xc] ss:$16 sps:$4 sm:$0xff]   ;;  %501 = vmatprep.subr.bf16.mxu1 %v684_v4  ;;  %v689_v7 = vld [vmem:[%s1026_s3] ss:$16 sps:$4 sm:$0xff]   ;;  %v690_v8 = vld [vmem:[%s1026_s3 + $0x24] ss:$16 sps:$4 sm:$0xff]   ;;  %v26_v4 = vlaneseq }
   0x4   :  { %542 = vmatprep.subr.bf16.mxu0 %v688_v6  ;;  %502 = vmatpush1.bf16.msra.mxu1 %v689_v7  ;;  %v692_v9 = vld [vmem:[%s1026_s3 + $0x28] ss:$16 sps:$4 sm:$0xff]   ;;  %v694_v10 = vld [vmem:[%s1026_s3 + $0x2c] ss:$16 sps:$4 sm:$0xff]   ;;  %v695_v11 = vld [vmem:[%s1026_s3 + $0x20] ss:$16 sps:$4 sm:$0xff]  }
   0x5   :  { %503 = vmatprep.subr.bf16.mxu1 %v690_v8  ;;  %v696_v12 = vld [vmem:[%s1026_s3 + $0x44] ss:$16 sps:$4 sm:$0xff]   ;;  %v700_v13 = vld [vmem:[%s1026_s3 + $0x4c] ss:$16 sps:$4 sm:$0xff]   ;;  %v701_v14 = vld [vmem:[%s1026_s3 + $0x40] ss:$16 sps:$4 sm:$0xff]  }
   0x6   :  { %611 = vmatmul.mubr.msk.bf16.vlgmr.msra.gmra.mrb[0].mxu0 %vm46_vm0, %v21_v3  ;;  %v698_v15 = vld [vmem:[%s1026_s3 + $0x48] ss:$16 sps:$4 sm:$0xff]   ;;  %v702_v16 = vld [vmem:[%s1026_s3 + $0x64] ss:$16 sps:$4 sm:$0xff]   ;;  %v706_v17 = vld [vmem:[%s1026_s3 + $0x6c] ss:$16 sps:$4 sm:$0xff]  }
   0x7   :  { %543 = vmatpush1.bf16.msra.mxu0 %v686_v5  ;;  %v704_v18 = vld [vmem:[%s1026_s3 + $0x68] ss:$16 sps:$4 sm:$0xff]   ;;  %v707_v19 = vld [vmem:[%s1026_s3 + $0x60] ss:$16 sps:$4 sm:$0xff]   ;;  %v708_v20 = vld [vmem:[%s1026_s3 + $0x84] ss:$16 sps:$4 sm:$0xff]  }
   0x8   :  { %544 = vmatprep.subr.bf16.mxu0 %v694_v10  ;;  %504 = vmatpush1.bf16.msra.mxu1 %v695_v11  ;;  %v712_v21 = vld [vmem:[%s1026_s3 + $0x8c] ss:$16 sps:$4 sm:$0xff]   ;;  %v713_v22 = vld [vmem:[%s1026_s3 + $0x80] ss:$16 sps:$4 sm:$0xff]   ;;  %v710_v23 = vld [vmem:[%s1026_s3 + $0x88] ss:$16 sps:$4 sm:$0xff]  }
   0x9   :  { %505 = vmatprep.subr.bf16.mxu1 %v696_v12  ;;  %v714_v24 = vld [vmem:[%s1026_s3 + $0xa4] ss:$16 sps:$4 sm:$0xff]   ;;  %v718_v25 = vld [vmem:[%s1026_s3 + $0xac] ss:$16 sps:$4 sm:$0xff]   ;;  %v716_v26 = vld [vmem:[%s1026_s3 + $0xa8] ss:$16 sps:$4 sm:$0xff]  }
   0xa   :  { %v719_v27 = vld [vmem:[%s1026_s3 + $0xa0] ss:$16 sps:$4 sm:$0xff]   ;;  %v720_v28 = vld [vmem:[%s1026_s3 + $0xc4] ss:$16 sps:$4 sm:$0xff]   ;;  %v724_v29 = vld [vmem:[%s1026_s3 + $0xcc] ss:$16 sps:$4 sm:$0xff]  }
   0xb   :  { %545 = vmatpush1.bf16.msra.mxu0 %v692_v9  ;;  %v725_v30 = vld [vmem:[%s1026_s3 + $0xc0] ss:$16 sps:$4 sm:$0xff]   ;;  %v722_v31 = vld [vmem:[%s1026_s3 + $0xc8] ss:$16 sps:$4 sm:$0xff]   ;;  %v726_v32 = vld [vmem:[%s1026_s3 + $0xe4] ss:$16 sps:$4 sm:$0xff]  }
   0xc   :  { %546 = vmatprep.subr.bf16.mxu0 %v700_v13  ;;  %506 = vmatpush1.bf16.msra.mxu1 %v701_v14  ;;  %v730_v33 = vld [vmem:[%s1026_s3 + $0xec] ss:$16 sps:$4 sm:$0xff]   ;;  %v728_v34 = vld [vmem:[%s1026_s3 + $0xe8] ss:$16 sps:$4 sm:$0xff]   ;;  %v731_v35 = vld [vmem:[%s1026_s3 + $0xe0] ss:$16 sps:$4 sm:$0xff]  }
   0xd   :  { %507 = vmatprep.subr.bf16.mxu1 %v702_v16  ;;  %v732_v36 = vld [vmem:[%s1026_s3 + $0x104] ss:$16 sps:$4 sm:$0xff]   ;;  %v736_v37 = vld [vmem:[%s1026_s3 + $0x10c] ss:$16 sps:$4 sm:$0xff]   ;;  %v737_v38 = vld [vmem:[%s1026_s3 + $0x100] ss:$16 sps:$4 sm:$0xff]  }
   0xe   :  { %v734_v39 = vld [vmem:[%s1026_s3 + $0x108] ss:$16 sps:$4 sm:$0xff]   ;;  %v738_v40 = vld [vmem:[%s1026_s3 + $0x124] ss:$16 sps:$4 sm:$0xff]   ;;  %v742_v41 = vld [vmem:[%s1026_s3 + $0x12c] ss:$16 sps:$4 sm:$0xff]  }
   0xf   :  { %547 = vmatpush1.bf16.msra.mxu0 %v698_v15  ;;  %v740_v42 = vld [vmem:[%s1026_s3 + $0x128] ss:$16 sps:$4 sm:$0xff]   ;;  %v743_v43 = vld [vmem:[%s1026_s3 + $0x120] ss:$16 sps:$4 sm:$0xff]   ;;  %v744_v44 = vld [vmem:[%s1026_s3 + $0x144] ss:$16 sps:$4 sm:$0xff]  }
  0x10   :  { %548 = vmatprep.subr.bf16.mxu0 %v706_v17  ;;  %508 = vmatpush1.bf16.msra.mxu1 %v707_v19  ;;  %v748_v45 = vld [vmem:[%s1026_s3 + $0x14c] ss:$16 sps:$4 sm:$0xff]   ;;  %v749_v46 = vld [vmem:[%s1026_s3 + $0x140] ss:$16 sps:$4 sm:$0xff]   ;;  %v746_v47 = vld [vmem:[%s1026_s3 + $0x148] ss:$16 sps:$4 sm:$0xff]  }
  0x11   :  { %509 = vmatprep.subr.bf16.mxu1 %v708_v20  ;;  %v750_v48 = vld [vmem:[%s1026_s3 + $0x164] ss:$16 sps:$4 sm:$0xff]   ;;  %v754_v49 = vld [vmem:[%s1026_s3 + $0x16c] ss:$16 sps:$4 sm:$0xff]   ;;  %v755_v50 = vld [vmem:[%s1026_s3 + $0x160] ss:$16 sps:$4 sm:$0xff]  }
  0x12   :  { %v752_v51 = vld [vmem:[%s1026_s3 + $0x168] ss:$16 sps:$4 sm:$0xff]   ;;  %v756_v52 = vld [vmem:[%s1026_s3 + $0x184] ss:$16 sps:$4 sm:$0xff]   ;;  %v760_v53 = vld [vmem:[%s1026_s3 + $0x18c] ss:$16 sps:$4 sm:$0xff]  }
  0x13   :  { %549 = vmatpush1.bf16.msra.mxu0 %v704_v18  ;;  %v761_v54 = vld [vmem:[%s1026_s3 + $0x180] ss:$16 sps:$4 sm:$0xff]   ;;  %v758_v55 = vld [vmem:[%s1026_s3 + $0x188] ss:$16 sps:$4 sm:$0xff]   ;;  %v762_v56 = vld [vmem:[%s1026_s3 + $0x1a4] ss:$16 sps:$4 sm:$0xff]  }
  0x14   :  { %550 = vmatprep.subr.bf16.mxu0 %v712_v21  ;;  %510 = vmatpush1.bf16.msra.mxu1 %v713_v22  ;;  %v766_v57 = vld [vmem:[%s1026_s3 + $0x1ac] ss:$16 sps:$4 sm:$0xff]   ;;  %v767_v58 = vld [vmem:[%s1026_s3 + $0x1a0] ss:$16 sps:$4 sm:$0xff]   ;;  %v764_v59 = vld [vmem:[%s1026_s3 + $0x1a8] ss:$16 sps:$4 sm:$0xff]  }
  0x15   :  { %511 = vmatprep.subr.bf16.mxu1 %v714_v24  ;;  %v768_v60 = vld [vmem:[%s1026_s3 + $0x1c4] ss:$16 sps:$4 sm:$0xff]   ;;  %v772_v61 = vld [vmem:[%s1026_s3 + $0x1cc] ss:$16 sps:$4 sm:$0xff]   ;;  %v770_v62 = vld [vmem:[%s1026_s3 + $0x1c8] ss:$16 sps:$4 sm:$0xff]  }
  0x16   :  { %v773_v63 = vld [vmem:[%s1026_s3 + $0x1c0] ss:$16 sps:$4 sm:$0xff]   ;;  %v774_v0 = vld [vmem:[%s1026_s3 + $0x1e4] ss:$16 sps:$4 sm:$0xff]   ;;  %v778_v1 = vld [vmem:[%s1026_s3 + $0x1ec] ss:$16 sps:$4 sm:$0xff]  }
  0x17   :  { %551 = vmatpush1.bf16.msra.mxu0 %v710_v23  ;;  %v776_v2 = vld [vmem:[%s1026_s3 + $0x1e8] ss:$16 sps:$4 sm:$0xff]   ;;  %v779_v3 = vld [vmem:[%s1026_s3 + $0x1e0] ss:$16 sps:$4 sm:$0xff]   ;;  %v27_v5 = vshrl.u32 %v26_v4, 7 }
  0x18   :  { %552 = vmatprep.subr.bf16.mxu0 %v718_v25  ;;  %512 = vmatpush1.bf16.msra.mxu1 %v719_v27  ;;  %v24_v7 = vld [vmem:[%s1027_s2] sm:$0x3] }
  0x19   :  { %513 = vmatprep.subr.bf16.mxu1 %v720_v28  ;;  %v28_v6 = vsub.s32 0, %v27_v5  ;;  %v32_v8 = vsub.s32 1, %v27_v5  ;;  %v171_v21 = vsub.s32 2, %v27_v5  ;;  %v159_v22 = vld [vmem:[%s1028_s4] sm:$0xf]  ;;  %v175_v23 = vsub.s32 3, %v27_v5 }
  0x1b   :  { %553 = vmatpush1.bf16.msra.mxu0 %v716_v26  ;;  %v29_v9 = vrot.slane %v24_v7, %v28_v6  ;;  %v33_v10 = vrot.slane %v24_v7, %v32_v8  ;;  %v164_v24 = vrot.slane %v159_v22, %v28_v6  ;;  %v172_v25 = vrot.slane %v159_v22, %v171_v21 }
  0x1c   :  { %554 = vmatprep.subr.bf16.mxu0 %v724_v29  ;;  %514 = vmatpush1.bf16.msra.mxu1 %v725_v30  ;;  %v168_v26 = vrot.slane %v159_v22, %v32_v8  ;;  %v176_v27 = vrot.slane %v159_v22, %v175_v23 }
  0x1d   :  { %515 = vmatprep.subr.bf16.mxu1 %v726_v32 }
  0x1f   :  { %555 = vmatpush1.bf16.msra.mxu0 %v722_v31 }
  0x20   :  { %556 = vmatprep.subr.bf16.mxu0 %v730_v33  ;;  %516 = vmatpush1.bf16.msra.mxu1 %v731_v35 }
  0x21   :  { %517 = vmatprep.subr.bf16.mxu1 %v732_v36 }
  0x23   :  { %557 = vmatpush1.bf16.msra.mxu0 %v728_v34 }
  0x24   :  { %558 = vmatprep.subr.bf16.mxu0 %v736_v37  ;;  %518 = vmatpush1.bf16.msra.mxu1 %v737_v38 }
  0x25   :  { %519 = vmatprep.subr.bf16.mxu1 %v738_v40 }
  0x27   :  { %559 = vmatpush1.bf16.msra.mxu0 %v734_v39 }
  0x28   :  { %560 = vmatprep.subr.bf16.mxu0 %v742_v41  ;;  %520 = vmatpush1.bf16.msra.mxu1 %v743_v43 }
  0x29   :  { %521 = vmatprep.subr.bf16.mxu1 %v744_v44 }
  0x2b   :  { %561 = vmatpush1.bf16.msra.mxu0 %v740_v42 }
  0x2c   :  { %562 = vmatprep.subr.bf16.mxu0 %v748_v45  ;;  %522 = vmatpush1.bf16.msra.mxu1 %v749_v46 }
  0x2d   :  { %523 = vmatprep.subr.bf16.mxu1 %v750_v48 }
  0x2f   :  { %563 = vmatpush1.bf16.msra.mxu0 %v746_v47 }
  0x30   :  { %564 = vmatprep.subr.bf16.mxu0 %v754_v49  ;;  %524 = vmatpush1.bf16.msra.mxu1 %v755_v50 }
  0x31   :  { %525 = vmatprep.subr.bf16.mxu1 %v756_v52 }
  0x33   :  { %565 = vmatpush1.bf16.msra.mxu0 %v752_v51 }
  0x34   :  { %566 = vmatprep.subr.bf16.mxu0 %v760_v53  ;;  %526 = vmatpush1.bf16.msra.mxu1 %v761_v54 }
  0x35   :  { %527 = vmatprep.subr.bf16.mxu1 %v762_v56 }
  0x37   :  { %567 = vmatpush1.bf16.msra.mxu0 %v758_v55 }
  0x38   :  { %568 = vmatprep.subr.bf16.mxu0 %v766_v57  ;;  %528 = vmatpush1.bf16.msra.mxu1 %v767_v58 }
  0x39   :  { %529 = vmatprep.subr.bf16.mxu1 %v768_v60 }
  0x3b   :  { %569 = vmatpush1.bf16.msra.mxu0 %v764_v59 }
  0x3c   :  { %570 = vmatprep.subr.bf16.mxu0 %v772_v61  ;;  %530 = vmatpush1.bf16.msra.mxu1 %v773_v63 }
  0x3d   :  { %531 = vmatprep.subr.bf16.mxu1 %v774_v0 }
  0x3f   :  { %571 = vmatpush1.bf16.msra.mxu0 %v770_v62 }
  0x40   :  { %572 = vmatprep.subr.bf16.mxu0 %v778_v1  ;;  %532 = vmatpush1.bf16.msra.mxu1 %v779_v3 }
  0x43   :  { %573 = vmatpush1.bf16.msra.mxu0 %v776_v2 }
  0xd9   :  { %v84_v11 = vpop.f32.mrb[0].mxu0 }
  0xda   :  { %v85_v12 = vadd.f32 %v84_v11, %v29_v9  ;;  %v86_v13 = vpop.f32.mrb[1].mxu0 }
  0xdb   :  { %v87_v14 = vadd.f32 %v86_v13, %v33_v10  ;;  %v88_v15 = vpop.f32.mrb[2].mxu0 }
  0xdc   :  { %v91_v16 = vmax.f32 %v85_v12, 0.0  ;;  %v89_v17 = vpop.f32.mrb[3].mxu0 }
  0xdd   :  { %v92_v18 = vmax.f32 %v87_v14, 0.0 }
  0xde   :  { %v93_v20 = vpack.c.bf16 %v91_v16, %v91_v16 }
  0xdf   :  { %v94_v19 = vpack.c.bf16 %v92_v18, %v92_v18 }
  0xe1   :  { %533 = vmatprep.mubr.bf16.mxu1 %v94_v19  ;;  %574 = vmatprep.mubr.bf16.mxu0 %v94_v19 }
  0xe2   :  { %534 = vmatmul.mubr.bf16.vlgmr.msra.gmra.mrb[0].mxu1 %v93_v20  ;;  %575 = vmatmul.mubr.bf16.vlgmr.msra.gmra.mrb[4].mxu0 %v93_v20 }
 0x1b5   :  { %v535_v28 = vpop.f32.mrb[0].mxu1  ;;  %v576_v29 = vpop.f32.mrb[4].mxu0 }
 0x1b6   :  { %v536_v30 = vadd.f32 %v535_v28, %v164_v24  ;;  %v577_v31 = vadd.f32 %v576_v29, %v172_v25  ;;  %v537_v32 = vpop.f32.mrb[1].mxu1  ;;  %v578_v33 = vpop.f32.mrb[5].mxu0 }
 0x1b7   :  { %v538_v34 = vadd.f32 %v537_v32, %v168_v26  ;;  %v579_v35 = vadd.f32 %v578_v33, %v176_v27  ;;  %v539_v36 = vpop.f32.mrb[2].mxu1  ;;  %v580_v37 = vpop.f32.mrb[6].mxu0 }
 0x1b8   :  { %v583_v38 = vmax.f32 %v536_v30, 0.0  ;;  %v585_v39 = vmax.f32 %v577_v31, 0.0  ;;  %v540_v40 = vpop.f32.mrb[3].mxu1  ;;  %v581_v41 = vpop.f32.mrb[7].mxu0 }
 0x1b9   :  { %v584_v42 = vmax.f32 %v538_v34, 0.0  ;;  %v586_v43 = vmax.f32 %v579_v35, 0.0 }
 0x1bb   :  { %v678_v44 = vpack.c.bf16 %v584_v42, %v583_v38  ;;  %v679_v45 = vpack.c.bf16 %v586_v43, %v585_v39 }
 0x1bd   :  { %603 = vst [vmem:[%s1029_s5] sm:$0xff] %v678_v44  ;;  %604 = vst [vmem:[%s1029_s5 + $0x8] sm:$0xff] %v679_v45 }

// kernel: conv_vae_forward.14
= control target key start
LH: loop header
LB: loop body
LE: loop exit
PB: predicated region body
PF: predicated region fallthrough
CT: control target
= control target key end

     0   :  { %s3653_s1 = inlined_call_operand.vmem [shape: bf16[768,512], index: 1, kind: input, shape index: {}]   ;;  %s3654_s0 = inlined_call_operand.vmem [shape: bf16[8,10,256], index: 0, kind: input, shape index: {}]   ;;  %s3655_s2 = inlined_call_operand.vmem [shape: f32[1,512], index: 2, kind: input, shape index: {}]   ;;  %s3656_s3 = inlined_call_operand.vmem [shape: bf16[8,8,512], index: 3, kind: output, shape index: {}]  }
   0x1   :  { %v2454_v0 = vld [vmem:[%s3653_s1 + $0x4] ss:$16 sps:$4 sm:$0xff]   ;;  %v2456_v1 = vld [vmem:[%s3653_s1 + $0xc] ss:$16 sps:$4 sm:$0xff]   ;;  %v2458_v2 = vld [vmem:[%s3653_s1] ss:$16 sps:$4 sm:$0xff]  }
   0x2   :  { %1476 = vmatprep.subr.bf16.mxu0 %v2454_v0  ;;  %v2459_v3 = vld [vmem:[%s3653_s1 + $0x8] ss:$16 sps:$4 sm:$0xff]   ;;  %1695 = vmatprep.subr.bf16.mxu1 %v2456_v1  ;;  %v2460_v4 = vld [vmem:[%s3653_s1 + $0x24] ss:$16 sps:$4 sm:$0xff]   ;;  %v2462_v5 = vld [vmem:[%s3653_s1 + $0x2c] ss:$16 sps:$4 sm:$0xff]  }
   0x3   :  { %1477 = vmatpush1.bf16.msra.mxu0 %v2458_v2  ;;  %1696 = vmatpush1.bf16.msra.mxu1 %v2459_v3  ;;  %v2464_v6 = vld [vmem:[%s3653_s1 + $0x20] ss:$16 sps:$4 sm:$0xff]   ;;  %v2465_v7 = vld [vmem:[%s3653_s1 + $0x28] ss:$16 sps:$4 sm:$0xff]   ;;  %v2466_v8 = vld [vmem:[%s3653_s1 + $0x44] ss:$16 sps:$4 sm:$0xff]  }
   0x4   :  { %1478 = vmatprep.subr.bf16.mxu0 %v2460_v4  ;;  %1697 = vmatprep.subr.bf16.mxu1 %v2462_v5  ;;  %v2468_v9 = vld [vmem:[%s3653_s1 + $0x4c] ss:$16 sps:$4 sm:$0xff]   ;;  %v2470_v10 = vld [vmem:[%s3653_s1 + $0x40] ss:$16 sps:$4 sm:$0xff]   ;;  %v2471_v11 = vld [vmem:[%s3653_s1 + $0x48] ss:$16 sps:$4 sm:$0xff]  }
   0x5   :  { %v2472_v12 = vld [vmem:[%s3653_s1 + $0x64] ss:$16 sps:$4 sm:$0xff]   ;;  %v2474_v13 = vld [vmem:[%s3653_s1 + $0x6c] ss:$16 sps:$4 sm:$0xff]   ;;  %v2476_v14 = vld [vmem:[%s3653_s1 + $0x60] ss:$16 sps:$4 sm:$0xff]  }
   0x6   :  { %v2477_v15 = vld [vmem:[%s3653_s1 + $0x68] ss:$16 sps:$4 sm:$0xff]   ;;  %v2478_v16 = vld [vmem:[%s3653_s1 + $0x84] ss:$16 sps:$4 sm:$0xff]   ;;  %v2480_v17 = vld [vmem:[%s3653_s1 + $0x8c] ss:$16 sps:$4 sm:$0xff]  }
   0x7   :  { %1479 = vmatpush1.bf16.msra.mxu0 %v2464_v6  ;;  %1698 = vmatpush1.bf16.msra.mxu1 %v2465_v7  ;;  %v2482_v18 = vld [vmem:[%s3653_s1 + $0x80] ss:$16 sps:$4 sm:$0xff]   ;;  %v2483_v19 = vld [vmem:[%s3653_s1 + $0x88] ss:$16 sps:$4 sm:$0xff]   ;;  %v2484_v20 = vld [vmem:[%s3653_s1 + $0xa4] ss:$16 sps:$4 sm:$0xff]  }
   0x8   :  { %1480 = vmatprep.subr.bf16.mxu0 %v2466_v8  ;;  %1699 = vmatprep.subr.bf16.mxu1 %v2468_v9  ;;  %v2486_v21 = vld [vmem:[%s3653_s1 + $0xac] ss:$16 sps:$4 sm:$0xff]   ;;  %v2488_v22 = vld [vmem:[%s3653_s1 + $0xa0] ss:$16 sps:$4 sm:$0xff]   ;;  %v2489_v23 = vld [vmem:[%s3653_s1 + $0xa8] ss:$16 sps:$4 sm:$0xff]  }
   0x9   :  { %v2490_v24 = vld [vmem:[%s3653_s1 + $0xc4] ss:$16 sps:$4 sm:$0xff]   ;;  %v2492_v25 = vld [vmem:[%s3653_s1 + $0xcc] ss:$16 sps:$4 sm:$0xff]   ;;  %v2494_v26 = vld [vmem:[%s3653_s1 + $0xc0] ss:$16 sps:$4 sm:$0xff]  }
   0xa   :  { %v2495_v27 = vld [vmem:[%s3653_s1 + $0xc8] ss:$16 sps:$4 sm:$0xff]   ;;  %v2496_v28 = vld [vmem:[%s3653_s1 + $0xe4] ss:$16 sps:$4 sm:$0xff]   ;;  %v2498_v29 = vld [vmem:[%s3653_s1 + $0xec] ss:$16 sps:$4 sm:$0xff]  }
   0xb   :  { %1481 = vmatpush1.bf16.msra.mxu0 %v2470_v10  ;;  %1700 = vmatpush1.bf16.msra.mxu1 %v2471_v11  ;;  %v2500_v30 = vld [vmem:[%s3653_s1 + $0xe0] ss:$16 sps:$4 sm:$0xff]   ;;  %v2501_v31 = vld [vmem:[%s3653_s1 + $0xe8] ss:$16 sps:$4 sm:$0xff]   ;;  %v2502_v32 = vld [vmem:[%s3653_s1 + $0x104] ss:$16 sps:$4 sm:$0xff]  }
   0xc   :  { %1482 = vmatprep.subr.bf16.mxu0 %v2472_v12  ;;  %1701 = vmatprep.subr.bf16.mxu1 %v2474_v13  ;;  %v2504_v33 = vld [vmem:[%s3653_s1 + $0x10c] ss:$16 sps:$4 sm:$0xff]   ;;  %v2506_v34 = vld [vmem:[%s3653_s1 + $0x100] ss:$16 sps:$4 sm:$0xff]   ;;  %v2507_v35 = vld [vmem:[%s3653_s1 + $0x108] ss:$16 sps:$4 sm:$0xff]  }
   0xd   :  { %v2508_v36 = vld [vmem:[%s3653_s1 + $0x124] ss:$16 sps:$4 sm:$0xff]   ;;  %v2510_v37 = vld [vmem:[%s3653_s1 + $0x12c] ss:$16 sps:$4 sm:$0xff]   ;;  %v2512_v38 = vld [vmem:[%s3653_s1 + $0x120] ss:$16 sps:$4 sm:$0xff]  }
   0xe   :  { %v2513_v39 = vld [vmem:[%s3653_s1 + $0x128] ss:$16 sps:$4 sm:$0xff]   ;;  %v2514_v40 = vld [vmem:[%s3653_s1 + $0x144] ss:$16 sps:$4 sm:$0xff]   ;;  %v2516_v41 = vld [vmem:[%s3653_s1 + $0x14c] ss:$16 sps:$4 sm:$0xff]  }
   0xf   :  { %1483 = vmatpush1.bf16.msra.mxu0 %v2476_v14  ;;  %1702 = vmatpush1.bf16.msra.mxu1 %v2477_v15  ;;  %v2518_v42 = vld [vmem:[%s3653_s1 + $0x140] ss:$16 sps:$4 sm:$0xff]   ;;  %v2519_v43 = vld [vmem:[%s3653_s1 + $0x148] ss:$16 sps:$4 sm:$0xff]   ;;  %v2520_v44 = vld [vmem:[%s3653_s1 + $0x164] ss:$16 sps:$4 sm:$0xff]  }
  0x10   :  { %1484 = vmatprep.subr.bf16.mxu0 %v2478_v16  ;;  %1703 = vmatprep.subr.bf16.mxu1 %v2480_v17  ;;  %v2522_v45 = vld [vmem:[%s3653_s1 + $0x16c] ss:$16 sps:$4 sm:$0xff]   ;;  %v2524_v46 = vld [vmem:[%s3653_s1 + $0x160] ss:$16 sps:$4 sm:$0xff]   ;;  %v2525_v47 = vld [vmem:[%s3653_s1 + $0x168] ss:$16 sps:$4 sm:$0xff]  }
  0x11   :  { %v14_v48 = vld [vmem:[%s3654_s0] sm:$0xff]  ;;  %v15_v49 = vld [vmem:[%s3654_s0 + $0x8] sm:$0x11]  ;;  %v16_v50 = vld [vmem:[%s3654_s0 + $0x10] sm:$0xff] }
  0x12   :  { %v17_v51 = vld [vmem:[%s3654_s0 + $0x18] sm:$0x11]  ;;  %v2526_v52 = vld [vmem:[%s3653_s1 + $0x184] ss:$16 sps:$4 sm:$0xff]   ;;  %v2945_v53 = vcombine.low %v14_v48, %v15_v49  ;;  %v2111_v56 = vcombine.high %v14_v48, %v16_v50  ;;  %v2530_v61 = vld [vmem:[%s3653_s1 + $0x180] ss:$16 sps:$4 sm:$0xff]   ;;  %v3000_v16 = vcombine.high %v14_v48, %v15_v49 }
  0x13   :  { %1485 = vmatpush1.bf16.msra.mxu0 %v2482_v18  ;;  %1704 = vmatpush1.bf16.msra.mxu1 %v2483_v19  ;;  %v2947_v54 = vcombine.low %v16_v50, %v17_v51  ;;  %v2528_v55 = vld [vmem:[%s3653_s1 + $0x18c] ss:$16 sps:$4 sm:$0xff]   ;;  %v2531_v62 = vld [vmem:[%s3653_s1 + $0x188] ss:$16 sps:$4 sm:$0xff]   ;;  %v2532_v63 = vld [vmem:[%s3653_s1 + $0x1a4] ss:$16 sps:$4 sm:$0xff]   ;;  %v3002_v17 = vcombine.high %v16_v50, %v17_v51 }
  0x14   :  { %1486 = vmatprep.subr.bf16.mxu0 %v2484_v20  ;;  %1705 = vmatprep.subr.bf16.mxu1 %v2486_v21  ;;  %v95_v57 = vshrl.u32 %v2945_v53, 16  ;;  %v97_v58 = vshll.u32 %v2945_v53, 16  ;;  %v2534_v2 = vld [vmem:[%s3653_s1 + $0x1ac] ss:$16 sps:$4 sm:$0xff]   ;;  %v2536_v5 = vld [vmem:[%s3653_s1 + $0x1a0] ss:$16 sps:$4 sm:$0xff]  }
  0x15   :  { %v109_v59 = vshrl.u32 %v2947_v54, 16  ;;  %v111_v60 = vshll.u32 %v2947_v54, 16  ;;  %1508 = vmatprep.mubr.bf16.mxu0 %v2111_v56  ;;  %1727 = vmatprep.mubr.bf16.mxu1 %v2111_v56  ;;  %v2537_v6 = vld [vmem:[%s3653_s1 + $0x1a8] ss:$16 sps:$4 sm:$0xff]   ;;  %v2538_v7 = vld [vmem:[%s3653_s1 + $0x1c4] ss:$16 sps:$4 sm:$0xff]  }
  0x16   :  { %v99_v0 = vrot.slane %v97_v58, 1  ;;  %v2540_v9 = vld [vmem:[%s3653_s1 + $0x1cc] ss:$16 sps:$4 sm:$0xff]   ;;  %v2542_v10 = vld [vmem:[%s3653_s1 + $0x1c0] ss:$16 sps:$4 sm:$0xff]   ;;  %v207_v20 = vrot.slane %v3000_v16, 1 }
  0x17   :  { %1487 = vmatpush1.bf16.msra.mxu0 %v2488_v22  ;;  %1706 = vmatpush1.bf16.msra.mxu1 %v2489_v23  ;;  %v113_v1 = vrot.slane %v111_v60, 1  ;;  %v2543_v11 = vld [vmem:[%s3653_s1 + $0x1c8] ss:$16 sps:$4 sm:$0xff]   ;;  %v2544_v12 = vld [vmem:[%s3653_s1 + $0x1e4] ss:$16 sps:$4 sm:$0xff]   ;;  %v209_v21 = vrot.slane %v3002_v17, 1  ;;  %v2110_v23 = vcombine.low %v14_v48, %v16_v50 }
  0x18   :  { %1488 = vmatprep.subr.bf16.mxu0 %v2490_v24  ;;  %1707 = vmatprep.subr.bf16.mxu1 %v2492_v25  ;;  %v100_v3 = vor.u32 %v99_v0, %v95_v57  ;;  %v2546_v13 = vld [vmem:[%s3653_s1 + $0x1ec] ss:$16 sps:$4 sm:$0xff]   ;;  %v2548_v14 = vld [vmem:[%s3653_s1 + $0x1e0] ss:$16 sps:$4 sm:$0xff]   ;;  %v2549_v15 = vld [vmem:[%s3653_s1 + $0x1e8] ss:$16 sps:$4 sm:$0xff]  }
  0x19   :  { %v114_v4 = vor.u32 %v113_v1, %v109_v59  ;;  %v2557_v18 = vld [vmem:[%s3653_s1 + $0x204] ss:$16 sps:$4 sm:$0xff]   ;;  %v2560_v19 = vld [vmem:[%s3653_s1 + $0x20c] ss:$16 sps:$4 sm:$0xff]   ;;  %v2555_v22 = vld [vmem:[%s3653_s1 + $0x200] ss:$16 sps:$4 sm:$0xff]  }
  0x1a   :  { %v206_v24 = vrot.slane %v2945_v53, 1  ;;  %v2558_v25 = vld [vmem:[%s3653_s1 + $0x208] ss:$16 sps:$4 sm:$0xff]   ;;  %v2580_v48 = vld [vmem:[%s3653_s1 + $0x280] ss:$16 sps:$4 sm:$0xff]  }
  0x1b   :  { %1489 = vmatpush1.bf16.msra.mxu0 %v2494_v26  ;;  %1708 = vmatpush1.bf16.msra.mxu1 %v2495_v27  ;;  %v2977_v8 = vcombine.low %v100_v3, %v114_v4  ;;  %v2564_v26 = vld [vmem:[%s3653_s1 + $0x224] ss:$16 sps:$4 sm:$0xff]   ;;  %v3022_v27 = vcombine.low %v207_v20, %v209_v21  ;;  %v2583_v50 = vld [vmem:[%s3653_s1 + $0x288] ss:$16 sps:$4 sm:$0xff]   ;;  %v2591_v53 = vld [vmem:[%s3653_s1 + $0x2ac] ss:$16 sps:$4 sm:$0xff]  }
  0x1c   :  { %1490 = vmatprep.subr.bf16.mxu0 %v2496_v28  ;;  %1709 = vmatprep.subr.bf16.mxu1 %v2498_v29  ;;  %v208_v28 = vrot.slane %v2947_v54, 1  ;;  %v2567_v29 = vld [vmem:[%s3653_s1 + $0x22c] ss:$16 sps:$4 sm:$0xff]   ;;  %v3091_v49 = vld [vmem:[%s3654_s0 + $0x50] sm:$0xff]  ;;  %v104_v54 = vshll.u32 %v3000_v16, 16 }
  0x1d   :  { %v2588_v51 = vld [vmem:[%s3653_s1 + $0x2a4] ss:$16 sps:$4 sm:$0xff]   ;;  %v2586_v56 = vld [vmem:[%s3653_s1 + $0x2a0] ss:$16 sps:$4 sm:$0xff]   ;;  %v2589_v58 = vld [vmem:[%s3653_s1 + $0x2a8] ss:$16 sps:$4 sm:$0xff]  }
  0x1e   :  { %v2594_v59 = vld [vmem:[%s3653_s1 + $0x2c4] ss:$16 sps:$4 sm:$0xff]   ;;  %v2597_v60 = vld [vmem:[%s3653_s1 + $0x2cc] ss:$16 sps:$4 sm:$0xff]   ;;  %v106_v1 = vrot.slane %v104_v54, 1 }
  0x1f   :  { %1491 = vmatpush1.bf16.msra.mxu0 %v2500_v30  ;;  %1710 = vmatpush1.bf16.msra.mxu1 %v2501_v31  ;;  %v3028_v30 = vcombine.low %v206_v24, %v208_v28  ;;  %v2562_v31 = vld [vmem:[%s3653_s1 + $0x220] ss:$16 sps:$4 sm:$0xff]   ;;  %v19_v20 = vld [vmem:[%s3654_s0 + $0x28] sm:$0x11]  ;;  %v21_v21 = vld [vmem:[%s3654_s0 + $0x38] sm:$0x11] }
  0x20   :  { %1492 = vmatprep.subr.bf16.mxu0 %v2502_v32  ;;  %1711 = vmatprep.subr.bf16.mxu1 %v2504_v33  ;;  %v2565_v32 = vld [vmem:[%s3653_s1 + $0x228] ss:$16 sps:$4 sm:$0xff]   ;;  %v2570_v33 = vld [vmem:[%s3653_s1 + $0x244] ss:$16 sps:$4 sm:$0xff]   ;;  %v2592_v4 = vld [vmem:[%s3653_s1 + $0x2c0] ss:$16 sps:$4 sm:$0xff]  }
  0x21   :  { %v2613_v24 = vld [vmem:[%s3653_s1 + $0x328] ss:$16 sps:$4 sm:$0xff]   ;;  %v2623_v28 = vld [vmem:[%s3653_s1 + $0x344] ss:$16 sps:$4 sm:$0xff]  }
  0x23   :  { %1493 = vmatpush1.bf16.msra.mxu0 %v2506_v34  ;;  %1712 = vmatpush1.bf16.msra.mxu1 %v2507_v35  ;;  %v2573_v34 = vld [vmem:[%s3653_s1 + $0x24c] ss:$16 sps:$4 sm:$0xff]   ;;  %v2568_v35 = vld [vmem:[%s3653_s1 + $0x240] ss:$16 sps:$4 sm:$0xff]  }
  0x24   :  { %1494 = vmatprep.subr.bf16.mxu0 %v2508_v36  ;;  %1713 = vmatprep.subr.bf16.mxu1 %v2510_v37  ;;  %v3048_v36 = vld [vmem:[%s3654_s0 + $0x20] sm:$0xff]  ;;  %v2571_v37 = vld [vmem:[%s3653_s1 + $0x248] ss:$16 sps:$4 sm:$0xff]  }
  0x27   :  { %1495 = vmatpush1.bf16.msra.mxu0 %v2512_v38  ;;  %1714 = vmatpush1.bf16.msra.mxu1 %v2513_v39  ;;  %v2576_v38 = vld [vmem:[%s3653_s1 + $0x264] ss:$16 sps:$4 sm:$0xff]  }
  0x28   :  { %1496 = vmatprep.subr.bf16.mxu0 %v2514_v40  ;;  %1715 = vmatprep.subr.bf16.mxu1 %v2516_v41  ;;  %v3059_v39 = vld [vmem:[%s3654_s0 + $0x30] sm:$0xff]  ;;  %v2579_v40 = vld [vmem:[%s3653_s1 + $0x26c] ss:$16 sps:$4 sm:$0xff]  }
  0x29   :  { %v2117_v41 = vcombine.high %v3048_v36, %v3059_v39 }
  0x2b   :  { %1497 = vmatpush1.bf16.msra.mxu0 %v2518_v42  ;;  %1716 = vmatpush1.bf16.msra.mxu1 %v2519_v43  ;;  %v2574_v42 = vld [vmem:[%s3653_s1 + $0x260] ss:$16 sps:$4 sm:$0xff]   ;;  %v2116_v43 = vcombine.low %v3048_v36, %v3059_v39 }
  0x2c   :  { %1498 = vmatprep.subr.bf16.mxu0 %v2520_v44  ;;  %1717 = vmatprep.subr.bf16.mxu1 %v2522_v45  ;;  %v2577_v44 = vld [vmem:[%s3653_s1 + $0x268] ss:$16 sps:$4 sm:$0xff]   ;;  %v2582_v45 = vld [vmem:[%s3653_s1 + $0x284] ss:$16 sps:$4 sm:$0xff]  }
  0x2f   :  { %1499 = vmatpush1.bf16.msra.mxu0 %v2524_v46  ;;  %1718 = vmatpush1.bf16.msra.mxu1 %v2525_v47  ;;  %v2585_v46 = vld [vmem:[%s3653_s1 + $0x28c] ss:$16 sps:$4 sm:$0xff]   ;;  %v3083_v47 = vld [vmem:[%s3654_s0 + $0x40] sm:$0xff] }
  0x30   :  { %1500 = vmatprep.subr.bf16.mxu0 %v2526_v52  ;;  %1719 = vmatprep.subr.bf16.mxu1 %v2528_v55  ;;  %v2123_v52 = vcombine.high %v3083_v47, %v3091_v49  ;;  %v118_v55 = vshll.u32 %v3002_v17, 16  ;;  %v2122_v57 = vcombine.low %v3083_v47, %v3091_v49 }
  0x32   :  { %v120_v3 = vrot.slane %v118_v55, 1 }
  0x33   :  { %1501 = vmatpush1.bf16.msra.mxu0 %v2530_v61  ;;  %1720 = vmatpush1.bf16.msra.mxu1 %v2531_v62  ;;  %v3123_v61 = vld [vmem:[%s3654_s0 + $0x60] sm:$0xff]  ;;  %v3128_v62 = vld [vmem:[%s3654_s0 + $0x70] sm:$0xff] }
  0x34   :  { %1502 = vmatprep.subr.bf16.mxu0 %v2532_v63  ;;  %1721 = vmatprep.subr.bf16.mxu1 %v2534_v2  ;;  %v102_v63 = vshrl.u32 %v3000_v16, 16  ;;  %v2129_v0 = vcombine.high %v3123_v61, %v3128_v62  ;;  %v116_v2 = vshrl.u32 %v3002_v17, 16  ;;  %v2604_v16 = vld [vmem:[%s3653_s1 + $0x300] ss:$16 sps:$4 sm:$0xff]  }
  0x37   :  { %1503 = vmatpush1.bf16.msra.mxu0 %v2536_v5  ;;  %1722 = vmatpush1.bf16.msra.mxu1 %v2537_v6  ;;  %v2595_v5 = vld [vmem:[%s3653_s1 + $0x2c8] ss:$16 sps:$4 sm:$0xff]   ;;  %v2600_v6 = vld [vmem:[%s3653_s1 + $0x2e4] ss:$16 sps:$4 sm:$0xff]  }
  0x38   :  { %1504 = vmatprep.subr.bf16.mxu0 %v2538_v7  ;;  %1723 = vmatprep.subr.bf16.mxu1 %v2540_v9  ;;  %v2603_v7 = vld [vmem:[%s3653_s1 + $0x2ec] ss:$16 sps:$4 sm:$0xff]   ;;  %v107_v9 = vor.u32 %v106_v1, %v102_v63  ;;  %v2641_v1 = vld [vmem:[%s3653_s1 + $0x384] ss:$16 sps:$4 sm:$0xff]  }
  0x3b   :  { %1505 = vmatpush1.bf16.msra.mxu0 %v2542_v10  ;;  %1724 = vmatpush1.bf16.msra.mxu1 %v2543_v11  ;;  %v121_v10 = vor.u32 %v120_v3, %v116_v2  ;;  %v2598_v11 = vld [vmem:[%s3653_s1 + $0x2e0] ss:$16 sps:$4 sm:$0xff]  }
  0x3c   :  { %1506 = vmatprep.subr.bf16.mxu0 %v2544_v12  ;;  %1725 = vmatprep.subr.bf16.mxu1 %v2546_v13  ;;  %v2128_v12 = vcombine.low %v3123_v61, %v3128_v62  ;;  %v2601_v13 = vld [vmem:[%s3653_s1 + $0x2e8] ss:$16 sps:$4 sm:$0xff]  }
  0x3d   :  { %v2113_v17 = vcombine.low %v107_v9, %v121_v10  ;;  %v2642_v9 = vld [vmem:[%s3653_s1 + $0x388] ss:$16 sps:$4 sm:$0xff]   ;;  %v2648_v10 = vld [vmem:[%s3653_s1 + $0x3a4] ss:$16 sps:$4 sm:$0xff]  }
  0x3f   :  { %1507 = vmatpush1.bf16.msra.mxu0 %v2548_v14  ;;  %1726 = vmatpush1.bf16.msra.mxu1 %v2549_v15  ;;  %v2606_v14 = vld [vmem:[%s3653_s1 + $0x304] ss:$16 sps:$4 sm:$0xff]   ;;  %v2609_v15 = vld [vmem:[%s3653_s1 + $0x30c] ss:$16 sps:$4 sm:$0xff]  }
  0x40   :  { %1549 = vmatprep.subr.bf16.mxu0 %v2557_v18  ;;  %1768 = vmatprep.subr.bf16.mxu1 %v2560_v19  ;;  %v2607_v18 = vld [vmem:[%s3653_s1 + $0x308] ss:$16 sps:$4 sm:$0xff]   ;;  %v2612_v19 = vld [vmem:[%s3653_s1 + $0x324] ss:$16 sps:$4 sm:$0xff]  }
  0x42   :  { %1509 = vmatmul.mubr.bf16.vlgmr.msra.gmra.mrb[0].mxu0 %v2110_v23  ;;  %1728 = vmatmul.mubr.bf16.vlgmr.msra.gmra.mrb[0].mxu1 %v2110_v23  ;;  %v2610_v23 = vld [vmem:[%s3653_s1 + $0x320] ss:$16 sps:$4 sm:$0xff]  }
  0x43   :  { %1550 = vmatpush1.bf16.msra.mxu0 %v2555_v22  ;;  %1769 = vmatpush1.bf16.msra.mxu1 %v2558_v25  ;;  %v2615_v22 = vld [vmem:[%s3653_s1 + $0x32c] ss:$16 sps:$4 sm:$0xff]   ;;  %v3185_v25 = vcombine.high %v3048_v36, %v19_v20 }
  0x44   :  { %1551 = vmatprep.subr.bf16.mxu0 %v2564_v26  ;;  %1770 = vmatprep.subr.bf16.mxu1 %v2567_v29  ;;  %v3188_v26 = vcombine.high %v3059_v39, %v21_v21  ;;  %v23_v29 = vld [vmem:[%s3654_s0 + $0x48] sm:$0x11] }
  0x45   :  { %1518 = vmatprep.mubr.bf16.mxu0 %v2117_v41  ;;  %1737 = vmatprep.mubr.bf16.mxu1 %v2117_v41 }
  0x47   :  { %1552 = vmatpush1.bf16.msra.mxu0 %v2562_v31  ;;  %1771 = vmatpush1.bf16.msra.mxu1 %v2565_v32  ;;  %v3197_v31 = vcombine.low %v3048_v36, %v19_v20  ;;  %v2626_v32 = vld [vmem:[%s3653_s1 + $0x34c] ss:$16 sps:$4 sm:$0xff]   ;;  %v211_v36 = vrot.slane %v3185_v25, 1 }
  0x48   :  { %1553 = vmatprep.subr.bf16.mxu0 %v2570_v33  ;;  %1772 = vmatprep.subr.bf16.mxu1 %v2573_v34  ;;  %v25_v33 = vld [vmem:[%s3654_s0 + $0x58] sm:$0x11]  ;;  %v3206_v34 = vcombine.low %v3059_v39, %v21_v21  ;;  %v2621_v39 = vld [vmem:[%s3653_s1 + $0x340] ss:$16 sps:$4 sm:$0xff]   ;;  %v144_v21 = vshrl.u32 %v3188_v26, 16 }
  0x49   :  { %v210_v41 = vrot.slane %v3197_v31, 1 }
  0x4a   :  { %1519 = vmatmul.mubr.bf16.gmra.mrb[4].mxu0 %v2116_v43  ;;  %1738 = vmatmul.mubr.bf16.gmra.mrb[4].mxu1 %v2116_v43  ;;  %v3227_v43 = vcombine.high %v3091_v49, %v25_v33 }
  0x4b   :  { %1554 = vmatpush1.bf16.msra.mxu0 %v2568_v35  ;;  %1773 = vmatpush1.bf16.msra.mxu1 %v2571_v37  ;;  %v27_v35 = vld [vmem:[%s3654_s0 + $0x68] sm:$0x11]  ;;  %v213_v37 = vrot.slane %v3188_v26, 1 }
  0x4c   :  { %1555 = vmatprep.subr.bf16.mxu0 %v2576_v38  ;;  %1774 = vmatprep.subr.bf16.mxu1 %v2579_v40  ;;  %v3214_v38 = vcombine.high %v3083_v47, %v23_v29  ;;  %v29_v40 = vld [vmem:[%s3654_s0 + $0x78] sm:$0x11]  ;;  %v217_v55 = vrot.slane %v3227_v43, 1 }
  0x4d   :  { %1528 = vmatprep.mubr.bf16.mxu0 %v2123_v52  ;;  %1747 = vmatprep.mubr.bf16.mxu1 %v2123_v52  ;;  %v2633_v52 = vld [vmem:[%s3653_s1 + $0x36c] ss:$16 sps:$4 sm:$0xff]  }
  0x4f   :  { %1556 = vmatpush1.bf16.msra.mxu0 %v2574_v42  ;;  %1775 = vmatpush1.bf16.msra.mxu1 %v2577_v44  ;;  %v3224_v42 = vcombine.low %v3083_v47, %v23_v29  ;;  %v3229_v44 = vcombine.low %v211_v36, %v213_v37  ;;  %v3239_v47 = vcombine.low %v3091_v49, %v25_v33  ;;  %v2664_v29 = vld [vmem:[%s3653_s1 + $0x3e0] ss:$16 sps:$4 sm:$0xff]   ;;  %v2667_v33 = vld [vmem:[%s3653_s1 + $0x3e8] ss:$16 sps:$4 sm:$0xff]   ;;  %v137_v36 = vshrl.u32 %v3206_v34, 16 }
  0x50   :  { %1557 = vmatprep.subr.bf16.mxu0 %v2582_v45  ;;  %1776 = vmatprep.subr.bf16.mxu1 %v2585_v46  ;;  %v212_v45 = vrot.slane %v3206_v34, 1  ;;  %v2624_v46 = vld [vmem:[%s3653_s1 + $0x348] ss:$16 sps:$4 sm:$0xff]   ;;  %v2675_v37 = vld [vmem:[%s3653_s1 + $0x40c] ss:$16 sps:$4 sm:$0xff]  }
  0x51   :  { %v214_v49 = vrot.slane %v3224_v42, 1 }
  0x52   :  { %1529 = vmatmul.mubr.bf16.gmra.mrb[8].mxu0 %v2122_v57  ;;  %1748 = vmatmul.mubr.bf16.gmra.mrb[8].mxu1 %v2122_v57  ;;  %v3251_v54 = vcombine.low %v210_v41, %v212_v45  ;;  %v216_v57 = vrot.slane %v3239_v47, 1  ;;  %v160_v45 = vshll.u32 %v3214_v38, 16 }
  0x53   :  { %1558 = vmatpush1.bf16.msra.mxu0 %v2580_v48  ;;  %1777 = vmatpush1.bf16.msra.mxu1 %v2583_v50  ;;  %v2630_v48 = vld [vmem:[%s3653_s1 + $0x364] ss:$16 sps:$4 sm:$0xff]   ;;  %v3242_v50 = vcombine.high %v3123_v61, %v27_v35 }
  0x54   :  { %1559 = vmatprep.subr.bf16.mxu0 %v2588_v51  ;;  %1778 = vmatprep.subr.bf16.mxu1 %v2591_v53  ;;  %v215_v51 = vrot.slane %v3214_v38, 1  ;;  %v3249_v53 = vcombine.high %v3128_v62, %v29_v40  ;;  %v3275_v2 = vcombine.low %v214_v49, %v216_v57 }
  0x55   :  { %1538 = vmatprep.mubr.bf16.mxu0 %v2129_v0  ;;  %1757 = vmatprep.mubr.bf16.mxu1 %v2129_v0 }
  0x56   :  { %v3266_v63 = vcombine.low %v215_v51, %v217_v55  ;;  %v221_v0 = vrot.slane %v3249_v53, 1  ;;  %v2678_v51 = vld [vmem:[%s3653_s1 + $0x424] ss:$16 sps:$4 sm:$0xff]  }
  0x57   :  { %1560 = vmatpush1.bf16.msra.mxu0 %v2586_v56  ;;  %1779 = vmatpush1.bf16.msra.mxu1 %v2589_v58  ;;  %v3256_v56 = vcombine.low %v3123_v61, %v27_v35  ;;  %v219_v58 = vrot.slane %v3242_v50, 1  ;;  %v2631_v61 = vld [vmem:[%s3653_s1 + $0x368] ss:$16 sps:$4 sm:$0xff]   ;;  %v2672_v35 = vld [vmem:[%s3653_s1 + $0x404] ss:$16 sps:$4 sm:$0xff]  }
  0x58   :  { %1561 = vmatprep.subr.bf16.mxu0 %v2594_v59  ;;  %1780 = vmatprep.subr.bf16.mxu1 %v2597_v60  ;;  %v2628_v59 = vld [vmem:[%s3653_s1 + $0x360] ss:$16 sps:$4 sm:$0xff]   ;;  %v3264_v60 = vcombine.low %v3128_v62, %v29_v40  ;;  %v2644_v62 = vld [vmem:[%s3653_s1 + $0x38c] ss:$16 sps:$4 sm:$0xff]  }
  0x59   :  { %v218_v3 = vrot.slane %v3256_v56, 1 }
  0x5a   :  { %1539 = vmatmul.mubr.bf16.gmra.mrb[12].mxu0 %v2128_v12  ;;  %1758 = vmatmul.mubr.bf16.gmra.mrb[12].mxu1 %v2128_v12  ;;  %v2646_v12 = vld [vmem:[%s3653_s1 + $0x3a0] ss:$16 sps:$4 sm:$0xff]  }
  0x5b   :  { %1562 = vmatpush1.bf16.msra.mxu0 %v2592_v4  ;;  %1781 = vmatpush1.bf16.msra.mxu1 %v2595_v5  ;;  %v3281_v4 = vcombine.low %v219_v58, %v221_v0  ;;  %v220_v5 = vrot.slane %v3264_v60, 1  ;;  %v158_v58 = vshrl.u32 %v3214_v38, 16  ;;  %v172_v0 = vshrl.u32 %v3227_v43, 16  ;;  %v2679_v38 = vld [vmem:[%s3653_s1 + $0x428] ss:$16 sps:$4 sm:$0xff]  }
  0x5c   :  { %1563 = vmatprep.subr.bf16.mxu0 %v2600_v6  ;;  %1782 = vmatprep.subr.bf16.mxu1 %v2603_v7  ;;  %v2639_v6 = vld [vmem:[%s3653_s1 + $0x380] ss:$16 sps:$4 sm:$0xff]  }
  0x5d   :  { %1581 = vmatprep.mubr.bf16.mxu0 %v2113_v17  ;;  %1800 = vmatprep.mubr.bf16.mxu1 %v2113_v17  ;;  %v3287_v7 = vcombine.low %v218_v3, %v220_v5  ;;  %v2662_v17 = vld [vmem:[%s3653_s1 + $0x3cc] ss:$16 sps:$4 sm:$0xff]   ;;  %v153_v3 = vshll.u32 %v3224_v42, 16 }
  0x5f   :  { %1564 = vmatpush1.bf16.msra.mxu0 %v2598_v11  ;;  %1783 = vmatpush1.bf16.msra.mxu1 %v2601_v13  ;;  %v2651_v11 = vld [vmem:[%s3653_s1 + $0x3ac] ss:$16 sps:$4 sm:$0xff]   ;;  %v132_v13 = vshll.u32 %v3185_v25, 16 }
  0x60   :  { %1565 = vmatprep.subr.bf16.mxu0 %v2606_v14  ;;  %1784 = vmatprep.subr.bf16.mxu1 %v2609_v15  ;;  %v2649_v14 = vld [vmem:[%s3653_s1 + $0x3a8] ss:$16 sps:$4 sm:$0xff]   ;;  %v2659_v15 = vld [vmem:[%s3653_s1 + $0x3c4] ss:$16 sps:$4 sm:$0xff]  }
  0x61   :  { %v134_v20 = vrot.slane %v132_v13, 1  ;;  %v155_v13 = vrot.slane %v153_v3, 1  ;;  %v2720_v3 = vld [vmem:[%s3653_s1 + $0x504] ss:$16 sps:$4 sm:$0xff]  }
  0x63   :  { %1566 = vmatpush1.bf16.msra.mxu0 %v2604_v16  ;;  %1785 = vmatpush1.bf16.msra.mxu1 %v2607_v18  ;;  %v146_v16 = vshll.u32 %v3188_v26, 16  ;;  %v2657_v18 = vld [vmem:[%s3653_s1 + $0x3c0] ss:$16 sps:$4 sm:$0xff]   ;;  %v139_v26 = vshll.u32 %v3206_v34, 16  ;;  %v2673_v34 = vld [vmem:[%s3653_s1 + $0x408] ss:$16 sps:$4 sm:$0xff]  }
  0x64   :  { %1567 = vmatprep.subr.bf16.mxu0 %v2612_v19  ;;  %1786 = vmatprep.subr.bf16.mxu1 %v2615_v22  ;;  %v130_v19 = vshrl.u32 %v3185_v25, 16  ;;  %v2660_v22 = vld [vmem:[%s3653_s1 + $0x3c8] ss:$16 sps:$4 sm:$0xff]   ;;  %v2669_v25 = vld [vmem:[%s3653_s1 + $0x3ec] ss:$16 sps:$4 sm:$0xff]  }
  0x66   :  { %v135_v40 = vor.u32 %v134_v20, %v130_v19 }
  0x67   :  { %1568 = vmatpush1.bf16.msra.mxu0 %v2610_v23  ;;  %1787 = vmatpush1.bf16.msra.mxu1 %v2613_v24  ;;  %v2666_v23 = vld [vmem:[%s3653_s1 + $0x3e4] ss:$16 sps:$4 sm:$0xff]   ;;  %v148_v24 = vrot.slane %v146_v16, 1  ;;  %v2682_v16 = vld [vmem:[%s3653_s1 + $0x440] ss:$16 sps:$4 sm:$0xff]  }
  0x68   :  { %1569 = vmatprep.subr.bf16.mxu0 %v2623_v28  ;;  %1788 = vmatprep.subr.bf16.mxu1 %v2626_v32  ;;  %v125_v28 = vshll.u32 %v3197_v31, 16  ;;  %v123_v32 = vshrl.u32 %v3197_v31, 16 }
  0x69   :  { %v149_v31 = vor.u32 %v148_v24, %v144_v21  ;;  %v200_v21 = vshrl.u32 %v3249_v53, 16 }
  0x6a   :  { %v127_v41 = vrot.slane %v125_v28, 1  ;;  %v195_v28 = vshll.u32 %v3264_v60, 16 }
  0x6b   :  { %1570 = vmatpush1.bf16.msra.mxu0 %v2621_v39  ;;  %1789 = vmatpush1.bf16.msra.mxu1 %v2624_v46  ;;  %v141_v39 = vrot.slane %v139_v26, 1  ;;  %v174_v46 = vshll.u32 %v3227_v43, 16  ;;  %v2119_v55 = vcombine.low %v135_v40, %v149_v31  ;;  %v2684_v43 = vld [vmem:[%s3653_s1 + $0x444] ss:$16 sps:$4 sm:$0xff]   ;;  %v2688_v26 = vld [vmem:[%s3653_s1 + $0x460] ss:$16 sps:$4 sm:$0xff]  }
  0x6c   :  { %1571 = vmatprep.subr.bf16.mxu0 %v2630_v48  ;;  %1790 = vmatprep.subr.bf16.mxu1 %v2633_v52  ;;  %v2670_v48 = vld [vmem:[%s3653_s1 + $0x400] ss:$16 sps:$4 sm:$0xff]   ;;  %v2681_v52 = vld [vmem:[%s3653_s1 + $0x42c] ss:$16 sps:$4 sm:$0xff]   ;;  %v128_v49 = vor.u32 %v127_v41, %v123_v32  ;;  %v193_v40 = vshrl.u32 %v3264_v60, 16  ;;  %v197_v31 = vrot.slane %v195_v28, 1 }
  0x6d   :  { %v142_v57 = vor.u32 %v141_v39, %v137_v36  ;;  %v2694_v41 = vld [vmem:[%s3653_s1 + $0x480] ss:$16 sps:$4 sm:$0xff]   ;;  %v2697_v39 = vld [vmem:[%s3653_s1 + $0x488] ss:$16 sps:$4 sm:$0xff]   ;;  %v2705_v60 = vld [vmem:[%s3653_s1 + $0x4ac] ss:$16 sps:$4 sm:$0xff]  }
  0x6e   :  { %v2757_v28 = vld [vmem:[%s3653_s1 + $0x5c8] ss:$16 sps:$4 sm:$0xff]  }
  0x6f   :  { %1572 = vmatpush1.bf16.msra.mxu0 %v2628_v59  ;;  %1791 = vmatpush1.bf16.msra.mxu1 %v2631_v61  ;;  %v162_v59 = vrot.slane %v160_v45, 1  ;;  %v176_v61 = vrot.slane %v174_v46, 1  ;;  %v2118_v5 = vcombine.low %v128_v49, %v142_v57  ;;  %v2706_v57 = vld [vmem:[%s3653_s1 + $0x4c0] ss:$16 sps:$4 sm:$0xff]  }
  0x70   :  { %1573 = vmatprep.subr.bf16.mxu0 %v2641_v1  ;;  %1792 = vmatprep.subr.bf16.mxu1 %v2644_v62  ;;  %v2676_v1 = vld [vmem:[%s3653_s1 + $0x420] ss:$16 sps:$4 sm:$0xff]   ;;  %v167_v62 = vshll.u32 %v3239_v47, 16 }
  0x73   :  { %1574 = vmatpush1.bf16.msra.mxu0 %v2639_v6  ;;  %1793 = vmatpush1.bf16.msra.mxu1 %v2642_v9  ;;  %v163_v6 = vor.u32 %v162_v59, %v158_v58  ;;  %v177_v9 = vor.u32 %v176_v61, %v172_v0  ;;  %v2709_v58 = vld [vmem:[%s3653_s1 + $0x4c8] ss:$16 sps:$4 sm:$0xff]   ;;  %v2714_v59 = vld [vmem:[%s3653_s1 + $0x4e4] ss:$16 sps:$4 sm:$0xff]   ;;  %v2717_v0 = vld [vmem:[%s3653_s1 + $0x4ec] ss:$16 sps:$4 sm:$0xff]  }
  0x74   :  { %1575 = vmatprep.subr.bf16.mxu0 %v2648_v10  ;;  %1794 = vmatprep.subr.bf16.mxu1 %v2651_v11  ;;  %v188_v10 = vshll.u32 %v3242_v50, 16  ;;  %v202_v11 = vshll.u32 %v3249_v53, 16  ;;  %v2696_v53 = vld [vmem:[%s3653_s1 + $0x484] ss:$16 sps:$4 sm:$0xff]   ;;  %v2712_v61 = vld [vmem:[%s3653_s1 + $0x4e0] ss:$16 sps:$4 sm:$0xff]  }
  0x75   :  { %v2125_v19 = vcombine.low %v163_v6, %v177_v9  ;;  %v2727_v6 = vld [vmem:[%s3653_s1 + $0x528] ss:$16 sps:$4 sm:$0xff]   ;;  %v2732_v9 = vld [vmem:[%s3653_s1 + $0x544] ss:$16 sps:$4 sm:$0xff]  }
  0x76   :  { %v190_v20 = vrot.slane %v188_v10, 1  ;;  %v2735_v10 = vld [vmem:[%s3653_s1 + $0x54c] ss:$16 sps:$4 sm:$0xff]  }
  0x77   :  { %1576 = vmatpush1.bf16.msra.mxu0 %v2646_v12  ;;  %1795 = vmatpush1.bf16.msra.mxu1 %v2649_v14  ;;  %v151_v12 = vshrl.u32 %v3224_v42, 16  ;;  %v165_v14 = vshrl.u32 %v3239_v47, 16  ;;  %v2690_v42 = vld [vmem:[%s3653_s1 + $0x464] ss:$16 sps:$4 sm:$0xff]   ;;  %v2693_v47 = vld [vmem:[%s3653_s1 + $0x46c] ss:$16 sps:$4 sm:$0xff]  }
  0x78   :  { %1577 = vmatprep.subr.bf16.mxu0 %v2659_v15  ;;  %1796 = vmatprep.subr.bf16.mxu1 %v2662_v17  ;;  %v169_v15 = vrot.slane %v167_v62, 1  ;;  %v2685_v17 = vld [vmem:[%s3653_s1 + $0x448] ss:$16 sps:$4 sm:$0xff]   ;;  %v2723_v62 = vld [vmem:[%s3653_s1 + $0x50c] ss:$16 sps:$4 sm:$0xff]  }
  0x7a   :  { %v170_v24 = vor.u32 %v169_v15, %v165_v14  ;;  %v2741_v14 = vld [vmem:[%s3653_s1 + $0x56c] ss:$16 sps:$4 sm:$0xff]   ;;  %v2736_v15 = vld [vmem:[%s3653_s1 + $0x560] ss:$16 sps:$4 sm:$0xff]  }
  0x7b   :  { %1578 = vmatpush1.bf16.msra.mxu0 %v2657_v18  ;;  %1797 = vmatpush1.bf16.msra.mxu1 %v2660_v22  ;;  %v186_v18 = vshrl.u32 %v3242_v50, 16  ;;  %v204_v22 = vrot.slane %v202_v11, 1  ;;  %v2691_v50 = vld [vmem:[%s3653_s1 + $0x468] ss:$16 sps:$4 sm:$0xff]   ;;  %v2730_v11 = vld [vmem:[%s3653_s1 + $0x540] ss:$16 sps:$4 sm:$0xff]  }
  0x7c   :  { %1579 = vmatprep.subr.bf16.mxu0 %v2666_v23  ;;  %1798 = vmatprep.subr.bf16.mxu1 %v2669_v25  ;;  %v156_v23 = vor.u32 %v155_v13, %v151_v12  ;;  %v181_v25 = vshll.u32 %v3256_v56, 16  ;;  %v2733_v12 = vld [vmem:[%s3653_s1 + $0x548] ss:$16 sps:$4 sm:$0xff]   ;;  %v2738_v13 = vld [vmem:[%s3653_s1 + $0x564] ss:$16 sps:$4 sm:$0xff]  }
  0x7d   :  { %v191_v32 = vor.u32 %v190_v20, %v186_v18  ;;  %v2745_v18 = vld [vmem:[%s3653_s1 + $0x588] ss:$16 sps:$4 sm:$0xff]   ;;  %v2753_v20 = vld [vmem:[%s3653_s1 + $0x5ac] ss:$16 sps:$4 sm:$0xff]  }
  0x7e   :  { %v2124_v36 = vcombine.low %v156_v23, %v170_v24  ;;  %v2756_v23 = vld [vmem:[%s3653_s1 + $0x5c4] ss:$16 sps:$4 sm:$0xff]   ;;  %v2759_v24 = vld [vmem:[%s3653_s1 + $0x5cc] ss:$16 sps:$4 sm:$0xff]  }
  0x7f   :  { %1580 = vmatpush1.bf16.msra.mxu0 %v2664_v29  ;;  %1799 = vmatpush1.bf16.msra.mxu1 %v2667_v33  ;;  %v2699_v29 = vld [vmem:[%s3653_s1 + $0x48c] ss:$16 sps:$4 sm:$0xff]   ;;  %v205_v33 = vor.u32 %v204_v22, %v200_v21  ;;  %v2748_v21 = vld [vmem:[%s3653_s1 + $0x5a0] ss:$16 sps:$4 sm:$0xff]   ;;  %v2751_v22 = vld [vmem:[%s3653_s1 + $0x5a8] ss:$16 sps:$4 sm:$0xff]  }
  0x80   :  { %1622 = vmatprep.subr.bf16.mxu0 %v2672_v35  ;;  %1841 = vmatprep.subr.bf16.mxu1 %v2675_v37  ;;  %v179_v35 = vshrl.u32 %v3256_v56, 16  ;;  %v183_v37 = vrot.slane %v181_v25, 1  ;;  %v2702_v56 = vld [vmem:[%s3653_s1 + $0x4a4] ss:$16 sps:$4 sm:$0xff]   ;;  %v2754_v25 = vld [vmem:[%s3653_s1 + $0x5c0] ss:$16 sps:$4 sm:$0xff]  }
  0x81   :  { %v2131_v45 = vcombine.low %v191_v32, %v205_v33 }
  0x82   :  { %1582 = vmatmul.mubr.bf16.vlgmr.msra.gmra.mrb[0].mxu0 %v2977_v8  ;;  %1801 = vmatmul.mubr.bf16.vlgmr.msra.gmra.mrb[0].mxu1 %v2977_v8  ;;  %v2687_v8 = vld [vmem:[%s3653_s1 + $0x44c] ss:$16 sps:$4 sm:$0xff]   ;;  %v184_v46 = vor.u32 %v183_v37, %v179_v35 }
  0x83   :  { %1623 = vmatpush1.bf16.msra.mxu0 %v2670_v48  ;;  %1842 = vmatpush1.bf16.msra.mxu1 %v2673_v34  ;;  %v198_v48 = vor.u32 %v197_v31, %v193_v40  ;;  %v2700_v34 = vld [vmem:[%s3653_s1 + $0x4a0] ss:$16 sps:$4 sm:$0xff]  }
  0x84   :  { %1624 = vmatprep.subr.bf16.mxu0 %v2678_v51  ;;  %1843 = vmatprep.subr.bf16.mxu1 %v2681_v52  ;;  %v2703_v51 = vld [vmem:[%s3653_s1 + $0x4a8] ss:$16 sps:$4 sm:$0xff]   ;;  %v2708_v52 = vld [vmem:[%s3653_s1 + $0x4c4] ss:$16 sps:$4 sm:$0xff]  }
  0x85   :  { %1591 = vmatprep.mubr.bf16.mxu0 %v2119_v55  ;;  %1810 = vmatprep.mubr.bf16.mxu1 %v2119_v55  ;;  %v2711_v55 = vld [vmem:[%s3653_s1 + $0x4cc] ss:$16 sps:$4 sm:$0xff]   ;;  %v2130_v49 = vcombine.low %v184_v46, %v198_v48 }
  0x87   :  { %1625 = vmatpush1.bf16.msra.mxu0 %v2676_v1  ;;  %1844 = vmatpush1.bf16.msra.mxu1 %v2679_v38  ;;  %v2715_v1 = vld [vmem:[%s3653_s1 + $0x4e8] ss:$16 sps:$4 sm:$0xff]   ;;  %v2718_v38 = vld [vmem:[%s3653_s1 + $0x500] ss:$16 sps:$4 sm:$0xff]  }
  0x88   :  { %1626 = vmatprep.subr.bf16.mxu0 %v2684_v43  ;;  %1845 = vmatprep.subr.bf16.mxu1 %v2687_v8  ;;  %v2721_v43 = vld [vmem:[%s3653_s1 + $0x508] ss:$16 sps:$4 sm:$0xff]   ;;  %v2726_v8 = vld [vmem:[%s3653_s1 + $0x524] ss:$16 sps:$4 sm:$0xff]  }
  0x8a   :  { %1592 = vmatmul.mubr.bf16.gmra.mrb[4].mxu0 %v2118_v5  ;;  %1811 = vmatmul.mubr.bf16.gmra.mrb[4].mxu1 %v2118_v5  ;;  %v2724_v5 = vld [vmem:[%s3653_s1 + $0x520] ss:$16 sps:$4 sm:$0xff]  }
  0x8b   :  { %1627 = vmatpush1.bf16.msra.mxu0 %v2682_v16  ;;  %1846 = vmatpush1.bf16.msra.mxu1 %v2685_v17  ;;  %v2739_v16 = vld [vmem:[%s3653_s1 + $0x568] ss:$16 sps:$4 sm:$0xff]   ;;  %v2744_v17 = vld [vmem:[%s3653_s1 + $0x584] ss:$16 sps:$4 sm:$0xff]  }
  0x8c   :  { %1628 = vmatprep.subr.bf16.mxu0 %v2690_v42  ;;  %1847 = vmatprep.subr.bf16.mxu1 %v2693_v47  ;;  %v2747_v42 = vld [vmem:[%s3653_s1 + $0x58c] ss:$16 sps:$4 sm:$0xff]   ;;  %v2742_v47 = vld [vmem:[%s3653_s1 + $0x580] ss:$16 sps:$4 sm:$0xff]  }
  0x8d   :  { %1601 = vmatprep.mubr.bf16.mxu0 %v2125_v19  ;;  %1820 = vmatprep.mubr.bf16.mxu1 %v2125_v19  ;;  %v2750_v19 = vld [vmem:[%s3653_s1 + $0x5a4] ss:$16 sps:$4 sm:$0xff]  }
  0x8f   :  { %1629 = vmatpush1.bf16.msra.mxu0 %v2688_v26  ;;  %1848 = vmatpush1.bf16.msra.mxu1 %v2691_v50  ;;  %v2762_v26 = vld [vmem:[%s3653_s1 + $0x5e4] ss:$16 sps:$4 sm:$0xff]   ;;  %v2765_v50 = vld [vmem:[%s3653_s1 + $0x5ec] ss:$16 sps:$4 sm:$0xff]  }
  0x90   :  { %1630 = vmatprep.subr.bf16.mxu0 %v2696_v53  ;;  %1849 = vmatprep.subr.bf16.mxu1 %v2699_v29  ;;  %v2760_v53 = vld [vmem:[%s3653_s1 + $0x5e0] ss:$16 sps:$4 sm:$0xff]   ;;  %v2763_v29 = vld [vmem:[%s3653_s1 + $0x5e8] ss:$16 sps:$4 sm:$0xff]  }
  0x92   :  { %1602 = vmatmul.mubr.bf16.gmra.mrb[8].mxu0 %v2124_v36  ;;  %1821 = vmatmul.mubr.bf16.gmra.mrb[8].mxu1 %v2124_v36 }
  0x93   :  { %1631 = vmatpush1.bf16.msra.mxu0 %v2694_v41  ;;  %1850 = vmatpush1.bf16.msra.mxu1 %v2697_v39 }
  0x94   :  { %1632 = vmatprep.subr.bf16.mxu0 %v2702_v56  ;;  %1851 = vmatprep.subr.bf16.mxu1 %v2705_v60 }
  0x95   :  { %1611 = vmatprep.mubr.bf16.mxu0 %v2131_v45  ;;  %1830 = vmatprep.mubr.bf16.mxu1 %v2131_v45 }
  0x97   :  { %1633 = vmatpush1.bf16.msra.mxu0 %v2700_v34  ;;  %1852 = vmatpush1.bf16.msra.mxu1 %v2703_v51 }
  0x98   :  { %1634 = vmatprep.subr.bf16.mxu0 %v2708_v52  ;;  %1853 = vmatprep.subr.bf16.mxu1 %v2711_v55 }
  0x9a   :  { %1612 = vmatmul.mubr.bf16.gmra.mrb[12].mxu0 %v2130_v49  ;;  %1831 = vmatmul.mubr.bf16.gmra.mrb[12].mxu1 %v2130_v49 }
  0x9b   :  { %1635 = vmatpush1.bf16.msra.mxu0 %v2706_v57  ;;  %1854 = vmatpush1.bf16.msra.mxu1 %v2709_v58 }
  0x9c   :  { %1636 = vmatprep.subr.bf16.mxu0 %v2714_v59  ;;  %1855 = vmatprep.subr.bf16.mxu1 %v2717_v0 }
  0x9d   :  { %1654 = vmatprep.mubr.bf16.mxu0 %v3022_v27  ;;  %1873 = vmatprep.mubr.bf16.mxu1 %v3022_v27  ;;  %v2729_v27 = vld [vmem:[%s3653_s1 + $0x52c] ss:$16 sps:$4 sm:$0xff]  }
  0x9f   :  { %1637 = vmatpush1.bf16.msra.mxu0 %v2712_v61  ;;  %1856 = vmatpush1.bf16.msra.mxu1 %v2715_v1 }
  0xa0   :  { %1638 = vmatprep.subr.bf16.mxu0 %v2720_v3  ;;  %1857 = vmatprep.subr.bf16.mxu1 %v2723_v62 }
  0xa3   :  { %1639 = vmatpush1.bf16.msra.mxu0 %v2718_v38  ;;  %1858 = vmatpush1.bf16.msra.mxu1 %v2721_v43 }
  0xa4   :  { %1640 = vmatprep.subr.bf16.mxu0 %v2726_v8  ;;  %1859 = vmatprep.subr.bf16.mxu1 %v2729_v27 }
  0xa7   :  { %1641 = vmatpush1.bf16.msra.mxu0 %v2724_v5  ;;  %1860 = vmatpush1.bf16.msra.mxu1 %v2727_v6 }
  0xa8   :  { %1642 = vmatprep.subr.bf16.mxu0 %v2732_v9  ;;  %1861 = vmatprep.subr.bf16.mxu1 %v2735_v10 }
  0xab   :  { %1643 = vmatpush1.bf16.msra.mxu0 %v2730_v11  ;;  %1862 = vmatpush1.bf16.msra.mxu1 %v2733_v12 }
  0xac   :  { %1644 = vmatprep.subr.bf16.mxu0 %v2738_v13  ;;  %1863 = vmatprep.subr.bf16.mxu1 %v2741_v14 }
  0xaf   :  { %1645 = vmatpush1.bf16.msra.mxu0 %v2736_v15  ;;  %1864 = vmatpush1.bf16.msra.mxu1 %v2739_v16 }
  0xb0   :  { %1646 = vmatprep.subr.bf16.mxu0 %v2744_v17  ;;  %1865 = vmatprep.subr.bf16.mxu1 %v2747_v42 }
  0xb3   :  { %1647 = vmatpush1.bf16.msra.mxu0 %v2742_v47  ;;  %1866 = vmatpush1.bf16.msra.mxu1 %v2745_v18 }
  0xb4   :  { %1648 = vmatprep.subr.bf16.mxu0 %v2750_v19  ;;  %1867 = vmatprep.subr.bf16.mxu1 %v2753_v20 }
  0xb7   :  { %1649 = vmatpush1.bf16.msra.mxu0 %v2748_v21  ;;  %1868 = vmatpush1.bf16.msra.mxu1 %v2751_v22 }
  0xb8   :  { %1650 = vmatprep.subr.bf16.mxu0 %v2756_v23  ;;  %1869 = vmatprep.subr.bf16.mxu1 %v2759_v24 }
  0xbb   :  { %1651 = vmatpush1.bf16.msra.mxu0 %v2754_v25  ;;  %1870 = vmatpush1.bf16.msra.mxu1 %v2757_v28 }
  0xbc   :  { %1652 = vmatprep.subr.bf16.mxu0 %v2762_v26  ;;  %1871 = vmatprep.subr.bf16.mxu1 %v2765_v50 }
  0xbf   :  { %1653 = vmatpush1.bf16.msra.mxu0 %v2760_v53  ;;  %1872 = vmatpush1.bf16.msra.mxu1 %v2763_v29 }
  0xc2   :  { %1655 = vmatmul.mubr.bf16.vlgmr.msra.gmra.mrb[0].mxu0 %v3028_v30  ;;  %1874 = vmatmul.mubr.bf16.vlgmr.msra.gmra.mrb[0].mxu1 %v3028_v30  ;;  %v448_v30 = vlaneseq }
  0xc3   :  { %1664 = vmatprep.mubr.bf16.mxu0 %v3229_v44  ;;  %1883 = vmatprep.mubr.bf16.mxu1 %v3229_v44 }
  0xc4   :  { %v449_v44 = vshrl.u32 %v448_v30, 7 }
  0xc6   :  { %v450_v32 = vsub.s32 0, %v449_v44  ;;  %v454_v33 = vsub.s32 1, %v449_v44  ;;  %v462_v35 = vsub.s32 3, %v449_v44 }
  0xca   :  { %1665 = vmatmul.mubr.bf16.gmra.mrb[4].mxu0 %v3251_v54  ;;  %1884 = vmatmul.mubr.bf16.gmra.mrb[4].mxu1 %v3251_v54  ;;  %v458_v54 = vsub.s32 2, %v449_v44 }
  0xcb   :  { %1674 = vmatprep.mubr.bf16.mxu0 %v3266_v63  ;;  %1893 = vmatprep.mubr.bf16.mxu1 %v3266_v63  ;;  %v446_v63 = vld [vmem:[%s3655_s2] sm:$0xf] }
  0xcc   :  { %v3565_v36 = vrot.slane %v446_v63, %v450_v32  ;;  %v3569_v37 = vrot.slane %v446_v63, %v454_v33 }
  0xd2   :  { %1675 = vmatmul.mubr.bf16.gmra.mrb[8].mxu0 %v3275_v2  ;;  %1894 = vmatmul.mubr.bf16.gmra.mrb[8].mxu1 %v3275_v2  ;;  %v3567_v2 = vrot.slane %v446_v63, %v458_v54 }
  0xd3   :  { %1684 = vmatprep.mubr.bf16.mxu0 %v3281_v4  ;;  %1903 = vmatprep.mubr.bf16.mxu1 %v3281_v4  ;;  %v3571_v4 = vrot.slane %v446_v63, %v462_v35 }
  0xda   :  { %1685 = vmatmul.mubr.bf16.gmra.mrb[12].mxu0 %v3287_v7  ;;  %1904 = vmatmul.mubr.bf16.gmra.mrb[12].mxu1 %v3287_v7 }
 0x195   :  { %v1656_v40 = vpop.f32.mrb[0].mxu0  ;;  %v1875_v7 = vpop.f32.mrb[0].mxu1 }
 0x196   :  { %v2358_v31 = vadd.f32 %v1656_v40, %v3565_v36  ;;  %v2374_v41 = vadd.f32 %v1875_v7, %v3567_v2  ;;  %v1658_v39 = vpop.f32.mrb[1].mxu0  ;;  %v1877_v56 = vpop.f32.mrb[1].mxu1 }
 0x197   :  { %v2359_v60 = vadd.f32 %v1658_v39, %v3569_v37  ;;  %v2375_v45 = vadd.f32 %v1877_v56, %v3571_v4  ;;  %v1660_v46 = vpop.f32.mrb[2].mxu0  ;;  %v1879_v48 = vpop.f32.mrb[2].mxu1 }
 0x198   :  { %v1914_v34 = vmax.f32 %v2358_v31, 0.0  ;;  %v1916_v51 = vmax.f32 %v2374_v41, 0.0  ;;  %v2360_v52 = vadd.f32 %v1660_v46, %v3565_v36  ;;  %v2376_v55 = vadd.f32 %v1879_v48, %v3567_v2  ;;  %v1662_v49 = vpop.f32.mrb[3].mxu0  ;;  %v1881_v57 = vpop.f32.mrb[3].mxu1 }
 0x199   :  { %v1915_v58 = vmax.f32 %v2359_v60, 0.0  ;;  %v1917_v59 = vmax.f32 %v2375_v45, 0.0  ;;  %v2361_v0 = vadd.f32 %v1662_v49, %v3569_v37  ;;  %v2377_v61 = vadd.f32 %v1881_v57, %v3571_v4 }
 0x19a   :  { %v1918_v1 = vmax.f32 %v2360_v52, 0.0  ;;  %v1920_v3 = vmax.f32 %v2376_v55, 0.0 }
 0x19b   :  { %v2342_v62 = vpack.c.bf16 %v1915_v58, %v1914_v34  ;;  %v2343_v38 = vpack.c.bf16 %v1917_v59, %v1916_v51  ;;  %v1919_v43 = vmax.f32 %v2361_v0, 0.0  ;;  %v1921_v8 = vmax.f32 %v2377_v61, 0.0 }
 0x19d   :  { %2074 = vst [vmem:[%s3656_s3] sm:$0xff] %v2342_v62  ;;  %2075 = vst [vmem:[%s3656_s3 + $0x8] sm:$0xff] %v2343_v38  ;;  %v2344_v27 = vpack.c.bf16 %v1919_v43, %v1918_v1  ;;  %v2345_v5 = vpack.c.bf16 %v1921_v8, %v1920_v3  ;;  %v1666_v6 = vpop.f32.mrb[4].mxu0  ;;  %v1885_v9 = vpop.f32.mrb[4].mxu1 }
 0x19e   :  { %v2362_v10 = vadd.f32 %v1666_v6, %v3565_v36  ;;  %v2378_v11 = vadd.f32 %v1885_v9, %v3567_v2  ;;  %v1668_v12 = vpop.f32.mrb[5].mxu0  ;;  %v1887_v13 = vpop.f32.mrb[5].mxu1 }
 0x19f   :  { %2076 = vst [vmem:[%s3656_s3 + $0x10] sm:$0xff] %v2344_v27  ;;  %2077 = vst [vmem:[%s3656_s3 + $0x18] sm:$0xff] %v2345_v5  ;;  %v2363_v14 = vadd.f32 %v1668_v12, %v3569_v37  ;;  %v2379_v15 = vadd.f32 %v1887_v13, %v3571_v4  ;;  %v1670_v16 = vpop.f32.mrb[6].mxu0  ;;  %v1889_v17 = vpop.f32.mrb[6].mxu1 }
 0x1a0   :  { %v1922_v42 = vmax.f32 %v2362_v10, 0.0  ;;  %v1924_v47 = vmax.f32 %v2378_v11, 0.0  ;;  %v2364_v18 = vadd.f32 %v1670_v16, %v3565_v36  ;;  %v2380_v19 = vadd.f32 %v1889_v17, %v3567_v2  ;;  %v1672_v20 = vpop.f32.mrb[7].mxu0  ;;  %v1891_v21 = vpop.f32.mrb[7].mxu1 }
 0x1a1   :  { %v1923_v22 = vmax.f32 %v2363_v14, 0.0  ;;  %v1925_v23 = vmax.f32 %v2379_v15, 0.0  ;;  %v2365_v24 = vadd.f32 %v1672_v20, %v3569_v37  ;;  %v2381_v25 = vadd.f32 %v1891_v21, %v3571_v4 }
 0x1a2   :  { %v1926_v28 = vmax.f32 %v2364_v18, 0.0  ;;  %v1928_v26 = vmax.f32 %v2380_v19, 0.0 }
 0x1a3   :  { %v2346_v50 = vpack.c.bf16 %v1923_v22, %v1922_v42  ;;  %v2347_v53 = vpack.c.bf16 %v1925_v23, %v1924_v47  ;;  %v1927_v29 = vmax.f32 %v2365_v24, 0.0  ;;  %v1929_v30 = vmax.f32 %v2381_v25, 0.0 }
 0x1a5   :  { %2078 = vst [vmem:[%s3656_s3 + $0x20] sm:$0xff] %v2346_v50  ;;  %2079 = vst [vmem:[%s3656_s3 + $0x28] sm:$0xff] %v2347_v53  ;;  %v2348_v44 = vpack.c.bf16 %v1927_v29, %v1926_v28  ;;  %v2349_v32 = vpack.c.bf16 %v1929_v30, %v1928_v26  ;;  %v1676_v54 = vpop.f32.mrb[8].mxu0  ;;  %v1895_v63 = vpop.f32.mrb[8].mxu1 }
 0x1a6   :  { %v2366_v33 = vadd.f32 %v1676_v54, %v3565_v36  ;;  %v2382_v35 = vadd.f32 %v1895_v63, %v3567_v2  ;;  %v1678_v40 = vpop.f32.mrb[9].mxu0  ;;  %v1897_v7 = vpop.f32.mrb[9].mxu1 }
 0x1a7   :  { %2080 = vst [vmem:[%s3656_s3 + $0x30] sm:$0xff] %v2348_v44  ;;  %2081 = vst [vmem:[%s3656_s3 + $0x38] sm:$0xff] %v2349_v32  ;;  %v2367_v31 = vadd.f32 %v1678_v40, %v3569_v37  ;;  %v2383_v41 = vadd.f32 %v1897_v7, %v3571_v4  ;;  %v1680_v39 = vpop.f32.mrb[10].mxu0  ;;  %v1899_v56 = vpop.f32.mrb[10].mxu1 }
 0x1a8   :  { %v1930_v60 = vmax.f32 %v2366_v33, 0.0  ;;  %v1932_v45 = vmax.f32 %v2382_v35, 0.0  ;;  %v2368_v46 = vadd.f32 %v1680_v39, %v3565_v36  ;;  %v2384_v48 = vadd.f32 %v1899_v56, %v3567_v2  ;;  %v1682_v34 = vpop.f32.mrb[11].mxu0  ;;  %v1901_v51 = vpop.f32.mrb[11].mxu1 }
 0x1a9   :  { %v1931_v52 = vmax.f32 %v2367_v31, 0.0  ;;  %v1933_v55 = vmax.f32 %v2383_v41, 0.0  ;;  %v2369_v49 = vadd.f32 %v1682_v34, %v3569_v37  ;;  %v2385_v57 = vadd.f32 %v1901_v51, %v3571_v4 }
 0x1aa   :  { %v1934_v58 = vmax.f32 %v2368_v46, 0.0  ;;  %v1936_v59 = vmax.f32 %v2384_v48, 0.0 }
 0x1ab   :  { %v2350_v0 = vpack.c.bf16 %v1931_v52, %v1930_v60  ;;  %v2351_v61 = vpack.c.bf16 %v1933_v55, %v1932_v45  ;;  %v1935_v1 = vmax.f32 %v2369_v49, 0.0  ;;  %v1937_v3 = vmax.f32 %v2385_v57, 0.0 }
 0x1ad   :  { %2082 = vst [vmem:[%s3656_s3 + $0x40] sm:$0xff] %v2350_v0  ;;  %2083 = vst [vmem:[%s3656_s3 + $0x48] sm:$0xff] %v2351_v61  ;;  %v2352_v62 = vpack.c.bf16 %v1935_v1, %v1934_v58  ;;  %v2353_v38 = vpack.c.bf16 %v1937_v3, %v1936_v59  ;;  %v1686_v43 = vpop.f32.mrb[12].mxu0  ;;  %v1905_v8 = vpop.f32.mrb[12].mxu1 }
 0x1ae   :  { %v2370_v27 = vadd.f32 %v1686_v43, %v3565_v36  ;;  %v2386_v5 = vadd.f32 %v1905_v8, %v3567_v2  ;;  %v1688_v6 = vpop.f32.mrb[13].mxu0  ;;  %v1907_v9 = vpop.f32.mrb[13].mxu1 }
 0x1af   :  { %2084 = vst [vmem:[%s3656_s3 + $0x50] sm:$0xff] %v2352_v62  ;;  %2085 = vst [vmem:[%s3656_s3 + $0x58] sm:$0xff] %v2353_v38  ;;  %v2371_v10 = vadd.f32 %v1688_v6, %v3569_v37  ;;  %v2387_v11 = vadd.f32 %v1907_v9, %v3571_v4  ;;  %v1690_v12 = vpop.f32.mrb[14].mxu0  ;;  %v1909_v13 = vpop.f32.mrb[14].mxu1 }
 0x1b0   :  { %v1938_v14 = vmax.f32 %v2370_v27, 0.0  ;;  %v1940_v15 = vmax.f32 %v2386_v5, 0.0  ;;  %v2372_v16 = vadd.f32 %v1690_v12, %v3565_v36  ;;  %v2388_v17 = vadd.f32 %v1909_v13, %v3567_v2  ;;  %v1692_v42 = vpop.f32.mrb[15].mxu0  ;;  %v1911_v47 = vpop.f32.mrb[15].mxu1 }
 0x1b1   :  { %v1939_v18 = vmax.f32 %v2371_v10, 0.0  ;;  %v1941_v19 = vmax.f32 %v2387_v11, 0.0  ;;  %v2373_v20 = vadd.f32 %v1692_v42, %v3569_v37  ;;  %v2389_v21 = vadd.f32 %v1911_v47, %v3571_v4 }
 0x1b2   :  { %v1942_v22 = vmax.f32 %v2372_v16, 0.0  ;;  %v1944_v23 = vmax.f32 %v2388_v17, 0.0 }
 0x1b3   :  { %v2354_v24 = vpack.c.bf16 %v1939_v18, %v1938_v14  ;;  %v2355_v25 = vpack.c.bf16 %v1941_v19, %v1940_v15  ;;  %v1943_v28 = vmax.f32 %v2373_v20, 0.0  ;;  %v1945_v26 = vmax.f32 %v2389_v21, 0.0 }
 0x1b5   :  { %2086 = vst [vmem:[%s3656_s3 + $0x60] sm:$0xff] %v2354_v24  ;;  %2087 = vst [vmem:[%s3656_s3 + $0x68] sm:$0xff] %v2355_v25  ;;  %v2356_v36 = vpack.c.bf16 %v1943_v28, %v1942_v22  ;;  %v2357_v2 = vpack.c.bf16 %v1945_v26, %v1944_v23 }
 0x1b7   :  { %2088 = vst [vmem:[%s3656_s3 + $0x70] sm:$0xff] %v2356_v36  ;;  %2089 = vst [vmem:[%s3656_s3 + $0x78] sm:$0xff] %v2357_v2 }

// kernel: conv_vae_forward.15
= control target key start
LH: loop header
LB: loop body
LE: loop exit
PB: predicated region body
PF: predicated region fallthrough
CT: control target
= control target key end

     0   :  { %vm3104_vm0 = vcmask 1043456   ;;  %vm3105_vm1 = vcmask 523268   ;;  %s5508_s1 = inlined_call_operand.vmem [shape: bf16[1152,448], index: 1, kind: input, shape index: {}]   ;;  %s5509_s0 = inlined_call_operand.vmem [shape: bf16[8,10,384], index: 0, kind: input, shape index: {}]   ;;  %s5510_s2 = inlined_call_operand.vmem [shape: f32[1,448], index: 2, kind: input, shape index: {}]   ;;  %s5511_s3 = inlined_call_operand.vmem [shape: bf16[8,8,448], index: 3, kind: output, shape index: {}]  }
   0x1   :  { %v3667_v0 = vld [vmem:[%s5508_s1 + $0x4] ss:$16 sps:$4 sm:$0xff]   ;;  %v3669_v1 = vld [vmem:[%s5508_s1 + $0xc] ss:$16 sps:$4 sm:$0xff]   ;;  %v3671_v2 = vld [vmem:[%s5508_s1] ss:$16 sps:$4 sm:$0xff]  }
   0x2   :  { %2213 = vmatprep.subr.bf16.mxu0 %v3667_v0  ;;  %v3672_v3 = vld [vmem:[%s5508_s1 + $0x8] ss:$16 sps:$4 sm:$0xff]   ;;  %2578 = vmatprep.subr.bf16.mxu1 %v3669_v1  ;;  %v3673_v4 = vld [vmem:[%s5508_s1 + $0x24] ss:$16 sps:$4 sm:$0xff]   ;;  %v3675_v5 = vld [vmem:[%s5508_s1 + $0x2c] ss:$16 sps:$4 sm:$0xff]  }
   0x3   :  { %2214 = vmatpush1.bf16.msra.mxu0 %v3671_v2  ;;  %2579 = vmatpush1.bf16.msra.mxu1 %v3672_v3  ;;  %v3677_v6 = vld [vmem:[%s5508_s1 + $0x20] ss:$16 sps:$4 sm:$0xff]   ;;  %v3678_v7 = vld [vmem:[%s5508_s1 + $0x28] ss:$16 sps:$4 sm:$0xff]   ;;  %v3679_v8 = vld [vmem:[%s5508_s1 + $0x44] ss:$16 sps:$4 sm:$0xff]  }
   0x4   :  { %2215 = vmatprep.subr.bf16.mxu0 %v3673_v4  ;;  %2580 = vmatprep.subr.bf16.mxu1 %v3675_v5  ;;  %v3681_v9 = vld [vmem:[%s5508_s1 + $0x4c] ss:$16 sps:$4 sm:$0xff]   ;;  %v3683_v10 = vld [vmem:[%s5508_s1 + $0x40] ss:$16 sps:$4 sm:$0xff]   ;;  %v3684_v11 = vld [vmem:[%s5508_s1 + $0x48] ss:$16 sps:$4 sm:$0xff]  }
   0x5   :  { %v3685_v12 = vld [vmem:[%s5508_s1 + $0x64] ss:$16 sps:$4 sm:$0xff]   ;;  %v3687_v13 = vld [vmem:[%s5508_s1 + $0x6c] ss:$16 sps:$4 sm:$0xff]   ;;  %v3689_v14 = vld [vmem:[%s5508_s1 + $0x60] ss:$16 sps:$4 sm:$0xff]  }
   0x6   :  { %v3690_v15 = vld [vmem:[%s5508_s1 + $0x68] ss:$16 sps:$4 sm:$0xff]   ;;  %v3691_v16 = vld [vmem:[%s5508_s1 + $0x84] ss:$16 sps:$4 sm:$0xff]   ;;  %v3693_v17 = vld [vmem:[%s5508_s1 + $0x8c] ss:$16 sps:$4 sm:$0xff]  }
   0x7   :  { %2216 = vmatpush1.bf16.msra.mxu0 %v3677_v6  ;;  %2581 = vmatpush1.bf16.msra.mxu1 %v3678_v7  ;;  %v3695_v18 = vld [vmem:[%s5508_s1 + $0x80] ss:$16 sps:$4 sm:$0xff]   ;;  %v3696_v19 = vld [vmem:[%s5508_s1 + $0x88] ss:$16 sps:$4 sm:$0xff]   ;;  %v3697_v20 = vld [vmem:[%s5508_s1 + $0xa4] ss:$16 sps:$4 sm:$0xff]  }
   0x8   :  { %2217 = vmatprep.subr.bf16.mxu0 %v3679_v8  ;;  %2582 = vmatprep.subr.bf16.mxu1 %v3681_v9  ;;  %v3699_v21 = vld [vmem:[%s5508_s1 + $0xac] ss:$16 sps:$4 sm:$0xff]   ;;  %v3701_v22 = vld [vmem:[%s5508_s1 + $0xa0] ss:$16 sps:$4 sm:$0xff]   ;;  %v3702_v23 = vld [vmem:[%s5508_s1 + $0xa8] ss:$16 sps:$4 sm:$0xff]  }
   0x9   :  { %v3703_v24 = vld [vmem:[%s5508_s1 + $0xc4] ss:$16 sps:$4 sm:$0xff]   ;;  %v3705_v25 = vld [vmem:[%s5508_s1 + $0xcc] ss:$16 sps:$4 sm:$0xff]   ;;  %v3707_v26 = vld [vmem:[%s5508_s1 + $0xc0] ss:$16 sps:$4 sm:$0xff]  }
   0xa   :  { %v3708_v27 = vld [vmem:[%s5508_s1 + $0xc8] ss:$16 sps:$4 sm:$0xff]   ;;  %v3709_v28 = vld [vmem:[%s5508_s1 + $0xe4] ss:$16 sps:$4 sm:$0xff]   ;;  %v3711_v29 = vld [vmem:[%s5508_s1 + $0xec] ss:$16 sps:$4 sm:$0xff]  }
   0xb   :  { %2218 = vmatpush1.bf16.msra.mxu0 %v3683_v10  ;;  %2583 = vmatpush1.bf16.msra.mxu1 %v3684_v11  ;;  %v3713_v30 = vld [vmem:[%s5508_s1 + $0xe0] ss:$16 sps:$4 sm:$0xff]   ;;  %v3714_v31 = vld [vmem:[%s5508_s1 + $0xe8] ss:$16 sps:$4 sm:$0xff]   ;;  %v3715_v32 = vld [vmem:[%s5508_s1 + $0x104] ss:$16 sps:$4 sm:$0xff]  }
   0xc   :  { %2219 = vmatprep.subr.bf16.mxu0 %v3685_v12  ;;  %2584 = vmatprep.subr.bf16.mxu1 %v3687_v13  ;;  %v3717_v33 = vld [vmem:[%s5508_s1 + $0x10c] ss:$16 sps:$4 sm:$0xff]   ;;  %v3719_v34 = vld [vmem:[%s5508_s1 + $0x100] ss:$16 sps:$4 sm:$0xff]   ;;  %v3720_v35 = vld [vmem:[%s5508_s1 + $0x108] ss:$16 sps:$4 sm:$0xff]  }
   0xd   :  { %v3721_v36 = vld [vmem:[%s5508_s1 + $0x124] ss:$16 sps:$4 sm:$0xff]   ;;  %v3723_v37 = vld [vmem:[%s5508_s1 + $0x12c] ss:$16 sps:$4 sm:$0xff]   ;;  %v3725_v38 = vld [vmem:[%s5508_s1 + $0x120] ss:$16 sps:$4 sm:$0xff]  }
   0xe   :  { %v3726_v39 = vld [vmem:[%s5508_s1 + $0x128] ss:$16 sps:$4 sm:$0xff]   ;;  %v3727_v40 = vld [vmem:[%s5508_s1 + $0x144] ss:$16 sps:$4 sm:$0xff]   ;;  %v3729_v41 = vld [vmem:[%s5508_s1 + $0x14c] ss:$16 sps:$4 sm:$0xff]  }
   0xf   :  { %2220 = vmatpush1.bf16.msra.mxu0 %v3689_v14  ;;  %2585 = vmatpush1.bf16.msra.mxu1 %v3690_v15  ;;  %v3731_v42 = vld [vmem:[%s5508_s1 + $0x140] ss:$16 sps:$4 sm:$0xff]   ;;  %v3732_v43 = vld [vmem:[%s5508_s1 + $0x148] ss:$16 sps:$4 sm:$0xff]   ;;  %v3733_v44 = vld [vmem:[%s5508_s1 + $0x164] ss:$16 sps:$4 sm:$0xff]  }
  0x10   :  { %2221 = vmatprep.subr.bf16.mxu0 %v3691_v16  ;;  %2586 = vmatprep.subr.bf16.mxu1 %v3693_v17  ;;  %v3735_v45 = vld [vmem:[%s5508_s1 + $0x16c] ss:$16 sps:$4 sm:$0xff]   ;;  %v3737_v46 = vld [vmem:[%s5508_s1 + $0x160] ss:$16 sps:$4 sm:$0xff]   ;;  %v3738_v47 = vld [vmem:[%s5508_s1 + $0x168] ss:$16 sps:$4 sm:$0xff]  }
  0x11   :  { %v4303_v48 = vld [vmem:[%s5509_s0] sm:$0xff]  ;;  %v4311_v50 = vld [vmem:[%s5509_s0 + $0xc] sm:$0x11]  ;;  %v4316_v51 = vld [vmem:[%s5509_s0 + $0x18] sm:$0xff] }
  0x12   :  { %v3739_v49 = vld [vmem:[%s5508_s1 + $0x184] ss:$16 sps:$4 sm:$0xff]   ;;  %v4325_v53 = vcombine.high %v4303_v48, %v4311_v50  ;;  %v3741_v54 = vld [vmem:[%s5508_s1 + $0x18c] ss:$16 sps:$4 sm:$0xff]   ;;  %v3151_v56 = vcombine.high %v4303_v48, %v4316_v51  ;;  %v3743_v57 = vld [vmem:[%s5508_s1 + $0x180] ss:$16 sps:$4 sm:$0xff]   ;;  %v3150_v16 = vcombine.low %v4303_v48, %v4316_v51 }
  0x13   :  { %2222 = vmatpush1.bf16.msra.mxu0 %v3695_v18  ;;  %2587 = vmatpush1.bf16.msra.mxu1 %v3696_v19  ;;  %v4321_v52 = vld [vmem:[%s5509_s0 + $0x24] sm:$0x11]  ;;  %v3747_v60 = vld [vmem:[%s5508_s1 + $0x1ac] ss:$16 sps:$4 sm:$0xff]   ;;  %v3749_v61 = vld [vmem:[%s5508_s1 + $0x1a0] ss:$16 sps:$4 sm:$0xff]  }
  0x14   :  { %2223 = vmatprep.subr.bf16.mxu0 %v3697_v20  ;;  %2588 = vmatprep.subr.bf16.mxu1 %v3699_v21  ;;  %v4332_v55 = vcombine.high %v4316_v51, %v4321_v52  ;;  %v3744_v58 = vld [vmem:[%s5508_s1 + $0x188] ss:$16 sps:$4 sm:$0xff]   ;;  %v3745_v59 = vld [vmem:[%s5508_s1 + $0x1a4] ss:$16 sps:$4 sm:$0xff]   ;;  %v3753_v0 = vld [vmem:[%s5508_s1 + $0x1cc] ss:$16 sps:$4 sm:$0xff]  }
  0x15   :  { %2245 = vmatprep.mubr.bf16.mxu0 %v3151_v56  ;;  %2610 = vmatprep.mubr.bf16.mxu1 %v3151_v56  ;;  %v3750_v62 = vld [vmem:[%s5508_s1 + $0x1a8] ss:$16 sps:$4 sm:$0xff]   ;;  %v3751_v63 = vld [vmem:[%s5508_s1 + $0x1c4] ss:$16 sps:$4 sm:$0xff]   ;;  %v3755_v1 = vld [vmem:[%s5508_s1 + $0x1c0] ss:$16 sps:$4 sm:$0xff]  }
  0x16   :  { %v3756_v2 = vld [vmem:[%s5508_s1 + $0x1c8] ss:$16 sps:$4 sm:$0xff]   ;;  %v161_v3 = vshll.u32 %v4325_v53, 16  ;;  %v182_v4 = vshll.u32 %v4332_v55, 16  ;;  %v3757_v5 = vld [vmem:[%s5508_s1 + $0x1e4] ss:$16 sps:$4 sm:$0xff]   ;;  %vm5416_vm2 = vmor %vm3105_vm1, %vm3104_vm0 }
  0x17   :  { %2224 = vmatpush1.bf16.msra.mxu0 %v3701_v22  ;;  %2589 = vmatpush1.bf16.msra.mxu1 %v3702_v23  ;;  %v3759_v6 = vld [vmem:[%s5508_s1 + $0x1ec] ss:$16 sps:$4 sm:$0xff]   ;;  %v3761_v7 = vld [vmem:[%s5508_s1 + $0x1e0] ss:$16 sps:$4 sm:$0xff]   ;;  %v3762_v8 = vld [vmem:[%s5508_s1 + $0x1e8] ss:$16 sps:$4 sm:$0xff]  }
  0x18   :  { %2225 = vmatprep.subr.bf16.mxu0 %v3703_v24  ;;  %2590 = vmatprep.subr.bf16.mxu1 %v3705_v25  ;;  %v159_v9 = vshrl.u32 %v4325_v53, 16  ;;  %v163_v10 = vrot.slane %v161_v3, 1  ;;  %v180_v11 = vshrl.u32 %v4332_v55, 16  ;;  %v184_v12 = vrot.slane %v182_v4, 1  ;;  %v3770_v13 = vld [vmem:[%s5508_s1 + $0x204] ss:$16 sps:$4 sm:$0xff]  }
  0x19   :  { %v3773_v14 = vld [vmem:[%s5508_s1 + $0x20c] ss:$16 sps:$4 sm:$0xff]   ;;  %v3768_v15 = vld [vmem:[%s5508_s1 + $0x200] ss:$16 sps:$4 sm:$0xff]   ;;  %v3771_v17 = vld [vmem:[%s5508_s1 + $0x208] ss:$16 sps:$4 sm:$0xff]  }
  0x1a   :  { %v164_v18 = vor.u32 %v163_v10, %v159_v9  ;;  %v185_v19 = vor.u32 %v184_v12, %v180_v11  ;;  %v3777_v20 = vld [vmem:[%s5508_s1 + $0x224] ss:$16 sps:$4 sm:$0xff]   ;;  %v3780_v21 = vld [vmem:[%s5508_s1 + $0x22c] ss:$16 sps:$4 sm:$0xff]   ;;  %v3775_v23 = vld [vmem:[%s5508_s1 + $0x220] ss:$16 sps:$4 sm:$0xff]  }
  0x1b   :  { %2226 = vmatpush1.bf16.msra.mxu0 %v3707_v26  ;;  %2591 = vmatpush1.bf16.msra.mxu1 %v3708_v27  ;;  %v3778_v24 = vld [vmem:[%s5508_s1 + $0x228] ss:$16 sps:$4 sm:$0xff]   ;;  %v3783_v25 = vld [vmem:[%s5508_s1 + $0x244] ss:$16 sps:$4 sm:$0xff]   ;;  %v3786_v26 = vld [vmem:[%s5508_s1 + $0x24c] ss:$16 sps:$4 sm:$0xff]  }
  0x1c   :  { %2227 = vmatprep.subr.bf16.mxu0 %v3709_v28  ;;  %2592 = vmatprep.subr.bf16.mxu1 %v3711_v29  ;;  %v4402_v22 = vcombine.low %v164_v18, %v185_v19  ;;  %v3781_v27 = vld [vmem:[%s5508_s1 + $0x240] ss:$16 sps:$4 sm:$0xff]   ;;  %v3784_v28 = vld [vmem:[%s5508_s1 + $0x248] ss:$16 sps:$4 sm:$0xff]   ;;  %v3807_v3 = vld [vmem:[%s5508_s1 + $0x2c4] ss:$16 sps:$4 sm:$0xff]  }
  0x1d   :  { %v4425_v29 = vld [vmem:[%s5509_s0 + $0x30] sm:$0xff]  ;;  %v3796_v56 = vld [vmem:[%s5508_s1 + $0x288] ss:$16 sps:$4 sm:$0xff]   ;;  %v3810_v4 = vld [vmem:[%s5508_s1 + $0x2cc] ss:$16 sps:$4 sm:$0xff]  }
  0x1e   :  { %v3816_v18 = vld [vmem:[%s5508_s1 + $0x2ec] ss:$16 sps:$4 sm:$0xff]  }
  0x1f   :  { %2228 = vmatpush1.bf16.msra.mxu0 %v3713_v30  ;;  %2593 = vmatpush1.bf16.msra.mxu1 %v3714_v31  ;;  %v4430_v30 = vld [vmem:[%s5509_s0 + $0x3c] sm:$0x11]  ;;  %v4435_v31 = vld [vmem:[%s5509_s0 + $0x48] sm:$0xff] }
  0x20   :  { %2229 = vmatprep.subr.bf16.mxu0 %v3715_v32  ;;  %2594 = vmatprep.subr.bf16.mxu1 %v3717_v33  ;;  %v4440_v32 = vld [vmem:[%s5509_s0 + $0x54] sm:$0x11]  ;;  %v4444_v33 = vcombine.high %v4425_v29, %v4430_v30 }
  0x23   :  { %2230 = vmatpush1.bf16.msra.mxu0 %v3719_v34  ;;  %2595 = vmatpush1.bf16.msra.mxu1 %v3720_v35  ;;  %v3160_v34 = vcombine.high %v4425_v29, %v4435_v31  ;;  %v4450_v35 = vcombine.low %v4303_v48, %v4311_v50  ;;  %v4494_v48 = vld [vmem:[%s5509_s0 + $0x78] sm:$0xff] }
  0x24   :  { %2231 = vmatprep.subr.bf16.mxu0 %v3721_v36  ;;  %2596 = vmatprep.subr.bf16.mxu1 %v3723_v37  ;;  %v3789_v36 = vld [vmem:[%s5508_s1 + $0x264] ss:$16 sps:$4 sm:$0xff]   ;;  %v3792_v37 = vld [vmem:[%s5508_s1 + $0x26c] ss:$16 sps:$4 sm:$0xff]  }
  0x27   :  { %2232 = vmatpush1.bf16.msra.mxu0 %v3725_v38  ;;  %2597 = vmatpush1.bf16.msra.mxu1 %v3726_v39  ;;  %v4460_v38 = vcombine.high %v4435_v31, %v4440_v32  ;;  %v3159_v39 = vcombine.low %v4425_v29, %v4435_v31 }
  0x28   :  { %2233 = vmatprep.subr.bf16.mxu0 %v3727_v40  ;;  %2598 = vmatprep.subr.bf16.mxu1 %v3729_v41  ;;  %v4466_v40 = vcombine.low %v4316_v51, %v4321_v52  ;;  %v3787_v41 = vld [vmem:[%s5508_s1 + $0x260] ss:$16 sps:$4 sm:$0xff]  }
  0x29   :  { %v3793_v51 = vld [vmem:[%s5508_s1 + $0x280] ss:$16 sps:$4 sm:$0xff]  }
  0x2a   :  { %v175_v50 = vshll.u32 %v4466_v40, 16 }
  0x2b   :  { %2234 = vmatpush1.bf16.msra.mxu0 %v3731_v42  ;;  %2599 = vmatpush1.bf16.msra.mxu1 %v3732_v43  ;;  %v3790_v42 = vld [vmem:[%s5508_s1 + $0x268] ss:$16 sps:$4 sm:$0xff]   ;;  %v3795_v43 = vld [vmem:[%s5508_s1 + $0x284] ss:$16 sps:$4 sm:$0xff]  }
  0x2c   :  { %2235 = vmatprep.subr.bf16.mxu0 %v3733_v44  ;;  %2600 = vmatprep.subr.bf16.mxu1 %v3735_v45  ;;  %v3798_v44 = vld [vmem:[%s5508_s1 + $0x28c] ss:$16 sps:$4 sm:$0xff]   ;;  %v4483_v45 = vld [vmem:[%s5509_s0 + $0x60] sm:$0xff] }
  0x2f   :  { %2236 = vmatpush1.bf16.msra.mxu0 %v3737_v46  ;;  %2601 = vmatpush1.bf16.msra.mxu1 %v3738_v47  ;;  %v154_v46 = vshll.u32 %v4450_v35, 16  ;;  %v4489_v47 = vld [vmem:[%s5509_s0 + $0x6c] sm:$0x11] }
  0x30   :  { %2237 = vmatprep.subr.bf16.mxu0 %v3739_v49  ;;  %2602 = vmatprep.subr.bf16.mxu1 %v3741_v54  ;;  %v4499_v49 = vld [vmem:[%s5509_s0 + $0x84] sm:$0x11]  ;;  %v4507_v52 = vcombine.high %v4483_v45, %v4489_v47 }
  0x31   :  { %v4511_v54 = vcombine.high %v4494_v48, %v4499_v49 }
  0x33   :  { %2238 = vmatpush1.bf16.msra.mxu0 %v3743_v57  ;;  %2603 = vmatpush1.bf16.msra.mxu1 %v3744_v58  ;;  %v3169_v57 = vcombine.high %v4483_v45, %v4494_v48  ;;  %v3168_v58 = vcombine.low %v4483_v45, %v4494_v48 }
  0x34   :  { %2239 = vmatprep.subr.bf16.mxu0 %v3745_v59  ;;  %2604 = vmatprep.subr.bf16.mxu1 %v3747_v60  ;;  %v152_v59 = vshrl.u32 %v4450_v35, 16  ;;  %v173_v60 = vshrl.u32 %v4466_v40, 16 }
  0x37   :  { %2240 = vmatpush1.bf16.msra.mxu0 %v3749_v61  ;;  %2605 = vmatpush1.bf16.msra.mxu1 %v3750_v62  ;;  %v3801_v61 = vld [vmem:[%s5508_s1 + $0x2a4] ss:$16 sps:$4 sm:$0xff]   ;;  %v3804_v62 = vld [vmem:[%s5508_s1 + $0x2ac] ss:$16 sps:$4 sm:$0xff]  }
  0x38   :  { %2241 = vmatprep.subr.bf16.mxu0 %v3751_v63  ;;  %2606 = vmatprep.subr.bf16.mxu1 %v3753_v0  ;;  %v156_v63 = vrot.slane %v154_v46, 1  ;;  %v3799_v0 = vld [vmem:[%s5508_s1 + $0x2a0] ss:$16 sps:$4 sm:$0xff]   ;;  %v222_v46 = vshrl.u32 %v4460_v38, 16 }
  0x3a   :  { %v157_v12 = vor.u32 %v156_v63, %v152_v59  ;;  %v245_v63 = vshll.u32 %v4507_v52, 16 }
  0x3b   :  { %2242 = vmatpush1.bf16.msra.mxu0 %v3755_v1  ;;  %2607 = vmatpush1.bf16.msra.mxu1 %v3756_v2  ;;  %v3802_v1 = vld [vmem:[%s5508_s1 + $0x2a8] ss:$16 sps:$4 sm:$0xff]   ;;  %v177_v2 = vrot.slane %v175_v50, 1 }
  0x3c   :  { %2243 = vmatprep.subr.bf16.mxu0 %v3757_v5  ;;  %2608 = vmatprep.subr.bf16.mxu1 %v3759_v6  ;;  %v4543_v5 = vld [vmem:[%s5509_s0 + $0x90] sm:$0xff]  ;;  %v4548_v6 = vld [vmem:[%s5509_s0 + $0x9c] sm:$0x11] }
  0x3d   :  { %v4562_v9 = vcombine.high %v4543_v5, %v4548_v6 }
  0x3f   :  { %2244 = vmatpush1.bf16.msra.mxu0 %v3761_v7  ;;  %2609 = vmatpush1.bf16.msra.mxu1 %v3762_v8  ;;  %v4553_v7 = vld [vmem:[%s5509_s0 + $0xa8] sm:$0xff]  ;;  %v4558_v8 = vld [vmem:[%s5509_s0 + $0xb4] sm:$0x11] }
  0x40   :  { %2286 = vmatprep.subr.bf16.mxu0 %v3770_v13  ;;  %2651 = vmatprep.subr.bf16.mxu1 %v3773_v14  ;;  %v4566_v10 = vcombine.high %v4553_v7, %v4558_v8  ;;  %v3178_v11 = vcombine.high %v4543_v5, %v4553_v7  ;;  %v178_v13 = vor.u32 %v177_v2, %v173_v60  ;;  %v3805_v14 = vld [vmem:[%s5508_s1 + $0x2c0] ss:$16 sps:$4 sm:$0xff]   ;;  %v3846_v60 = vld [vmem:[%s5508_s1 + $0x36c] ss:$16 sps:$4 sm:$0xff]   ;;  %v266_v2 = vshll.u32 %v4511_v54, 16 }
  0x42   :  { %2246 = vmatmul.mubr.bf16.vlgmr.msra.gmra.mrb[0].mxu0 %v3150_v16  ;;  %2611 = vmatmul.mubr.bf16.vlgmr.msra.gmra.mrb[0].mxu1 %v3150_v16  ;;  %v3808_v16 = vld [vmem:[%s5508_s1 + $0x2c8] ss:$16 sps:$4 sm:$0xff]   ;;  %v3153_v19 = vcombine.low %v157_v12, %v178_v13  ;;  %v264_v12 = vshrl.u32 %v4511_v54, 16  ;;  %v268_v13 = vrot.slane %v266_v2, 1 }
  0x43   :  { %2287 = vmatpush1.bf16.msra.mxu0 %v3768_v15  ;;  %2652 = vmatpush1.bf16.msra.mxu1 %v3771_v17  ;;  %v3177_v15 = vcombine.low %v4543_v5, %v4553_v7  ;;  %v3813_v17 = vld [vmem:[%s5508_s1 + $0x2e4] ss:$16 sps:$4 sm:$0xff]  }
  0x44   :  { %2288 = vmatprep.subr.bf16.mxu0 %v3777_v20  ;;  %2653 = vmatprep.subr.bf16.mxu1 %v3780_v21  ;;  %v3811_v20 = vld [vmem:[%s5508_s1 + $0x2e0] ss:$16 sps:$4 sm:$0xff]   ;;  %v3814_v21 = vld [vmem:[%s5508_s1 + $0x2e8] ss:$16 sps:$4 sm:$0xff]  }
  0x45   :  { %2255 = vmatprep.mubr.bf16.mxu0 %v3160_v34  ;;  %2620 = vmatprep.mubr.bf16.mxu1 %v3160_v34  ;;  %v3823_v34 = vld [vmem:[%s5508_s1 + $0x320] ss:$16 sps:$4 sm:$0xff]  }
  0x47   :  { %2289 = vmatpush1.bf16.msra.mxu0 %v3775_v23  ;;  %2654 = vmatpush1.bf16.msra.mxu1 %v3778_v24  ;;  %v3819_v23 = vld [vmem:[%s5508_s1 + $0x304] ss:$16 sps:$4 sm:$0xff]   ;;  %v3822_v24 = vld [vmem:[%s5508_s1 + $0x30c] ss:$16 sps:$4 sm:$0xff]  }
  0x48   :  { %2290 = vmatprep.subr.bf16.mxu0 %v3783_v25  ;;  %2655 = vmatprep.subr.bf16.mxu1 %v3786_v26  ;;  %v3817_v25 = vld [vmem:[%s5508_s1 + $0x300] ss:$16 sps:$4 sm:$0xff]   ;;  %v3820_v26 = vld [vmem:[%s5508_s1 + $0x308] ss:$16 sps:$4 sm:$0xff]  }
  0x4a   :  { %2256 = vmatmul.mubr.bf16.gmra.mrb[4].mxu0 %v3159_v39  ;;  %2621 = vmatmul.mubr.bf16.gmra.mrb[4].mxu1 %v3159_v39  ;;  %v3836_v39 = vld [vmem:[%s5508_s1 + $0x344] ss:$16 sps:$4 sm:$0xff]  }
  0x4b   :  { %2291 = vmatpush1.bf16.msra.mxu0 %v3781_v27  ;;  %2656 = vmatpush1.bf16.msra.mxu1 %v3784_v28  ;;  %v3825_v27 = vld [vmem:[%s5508_s1 + $0x324] ss:$16 sps:$4 sm:$0xff]   ;;  %v3828_v28 = vld [vmem:[%s5508_s1 + $0x32c] ss:$16 sps:$4 sm:$0xff]  }
  0x4c   :  { %2292 = vmatprep.subr.bf16.mxu0 %v3789_v36  ;;  %2657 = vmatprep.subr.bf16.mxu1 %v3792_v37  ;;  %v203_v36 = vshll.u32 %v4444_v33, 16  ;;  %v3826_v37 = vld [vmem:[%s5508_s1 + $0x328] ss:$16 sps:$4 sm:$0xff]  }
  0x4d   :  { %2265 = vmatprep.mubr.bf16.mxu0 %v3169_v57  ;;  %2630 = vmatprep.mubr.bf16.mxu1 %v3169_v57  ;;  %v3837_v57 = vld [vmem:[%s5508_s1 + $0x348] ss:$16 sps:$4 sm:$0xff]  }
  0x4f   :  { %2293 = vmatpush1.bf16.msra.mxu0 %v3787_v41  ;;  %2658 = vmatpush1.bf16.msra.mxu1 %v3790_v42  ;;  %v224_v41 = vshll.u32 %v4460_v38, 16  ;;  %v3839_v42 = vld [vmem:[%s5508_s1 + $0x34c] ss:$16 sps:$4 sm:$0xff]  }
  0x50   :  { %2294 = vmatprep.subr.bf16.mxu0 %v3795_v43  ;;  %2659 = vmatprep.subr.bf16.mxu1 %v3798_v44  ;;  %v201_v43 = vshrl.u32 %v4444_v33, 16  ;;  %v205_v44 = vrot.slane %v203_v36, 1  ;;  %v306_v36 = vshrl.u32 %v4566_v10, 16 }
  0x51   :  { %v226_v50 = vrot.slane %v224_v41, 1  ;;  %v3870_v41 = vld [vmem:[%s5508_s1 + $0x3c0] ss:$16 sps:$4 sm:$0xff]  }
  0x52   :  { %2266 = vmatmul.mubr.bf16.gmra.mrb[8].mxu0 %v3168_v58  ;;  %2631 = vmatmul.mubr.bf16.gmra.mrb[8].mxu1 %v3168_v58  ;;  %v3843_v58 = vld [vmem:[%s5508_s1 + $0x364] ss:$16 sps:$4 sm:$0xff]  }
  0x53   :  { %2295 = vmatpush1.bf16.msra.mxu0 %v3793_v51  ;;  %2660 = vmatpush1.bf16.msra.mxu1 %v3796_v56  ;;  %v3834_v51 = vld [vmem:[%s5508_s1 + $0x340] ss:$16 sps:$4 sm:$0xff]   ;;  %v206_v56 = vor.u32 %v205_v44, %v201_v43  ;;  %v227_v59 = vor.u32 %v226_v50, %v222_v46  ;;  %v4702_v44 = vcombine.low %v4483_v45, %v4489_v47  ;;  %v3879_v46 = vld [vmem:[%s5508_s1 + $0x3e4] ss:$16 sps:$4 sm:$0xff]   ;;  %v3882_v50 = vld [vmem:[%s5508_s1 + $0x3ec] ss:$16 sps:$4 sm:$0xff]  }
  0x54   :  { %2296 = vmatprep.subr.bf16.mxu0 %v3801_v61  ;;  %2661 = vmatprep.subr.bf16.mxu1 %v3804_v62  ;;  %v3841_v62 = vld [vmem:[%s5508_s1 + $0x360] ss:$16 sps:$4 sm:$0xff]  }
  0x55   :  { %2275 = vmatprep.mubr.bf16.mxu0 %v3178_v11  ;;  %2640 = vmatprep.mubr.bf16.mxu1 %v3178_v11  ;;  %v4636_v61 = vcombine.low %v206_v56, %v227_v59  ;;  %v247_v11 = vrot.slane %v245_v63, 1  ;;  %v3877_v45 = vld [vmem:[%s5508_s1 + $0x3e0] ss:$16 sps:$4 sm:$0xff]   ;;  %v3888_v63 = vld [vmem:[%s5508_s1 + $0x40c] ss:$16 sps:$4 sm:$0xff]  }
  0x57   :  { %2297 = vmatpush1.bf16.msra.mxu0 %v3799_v0  ;;  %2662 = vmatpush1.bf16.msra.mxu1 %v3802_v1  ;;  %v3844_v0 = vld [vmem:[%s5508_s1 + $0x368] ss:$16 sps:$4 sm:$0xff]   ;;  %v3854_v1 = vld [vmem:[%s5508_s1 + $0x384] ss:$16 sps:$4 sm:$0xff]  }
  0x58   :  { %2298 = vmatprep.subr.bf16.mxu0 %v3807_v3  ;;  %2663 = vmatprep.subr.bf16.mxu1 %v3810_v4  ;;  %v3857_v3 = vld [vmem:[%s5508_s1 + $0x38c] ss:$16 sps:$4 sm:$0xff]   ;;  %v243_v4 = vshrl.u32 %v4507_v52, 16 }
  0x5a   :  { %2276 = vmatmul.mubr.bf16.gmra.mrb[12].mxu0 %v3177_v15  ;;  %2641 = vmatmul.mubr.bf16.gmra.mrb[12].mxu1 %v3177_v15  ;;  %v248_v15 = vor.u32 %v247_v11, %v243_v4  ;;  %v3883_v4 = vld [vmem:[%s5508_s1 + $0x400] ss:$16 sps:$4 sm:$0xff]  }
  0x5b   :  { %2299 = vmatpush1.bf16.msra.mxu0 %v3805_v14  ;;  %2664 = vmatpush1.bf16.msra.mxu1 %v3808_v16  ;;  %v3852_v14 = vld [vmem:[%s5508_s1 + $0x380] ss:$16 sps:$4 sm:$0xff]   ;;  %v3855_v16 = vld [vmem:[%s5508_s1 + $0x388] ss:$16 sps:$4 sm:$0xff]  }
  0x5c   :  { %2300 = vmatprep.subr.bf16.mxu0 %v3813_v17  ;;  %2665 = vmatprep.subr.bf16.mxu1 %v3816_v18  ;;  %v3861_v17 = vld [vmem:[%s5508_s1 + $0x3a4] ss:$16 sps:$4 sm:$0xff]   ;;  %v269_v18 = vor.u32 %v268_v13, %v264_v12  ;;  %v3886_v12 = vld [vmem:[%s5508_s1 + $0x408] ss:$16 sps:$4 sm:$0xff]  }
  0x5d   :  { %2318 = vmatprep.mubr.bf16.mxu0 %v3153_v19  ;;  %2683 = vmatprep.mubr.bf16.mxu1 %v3153_v19  ;;  %v3864_v19 = vld [vmem:[%s5508_s1 + $0x3ac] ss:$16 sps:$4 sm:$0xff]   ;;  %v3892_v13 = vld [vmem:[%s5508_s1 + $0x424] ss:$16 sps:$4 sm:$0xff]  }
  0x5f   :  { %2301 = vmatpush1.bf16.msra.mxu0 %v3811_v20  ;;  %2666 = vmatpush1.bf16.msra.mxu1 %v3814_v21  ;;  %v4668_v20 = vcombine.low %v4425_v29, %v4430_v30  ;;  %v4672_v21 = vcombine.low %v4435_v31, %v4440_v32  ;;  %v3872_v29 = vld [vmem:[%s5508_s1 + $0x3c4] ss:$16 sps:$4 sm:$0xff]   ;;  %v308_v30 = vshll.u32 %v4566_v10, 16  ;;  %v3875_v31 = vld [vmem:[%s5508_s1 + $0x3cc] ss:$16 sps:$4 sm:$0xff]   ;;  %v285_v32 = vshrl.u32 %v4562_v9, 16 }
  0x60   :  { %2302 = vmatprep.subr.bf16.mxu0 %v3819_v23  ;;  %2667 = vmatprep.subr.bf16.mxu1 %v3822_v24  ;;  %v4674_v23 = vcombine.low %v248_v15, %v269_v18  ;;  %v3859_v24 = vld [vmem:[%s5508_s1 + $0x3a0] ss:$16 sps:$4 sm:$0xff]   ;;  %v320_v15 = vrot.slane %v4325_v53, 1  ;;  %v3895_v18 = vld [vmem:[%s5508_s1 + $0x42c] ss:$16 sps:$4 sm:$0xff]  }
  0x61   :  { %v215_v56 = vshrl.u32 %v4672_v21, 16  ;;  %v3890_v53 = vld [vmem:[%s5508_s1 + $0x420] ss:$16 sps:$4 sm:$0xff]  }
  0x63   :  { %2303 = vmatpush1.bf16.msra.mxu0 %v3817_v25  ;;  %2668 = vmatpush1.bf16.msra.mxu1 %v3820_v26  ;;  %v287_v25 = vshll.u32 %v4562_v9, 16  ;;  %v3862_v26 = vld [vmem:[%s5508_s1 + $0x3a8] ss:$16 sps:$4 sm:$0xff]  }
  0x64   :  { %2304 = vmatprep.subr.bf16.mxu0 %v3825_v27  ;;  %2669 = vmatprep.subr.bf16.mxu1 %v3828_v28  ;;  %v196_v28 = vshll.u32 %v4668_v20, 16 }
  0x65   :  { %v289_v27 = vrot.slane %v287_v25, 1 }
  0x66   :  { %v198_v47 = vrot.slane %v196_v28, 1 }
  0x67   :  { %2305 = vmatpush1.bf16.msra.mxu0 %v3823_v34  ;;  %2670 = vmatpush1.bf16.msra.mxu1 %v3826_v37  ;;  %v217_v34 = vshll.u32 %v4672_v21, 16  ;;  %v310_v37 = vrot.slane %v308_v30, 1  ;;  %v3901_v30 = vld [vmem:[%s5508_s1 + $0x44c] ss:$16 sps:$4 sm:$0xff]  }
  0x68   :  { %2306 = vmatprep.subr.bf16.mxu0 %v3836_v39  ;;  %2671 = vmatprep.subr.bf16.mxu1 %v3839_v42  ;;  %v290_v39 = vor.u32 %v289_v27, %v285_v32  ;;  %v3873_v42 = vld [vmem:[%s5508_s1 + $0x3c8] ss:$16 sps:$4 sm:$0xff]  }
  0x69   :  { %v311_v43 = vor.u32 %v310_v37, %v306_v36 }
  0x6b   :  { %2307 = vmatpush1.bf16.msra.mxu0 %v3834_v51  ;;  %2672 = vmatpush1.bf16.msra.mxu1 %v3837_v57  ;;  %v194_v51 = vshrl.u32 %v4668_v20, 16  ;;  %v4714_v57 = vcombine.low %v4494_v48, %v4499_v49  ;;  %v4719_v59 = vcombine.low %v290_v39, %v311_v43  ;;  %v4730_v48 = vld [vmem:[%s5509_s0 + $0x8] sm:$0xf]  ;;  %v4735_v49 = vld [vmem:[%s5509_s0 + $0x20] sm:$0xf] }
  0x6c   :  { %2308 = vmatprep.subr.bf16.mxu0 %v3843_v58  ;;  %2673 = vmatprep.subr.bf16.mxu1 %v3846_v60  ;;  %v219_v58 = vrot.slane %v217_v34, 1  ;;  %v3880_v60 = vld [vmem:[%s5508_s1 + $0x3e8] ss:$16 sps:$4 sm:$0xff]   ;;  %v3152_v11 = vcombine.low %v4730_v48, %v4735_v49  ;;  %v3896_v34 = vld [vmem:[%s5508_s1 + $0x440] ss:$16 sps:$4 sm:$0xff]  }
  0x6d   :  { %v3899_v39 = vld [vmem:[%s5508_s1 + $0x448] ss:$16 sps:$4 sm:$0xff]   ;;  %v3907_v43 = vld [vmem:[%s5508_s1 + $0x46c] ss:$16 sps:$4 sm:$0xff]  }
  0x6e   :  { %v220_v2 = vor.u32 %v219_v58, %v215_v56  ;;  %v3905_v56 = vld [vmem:[%s5508_s1 + $0x468] ss:$16 sps:$4 sm:$0xff]   ;;  %v22_v58 = vld [vmem:[%s5509_s0 + $0x2c] sm:$0x1] }
  0x6f   :  { %2309 = vmatpush1.bf16.msra.mxu0 %v3841_v62  ;;  %2674 = vmatpush1.bf16.msra.mxu1 %v3844_v0  ;;  %v3885_v62 = vld [vmem:[%s5508_s1 + $0x404] ss:$16 sps:$4 sm:$0xff]   ;;  %v238_v0 = vshll.u32 %v4702_v44, 16 }
  0x70   :  { %2310 = vmatprep.subr.bf16.mxu0 %v3854_v1  ;;  %2675 = vmatprep.subr.bf16.mxu1 %v3857_v3  ;;  %v199_v1 = vor.u32 %v198_v47, %v194_v51  ;;  %v259_v3 = vshll.u32 %v4714_v57, 16  ;;  %v3902_v51 = vld [vmem:[%s5508_s1 + $0x460] ss:$16 sps:$4 sm:$0xff]   ;;  %v18_v47 = vld [vmem:[%s5509_s0 + $0x14] sm:$0x1] }
  0x72   :  { %v3162_v25 = vcombine.low %v199_v1, %v220_v2  ;;  %v3910_v1 = vld [vmem:[%s5508_s1 + $0x484] ss:$16 sps:$4 sm:$0xff]  }
  0x73   :  { %2311 = vmatpush1.bf16.msra.mxu0 %v3852_v14  ;;  %2676 = vmatpush1.bf16.msra.mxu1 %v3855_v16  ;;  %v236_v14 = vshrl.u32 %v4702_v44, 16  ;;  %v4757_v16 = vcombine.low %v4543_v5, %v4548_v6  ;;  %v261_v5 = vrot.slane %v259_v3, 1  ;;  %v323_v6 = vrot.slane %v4332_v55, 1  ;;  %v4785_v55 = vld [vmem:[%s5509_s0 + $0x50] sm:$0xf] }
  0x74   :  { %2312 = vmatprep.subr.bf16.mxu0 %v3861_v17  ;;  %2677 = vmatprep.subr.bf16.mxu1 %v3864_v19  ;;  %v4761_v17 = vcombine.low %v4553_v7, %v4558_v8  ;;  %v240_v19 = vrot.slane %v238_v0, 1  ;;  %v3893_v7 = vld [vmem:[%s5508_s1 + $0x428] ss:$16 sps:$4 sm:$0xff]   ;;  %v3898_v8 = vld [vmem:[%s5508_s1 + $0x444] ss:$16 sps:$4 sm:$0xff]  }
  0x75   :  { %v278_v37 = vshrl.u32 %v4757_v16, 16  ;;  %v4836_v0 = vld [vmem:[%s5509_s0 + $0x80] sm:$0xf] }
  0x76   :  { %v301_v32 = vshll.u32 %v4761_v17, 16  ;;  %v241_v27 = vor.u32 %v240_v19, %v236_v14  ;;  %v3916_v14 = vld [vmem:[%s5508_s1 + $0x4a4] ss:$16 sps:$4 sm:$0xff]   ;;  %v3919_v19 = vld [vmem:[%s5508_s1 + $0x4ac] ss:$16 sps:$4 sm:$0xff]  }
  0x77   :  { %2313 = vmatpush1.bf16.msra.mxu0 %v3859_v24  ;;  %2678 = vmatpush1.bf16.msra.mxu1 %v3862_v26  ;;  %v257_v24 = vshrl.u32 %v4714_v57, 16  ;;  %v4780_v26 = vld [vmem:[%s5509_s0 + $0x38] sm:$0xf] }
  0x78   :  { %2314 = vmatprep.subr.bf16.mxu0 %v3872_v29  ;;  %2679 = vmatprep.subr.bf16.mxu1 %v3875_v31  ;;  %v4787_v29 = vcombine.low %v320_v15, %v323_v6  ;;  %v280_v31 = vshll.u32 %v4757_v16, 16  ;;  %v3161_v36 = vcombine.low %v4780_v26, %v4785_v55  ;;  %v326_v15 = vrot.slane %v4444_v33, 1  ;;  %v3917_v33 = vld [vmem:[%s5508_s1 + $0x4a8] ss:$16 sps:$4 sm:$0xff]  }
  0x79   :  { %v262_v28 = vor.u32 %v261_v5, %v257_v24  ;;  %v3914_v5 = vld [vmem:[%s5508_s1 + $0x4a0] ss:$16 sps:$4 sm:$0xff]  }
  0x7b   :  { %2315 = vmatpush1.bf16.msra.mxu0 %v3870_v41  ;;  %2680 = vmatpush1.bf16.msra.mxu1 %v3873_v42  ;;  %v3904_v41 = vld [vmem:[%s5508_s1 + $0x464] ss:$16 sps:$4 sm:$0xff]   ;;  %v299_v42 = vshrl.u32 %v4761_v17, 16 }
  0x7c   :  { %2316 = vmatprep.subr.bf16.mxu0 %v3879_v46  ;;  %2681 = vmatprep.subr.bf16.mxu1 %v3882_v50  ;;  %v282_v46 = vrot.slane %v280_v31, 1  ;;  %v303_v50 = vrot.slane %v301_v32, 1  ;;  %v4879_v31 = vld [vmem:[%s5509_s0 + $0x98] sm:$0xf]  ;;  %v335_v32 = vrot.slane %v4511_v54, 1  ;;  %v338_v54 = vrot.slane %v4562_v9, 1 }
  0x7d   :  { %v3931_v9 = vld [vmem:[%s5508_s1 + $0x4ec] ss:$16 sps:$4 sm:$0xff]  }
  0x7e   :  { %v283_v2 = vor.u32 %v282_v46, %v278_v37  ;;  %v3920_v37 = vld [vmem:[%s5508_s1 + $0x4c0] ss:$16 sps:$4 sm:$0xff]  }
  0x7f   :  { %2317 = vmatpush1.bf16.msra.mxu0 %v3877_v45  ;;  %2682 = vmatpush1.bf16.msra.mxu1 %v3880_v60  ;;  %v3171_v45 = vcombine.low %v241_v27, %v262_v28  ;;  %v4825_v60 = vld [vmem:[%s5509_s0 + $0x68] sm:$0xf]  ;;  %v4885_v27 = vld [vmem:[%s5509_s0 + $0xb0] sm:$0xf] }
  0x80   :  { %2359 = vmatprep.subr.bf16.mxu0 %v3885_v62  ;;  %2724 = vmatprep.subr.bf16.mxu1 %v3888_v63  ;;  %v4828_v62 = vcombine.low %v4730_v48, %v18_v47  ;;  %v4831_v63 = vcombine.low %v4735_v49, %v22_v58  ;;  %v3913_v48 = vld [vmem:[%s5508_s1 + $0x48c] ss:$16 sps:$4 sm:$0xff]   ;;  %v304_v49 = vor.u32 %v303_v50, %v299_v42  ;;  %v341_v42 = vrot.slane %v4566_v10, 1  ;;  %v3929_v10 = vld [vmem:[%s5508_s1 + $0x4e8] ss:$16 sps:$4 sm:$0xff]  }
  0x81   :  { %v3932_v47 = vld [vmem:[%s5508_s1 + $0x500] ss:$16 sps:$4 sm:$0xff]   ;;  %v3935_v58 = vld [vmem:[%s5508_s1 + $0x508] ss:$16 sps:$4 sm:$0xff]  }
  0x82   :  { %2319 = vmatmul.mubr.bf16.vlgmr.msra.gmra.mrb[0].mxu0 %v3152_v11  ;;  %2684 = vmatmul.mubr.bf16.vlgmr.msra.gmra.mrb[0].mxu1 %v3152_v11  ;;  %v168_v3 = vshll.u32 %v4828_v62, 16  ;;  %v3908_v11 = vld [vmem:[%s5508_s1 + $0x480] ss:$16 sps:$4 sm:$0xff]   ;;  %v3180_v24 = vcombine.low %v283_v2, %v304_v49  ;;  %v4908_v46 = vcombine.low %v338_v54, %v341_v42  ;;  %v321_v2 = vrot.slane %v4828_v62, 1  ;;  %v3940_v49 = vld [vmem:[%s5508_s1 + $0x524] ss:$16 sps:$4 sm:$0xff]  }
  0x83   :  { %2360 = vmatpush1.bf16.msra.mxu0 %v3883_v4  ;;  %2725 = vmatpush1.bf16.msra.mxu1 %v3886_v12  ;;  %v189_v4 = vshll.u32 %v4831_v63, 16  ;;  %v3911_v12 = vld [vmem:[%s5508_s1 + $0x488] ss:$16 sps:$4 sm:$0xff]   ;;  %v3973_v42 = vld [vmem:[%s5508_s1 + $0x5ac] ss:$16 sps:$4 sm:$0xff]  }
  0x84   :  { %2361 = vmatprep.subr.bf16.mxu0 %v3892_v13  ;;  %2726 = vmatprep.subr.bf16.mxu1 %v3895_v18  ;;  %v3170_v13 = vcombine.low %v4825_v60, %v4836_v0  ;;  %v329_v18 = vrot.slane %v4460_v38, 1  ;;  %v170_v38 = vrot.slane %v168_v3, 1  ;;  %v324_v3 = vrot.slane %v4831_v63, 1 }
  0x85   :  { %2328 = vmatprep.mubr.bf16.mxu0 %v3162_v25  ;;  %2693 = vmatprep.mubr.bf16.mxu1 %v3162_v25  ;;  %v187_v25 = vshrl.u32 %v4831_v63, 16  ;;  %v191_v6 = vrot.slane %v189_v4, 1  ;;  %v3943_v4 = vld [vmem:[%s5508_s1 + $0x52c] ss:$16 sps:$4 sm:$0xff]   ;;  %v3941_v63 = vld [vmem:[%s5508_s1 + $0x528] ss:$16 sps:$4 sm:$0xff]  }
  0x87   :  { %2362 = vmatpush1.bf16.msra.mxu0 %v3890_v53  ;;  %2727 = vmatpush1.bf16.msra.mxu1 %v3893_v7  ;;  %v166_v53 = vshrl.u32 %v4828_v62, 16  ;;  %v4870_v7 = vcombine.low %v326_v15, %v329_v18  ;;  %v4948_v62 = vcombine.low %v321_v2, %v324_v3  ;;  %v3949_v15 = vld [vmem:[%s5508_s1 + $0x54c] ss:$16 sps:$4 sm:$0xff]   ;;  %v3944_v18 = vld [vmem:[%s5508_s1 + $0x540] ss:$16 sps:$4 sm:$0xff]  }
  0x88   :  { %2363 = vmatprep.subr.bf16.mxu0 %v3898_v8  ;;  %2728 = vmatprep.subr.bf16.mxu1 %v3901_v30  ;;  %v332_v8 = vrot.slane %v4507_v52, 1  ;;  %v3922_v30 = vld [vmem:[%s5508_s1 + $0x4c4] ss:$16 sps:$4 sm:$0xff]   ;;  %v3925_v52 = vld [vmem:[%s5508_s1 + $0x4cc] ss:$16 sps:$4 sm:$0xff]  }
  0x89   :  { %v3985_v2 = vld [vmem:[%s5508_s1 + $0x5e4] ss:$16 sps:$4 sm:$0xff]  }
  0x8a   :  { %2329 = vmatmul.mubr.bf16.gmra.mrb[4].mxu0 %v3161_v36  ;;  %2694 = vmatmul.mubr.bf16.gmra.mrb[4].mxu1 %v3161_v36  ;;  %v4890_v28 = vcombine.low %v332_v8, %v335_v32  ;;  %v192_v36 = vor.u32 %v191_v6, %v187_v25  ;;  %v38_v25 = vld [vmem:[%s5509_s0 + $0x8c] sm:$0x1]  ;;  %v3953_v8 = vld [vmem:[%s5508_s1 + $0x560] ss:$16 sps:$4 sm:$0xff]   ;;  %v3961_v32 = vld [vmem:[%s5508_s1 + $0x584] ss:$16 sps:$4 sm:$0xff]  }
  0x8b   :  { %2364 = vmatpush1.bf16.msra.mxu0 %v3896_v34  ;;  %2729 = vmatpush1.bf16.msra.mxu1 %v3899_v39  ;;  %v171_v34 = vor.u32 %v170_v38, %v166_v53  ;;  %v3923_v39 = vld [vmem:[%s5508_s1 + $0x4c8] ss:$16 sps:$4 sm:$0xff]   ;;  %v34_v53 = vld [vmem:[%s5509_s0 + $0x74] sm:$0x1]  ;;  %v4988_v6 = vcombine.low %v4836_v0, %v38_v25  ;;  %v3964_v0 = vld [vmem:[%s5508_s1 + $0x58c] ss:$16 sps:$4 sm:$0xff]  }
  0x8c   :  { %2365 = vmatprep.subr.bf16.mxu0 %v3904_v41  ;;  %2730 = vmatprep.subr.bf16.mxu1 %v3907_v43  ;;  %v3179_v41 = vcombine.low %v4879_v31, %v4885_v27  ;;  %v3928_v43 = vld [vmem:[%s5508_s1 + $0x4e4] ss:$16 sps:$4 sm:$0xff]   ;;  %v4985_v38 = vcombine.low %v4825_v60, %v34_v53  ;;  %v3991_v53 = vld [vmem:[%s5508_s1 + $0x600] ss:$16 sps:$4 sm:$0xff]   ;;  %v3994_v25 = vld [vmem:[%s5508_s1 + $0x608] ss:$16 sps:$4 sm:$0xff]  }
  0x8d   :  { %2338 = vmatprep.mubr.bf16.mxu0 %v3171_v45  ;;  %2703 = vmatprep.mubr.bf16.mxu1 %v3171_v45  ;;  %v3155_v50 = vcombine.low %v171_v34, %v192_v36  ;;  %v3937_v45 = vld [vmem:[%s5508_s1 + $0x50c] ss:$16 sps:$4 sm:$0xff]   ;;  %v3959_v34 = vld [vmem:[%s5508_s1 + $0x580] ss:$16 sps:$4 sm:$0xff]   ;;  %v3962_v36 = vld [vmem:[%s5508_s1 + $0x588] ss:$16 sps:$4 sm:$0xff]  }
  0x8e   :  { %v333_v60 = vrot.slane %v4985_v38, 1 }
  0x8f   :  { %2366 = vmatpush1.bf16.msra.mxu0 %v3902_v51  ;;  %2731 = vmatpush1.bf16.msra.mxu1 %v3905_v56  ;;  %v3926_v51 = vld [vmem:[%s5508_s1 + $0x4e0] ss:$16 sps:$4 sm:$0xff]   ;;  %v3934_v56 = vld [vmem:[%s5508_s1 + $0x504] ss:$16 sps:$4 sm:$0xff]  }
  0x90   :  { %2367 = vmatprep.subr.bf16.mxu0 %v3910_v1  ;;  %2732 = vmatprep.subr.bf16.mxu1 %v3913_v48  ;;  %v26_v1 = vld [vmem:[%s5509_s0 + $0x44] sm:$0x1]  ;;  %v30_v48 = vld [vmem:[%s5509_s0 + $0x5c] sm:$0x1] }
  0x92   :  { %2339 = vmatmul.mubr.bf16.gmra.mrb[8].mxu0 %v3170_v13  ;;  %2704 = vmatmul.mubr.bf16.gmra.mrb[8].mxu1 %v3170_v13  ;;  %v3938_v13 = vld [vmem:[%s5508_s1 + $0x520] ss:$16 sps:$4 sm:$0xff]  }
  0x93   :  { %2368 = vmatpush1.bf16.msra.mxu0 %v3908_v11  ;;  %2733 = vmatpush1.bf16.msra.mxu1 %v3911_v12  ;;  %v4943_v11 = vcombine.low %v4780_v26, %v26_v1  ;;  %v4946_v12 = vcombine.low %v4785_v55, %v30_v48  ;;  %v3946_v26 = vld [vmem:[%s5508_s1 + $0x544] ss:$16 sps:$4 sm:$0xff]   ;;  %v3974_v1 = vld [vmem:[%s5508_s1 + $0x5c0] ss:$16 sps:$4 sm:$0xff]   ;;  %v3977_v48 = vld [vmem:[%s5508_s1 + $0x5c8] ss:$16 sps:$4 sm:$0xff]  }
  0x94   :  { %2369 = vmatprep.subr.bf16.mxu0 %v3916_v14  ;;  %2734 = vmatprep.subr.bf16.mxu1 %v3919_v19  ;;  %v3947_v19 = vld [vmem:[%s5508_s1 + $0x548] ss:$16 sps:$4 sm:$0xff]  }
  0x95   :  { %2348 = vmatprep.mubr.bf16.mxu0 %v3180_v24  ;;  %2713 = vmatprep.mubr.bf16.mxu1 %v3180_v24  ;;  %v327_v14 = vrot.slane %v4943_v11, 1  ;;  %v330_v55 = vrot.slane %v4946_v12, 1  ;;  %v208_v3 = vshrl.u32 %v4943_v11, 16 }
  0x97   :  { %2370 = vmatpush1.bf16.msra.mxu0 %v3914_v5  ;;  %2735 = vmatpush1.bf16.msra.mxu1 %v3917_v33  ;;  %v4970_v24 = vcombine.low %v327_v14, %v330_v55  ;;  %v3955_v5 = vld [vmem:[%s5508_s1 + $0x564] ss:$16 sps:$4 sm:$0xff]   ;;  %v3958_v33 = vld [vmem:[%s5508_s1 + $0x56c] ss:$16 sps:$4 sm:$0xff]   ;;  %v3986_v14 = vld [vmem:[%s5508_s1 + $0x5e8] ss:$16 sps:$4 sm:$0xff]  }
  0x98   :  { %2371 = vmatprep.subr.bf16.mxu0 %v3922_v30  ;;  %2736 = vmatprep.subr.bf16.mxu1 %v3925_v52  ;;  %v3956_v30 = vld [vmem:[%s5508_s1 + $0x568] ss:$16 sps:$4 sm:$0xff]   ;;  %v336_v52 = vrot.slane %v4988_v6, 1  ;;  %v3993_v55 = vld [vmem:[%s5508_s1 + $0x604] ss:$16 sps:$4 sm:$0xff]  }
  0x9a   :  { %2349 = vmatmul.mubr.bf16.gmra.mrb[12].mxu0 %v3179_v41  ;;  %2714 = vmatmul.mubr.bf16.gmra.mrb[12].mxu1 %v3179_v41  ;;  %v5010_v54 = vcombine.low %v333_v60, %v336_v52  ;;  %v3970_v41 = vld [vmem:[%s5508_s1 + $0x5a4] ss:$16 sps:$4 sm:$0xff]   ;;  %v271_v60 = vshrl.u32 %v4988_v6, 16 }
  0x9b   :  { %2372 = vmatpush1.bf16.msra.mxu0 %v3920_v37  ;;  %2737 = vmatpush1.bf16.msra.mxu1 %v3923_v39  ;;  %v42_v37 = vld [vmem:[%s5509_s0 + $0xa4] sm:$0x1]  ;;  %v46_v39 = vld [vmem:[%s5509_s0 + $0xbc] sm:$0x1] }
  0x9c   :  { %2373 = vmatprep.subr.bf16.mxu0 %v3928_v43  ;;  %2738 = vmatprep.subr.bf16.mxu1 %v3931_v9  ;;  %v5025_v43 = vcombine.low %v4879_v31, %v42_v37  ;;  %v5028_v9 = vcombine.low %v4885_v27, %v46_v39  ;;  %v3979_v27 = vld [vmem:[%s5508_s1 + $0x5cc] ss:$16 sps:$4 sm:$0xff]  }
  0x9d   :  { %2391 = vmatprep.mubr.bf16.mxu0 %v3155_v50  ;;  %2756 = vmatprep.mubr.bf16.mxu1 %v3155_v50  ;;  %v3968_v50 = vld [vmem:[%s5508_s1 + $0x5a0] ss:$16 sps:$4 sm:$0xff]  }
  0x9e   :  { %v339_v31 = vrot.slane %v5025_v43, 1  ;;  %v294_v37 = vshll.u32 %v5025_v43, 16  ;;  %v315_v39 = vshll.u32 %v5028_v9, 16 }
  0x9f   :  { %2374 = vmatpush1.bf16.msra.mxu0 %v3926_v51  ;;  %2739 = vmatpush1.bf16.msra.mxu1 %v3929_v10  ;;  %v3971_v51 = vld [vmem:[%s5508_s1 + $0x5a8] ss:$16 sps:$4 sm:$0xff]   ;;  %v3976_v10 = vld [vmem:[%s5508_s1 + $0x5c4] ss:$16 sps:$4 sm:$0xff]  }
  0xa0   :  { %2375 = vmatprep.subr.bf16.mxu0 %v3934_v56  ;;  %2740 = vmatprep.subr.bf16.mxu1 %v3937_v45  ;;  %v342_v56 = vrot.slane %v5028_v9, 1  ;;  %v210_v45 = vshll.u32 %v4943_v11, 16  ;;  %v3996_v11 = vld [vmem:[%s5508_s1 + $0x60c] ss:$16 sps:$4 sm:$0xff]  }
  0xa3   :  { %2376 = vmatpush1.bf16.msra.mxu0 %v3932_v47  ;;  %2741 = vmatpush1.bf16.msra.mxu1 %v3935_v58  ;;  %v231_v47 = vshll.u32 %v4946_v12, 16  ;;  %v5046_v58 = vcombine.low %v339_v31, %v342_v56  ;;  %v296_v56 = vrot.slane %v294_v37, 1  ;;  %v4068_v37 = vld [vmem:[%s5508_s1 + $0x78c] ss:$16 sps:$4 sm:$0xff]  }
  0xa4   :  { %2377 = vmatprep.subr.bf16.mxu0 %v3940_v49  ;;  %2742 = vmatprep.subr.bf16.mxu1 %v3943_v4  ;;  %v3988_v49 = vld [vmem:[%s5508_s1 + $0x5ec] ss:$16 sps:$4 sm:$0xff]   ;;  %v212_v4 = vrot.slane %v210_v45, 1  ;;  %v317_v45 = vrot.slane %v315_v39, 1  ;;  %v4063_v39 = vld [vmem:[%s5508_s1 + $0x780] ss:$16 sps:$4 sm:$0xff]  }
  0xa7   :  { %2378 = vmatpush1.bf16.msra.mxu0 %v3938_v13  ;;  %2743 = vmatpush1.bf16.msra.mxu1 %v3941_v63  ;;  %v229_v13 = vshrl.u32 %v4946_v12, 16  ;;  %v233_v63 = vrot.slane %v231_v47, 1  ;;  %v213_v12 = vor.u32 %v212_v4, %v208_v3  ;;  %v4009_v47 = vld [vmem:[%s5508_s1 + $0x660] ss:$16 sps:$4 sm:$0xff]   ;;  %v4023_v3 = vld [vmem:[%s5508_s1 + $0x6a4] ss:$16 sps:$4 sm:$0xff]  }
  0xa8   :  { %2379 = vmatprep.subr.bf16.mxu0 %v3946_v26  ;;  %2744 = vmatprep.subr.bf16.mxu1 %v3949_v15  ;;  %v3983_v26 = vld [vmem:[%s5508_s1 + $0x5e0] ss:$16 sps:$4 sm:$0xff]   ;;  %v4026_v4 = vld [vmem:[%s5508_s1 + $0x6ac] ss:$16 sps:$4 sm:$0xff]  }
  0xa9   :  { %v234_v15 = vor.u32 %v233_v63, %v229_v13  ;;  %v4021_v63 = vld [vmem:[%s5508_s1 + $0x6a0] ss:$16 sps:$4 sm:$0xff]  }
  0xab   :  { %2380 = vmatpush1.bf16.msra.mxu0 %v3944_v18  ;;  %2745 = vmatpush1.bf16.msra.mxu1 %v3947_v19  ;;  %v252_v18 = vshll.u32 %v4985_v38, 16  ;;  %v273_v19 = vshll.u32 %v4988_v6, 16 }
  0xac   :  { %2381 = vmatprep.subr.bf16.mxu0 %v3955_v5  ;;  %2746 = vmatprep.subr.bf16.mxu1 %v3958_v33  ;;  %v3999_v5 = vld [vmem:[%s5508_s1 + $0x624] ss:$16 sps:$4 sm:$0xff]   ;;  %v4002_v33 = vld [vmem:[%s5508_s1 + $0x62c] ss:$16 sps:$4 sm:$0xff]  }
  0xad   :  { %v275_v52 = vrot.slane %v273_v19, 1  ;;  %v4036_v19 = vld [vmem:[%s5508_s1 + $0x6e8] ss:$16 sps:$4 sm:$0xff]  }
  0xaf   :  { %2382 = vmatpush1.bf16.msra.mxu0 %v3953_v8  ;;  %2747 = vmatpush1.bf16.msra.mxu1 %v3956_v30  ;;  %v250_v8 = vshrl.u32 %v4985_v38, 16  ;;  %v3164_v30 = vcombine.low %v213_v12, %v234_v15  ;;  %v4005_v38 = vld [vmem:[%s5508_s1 + $0x644] ss:$16 sps:$4 sm:$0xff]   ;;  %v4038_v15 = vld [vmem:[%s5508_s1 + $0x6ec] ss:$16 sps:$4 sm:$0xff]  }
  0xb0   :  { %2383 = vmatprep.subr.bf16.mxu0 %v3961_v32  ;;  %2748 = vmatprep.subr.bf16.mxu1 %v3964_v0  ;;  %v254_v32 = vrot.slane %v252_v18, 1  ;;  %v3997_v0 = vld [vmem:[%s5508_s1 + $0x620] ss:$16 sps:$4 sm:$0xff]   ;;  %v4035_v12 = vld [vmem:[%s5508_s1 + $0x6e4] ss:$16 sps:$4 sm:$0xff]  }
  0xb1   :  { %v4033_v18 = vld [vmem:[%s5508_s1 + $0x6e0] ss:$16 sps:$4 sm:$0xff]  }
  0xb2   :  { %v255_v6 = vor.u32 %v254_v32, %v250_v8  ;;  %v4045_v8 = vld [vmem:[%s5508_s1 + $0x720] ss:$16 sps:$4 sm:$0xff]   ;;  %v4053_v32 = vld [vmem:[%s5508_s1 + $0x744] ss:$16 sps:$4 sm:$0xff]  }
  0xb3   :  { %2384 = vmatpush1.bf16.msra.mxu0 %v3959_v34  ;;  %2749 = vmatpush1.bf16.msra.mxu1 %v3962_v36  ;;  %v4000_v34 = vld [vmem:[%s5508_s1 + $0x628] ss:$16 sps:$4 sm:$0xff]   ;;  %v276_v36 = vor.u32 %v275_v52, %v271_v60  ;;  %v4056_v60 = vld [vmem:[%s5508_s1 + $0x74c] ss:$16 sps:$4 sm:$0xff]   ;;  %v4051_v52 = vld [vmem:[%s5508_s1 + $0x740] ss:$16 sps:$4 sm:$0xff]  }
  0xb4   :  { %2385 = vmatprep.subr.bf16.mxu0 %v3970_v41  ;;  %2750 = vmatprep.subr.bf16.mxu1 %v3973_v42  ;;  %v4003_v41 = vld [vmem:[%s5508_s1 + $0x640] ss:$16 sps:$4 sm:$0xff]   ;;  %v4006_v42 = vld [vmem:[%s5508_s1 + $0x648] ss:$16 sps:$4 sm:$0xff]  }
  0xb5   :  { %v3173_v31 = vcombine.low %v255_v6, %v276_v36  ;;  %v4060_v6 = vld [vmem:[%s5508_s1 + $0x768] ss:$16 sps:$4 sm:$0xff]   ;;  %v4065_v36 = vld [vmem:[%s5508_s1 + $0x784] ss:$16 sps:$4 sm:$0xff]  }
  0xb7   :  { %2386 = vmatpush1.bf16.msra.mxu0 %v3968_v50  ;;  %2751 = vmatpush1.bf16.msra.mxu1 %v3971_v51  ;;  %v4011_v50 = vld [vmem:[%s5508_s1 + $0x664] ss:$16 sps:$4 sm:$0xff]   ;;  %v4014_v51 = vld [vmem:[%s5508_s1 + $0x66c] ss:$16 sps:$4 sm:$0xff]  }
  0xb8   :  { %2387 = vmatprep.subr.bf16.mxu0 %v3976_v10  ;;  %2752 = vmatprep.subr.bf16.mxu1 %v3979_v27  ;;  %v292_v10 = vshrl.u32 %v5025_v43, 16  ;;  %v313_v27 = vshrl.u32 %v5028_v9, 16  ;;  %v4017_v43 = vld [vmem:[%s5508_s1 + $0x684] ss:$16 sps:$4 sm:$0xff]  }
  0xba   :  { %v297_v9 = vor.u32 %v296_v56, %v292_v10  ;;  %v4072_v10 = vld [vmem:[%s5508_s1 + $0x7a8] ss:$16 sps:$4 sm:$0xff]   ;;  %v4080_v56 = vld [vmem:[%s5508_s1 + $0x7cc] ss:$16 sps:$4 sm:$0xff]  }
  0xbb   :  { %2388 = vmatpush1.bf16.msra.mxu0 %v3974_v1  ;;  %2753 = vmatpush1.bf16.msra.mxu1 %v3977_v48  ;;  %v4012_v1 = vld [vmem:[%s5508_s1 + $0x668] ss:$16 sps:$4 sm:$0xff]   ;;  %v318_v48 = vor.u32 %v317_v45, %v313_v27  ;;  %v4075_v27 = vld [vmem:[%s5508_s1 + $0x7c0] ss:$16 sps:$4 sm:$0xff]  }
  0xbc   :  { %2389 = vmatprep.subr.bf16.mxu0 %v3985_v2  ;;  %2754 = vmatprep.subr.bf16.mxu1 %v3988_v49  ;;  %v4015_v2 = vld [vmem:[%s5508_s1 + $0x680] ss:$16 sps:$4 sm:$0xff]   ;;  %v4018_v49 = vld [vmem:[%s5508_s1 + $0x688] ss:$16 sps:$4 sm:$0xff]  }
  0xbd   :  { %v3182_v13 = vcombine.low %v297_v9, %v318_v48  ;;  %v4078_v45 = vld [vmem:[%s5508_s1 + $0x7c8] ss:$16 sps:$4 sm:$0xff]   ;;  %v4081_v9 = vld [vmem:[%s5508_s1 + $0x7e0] ss:$16 sps:$4 sm:$0xff]  }
  0xbe   :  { %v4084_v48 = vld [vmem:[%s5508_s1 + $0x7e8] ss:$16 sps:$4 sm:$0xff]  }
  0xbf   :  { %2390 = vmatpush1.bf16.msra.mxu0 %v3983_v26  ;;  %2755 = vmatpush1.bf16.msra.mxu1 %v3986_v14  ;;  %v4024_v26 = vld [vmem:[%s5508_s1 + $0x6a8] ss:$16 sps:$4 sm:$0xff]   ;;  %v4029_v14 = vld [vmem:[%s5508_s1 + $0x6c4] ss:$16 sps:$4 sm:$0xff]  }
  0xc0   :  { %2432 = vmatprep.subr.bf16.mxu0 %v3993_v55  ;;  %2797 = vmatprep.subr.bf16.mxu1 %v3996_v11  ;;  %v4027_v55 = vld [vmem:[%s5508_s1 + $0x6c0] ss:$16 sps:$4 sm:$0xff]   ;;  %v4030_v11 = vld [vmem:[%s5508_s1 + $0x6c8] ss:$16 sps:$4 sm:$0xff]  }
  0xc2   :  { %2392 = vmatmul.mubr.bf16.vlgmr.msra.gmra.mrb[0].mxu0 %v4402_v22  ;;  %2757 = vmatmul.mubr.bf16.vlgmr.msra.gmra.mrb[0].mxu1 %v4402_v22  ;;  %v4008_v22 = vld [vmem:[%s5508_s1 + $0x64c] ss:$16 sps:$4 sm:$0xff]  }
  0xc3   :  { %2433 = vmatpush1.bf16.msra.mxu0 %v3991_v53  ;;  %2798 = vmatpush1.bf16.msra.mxu1 %v3994_v25  ;;  %v4041_v53 = vld [vmem:[%s5508_s1 + $0x704] ss:$16 sps:$4 sm:$0xff]   ;;  %v4039_v25 = vld [vmem:[%s5508_s1 + $0x700] ss:$16 sps:$4 sm:$0xff]  }
  0xc4   :  { %2434 = vmatprep.subr.bf16.mxu0 %v3999_v5  ;;  %2799 = vmatprep.subr.bf16.mxu1 %v4002_v33  ;;  %v4042_v5 = vld [vmem:[%s5508_s1 + $0x708] ss:$16 sps:$4 sm:$0xff]   ;;  %v4047_v33 = vld [vmem:[%s5508_s1 + $0x724] ss:$16 sps:$4 sm:$0xff]  }
  0xc5   :  { %2401 = vmatprep.mubr.bf16.mxu0 %v3164_v30  ;;  %2766 = vmatprep.mubr.bf16.mxu1 %v3164_v30  ;;  %v4048_v30 = vld [vmem:[%s5508_s1 + $0x728] ss:$16 sps:$4 sm:$0xff]  }
  0xc7   :  { %2435 = vmatpush1.bf16.msra.mxu0 %v3997_v0  ;;  %2800 = vmatpush1.bf16.msra.mxu1 %v4000_v34  ;;  %v4054_v0 = vld [vmem:[%s5508_s1 + $0x748] ss:$16 sps:$4 sm:$0xff]   ;;  %v4059_v34 = vld [vmem:[%s5508_s1 + $0x764] ss:$16 sps:$4 sm:$0xff]  }
  0xc8   :  { %2436 = vmatprep.subr.bf16.mxu0 %v4005_v38  ;;  %2801 = vmatprep.subr.bf16.mxu1 %v4008_v22  ;;  %v4062_v38 = vld [vmem:[%s5508_s1 + $0x76c] ss:$16 sps:$4 sm:$0xff]   ;;  %v4057_v22 = vld [vmem:[%s5508_s1 + $0x760] ss:$16 sps:$4 sm:$0xff]  }
  0xca   :  { %2402 = vmatmul.mubr.bf16.gmra.mrb[4].mxu0 %v4636_v61  ;;  %2767 = vmatmul.mubr.bf16.gmra.mrb[4].mxu1 %v4636_v61  ;;  %v4020_v61 = vld [vmem:[%s5508_s1 + $0x68c] ss:$16 sps:$4 sm:$0xff]  }
  0xcb   :  { %2437 = vmatpush1.bf16.msra.mxu0 %v4003_v41  ;;  %2802 = vmatpush1.bf16.msra.mxu1 %v4006_v42  ;;  %v4066_v41 = vld [vmem:[%s5508_s1 + $0x788] ss:$16 sps:$4 sm:$0xff]   ;;  %v4071_v42 = vld [vmem:[%s5508_s1 + $0x7a4] ss:$16 sps:$4 sm:$0xff]  }
  0xcc   :  { %2438 = vmatprep.subr.bf16.mxu0 %v4011_v50  ;;  %2803 = vmatprep.subr.bf16.mxu1 %v4014_v51  ;;  %v4074_v50 = vld [vmem:[%s5508_s1 + $0x7ac] ss:$16 sps:$4 sm:$0xff]   ;;  %v4069_v51 = vld [vmem:[%s5508_s1 + $0x7a0] ss:$16 sps:$4 sm:$0xff]  }
  0xcd   :  { %2411 = vmatprep.mubr.bf16.mxu0 %v3173_v31  ;;  %2776 = vmatprep.mubr.bf16.mxu1 %v3173_v31  ;;  %v4077_v31 = vld [vmem:[%s5508_s1 + $0x7c4] ss:$16 sps:$4 sm:$0xff]  }
  0xcf   :  { %2439 = vmatpush1.bf16.msra.mxu0 %v4009_v47  ;;  %2804 = vmatpush1.bf16.msra.mxu1 %v4012_v1  ;;  %v4083_v47 = vld [vmem:[%s5508_s1 + $0x7e4] ss:$16 sps:$4 sm:$0xff]   ;;  %v4086_v1 = vld [vmem:[%s5508_s1 + $0x7ec] ss:$16 sps:$4 sm:$0xff]  }
  0xd0   :  { %2440 = vmatprep.subr.bf16.mxu0 %v4017_v43  ;;  %2805 = vmatprep.subr.bf16.mxu1 %v4020_v61  ;;  %v319_v43 = vrot.slane %v4450_v35, 1  ;;  %v322_v61 = vrot.slane %v4466_v40, 1  ;;  %v4092_v35 = vld [vmem:[%s5508_s1 + $0x80c] ss:$16 sps:$4 sm:$0xff]  }
  0xd2   :  { %2412 = vmatmul.mubr.bf16.gmra.mrb[8].mxu0 %v4674_v23  ;;  %2777 = vmatmul.mubr.bf16.gmra.mrb[8].mxu1 %v4674_v23  ;;  %v4032_v23 = vld [vmem:[%s5508_s1 + $0x6cc] ss:$16 sps:$4 sm:$0xff]   ;;  %v3156_v40 = vcombine.low %v319_v43, %v322_v61 }
  0xd3   :  { %2441 = vmatpush1.bf16.msra.mxu0 %v4015_v2  ;;  %2806 = vmatpush1.bf16.msra.mxu1 %v4018_v49  ;;  %v4089_v2 = vld [vmem:[%s5508_s1 + $0x804] ss:$16 sps:$4 sm:$0xff]   ;;  %v4087_v49 = vld [vmem:[%s5508_s1 + $0x800] ss:$16 sps:$4 sm:$0xff]  }
  0xd4   :  { %2442 = vmatprep.subr.bf16.mxu0 %v4023_v3  ;;  %2807 = vmatprep.subr.bf16.mxu1 %v4026_v4  ;;  %v4090_v3 = vld [vmem:[%s5508_s1 + $0x808] ss:$16 sps:$4 sm:$0xff]   ;;  %v4095_v4 = vld [vmem:[%s5508_s1 + $0x824] ss:$16 sps:$4 sm:$0xff]  }
  0xd5   :  { %2421 = vmatprep.mubr.bf16.mxu0 %v3182_v13  ;;  %2786 = vmatprep.mubr.bf16.mxu1 %v3182_v13  ;;  %v4098_v13 = vld [vmem:[%s5508_s1 + $0x82c] ss:$16 sps:$4 sm:$0xff]  }
  0xd7   :  { %2443 = vmatpush1.bf16.msra.mxu0 %v4021_v63  ;;  %2808 = vmatpush1.bf16.msra.mxu1 %v4024_v26  ;;  %v325_v63 = vrot.slane %v4668_v20, 1  ;;  %v328_v26 = vrot.slane %v4672_v21, 1  ;;  %v4104_v20 = vld [vmem:[%s5508_s1 + $0x84c] ss:$16 sps:$4 sm:$0xff]  }
  0xd8   :  { %2444 = vmatprep.subr.bf16.mxu0 %v4029_v14  ;;  %2809 = vmatprep.subr.bf16.mxu1 %v4032_v23  ;;  %v4093_v14 = vld [vmem:[%s5508_s1 + $0x820] ss:$16 sps:$4 sm:$0xff]   ;;  %v4096_v23 = vld [vmem:[%s5508_s1 + $0x828] ss:$16 sps:$4 sm:$0xff]  }
  0xd9   :  { %v3165_v21 = vcombine.low %v325_v63, %v328_v26 }
  0xda   :  { %2422 = vmatmul.mubr.bf16.gmra.mrb[12].mxu0 %v4719_v59  ;;  %2787 = vmatmul.mubr.bf16.gmra.mrb[12].mxu1 %v4719_v59  ;;  %v4044_v59 = vld [vmem:[%s5508_s1 + $0x70c] ss:$16 sps:$4 sm:$0xff]  }
  0xdb   :  { %2445 = vmatpush1.bf16.msra.mxu0 %v4027_v55  ;;  %2810 = vmatpush1.bf16.msra.mxu1 %v4030_v11  ;;  %v4101_v55 = vld [vmem:[%s5508_s1 + $0x844] ss:$16 sps:$4 sm:$0xff]   ;;  %v4099_v11 = vld [vmem:[%s5508_s1 + $0x840] ss:$16 sps:$4 sm:$0xff]  }
  0xdc   :  { %2446 = vmatprep.subr.bf16.mxu0 %v4035_v12  ;;  %2811 = vmatprep.subr.bf16.mxu1 %v4038_v15  ;;  %v4102_v12 = vld [vmem:[%s5508_s1 + $0x848] ss:$16 sps:$4 sm:$0xff]   ;;  %v4107_v15 = vld [vmem:[%s5508_s1 + $0x864] ss:$16 sps:$4 sm:$0xff]  }
  0xdd   :  { %2464 = vmatprep.mubr.bf16.mxu0 %v4787_v29  ;;  %2829 = vmatprep.mubr.bf16.mxu1 %v4787_v29  ;;  %v4050_v29 = vld [vmem:[%s5508_s1 + $0x72c] ss:$16 sps:$4 sm:$0xff]  }
  0xdf   :  { %2447 = vmatpush1.bf16.msra.mxu0 %v4033_v18  ;;  %2812 = vmatpush1.bf16.msra.mxu1 %v4036_v19  ;;  %v331_v18 = vrot.slane %v4702_v44, 1  ;;  %v334_v19 = vrot.slane %v4714_v57, 1  ;;  %v4116_v44 = vld [vmem:[%s5508_s1 + $0x88c] ss:$16 sps:$4 sm:$0xff]  }
  0xe0   :  { %2448 = vmatprep.subr.bf16.mxu0 %v4041_v53  ;;  %2813 = vmatprep.subr.bf16.mxu1 %v4044_v59  ;;  %v4105_v53 = vld [vmem:[%s5508_s1 + $0x860] ss:$16 sps:$4 sm:$0xff]   ;;  %v4108_v59 = vld [vmem:[%s5508_s1 + $0x868] ss:$16 sps:$4 sm:$0xff]  }
  0xe1   :  { %v3174_v57 = vcombine.low %v331_v18, %v334_v19 }
  0xe3   :  { %2449 = vmatpush1.bf16.msra.mxu0 %v4039_v25  ;;  %2814 = vmatpush1.bf16.msra.mxu1 %v4042_v5  ;;  %v4113_v25 = vld [vmem:[%s5508_s1 + $0x884] ss:$16 sps:$4 sm:$0xff]   ;;  %v4111_v5 = vld [vmem:[%s5508_s1 + $0x880] ss:$16 sps:$4 sm:$0xff]  }
  0xe4   :  { %2450 = vmatprep.subr.bf16.mxu0 %v4047_v33  ;;  %2815 = vmatprep.subr.bf16.mxu1 %v4050_v29  ;;  %v4114_v33 = vld [vmem:[%s5508_s1 + $0x888] ss:$16 sps:$4 sm:$0xff]   ;;  %v4119_v29 = vld [vmem:[%s5508_s1 + $0x8a4] ss:$16 sps:$4 sm:$0xff]  }
  0xe7   :  { %2451 = vmatpush1.bf16.msra.mxu0 %v4045_v8  ;;  %2816 = vmatpush1.bf16.msra.mxu1 %v4048_v30  ;;  %v337_v8 = vrot.slane %v4757_v16, 1  ;;  %v340_v30 = vrot.slane %v4761_v17, 1  ;;  %v4128_v16 = vld [vmem:[%s5508_s1 + $0x8cc] ss:$16 sps:$4 sm:$0xff]  }
  0xe8   :  { %2452 = vmatprep.subr.bf16.mxu0 %v4053_v32  ;;  %2817 = vmatprep.subr.bf16.mxu1 %v4056_v60  ;;  %v4117_v32 = vld [vmem:[%s5508_s1 + $0x8a0] ss:$16 sps:$4 sm:$0xff]   ;;  %v4120_v60 = vld [vmem:[%s5508_s1 + $0x8a8] ss:$16 sps:$4 sm:$0xff]  }
  0xe9   :  { %v3183_v17 = vcombine.low %v337_v8, %v340_v30 }
  0xeb   :  { %2453 = vmatpush1.bf16.msra.mxu0 %v4051_v52  ;;  %2818 = vmatpush1.bf16.msra.mxu1 %v4054_v0  ;;  %v4125_v52 = vld [vmem:[%s5508_s1 + $0x8c4] ss:$16 sps:$4 sm:$0xff]   ;;  %v4123_v0 = vld [vmem:[%s5508_s1 + $0x8c0] ss:$16 sps:$4 sm:$0xff]  }
  0xec   :  { %2454 = vmatprep.subr.bf16.mxu0 %v4059_v34  ;;  %2819 = vmatprep.subr.bf16.mxu1 %v4062_v38  ;;  %v4126_v34 = vld [vmem:[%s5508_s1 + $0x8c8] ss:$16 sps:$4 sm:$0xff]   ;;  %v4131_v38 = vld [vmem:[%s5508_s1 + $0x8e4] ss:$16 sps:$4 sm:$0xff]  }
  0xef   :  { %2455 = vmatpush1.bf16.msra.mxu0 %v4057_v22  ;;  %2820 = vmatpush1.bf16.msra.mxu1 %v4060_v6  ;;  %v4129_v22 = vld [vmem:[%s5508_s1 + $0x8e0] ss:$16 sps:$4 sm:$0xff]   ;;  %v4132_v6 = vld [vmem:[%s5508_s1 + $0x8e8] ss:$16 sps:$4 sm:$0xff]  }
  0xf0   :  { %2456 = vmatprep.subr.bf16.mxu0 %v4065_v36  ;;  %2821 = vmatprep.subr.bf16.mxu1 %v4068_v37  ;;  %v4135_v36 = vmov 0   ;;  %v681_v37 = vlaneseq }
  0xf3   :  { %2457 = vmatpush1.bf16.msra.mxu0 %v4063_v39  ;;  %2822 = vmatpush1.bf16.msra.mxu1 %v4066_v41 }
  0xf4   :  { %2458 = vmatprep.subr.bf16.mxu0 %v4071_v42  ;;  %2823 = vmatprep.subr.bf16.mxu1 %v4074_v50 }
  0xf7   :  { %2459 = vmatpush1.bf16.msra.mxu0 %v4069_v51  ;;  %2824 = vmatpush1.bf16.msra.mxu1 %v4072_v10 }
  0xf8   :  { %2460 = vmatprep.subr.bf16.mxu0 %v4077_v31  ;;  %2825 = vmatprep.subr.bf16.mxu1 %v4080_v56 }
  0xfb   :  { %2461 = vmatpush1.bf16.msra.mxu0 %v4075_v27  ;;  %2826 = vmatpush1.bf16.msra.mxu1 %v4078_v45 }
  0xfc   :  { %2462 = vmatprep.subr.bf16.mxu0 %v4083_v47  ;;  %2827 = vmatprep.subr.bf16.mxu1 %v4086_v1 }
  0xff   :  { %2463 = vmatpush1.bf16.msra.mxu0 %v4081_v9  ;;  %2828 = vmatpush1.bf16.msra.mxu1 %v4084_v48 }
 0x100   :  { %2505 = vmatprep.subr.bf16.mxu0 %v4089_v2  ;;  %2870 = vmatprep.subr.bf16.mxu1 %v4092_v35 }
 0x102   :  { %2465 = vmatmul.mubr.bf16.vlgmr.msra.gmra.mrb[0].mxu0 %v3156_v40  ;;  %2830 = vmatmul.mubr.bf16.vlgmr.msra.gmra.mrb[0].mxu1 %v3156_v40 }
 0x103   :  { %2506 = vmatpush1.bf16.msra.mxu0 %v4087_v49  ;;  %2871 = vmatpush1.bf16.msra.mxu1 %v4090_v3 }
 0x104   :  { %2507 = vmatprep.subr.bf16.mxu0 %v4095_v4  ;;  %2872 = vmatprep.subr.bf16.mxu1 %v4098_v13 }
 0x105   :  { %2474 = vmatprep.mubr.bf16.mxu0 %v4870_v7  ;;  %2839 = vmatprep.mubr.bf16.mxu1 %v4870_v7  ;;  %v4110_v7 = vld [vmem:[%s5508_s1 + $0x86c] ss:$16 sps:$4 sm:$0xff]  }
 0x107   :  { %2508 = vmatpush1.bf16.msra.mxu0 %v4093_v14  ;;  %2873 = vmatpush1.bf16.msra.mxu1 %v4096_v23 }
 0x108   :  { %2509 = vmatprep.subr.bf16.mxu0 %v4101_v55  ;;  %2874 = vmatprep.subr.bf16.mxu1 %v4104_v20 }
 0x10a   :  { %2475 = vmatmul.mubr.bf16.gmra.mrb[4].mxu0 %v3165_v21  ;;  %2840 = vmatmul.mubr.bf16.gmra.mrb[4].mxu1 %v3165_v21 }
 0x10b   :  { %2510 = vmatpush1.bf16.msra.mxu0 %v4099_v11  ;;  %2875 = vmatpush1.bf16.msra.mxu1 %v4102_v12 }
 0x10c   :  { %2511 = vmatprep.subr.bf16.mxu0 %v4107_v15  ;;  %2876 = vmatprep.subr.bf16.mxu1 %v4110_v7 }
 0x10d   :  { %2484 = vmatprep.mubr.bf16.mxu0 %v4890_v28  ;;  %2849 = vmatprep.mubr.bf16.mxu1 %v4890_v28  ;;  %v4122_v28 = vld [vmem:[%s5508_s1 + $0x8ac] ss:$16 sps:$4 sm:$0xff]  }
 0x10f   :  { %2512 = vmatpush1.bf16.msra.mxu0 %v4105_v53  ;;  %2877 = vmatpush1.bf16.msra.mxu1 %v4108_v59 }
 0x110   :  { %2513 = vmatprep.subr.bf16.mxu0 %v4113_v25  ;;  %2878 = vmatprep.subr.bf16.mxu1 %v4116_v44 }
 0x112   :  { %2485 = vmatmul.mubr.bf16.gmra.mrb[8].mxu0 %v3174_v57  ;;  %2850 = vmatmul.mubr.bf16.gmra.mrb[8].mxu1 %v3174_v57 }
 0x113   :  { %2514 = vmatpush1.bf16.msra.mxu0 %v4111_v5  ;;  %2879 = vmatpush1.bf16.msra.mxu1 %v4114_v33 }
 0x114   :  { %2515 = vmatprep.subr.bf16.mxu0 %v4119_v29  ;;  %2880 = vmatprep.subr.bf16.mxu1 %v4122_v28 }
 0x115   :  { %2494 = vmatprep.mubr.bf16.mxu0 %v4908_v46  ;;  %2859 = vmatprep.mubr.bf16.mxu1 %v4908_v46  ;;  %v4134_v46 = vld [vmem:[%s5508_s1 + $0x8ec] ss:$16 sps:$4 sm:$0xff]  }
 0x117   :  { %2516 = vmatpush1.bf16.msra.mxu0 %v4117_v32  ;;  %2881 = vmatpush1.bf16.msra.mxu1 %v4120_v60 }
 0x118   :  { %2517 = vmatprep.subr.bf16.mxu0 %v4125_v52  ;;  %2882 = vmatprep.subr.bf16.mxu1 %v4128_v16 }
 0x11a   :  { %2495 = vmatmul.mubr.bf16.gmra.mrb[12].mxu0 %v3183_v17  ;;  %2860 = vmatmul.mubr.bf16.gmra.mrb[12].mxu1 %v3183_v17 }
 0x11b   :  { %2518 = vmatpush1.bf16.msra.mxu0 %v4123_v0  ;;  %2883 = vmatpush1.bf16.msra.mxu1 %v4126_v34 }
 0x11c   :  { %2519 = vmatprep.subr.bf16.mxu0 %v4131_v38  ;;  %2884 = vmatprep.subr.bf16.mxu1 %v4134_v46 }
 0x11d   :  { %2537 = vmatprep.mubr.bf16.mxu0 %v4135_v36  ;;  %2902 = vmatprep.mubr.bf16.mxu1 %v4135_v36 }
 0x11f   :  { %2520 = vmatpush1.bf16.msra.mxu0 %v4129_v22  ;;  %2885 = vmatpush1.bf16.msra.mxu1 %v4132_v6 }
 0x122   :  { %2538 = vmatmul.mubr.bf16.vlgmr.msra.gmra.mrb[0].mxu0 %v4948_v62  ;;  %2903 = vmatmul.mubr.bf16.vlgmr.msra.gmra.mrb[0].mxu1 %v4948_v62  ;;  %v682_v62 = vshrl.u32 %v681_v37, 7 }
 0x123   :  { %2547 = vmatprep.mubr.bf16.mxu0 %v4135_v36  ;;  %2912 = vmatprep.mubr.bf16.mxu1 %v4135_v36 }
 0x124   :  { %v683_v39 = vsub.s32 0, %v682_v62  ;;  %v691_v41 = vsub.s32 2, %v682_v62  ;;  %v687_v42 = vsub.s32 1, %v682_v62  ;;  %v695_v50 = vsub.s32 3, %v682_v62 }
 0x12a   :  { %2548 = vmatmul.mubr.bf16.gmra.mrb[4].mxu0 %v4970_v24  ;;  %2913 = vmatmul.mubr.bf16.gmra.mrb[4].mxu1 %v4970_v24  ;;  %v679_v24 = vld [vmem:[%s5510_s2] sm:$0xf] }
 0x12b   :  { %2557 = vmatprep.mubr.bf16.mxu0 %v4135_v36  ;;  %2922 = vmatprep.mubr.bf16.mxu1 %v4135_v36  ;;  %v5399_v51 = vrot.slane %v679_v24, %v683_v39  ;;  %v5401_v10 = vrot.slane %v679_v24, %v691_v41  ;;  %v5405_v31 = vrot.slane %v679_v24, %v695_v50 }
 0x132   :  { %2558 = vmatmul.mubr.bf16.gmra.mrb[8].mxu0 %v5010_v54  ;;  %2923 = vmatmul.mubr.bf16.gmra.mrb[8].mxu1 %v5010_v54  ;;  %v5403_v54 = vrot.slane %v679_v24, %v687_v42 }
 0x133   :  { %2567 = vmatprep.mubr.bf16.mxu0 %v4135_v36  ;;  %2932 = vmatprep.mubr.bf16.mxu1 %v4135_v36 }
 0x13a   :  { %2568 = vmatmul.mubr.bf16.gmra.mrb[12].mxu0 %v5046_v58  ;;  %2933 = vmatmul.mubr.bf16.gmra.mrb[12].mxu1 %v5046_v58 }
 0x1f5   :  { %v2539_v56 = vpop.f32.mrb[0].mxu0  ;;  %v2904_v58 = vpop.f32.mrb[0].mxu1 }
 0x1f6   :  { %v3506_v27 = vadd.f32 %v2539_v56, %v5399_v51  ;;  %v3522_v45 = vadd.f32 %v2904_v58, %v5401_v10  ;;  %v2541_v47 = vpop.f32.mrb[1].mxu0  ;;  %v2906_v1 = vpop.f32.mrb[1].mxu1 }
 0x1f7   :  { %v3507_v43 = vadd.f32 %v2541_v47, %v5403_v54  ;;  %v3523_v61 = vadd.f32 %v2906_v1, %v5405_v31  ;;  %v2543_v9 = vpop.f32.mrb[2].mxu0  ;;  %v2908_v48 = vpop.f32.mrb[2].mxu1 }
 0x1f8   :  { %v2943_v2 = vmax.f32 %v3506_v27, 0.0  ;;  %v2945_v35 = vmax.f32 %v3522_v45, 0.0  ;;  %v3508_v40 = vadd.f32 %v2543_v9, %v5399_v51  ;;  %v3524_v49 = vadd.f32 %v2908_v48, %v5401_v10  ;;  %v2545_v3 = vpop.f32.mrb[3].mxu0  ;;  %v2910_v4 = vpop.f32.mrb[3].mxu1 }
 0x1f9   :  { %v2944_v13 = vmax.f32 %v3507_v43, 0.0  ;;  %v2946_v63 = vmax.f32 %v3523_v61, 0.0  ;;  %v3509_v26 = vadd.f32 %v2545_v3, %v5403_v54  ;;  %v3525_v14 = vadd.f32 %v2910_v4, %v5405_v31 }
 0x1fa   :  { %v2947_v55 = vmax.f32 %v3508_v40, 0.0  ;;  %v2949_v20 = vmax.f32 %v3524_v49, 0.0 }
 0x1fb   :  { %v3490_v21 = vpack.c.bf16 %v2944_v13, %v2943_v2  ;;  %v3491_v11 = vpack.c.bf16 %v2946_v63, %v2945_v35  ;;  %v2948_v12 = vmax.f32 %v3509_v26, 0.0  ;;  %v2950_v15 = vmax.f32 %v3525_v14, 0.0 }
 0x1fd   :  { %3103 = vst [vmem:[%s5511_s3] sm:$0xff] %v3490_v21  ;;  %3107 = vst.msk [vmem:[%s5511_s3 + $0x8] sm:$0xff] %vm5416_vm2, %v3491_v11  ;;  %v3492_v7 = vpack.c.bf16 %v2948_v12, %v2947_v55  ;;  %v3493_v18 = vpack.c.bf16 %v2950_v15, %v2949_v20  ;;  %v2549_v19 = vpop.f32.mrb[4].mxu0  ;;  %v2914_v53 = vpop.f32.mrb[4].mxu1 }
 0x1fe   :  { %v3510_v59 = vadd.f32 %v2549_v19, %v5399_v51  ;;  %v3526_v25 = vadd.f32 %v2914_v53, %v5401_v10  ;;  %v2551_v44 = vpop.f32.mrb[5].mxu0  ;;  %v2916_v57 = vpop.f32.mrb[5].mxu1 }
 0x1ff   :  { %3108 = vst [vmem:[%s5511_s3 + $0x10] sm:$0xff] %v3492_v7  ;;  %3109 = vst.msk [vmem:[%s5511_s3 + $0x18] sm:$0xff] %vm5416_vm2, %v3493_v18  ;;  %v3511_v5 = vadd.f32 %v2551_v44, %v5403_v54  ;;  %v3527_v33 = vadd.f32 %v2916_v57, %v5405_v31  ;;  %v2553_v29 = vpop.f32.mrb[6].mxu0  ;;  %v2918_v28 = vpop.f32.mrb[6].mxu1 }
 0x200   :  { %v2951_v8 = vmax.f32 %v3510_v59, 0.0  ;;  %v2953_v30 = vmax.f32 %v3526_v25, 0.0  ;;  %v3512_v32 = vadd.f32 %v2553_v29, %v5399_v51  ;;  %v3528_v60 = vadd.f32 %v2918_v28, %v5401_v10  ;;  %v2555_v52 = vpop.f32.mrb[7].mxu0  ;;  %v2920_v16 = vpop.f32.mrb[7].mxu1 }
 0x201   :  { %v2952_v17 = vmax.f32 %v3511_v5, 0.0  ;;  %v2954_v0 = vmax.f32 %v3527_v33, 0.0  ;;  %v3513_v34 = vadd.f32 %v2555_v52, %v5403_v54  ;;  %v3529_v38 = vadd.f32 %v2920_v16, %v5405_v31 }
 0x202   :  { %v2955_v46 = vmax.f32 %v3512_v32, 0.0  ;;  %v2957_v22 = vmax.f32 %v3528_v60, 0.0 }
 0x203   :  { %v3494_v6 = vpack.c.bf16 %v2952_v17, %v2951_v8  ;;  %v3495_v36 = vpack.c.bf16 %v2954_v0, %v2953_v30  ;;  %v2956_v37 = vmax.f32 %v3513_v34, 0.0  ;;  %v2958_v62 = vmax.f32 %v3529_v38, 0.0 }
 0x205   :  { %3110 = vst [vmem:[%s5511_s3 + $0x20] sm:$0xff] %v3494_v6  ;;  %3111 = vst.msk [vmem:[%s5511_s3 + $0x28] sm:$0xff] %vm5416_vm2, %v3495_v36  ;;  %v3496_v39 = vpack.c.bf16 %v2956_v37, %v2955_v46  ;;  %v3497_v41 = vpack.c.bf16 %v2958_v62, %v2957_v22  ;;  %v2559_v24 = vpop.f32.mrb[8].mxu0  ;;  %v2924_v42 = vpop.f32.mrb[8].mxu1 }
 0x206   :  { %v3514_v50 = vadd.f32 %v2559_v24, %v5399_v51  ;;  %v3530_v56 = vadd.f32 %v2924_v42, %v5401_v10  ;;  %v2561_v58 = vpop.f32.mrb[9].mxu0  ;;  %v2926_v27 = vpop.f32.mrb[9].mxu1 }
 0x207   :  { %3112 = vst [vmem:[%s5511_s3 + $0x30] sm:$0xff] %v3496_v39  ;;  %3113 = vst.msk [vmem:[%s5511_s3 + $0x38] sm:$0xff] %vm5416_vm2, %v3497_v41  ;;  %v3515_v45 = vadd.f32 %v2561_v58, %v5403_v54  ;;  %v3531_v47 = vadd.f32 %v2926_v27, %v5405_v31  ;;  %v2563_v1 = vpop.f32.mrb[10].mxu0  ;;  %v2928_v43 = vpop.f32.mrb[10].mxu1 }
 0x208   :  { %v2959_v61 = vmax.f32 %v3514_v50, 0.0  ;;  %v2961_v9 = vmax.f32 %v3530_v56, 0.0  ;;  %v3516_v48 = vadd.f32 %v2563_v1, %v5399_v51  ;;  %v3532_v2 = vadd.f32 %v2928_v43, %v5401_v10  ;;  %v2565_v35 = vpop.f32.mrb[11].mxu0  ;;  %v2930_v40 = vpop.f32.mrb[11].mxu1 }
 0x209   :  { %v2960_v49 = vmax.f32 %v3515_v45, 0.0  ;;  %v2962_v3 = vmax.f32 %v3531_v47, 0.0  ;;  %v3517_v4 = vadd.f32 %v2565_v35, %v5403_v54  ;;  %v3533_v13 = vadd.f32 %v2930_v40, %v5405_v31 }
 0x20a   :  { %v2963_v63 = vmax.f32 %v3516_v48, 0.0  ;;  %v2965_v26 = vmax.f32 %v3532_v2, 0.0 }
 0x20b   :  { %v3498_v14 = vpack.c.bf16 %v2960_v49, %v2959_v61  ;;  %v3499_v55 = vpack.c.bf16 %v2962_v3, %v2961_v9  ;;  %v2964_v20 = vmax.f32 %v3517_v4, 0.0  ;;  %v2966_v21 = vmax.f32 %v3533_v13, 0.0 }
 0x20d   :  { %3114 = vst [vmem:[%s5511_s3 + $0x40] sm:$0xff] %v3498_v14  ;;  %3115 = vst.msk [vmem:[%s5511_s3 + $0x48] sm:$0xff] %vm5416_vm2, %v3499_v55  ;;  %v3500_v11 = vpack.c.bf16 %v2964_v20, %v2963_v63  ;;  %v3501_v12 = vpack.c.bf16 %v2966_v21, %v2965_v26  ;;  %v2569_v15 = vpop.f32.mrb[12].mxu0  ;;  %v2934_v7 = vpop.f32.mrb[12].mxu1 }
 0x20e   :  { %v3518_v18 = vadd.f32 %v2569_v15, %v5399_v51  ;;  %v3534_v19 = vadd.f32 %v2934_v7, %v5401_v10  ;;  %v2571_v53 = vpop.f32.mrb[13].mxu0  ;;  %v2936_v59 = vpop.f32.mrb[13].mxu1 }
 0x20f   :  { %3116 = vst [vmem:[%s5511_s3 + $0x50] sm:$0xff] %v3500_v11  ;;  %3117 = vst.msk [vmem:[%s5511_s3 + $0x58] sm:$0xff] %vm5416_vm2, %v3501_v12  ;;  %v3519_v25 = vadd.f32 %v2571_v53, %v5403_v54  ;;  %v3535_v44 = vadd.f32 %v2936_v59, %v5405_v31  ;;  %v2573_v57 = vpop.f32.mrb[14].mxu0  ;;  %v2938_v5 = vpop.f32.mrb[14].mxu1 }
 0x210   :  { %v2967_v33 = vmax.f32 %v3518_v18, 0.0  ;;  %v2969_v29 = vmax.f32 %v3534_v19, 0.0  ;;  %v3520_v28 = vadd.f32 %v2573_v57, %v5399_v51  ;;  %v3536_v8 = vadd.f32 %v2938_v5, %v5401_v10  ;;  %v2575_v30 = vpop.f32.mrb[15].mxu0  ;;  %v2940_v32 = vpop.f32.mrb[15].mxu1 }
 0x211   :  { %v2968_v60 = vmax.f32 %v3519_v25, 0.0  ;;  %v2970_v52 = vmax.f32 %v3535_v44, 0.0  ;;  %v3521_v16 = vadd.f32 %v2575_v30, %v5403_v54  ;;  %v3537_v17 = vadd.f32 %v2940_v32, %v5405_v31 }
 0x212   :  { %v2971_v0 = vmax.f32 %v3520_v28, 0.0  ;;  %v2973_v34 = vmax.f32 %v3536_v8, 0.0 }
 0x213   :  { %v3502_v38 = vpack.c.bf16 %v2968_v60, %v2967_v33  ;;  %v3503_v46 = vpack.c.bf16 %v2970_v52, %v2969_v29  ;;  %v2972_v22 = vmax.f32 %v3521_v16, 0.0  ;;  %v2974_v6 = vmax.f32 %v3537_v17, 0.0 }
 0x215   :  { %3118 = vst [vmem:[%s5511_s3 + $0x60] sm:$0xff] %v3502_v38  ;;  %3119 = vst.msk [vmem:[%s5511_s3 + $0x68] sm:$0xff] %vm5416_vm2, %v3503_v46  ;;  %v3504_v51 = vpack.c.bf16 %v2972_v22, %v2971_v0  ;;  %v3505_v10 = vpack.c.bf16 %v2974_v6, %v2973_v34 }
 0x217   :  { %3120 = vst [vmem:[%s5511_s3 + $0x70] sm:$0xff] %v3504_v51  ;;  %3121 = vst.msk [vmem:[%s5511_s3 + $0x78] sm:$0xff] %vm5416_vm2, %v3505_v10 }

// kernel: conv_vae_forward.16
= control target key start
LH: loop header
LB: loop body
LE: loop exit
PB: predicated region body
PF: predicated region fallthrough
CT: control target
= control target key end

     0   :  { %s1426_s21 = smov 0   ;;  %s1700_s0 = inlined_call_operand.vmem [shape: bf16[8,18,256], index: 0, kind: input, shape index: {}]   ;;  %s1701_s1 = inlined_call_operand.vmem [shape: bf16[768,56], index: 1, kind: input, shape index: {}]   ;;  %s1702_s2 = inlined_call_operand.vmem [shape: f32[1,56], index: 2, kind: input, shape index: {}]   ;;  %s1703_s3 = inlined_call_operand.vmem [shape: f32[2,16,56], index: 3, kind: input, shape index: {}]   ;;  %s1704_s4 = inlined_call_operand.vmem [shape: f32[2,16,56], index: 4, kind: input, shape index: {}]   ;;  %s1705_s5 = inlined_call_operand.vmem [shape: f32[8,16,56], index: 5, kind: output, shape index: {0}]   ;;  %s1706_s6 = inlined_call_operand.vmem [shape: f32[8,1,1], index: 6, kind: output, shape index: {1}]  }
   0x1 LB: > { %s1129_s22 = sadd.s32 4294967295, %s1389_s21   ;;  %p1133_p0 = scmp.ge.s32.totalorder %s1389_s21, 1  ;;  %s1389_s21 = sphi %s1426_s21, %s17_s21  }
   0x2   : > { %p217_p1 = scmp.lt.s32.totalorder %s1389_s21, 5 }
   0x4   : > { %p218_p2 = pnand %p1133_p0, %p217_p1 }
   0x5   : > { %v1309_v0 = vld [vmem:[%s1701_s1 + $0x40] sm:$0xff] (!%p218_p2)   ;;  %v1313_v4 = vld [vmem:[%s1701_s1 + $0x48] sm:$0xff] (!%p218_p2)   ;;  %v1317_v8 = vld [vmem:[%s1701_s1 + $0x50] sm:$0xff] (!%p218_p2)   ;;  %s1134_s7 = sshll.u32 (!%p218_p2), %s1129_s22, 1  ;;  %vm309_vm0 = vsmask.f32 (!%p218_p2), 7424 }
   0x6   : > { %221 = sbr.rel (%p218_p2) target bundleno = 494 (0x1ee), region = 40  ;;  %v1310_v1 = vld [vmem:[%s1701_s1 + $0xc0] sm:$0xff] (!%p218_p2)   ;;  %1200 = vmatprep.subr.bf16.mxu0 (!%p218_p2), %v1309_v0  ;;  %v1314_v5 = vld [vmem:[%s1701_s1 + $0xc8] sm:$0xff] (!%p218_p2)   ;;  %v1318_v9 = vld [vmem:[%s1701_s1 + $0xd0] sm:$0xff] (!%p218_p2)   ;;  %p254_p3 = scmp.lt.s32.totalorder (!%p218_p2), %s1134_s7, 7  ;;  %vm362_vm1 = vcmask (!%p218_p2), 1046528  }
   0x7   : > { %v1311_v2 = vld [vmem:[%s1701_s1] sm:$0xff] (!%p218_p2)   ;;  %1228 = vmatprep.subr.bf16.mxu1 (!%p218_p2), %v1310_v1  ;;  %v1315_v6 = vld [vmem:[%s1701_s1 + $0x8] sm:$0xff] (!%p218_p2)   ;;  %v1319_v10 = vld [vmem:[%s1701_s1 + $0x10] sm:$0xff] (!%p218_p2)   ;;  %vm917_vm2 = vcmask (!%p218_p2), 457728   ;;  %vm1040_vm11 = vcmask (!%p218_p2), 0  }
   0x8   : > { %v1312_v3 = vld [vmem:[%s1701_s1 + $0x80] sm:$0xff] (!%p218_p2)   ;;  %1201 = vmatpush3.bf16.msra.mxu0 (!%p218_p2), %v1311_v2  ;;  %v1316_v7 = vld [vmem:[%s1701_s1 + $0x88] sm:$0xff] (!%p218_p2)   ;;  %v1320_v11 = vld [vmem:[%s1701_s1 + $0x90] sm:$0xff] (!%p218_p2)  }
   0x9   : > { %1229 = vmatpush3.bf16.msra.mxu1 (!%p218_p2), %v1312_v3  ;;  %1202 = vmatprep.subr.bf16.mxu0 (!%p218_p2), %v1313_v4  ;;  %v1321_v12 = vld [vmem:[%s1701_s1 + $0x58] sm:$0xff] (!%p218_p2)   ;;  %v1325_v16 = vld [vmem:[%s1701_s1 + $0x60] sm:$0xff] (!%p218_p2)   ;;  %v1329_v20 = vld [vmem:[%s1701_s1 + $0x68] sm:$0xff] (!%p218_p2)  }
   0xa   : > { %1230 = vmatprep.subr.bf16.mxu1 (!%p218_p2), %v1314_v5  ;;  %v1322_v13 = vld [vmem:[%s1701_s1 + $0xd8] sm:$0xff] (!%p218_p2)   ;;  %v1326_v17 = vld [vmem:[%s1701_s1 + $0xe0] sm:$0xff] (!%p218_p2)   ;;  %v1330_v21 = vld [vmem:[%s1701_s1 + $0xe8] sm:$0xff] (!%p218_p2)  }
   0xb   : > { %v1323_v14 = vld [vmem:[%s1701_s1 + $0x18] sm:$0xff] (!%p218_p2)   ;;  %v1327_v18 = vld [vmem:[%s1701_s1 + $0x20] sm:$0xff] (!%p218_p2)   ;;  %v1331_v22 = vld [vmem:[%s1701_s1 + $0x28] sm:$0xff] (!%p218_p2)  }
   0xc   : > { %1203 = vmatpush3.bf16.msra.mxu0 (!%p218_p2), %v1315_v6  ;;  %v1324_v15 = vld [vmem:[%s1701_s1 + $0x98] sm:$0xff] (!%p218_p2)   ;;  %v1328_v19 = vld [vmem:[%s1701_s1 + $0xa0] sm:$0xff] (!%p218_p2)   ;;  %v1332_v23 = vld [vmem:[%s1701_s1 + $0xa8] sm:$0xff] (!%p218_p2)  }
   0xd   : > { %1231 = vmatpush3.bf16.msra.mxu1 %v1316_v7  ;;  %1204 = vmatprep.subr.bf16.mxu0 %v1317_v8  ;;  %s1708_s7 = smov (!%p254_p3, %s1134_s7), 7  ;;  %v1333_v24 = vld [vmem:[%s1701_s1 + $0x70] sm:$0xff]   ;;  %v1337_v28 = vld [vmem:[%s1701_s1 + $0x78] sm:$0xff]   ;;  %v1346_v39 = vld [vmem:[%s1701_s1 + $0x140] sm:$0xff]  }
   0xe   : > { %1232 = vmatprep.subr.bf16.mxu1 %v1318_v9  ;;  %v1334_v25 = vld [vmem:[%s1701_s1 + $0xf0] sm:$0xff]   ;;  %s1300_s8 = smul.u32 24, %s1708_s7  ;;  %v1338_v29 = vld [vmem:[%s1701_s1 + $0xf8] sm:$0xff]   ;;  %v1347_v40 = vld [vmem:[%s1701_s1 + $0x100] sm:$0xff]   ;;  %s1199_s14 = sshll.u32 %s1708_s7, 4 }
   0xf   : > { %v1335_v26 = vld [vmem:[%s1701_s1 + $0x30] sm:$0xff]   ;;  %v1339_v30 = vld [vmem:[%s1701_s1 + $0x38] sm:$0xff]   ;;  %v1348_v46 = vld [vmem:[%s1701_s1 + $0x148] sm:$0xff]   ;;  %s265_s16 = scalar_lea.vmem %s1705_s5, %s1199_s14  ;;  %s270_s14 = scalar_lea.vmem %s1706_s6, %s1708_s7 }
  0x10   : > { %1205 = vmatpush3.bf16.msra.mxu0 %v1319_v10  ;;  %v1336_v27 = vld [vmem:[%s1701_s1 + $0xb0] sm:$0xff]   ;;  %s1532_s18 = scalar_lea.vmem %s1700_s0, %s1300_s8  ;;  %v1340_v31 = vld [vmem:[%s1701_s1 + $0xb8] sm:$0xff]   ;;  %v1349_v48 = vld [vmem:[%s1701_s1 + $0x108] sm:$0xff]  }
  0x11   : > { %1233 = vmatpush3.bf16.msra.mxu1 %v1320_v11  ;;  %1206 = vmatprep.subr.bf16.mxu0 %v1321_v12  ;;  %v1341_v32 = vld [vmem:[%s1532_s18 + $0x4] ss:$8 sps:$4 sm:$0xff]   ;;  %v275_v33 = vld [vmem:[%s1532_s18 + $0x10] sm:$0x11]  ;;  %v1543_v34 = vld [vmem:[%s1532_s18] ss:$8 sps:$4 sm:$0xff]  }
  0x12   : > { %1234 = vmatprep.subr.bf16.mxu1 %v1322_v13  ;;  %802 = vmatprep.mubr.bf16.mxu0 %v1341_v32  ;;  %v1145_v35 = vcombine.high %v275_v33, %v275_v33  ;;  %v323_v36 = vshrl.u32 %v1341_v32, 16  ;;  %v325_v37 = vshll.u32 %v1341_v32, 16  ;;  %v1545_v38 = vcombine.low %v275_v33, %v275_v33  ;;  %v1350_v53 = vld [vmem:[%s1701_s1 + $0x150] sm:$0xff]   ;;  %v1352_v58 = vld [vmem:[%s1701_s1 + $0x158] sm:$0xff]   ;;  %v1354_v63 = vld [vmem:[%s1701_s1 + $0x160] sm:$0xff]  }
  0x13   : > { %v311_v41 = vshrl.u32 %v1543_v34, 16  ;;  %v313_v42 = vshll.u32 %v1543_v34, 16  ;;  %v1351_v56 = vld [vmem:[%s1701_s1 + $0x110] sm:$0xff]   ;;  %v366_v57 = vrot.slane %v1341_v32, 1  ;;  %v1353_v60 = vld [vmem:[%s1701_s1 + $0x118] sm:$0xff]   ;;  %v1355_v8 = vld [vmem:[%s1701_s1 + $0x120] sm:$0xff]  }
  0x14   : > { %1207 = vmatpush3.bf16.msra.mxu0 %v1323_v14  ;;  %v327_v43 = vrot.slane %v325_v37, 1  ;;  %v330_v44 = vshll.u32 %v1145_v35, 16  ;;  %v318_v45 = vshll.u32 %v1545_v38, 16  ;;  %v367_v59 = vrot.slane %v1145_v35, 1  ;;  %v1356_v61 = vld [vmem:[%s1532_s18 + $0x1c] ss:$8 sps:$4 sm:$0xff]  }
  0x15   : > { %1235 = vmatpush3.bf16.msra.mxu1 %v1324_v15  ;;  %1208 = vmatprep.subr.bf16.mxu0 %v1325_v16  ;;  %v315_v47 = vrot.slane %v313_v42, 1  ;;  %v1579_v62 = vld [vmem:[%s1532_s18 + $0x18] ss:$8 sps:$4 sm:$0xff]   ;;  %v278_v1 = vld [vmem:[%s1532_s18 + $0x28] sm:$0x11]  ;;  %v347_v2 = vshrl.u32 %v1356_v61, 16 }
  0x16   : > { %1236 = vmatprep.subr.bf16.mxu1 %v1326_v17  ;;  %v328_v49 = vor.u32 %v327_v43, %v323_v36  ;;  %v332_v50 = vrot.slane %v330_v44, 1  ;;  %v320_v51 = vrot.slane %v318_v45, 1  ;;  %v368_v0 = vsel %vm362_vm1, %v366_v57, %v367_v59  ;;  %v1359_v10 = vld [vmem:[%s1701_s1 + $0x168] sm:$0xff]  }
  0x17   : > { %v316_v52 = vor.u32 %v315_v47, %v311_v41  ;;  %v349_v3 = vshll.u32 %v1356_v61, 16  ;;  %v1147_v4 = vcombine.high %v278_v1, %v278_v1  ;;  %v1146_v5 = vcombine.low %v278_v1, %v278_v1 }
  0x18   : > { %1209 = vmatpush3.bf16.msra.mxu0 %v1327_v18  ;;  %v333_v54 = vsel %vm309_vm0, %v328_v49, %v332_v50  ;;  %v335_v6 = vshrl.u32 %v1579_v62, 16  ;;  %v337_v7 = vshll.u32 %v1579_v62, 16  ;;  %v1361_v18 = vld [vmem:[%s1701_s1 + $0x128] sm:$0xff]  }
  0x19   : > { %1237 = vmatpush3.bf16.msra.mxu1 %v1328_v19  ;;  %1210 = vmatprep.subr.bf16.mxu0 %v1329_v20  ;;  %v321_v55 = vsel %vm309_vm0, %v316_v52, %v320_v51  ;;  %v351_v9 = vrot.slane %v349_v3, 1  ;;  %v354_v11 = vshll.u32 %v1147_v4, 16  ;;  %v342_v13 = vshll.u32 %v1146_v5, 16 }
  0x1a   : > { %1238 = vmatprep.subr.bf16.mxu1 %v1330_v21  ;;  %851 = vmatprep.mubr.bf16.mxu1 %v333_v54  ;;  %v339_v12 = vrot.slane %v337_v7, 1  ;;  %v372_v19 = vrot.slane %v1356_v61, 1  ;;  %v373_v20 = vrot.slane %v1147_v4, 1  ;;  %v370_v32 = vrot.slane %v1146_v5, 1 }
  0x1b   : > { %v352_v14 = vor.u32 %v351_v9, %v347_v2  ;;  %v356_v15 = vrot.slane %v354_v11, 1  ;;  %v344_v17 = vrot.slane %v342_v13, 1 }
  0x1c   : > { %1211 = vmatpush3.bf16.msra.mxu0 %v1331_v22  ;;  %v340_v16 = vor.u32 %v339_v12, %v335_v6 }
  0x1d   : > { %1239 = vmatpush3.bf16.msra.mxu1 %v1332_v23  ;;  %1212 = vmatprep.subr.bf16.mxu0 %v1333_v24  ;;  %v357_v21 = vsel %vm309_vm0, %v352_v14, %v356_v15  ;;  %v1363_v23 = vld [vmem:[%s1701_s1 + $0x170] sm:$0xff]   ;;  %v374_v24 = vsel %vm362_vm1, %v372_v19, %v373_v20 }
  0x1e   : > { %1240 = vmatprep.subr.bf16.mxu1 %v1334_v25  ;;  %v345_v22 = vsel %vm309_vm0, %v340_v16, %v344_v17  ;;  %v1364_v25 = vld [vmem:[%s1701_s1 + $0x130] sm:$0xff]  }
  0x20   : > { %1213 = vmatpush3.bf16.msra.mxu0 %v1335_v26  ;;  %v1365_v26 = vld [vmem:[%s1701_s1 + $0x178] sm:$0xff]  }
  0x21   : > { %1241 = vmatpush3.bf16.msra.mxu1 %v1336_v27  ;;  %1214 = vmatprep.subr.bf16.mxu0 %v1337_v28  ;;  %v1366_v27 = vld [vmem:[%s1701_s1 + $0x138] sm:$0xff]   ;;  %v363_v28 = vrot.slane %v1543_v34, 1 }
  0x22   : > { %1242 = vmatprep.subr.bf16.mxu1 %v1338_v29  ;;  %v364_v29 = vrot.slane %v1545_v38, 1 }
  0x24   : > { %1215 = vmatpush3.bf16.msra.mxu0 %v1339_v30  ;;  %v365_v30 = vsel %vm362_vm1, %v363_v28, %v364_v29 }
  0x25   : > { %1243 = vmatpush3.bf16.msra.mxu1 %v1340_v31  ;;  %1256 = vmatprep.subr.bf16.mxu0 %v1346_v39  ;;  %v369_v31 = vrot.slane %v1579_v62, 1 }
  0x26   : > { %1284 = vmatprep.subr.bf16.mxu1 %v1346_v39  ;;  %v1148_v39 = vld [vmem:[%s1702_s2] ss:$0 sm:$0xff] }
  0x27   : > { %803 = vmatmul.mubr.bf16.vlgmr.msra.gmra.mrb[0].mxu0 %v1543_v34  ;;  %v371_v33 = vsel %vm362_vm1, %v369_v31, %v370_v32 }
  0x28   : > { %1257 = vmatpush3.bf16.msra.mxu0 %v1347_v40  ;;  %852 = vmatmul.mubr.bf16.vlgmr.msra.gmra.mrb[0].mxu1 %v321_v55 }
  0x29   : > { %1258 = vmatprep.subr.bf16.mxu0 %v1348_v46  ;;  %1292 = vmatpush3.bf16.msra.mxu1 %v1347_v40 }
  0x2a   : > { %1285 = vmatprep.subr.bf16.mxu1 %v1348_v46  ;;  %810 = vmatprep.mubr.bf16.mxu0 %v1356_v61 }
  0x2b   : > { %859 = vmatprep.mubr.bf16.mxu1 %v357_v21 }
  0x2c   : > { %1259 = vmatpush3.bf16.msra.mxu0 %v1349_v48 }
  0x2d   : > { %1260 = vmatprep.subr.bf16.mxu0 %v1350_v53  ;;  %1293 = vmatpush3.bf16.msra.mxu1 %v1349_v48 }
  0x2e   : > { %1286 = vmatprep.subr.bf16.mxu1 %v1350_v53 }
  0x2f   : > { %811 = vmatmul.mubr.bf16.gmra.mrb[4].mxu0 %v1579_v62 }
  0x30   : > { %1261 = vmatpush3.bf16.msra.mxu0 %v1351_v56  ;;  %900 = vmatprep.mubr.bf16.mxu0 %v368_v0 }
  0x31   : > { %1262 = vmatprep.subr.bf16.mxu0 %v1352_v58  ;;  %1294 = vmatpush3.bf16.msra.mxu1 %v1351_v56 }
  0x32   : > { %1287 = vmatprep.subr.bf16.mxu1 %v1352_v58  ;;  %860 = vmatmul.mubr.bf16.gmra.mrb[4].mxu1 %v345_v22 }
  0x33   : > { %908 = vmatprep.mubr.bf16.mxu1 %v374_v24 }
  0x34   : > { %1263 = vmatpush3.bf16.msra.mxu0 %v1353_v60 }
  0x35   : > { %1264 = vmatprep.subr.bf16.mxu0 %v1354_v63  ;;  %1295 = vmatpush3.bf16.msra.mxu1 %v1353_v60 }
  0x36   : > { %1288 = vmatprep.subr.bf16.mxu1 %v1354_v63 }
  0x38   : > { %1265 = vmatpush3.bf16.msra.mxu0 %v1355_v8 }
  0x39   : > { %1266 = vmatprep.subr.bf16.mxu0 %v1359_v10  ;;  %1296 = vmatpush3.bf16.msra.mxu1 %v1355_v8 }
  0x3a   : > { %1289 = vmatprep.subr.bf16.mxu1 %v1359_v10 }
  0x3c   : > { %1267 = vmatpush3.bf16.msra.mxu0 %v1361_v18 }
  0x3d   : > { %1268 = vmatprep.subr.bf16.mxu0 %v1363_v23  ;;  %1297 = vmatpush3.bf16.msra.mxu1 %v1361_v18 }
  0x3e   : > { %1290 = vmatprep.subr.bf16.mxu1 %v1363_v23 }
  0x40   : > { %1269 = vmatpush3.bf16.msra.mxu0 %v1364_v25 }
  0x41   : > { %1270 = vmatprep.subr.bf16.mxu0 %v1365_v26  ;;  %1298 = vmatpush3.bf16.msra.mxu1 %v1364_v25 }
  0x42   : > { %1291 = vmatprep.subr.bf16.mxu1 %v1365_v26 }
  0x44   : > { %1271 = vmatpush3.bf16.msra.mxu0 %v1366_v27 }
  0x45   : > { %1299 = vmatpush3.bf16.msra.mxu1 %v1366_v27 }
  0x47   : > { %901 = vmatmul.mubr.bf16.vlgmr.msra.gmra.mrb[8].mxu0 %v365_v30 }
  0x48   : > { %909 = vmatmul.mubr.bf16.vlgmr.msra.gmra.mrb[8].mxu1 %v371_v33 }
  0xfa   : > { %v1216_v35 = vpop.f32.mrb[0].mxu0 }
  0xfb   : > { %v1217_v34 = vpop.f32.mrb[1].mxu0  ;;  %v1244_v41 = vpop.f32.mrb[0].mxu1 }
  0xfc   : > { %v1218_v36 = vadd.f32 %v1217_v34, %v1216_v35  ;;  %v1219_v37 = vpop.f32.mrb[2].mxu0  ;;  %v1245_v43 = vpop.f32.mrb[1].mxu1 }
  0xfd   : > { %v1220_v38 = vpop.f32.mrb[3].mxu0  ;;  %v1246_v44 = vadd.f32 %v1245_v43, %v1244_v41  ;;  %v1247_v45 = vpop.f32.mrb[2].mxu1 }
  0xfe   : > { %v1221_v40 = vadd.f32 %v1220_v38, %v1219_v37  ;;  %v805_v42 = vadd.f32 %v1218_v36, %v1148_v39  ;;  %v1248_v47 = vpop.f32.mrb[3].mxu1 }
  0xff   : > { %v1249_v49 = vadd.f32 %v1248_v47, %v1247_v45 }
 0x100   : > { %v808_v46 = vadd.f32 %v1221_v40, %v1148_v39  ;;  %v854_v48 = vadd.f32 %v1246_v44, %v805_v42 }
 0x102   : > { %v857_v50 = vadd.f32 %v1249_v49, %v808_v46  ;;  %v1222_v51 = vpop.f32.mrb[4].mxu0 }
 0x103   : > { %v1223_v52 = vpop.f32.mrb[5].mxu0 }
 0x104   : > { %v1224_v53 = vadd.f32 %v1223_v52, %v1222_v51  ;;  %v1225_v54 = vpop.f32.mrb[6].mxu0  ;;  %v922_v51 = vld [vmem:[%s1703_s3] sm:$0xff] }
 0x105   : > { %v1226_v55 = vpop.f32.mrb[7].mxu0  ;;  %v1250_v58 = vpop.f32.mrb[4].mxu1 }
 0x106   : > { %v1227_v56 = vadd.f32 %v1226_v55, %v1225_v54  ;;  %v813_v57 = vadd.f32 %v1224_v53, %v1148_v39  ;;  %v1251_v59 = vpop.f32.mrb[5].mxu1 }
 0x107   : > { %v1252_v61 = vadd.f32 %v1251_v59, %v1250_v58  ;;  %v1253_v62 = vpop.f32.mrb[6].mxu1 }
 0x108   : > { %v816_v60 = vadd.f32 %v1227_v56, %v1148_v39  ;;  %v1254_v63 = vpop.f32.mrb[7].mxu1  ;;  %v923_v56 = vld [vmem:[%s1703_s3 + $0x8] sm:$0xff] }
 0x109   : > { %v862_v0 = vadd.f32 %v1252_v61, %v813_v57  ;;  %v1255_v1 = vadd.f32 %v1254_v63, %v1253_v62 }
 0x10b   : > { %v865_v2 = vadd.f32 %v1255_v1, %v816_v60 }
 0x11a   : > { %v1272_v3 = vpop.f32.mrb[8].mxu0 }
 0x11b   : > { %v1273_v4 = vpop.f32.mrb[9].mxu0  ;;  %v1278_v10 = vpop.f32.mrb[8].mxu1 }
 0x11c   : > { %v1274_v5 = vadd.f32 %v1273_v4, %v1272_v3  ;;  %v1275_v6 = vpop.f32.mrb[10].mxu0  ;;  %v1279_v13 = vpop.f32.mrb[9].mxu1 }
 0x11d   : > { %v1276_v7 = vpop.f32.mrb[11].mxu0  ;;  %v1280_v15 = vadd.f32 %v1279_v13, %v1278_v10  ;;  %v1281_v16 = vpop.f32.mrb[10].mxu1 }
 0x11e   : > { %v1625_v8 = vadd.f32 %v1274_v5, %v854_v48  ;;  %v1277_v9 = vadd.f32 %v1276_v7, %v1275_v6  ;;  %v1282_v18 = vpop.f32.mrb[11].mxu1  ;;  %v924_v6 = vld [vmem:[%s1703_s3 + $0x10] sm:$0xff] }
 0x11f   : > { %v1635_v20 = vadd.f32 %v1280_v15, %v862_v0  ;;  %v1283_v22 = vadd.f32 %v1282_v18, %v1281_v16  ;;  %v1007_v15 = vld [vmem:[%s1704_s4 + $0x8] sm:$0xff] }
 0x120   : > { %v942_v11 = vand.u32 2147483647, %v1625_v8  ;;  %v1628_v12 = vadd.f32 %v1277_v9, %v857_v50  ;;  %918 = vst.msk [vmem:[%s265_s16] sm:$0xff] %vm917_vm2, %v1625_v8  ;;  %v930_v52 = vmax.f32 %v1625_v8, 0.0  ;;  %v926_v62 = vmul.f32 %v922_v51, %v1625_v8 }
 0x121   : > { %v944_v23 = vand.u32 2147483647, %v1635_v20  ;;  %v1638_v25 = vadd.f32 %v1283_v22, %v865_v2  ;;  %920 = vst.msk [vmem:[%s265_s16 + $0x10] sm:$0xff] %vm917_vm2, %v1635_v20  ;;  %vm934_vm5 = vcmp.ne.f32.partialorder %v1625_v8, %v1625_v8  ;;  %v1006_v2 = vld [vmem:[%s1704_s4] sm:$0xff]  ;;  %vm936_vm9 = vcmp.ne.f32.partialorder %v1635_v20, %v1635_v20 }
 0x122   : > { %v946_v14 = vsub.f32 0.0, %v942_v11  ;;  %v943_v17 = vand.u32 2147483647, %v1628_v12  ;;  %919 = vst.msk [vmem:[%s265_s16 + $0x8] sm:$0xff] %vm917_vm2, %v1628_v12  ;;  %v931_v53 = vmax.f32 %v1628_v12, 0.0  ;;  %v927_v4 = vmul.f32 %v923_v56, %v1628_v12 }
 0x123   : > { %v948_v26 = vsub.f32 0.0, %v944_v23  ;;  %v945_v27 = vand.u32 2147483647, %v1638_v25  ;;  %921 = vst.msk [vmem:[%s265_s16 + $0x18] sm:$0xff] %vm917_vm2, %v1638_v25  ;;  %vm935_vm6 = vcmp.ne.f32.partialorder %v1628_v12, %v1628_v12  ;;  %v925_v23 = vld [vmem:[%s1703_s3 + $0x18] sm:$0xff]  ;;  %vm937_vm10 = vcmp.ne.f32.partialorder %v1638_v25, %v1638_v25 }
 0x124   : > { %v950_v19 = vmul.f32 1.442695, %v946_v14  ;;  %v947_v21 = vsub.f32 0.0, %v943_v17 }
 0x125   : > { %v954_v28 = vmul.f32 1.442695, %v948_v26  ;;  %v949_v29 = vsub.f32 0.0, %v945_v27 }
 0x126   : > { %1367 = vpow2.f32 %v950_v19  ;;  %v952_v24 = vmul.f32 1.442695, %v947_v21  ;;  %v928_v21 = vmul.f32 %v924_v6, %v1635_v20 }
 0x127   : > { %v956_v30 = vmul.f32 1.442695, %v949_v29  ;;  %v1008_v29 = vld [vmem:[%s1704_s4 + $0x10] sm:$0xff] }
 0x128   : > { %1369 = vpow2.f32 %v952_v24  ;;  %v933_v24 = vmax.f32 %v1638_v25, 0.0 }
 0x129   : > { %1371 = vpow2.f32 %v954_v28 }
 0x12a   : > { %1373 = vpow2.f32 %v956_v30 }
 0x130   : > { %v1368_v31 = vpop.eup %1367 }
 0x131   : > { %v958_v32 = vadd.f32 1.0, %v1368_v31  ;;  %v961_v36 = vmul.f32 -0.5, %v1368_v31  ;;  %v964_v42 = vand.u32 2147483647, %v1368_v31 }
 0x132   : > { %v1370_v33 = vpop.eup %1369 }
 0x133   : > { %1375 = vlog2.f32 %v958_v32  ;;  %v967_v35 = vadd.f32 1.0, %v1370_v33  ;;  %v1372_v34 = vpop.eup %1371  ;;  %v970_v39 = vmul.f32 -0.5, %v1370_v33  ;;  %v962_v41 = vadd.f32 1.0, %v961_v36 }
 0x134   : > { %v976_v37 = vadd.f32 1.0, %v1372_v34  ;;  %v1374_v38 = vpop.eup %1373  ;;  %v979_v43 = vmul.f32 -0.5, %v1372_v34  ;;  %v973_v47 = vand.u32 2147483647, %v1370_v33  ;;  %vm965_vm3 = vcmp.lt.f32.partialorder %v964_v42, 0.0004427343 }
 0x135   : > { %1377 = vlog2.f32 %v967_v35  ;;  %v985_v40 = vadd.f32 1.0, %v1374_v38  ;;  %v971_v44 = vadd.f32 1.0, %v970_v39  ;;  %v988_v46 = vmul.f32 -0.5, %v1374_v38  ;;  %v1009_v35 = vld [vmem:[%s1704_s4 + $0x18] sm:$0xff] }
 0x136   : > { %1379 = vlog2.f32 %v976_v37  ;;  %v963_v49 = vmul.f32 %v1368_v31, %v962_v41  ;;  %v980_v54 = vadd.f32 1.0, %v979_v43  ;;  %v982_v59 = vand.u32 2147483647, %v1372_v34 }
 0x137   : > { %1381 = vlog2.f32 %v985_v40  ;;  %v972_v58 = vmul.f32 %v1370_v33, %v971_v44  ;;  %v989_v61 = vadd.f32 1.0, %v988_v46  ;;  %vm974_vm4 = vcmp.lt.f32.partialorder %v973_v47, 0.0004427343 }
 0x138   : > { %v991_v3 = vand.u32 2147483647, %v1374_v38  ;;  %v981_v9 = vmul.f32 %v1372_v34, %v980_v54  ;;  %vm983_vm7 = vcmp.lt.f32.partialorder %v982_v59, 0.0004427343  ;;  %v929_v32 = vmul.f32 %v925_v23, %v1638_v25 }
 0x139   : > { %v990_v13 = vmul.f32 %v1374_v38, %v989_v61 }
 0x13a   : > { %vm992_vm8 = vcmp.lt.f32.partialorder %v991_v3, 0.0004427343 }
 0x13d   : > { %v1376_v45 = vpop.eup %1375 }
 0x13e   : > { %v960_v48 = vmul.f32 0.6931472, %v1376_v45 }
 0x13f   : > { %v1378_v50 = vpop.eup %1377 }
 0x140   : > { %v966_v55 = vsel %vm965_vm3, %v963_v49, %v960_v48  ;;  %v969_v57 = vmul.f32 0.6931472, %v1378_v50  ;;  %v1380_v0 = vpop.eup %1379 }
 0x141   : > { %v994_v60 = vadd.f32 %v966_v55, %v930_v52  ;;  %v978_v7 = vmul.f32 0.6931472, %v1380_v0  ;;  %v1382_v11 = vpop.eup %1381 }
 0x142   : > { %v975_v63 = vsel %vm974_vm4, %v972_v58, %v969_v57  ;;  %v987_v18 = vmul.f32 0.6931472, %v1382_v11 }
 0x143   : > { %v998_v1 = vsel %vm934_vm5, %v1625_v8, %v994_v60  ;;  %v995_v5 = vadd.f32 %v975_v63, %v931_v53  ;;  %v932_v8 = vmax.f32 %v1635_v20, 0.0  ;;  %v984_v16 = vsel %vm983_vm7, %v981_v9, %v978_v7 }
 0x144   : > { %v1002_v10 = vsub.f32 %v926_v62, %v998_v1  ;;  %v993_v26 = vsel %vm992_vm8, %v990_v13, %v987_v18 }
 0x145   : > { %v999_v14 = vsel %vm935_vm6, %v1628_v12, %v995_v5  ;;  %v996_v22 = vadd.f32 %v984_v16, %v932_v8  ;;  %v997_v30 = vadd.f32 %v993_v26, %v933_v24 }
 0x146   : > { %v1010_v17 = vmul.f32 %v1006_v2, %v1002_v10  ;;  %v1003_v19 = vsub.f32 %v927_v4, %v999_v14 }
 0x147   : > { %v1000_v28 = vsel %vm936_vm9, %v1635_v20, %v996_v22  ;;  %v1001_v33 = vsel %vm937_vm10, %v1638_v25, %v997_v30 }
 0x148   : > { %v1014_v12 = vsel %vm917_vm2, %v1010_v17, 0.0  ;;  %v1011_v27 = vmul.f32 %v1007_v15, %v1003_v19  ;;  %v1004_v31 = vsub.f32 %v928_v21, %v1000_v28  ;;  %v1005_v20 = vsub.f32 %v929_v32, %v1001_v33 }
 0x149   : > { %1015 = vadd.xlane.f32.xlu0 %v1014_v12 }
 0x14a   : > { %v1012_v34 = vmul.f32 %v1008_v29, %v1004_v31  ;;  %v1017_v36 = vsel %vm917_vm2, %v1011_v27, 0.0  ;;  %v1013_v38 = vmul.f32 %v1009_v35, %v1005_v20 }
 0x14c   : > { %v1020_v37 = vsel %vm917_vm2, %v1012_v34, 0.0  ;;  %v1023_v39 = vsel %vm917_vm2, %v1013_v38, 0.0 }
 0x14d   : > { %1018 = vadd.xlane.f32.xlu0 %v1017_v36  ;;  %1021 = vadd.xlane.f32.xlu1 %v1020_v37 }
 0x151   : > { %1024 = vadd.xlane.f32.xlu1 %v1023_v39 }
 0x1d6   : > { %v1016_v40 = vpop.xlane.xlu0 %1015 }
 0x1da   : > { %v1019_v41 = vpop.xlane.xlu0 %1018  ;;  %v1022_v42 = vpop.xlane.xlu1 %1021 }
 0x1db   : > { %v1026_v25 = vadd.f32 %v1019_v41, %v1016_v40 }
 0x1dd   : > { %v1027_v43 = vrot.slane %v1026_v25, 4 }
 0x1de   : > { %v1025_v45 = vpop.xlane.xlu1 %1024 }
 0x1df   : > { %v1028_v44 = vadd.f32 %v1027_v43, %v1026_v25  ;;  %v1033_v46 = vadd.f32 %v1025_v45, %v1022_v42 }
 0x1e1   : > { %v1029_v47 = vrot.slane %v1028_v44, 2  ;;  %v1034_v48 = vrot.slane %v1033_v46, 4 }
 0x1e3   : > { %v1030_v49 = vadd.f32 %v1029_v47, %v1028_v44  ;;  %v1035_v50 = vadd.f32 %v1034_v48, %v1033_v46 }
 0x1e5   : > { %v1031_v51 = vrot.slane %v1030_v49, 1  ;;  %v1036_v52 = vrot.slane %v1035_v50, 2 }
 0x1e7   : > { %v1032_v53 = vadd.f32 %v1031_v51, %v1030_v49  ;;  %v1037_v54 = vadd.f32 %v1036_v52, %v1035_v50 }
 0x1e9   : > { %1041 = vst.msk [vmem:[%s270_s14] sm:$0x1] %vm1040_vm11, %v1032_v53  ;;  %v1038_v55 = vrot.slane %v1037_v54, 1 }
 0x1eb   : > { %v1039_v56 = vadd.f32 %v1038_v55, %v1037_v54 }
 0x1ed   : > { %1042 = vst.msk [vmem:[%s270_s14 + $0x1] sm:$0x1] %vm1040_vm11, %v1039_v56 }
 0x1ee PF: > { %s17_s21 = sadd.s32 1, %s1389_s21  }
 0x1ef   : > { %p14_p4 = scmp.ge.s32.totalorder %s17_s21, 6  }
 0x1f1   :  { %16 = sbr.rel (!%p14_p4) target bundleno = 1 (0x1), region = 82 }

// kernel: conv_vae_forward.17
= control target key start
LH: loop header
LB: loop body
LE: loop exit
PB: predicated region body
PF: predicated region fallthrough
CT: control target
= control target key end

     0   :  { %s257_s0 = inlined_call_operand.vmem [shape: f32[4,2], index: 0, kind: input, shape index: {}]   ;;  %s258_s1 = inlined_call_operand.vmem [shape: f32[4,2,16], index: 1, kind: input, shape index: {}]   ;;  %s259_s2 = inlined_call_operand.vmem [shape: f32[2,16], index: 2, kind: input, shape index: {}]   ;;  %s260_s3 = inlined_call_operand.vmem [shape: f32[2,16], index: 3, kind: input, shape index: {}]   ;;  %s261_s4 = inlined_call_operand.vmem [shape: f32[4,2], index: 4, kind: output, shape index: {0}]   ;;  %s262_s5 = inlined_call_operand.hbm [shape: f32[1,1], index: 5, kind: output, shape index: {1}]  }
   0x1   :  { %v20_v0 = vld [vmem:[%s258_s1] sm:$0x3]  ;;  %v22_v4 = vld [vmem:[%s258_s1 + $0x4] sm:$0x3]  ;;  %v21_v5 = vld [vmem:[%s258_s1 + $0x2] sm:$0x3] }
   0x2   :  { %v25_v1 = vld [vmem:[%s260_s3] sm:$0x3] }
   0x3   :  { %v24_v2 = vld [vmem:[%s259_s2] sm:$0x3]  ;;  %v51_v3 = vsub.f32 0.0, %v25_v1 }
   0x5   :  { %v52_v6 = vmul.f32 1.442695, %v51_v3 }
   0x6   :  { %11 = vsyncpa [#allocation3], 0  ;;  %v39_v7 = vsub.f32 %v20_v0, %v24_v2  ;;  %v41_v8 = vsub.f32 %v22_v4, %v24_v2  ;;  %v40_v9 = vsub.f32 %v21_v5, %v24_v2  ;;  %v23_v10 = vld [vmem:[%s258_s1 + $0x6] sm:$0x3]  ;;  %v26_v11 = vmul.f32 0.5, %v20_v0 }
   0x7   :  { %157 = vpow2.f32 %v52_v6  ;;  %v28_v12 = vmul.f32 0.5, %v22_v4  ;;  %v27_v13 = vmul.f32 0.5, %v21_v5  ;;  %v29_v14 = vmul.f32 0.5, %v23_v10  ;;  %v106_v59 = vld [vmem:[%s257_s0] sm:$0xf]  ;;  %s187_s0 = smov [#allocation2]  }
   0x8   :  { %v42_v15 = vsub.f32 %v23_v10, %v24_v2  ;;  %v43_v16 = vmul.f32 %v39_v7, %v39_v7  ;;  %v45_v17 = vmul.f32 %v41_v8, %v41_v8  ;;  %v44_v18 = vmul.f32 %v40_v9, %v40_v9 }
   0x9   :  { %v34_v19 = vmul.f32 0.5, %v25_v1  ;;  %v30_v21 = vmul.f32 %v26_v11, %v20_v0  ;;  %v32_v22 = vmul.f32 %v28_v12, %v22_v4  ;;  %v31_v23 = vmul.f32 %v27_v13, %v21_v5 }
   0xa   :  { %v46_v20 = vmul.f32 %v42_v15, %v42_v15  ;;  %v33_v24 = vmul.f32 %v29_v14, %v23_v10  ;;  %v47_v25 = vmul.f32 0.5, %v43_v16  ;;  %v49_v26 = vmul.f32 0.5, %v45_v17 }
   0xb   :  { %v48_v27 = vmul.f32 0.5, %v44_v18  ;;  %v35_v29 = vsub.f32 %v30_v21, %v34_v19  ;;  %v37_v30 = vsub.f32 %v32_v22, %v34_v19  ;;  %v36_v31 = vsub.f32 %v31_v23, %v34_v19 }
   0xc   :  { %v50_v28 = vmul.f32 0.5, %v46_v20  ;;  %v38_v32 = vsub.f32 %v33_v24, %v34_v19  ;;  %vm62_vm0 = vcmask 123904   ;;  %v79_v46 = vlaneseq }
   0xd   :  { %vm97_vm1 = vcmask 1041409   ;;  %vm99_vm2 = vcmask 1042434   ;;  %vm101_vm3 = vcmask 1043459   ;;  %vm104_vm4 = vcmask 11264  }
   0xe   :  { %v80_v47 = vand.u32 127, %v79_v46  ;;  %v82_v48 = vshrl.u32 %v79_v46, 7  ;;  %vm129_vm5 = vcmask 15360   ;;  %vm135_vm6 = vcmask 0  }
  0x10   :  { %v83_v51 = vsub.s32 %v80_v47, %v82_v48 }
  0x11   :  { %v158_v33 = vpop.eup %157 }
  0x12   :  { %v54_v34 = vmul.f32 %v158_v33, %v47_v25  ;;  %v56_v35 = vmul.f32 %v158_v33, %v49_v26  ;;  %v55_v36 = vmul.f32 %v158_v33, %v48_v27  ;;  %v57_v37 = vmul.f32 %v158_v33, %v50_v28 }
  0x14   :  { %v58_v38 = vsub.f32 %v35_v29, %v54_v34  ;;  %v60_v39 = vsub.f32 %v37_v30, %v56_v35  ;;  %v59_v40 = vsub.f32 %v36_v31, %v55_v36  ;;  %v61_v41 = vsub.f32 %v38_v32, %v57_v37 }
  0x16   :  { %v63_v42 = vsel %vm62_vm0, %v58_v38, 0.0  ;;  %v69_v43 = vsel %vm62_vm0, %v60_v39, 0.0  ;;  %v66_v44 = vsel %vm62_vm0, %v59_v40, 0.0  ;;  %v72_v45 = vsel %vm62_vm0, %v61_v41, 0.0 }
  0x17   :  { %64 = vadd.xlane.f32.xlu0 %v63_v42  ;;  %70 = vadd.xlane.f32.xlu1 %v69_v43 }
  0x1b   :  { %67 = vadd.xlane.f32.xlu0 %v66_v44  ;;  %73 = vadd.xlane.f32.xlu1 %v72_v45 }
  0xa4   :  { %v65_v49 = vpop.xlane.xlu0 %64  ;;  %v71_v50 = vpop.xlane.xlu1 %70 }
  0xa5   :  { %v84_v54 = vrot.slane %v65_v49, %v83_v51  ;;  %v92_v57 = vrot.slane %v71_v50, %v83_v51 }
  0xa8   :  { %v68_v52 = vpop.xlane.xlu0 %67  ;;  %v74_v53 = vpop.xlane.xlu1 %73 }
  0xa9   :  { %v88_v55 = vrot.slane %v68_v52, %v83_v51  ;;  %v96_v56 = vrot.slane %v74_v53, %v83_v51 }
  0xab   :  { %v98_v58 = vsel %vm97_vm1, %v88_v55, %v84_v54 }
  0xac   :  { %v100_v60 = vsel %vm99_vm2, %v92_v57, %v98_v58 }
  0xad   :  { %v102_v61 = vsel %vm101_vm3, %v96_v56, %v100_v60 }
  0xae   :  { %105 = vst.msk [vmem:[%s261_s4] sm:$0xf] %vm104_vm4, %v102_v61  ;;  %v107_v62 = vsub.f32 %v106_v59, %v102_v61  ;;  %s145_s4 = sshll.u32 %s187_s0, 4  ;;  %s146_s4 = int_to_ptr.vmem [resolvable:$true] %s145_s4 }
  0xaf   :  { %s163_s6 = scalar_lea.vmem %s146_s4, 16  ;;  %s167_s7 = scalar_lea.vmem %s146_s4, 32 }
  0xb0   :  { %v108_v63 = vsel %vm104_vm4, %v107_v62, -inf  ;;  %p164_p0 = scmp.ne.s32.totalorder %s146_s4, %s163_s6  ;;  %p168_p1 = scmp.lt.s32.totalorder %s146_s4, %s146_s4 }
  0xb1   :  { %v109_v0 = vrot.slane %v108_v63, 4  ;;  %p169_p2 = scmp.lt.s32.totalorder %s167_s7, %s163_s6 }
  0xb3   :  { %v110_v1 = vmax.f32 %v108_v63, %v109_v0  ;;  %p170_p3 = por %p169_p2, %p168_p1 }
  0xb5   :  { %v111_v2 = vrot.slane %v110_v1, 2  ;;  %p171_p4 = pnand %p170_p3, %p164_p0 }
  0xb7   :  { %v112_v3 = vmax.f32 %v110_v1, %v111_v2 }
  0xb9   :  { %v113_v4 = vrot.slane %v112_v3, 1 }
  0xbb   :  { %v114_v5 = vmax.f32 %v112_v3, %v113_v4 }
  0xbd   :  { %v115_v6 = vsub.f32 %v107_v62, %v114_v5 }
  0xbf   :  { %v116_v7 = vmul.f32 1.442695, %v115_v6 }
  0xc1   :  { %159 = vpow2.f32 %v116_v7 }
  0xcb   :  { %v160_v8 = vpop.eup %159 }
  0xcc   :  { %v118_v9 = vsel %vm104_vm4, %v160_v8, 0.0 }
  0xcd   :  { %v119_v10 = vrot.slane %v118_v9, 4 }
  0xcf   :  { %v120_v11 = vadd.f32 %v119_v10, %v118_v9 }
  0xd1   :  { %v121_v12 = vrot.slane %v120_v11, 2 }
  0xd3   :  { %v122_v13 = vadd.f32 %v121_v12, %v120_v11 }
  0xd5   :  { %v123_v14 = vrot.slane %v122_v13, 1 }
  0xd7   :  { %v124_v15 = vadd.f32 %v123_v14, %v122_v13 }
  0xd9   :  { %161 = vlog2.f32 %v124_v15 }
  0xe3   :  { %v162_v16 = vpop.eup %161 }
  0xe4   :  { %v126_v17 = vmul.f32 0.6931472, %v162_v16 }
  0xe6   :  { %v127_v18 = vadd.f32 %v126_v17, %v114_v5 }
  0xe8   :  { %v155_v19 = vadd.f32 -1.3862944, %v127_v18 }
  0xea   :  { %v130_v20 = vsel %vm129_vm5, %v155_v19, 0.0 }
  0xeb   :  { %131 = vadd.xlane.f32.xlu0 %v130_v20 }
 0x178   :  { %v132_v21 = vpop.xlane.xlu0 %131 }
 0x179   :  { %v134_v22 = vmul.f32 0.5, %v132_v21 }
 0x17b   :  { %136 = vst.msk [vmem:[#allocation2] sm:$0x1] %vm135_vm6, %v134_v22 }
 0x17c   :  { %174 = shalt.err (!%p171_p4)
}
 0x17d   :  { %s175_s10 = scalar_lea.hbm %s262_s5, 16 }
 0x17e   :  { %p176_p5 = scmp.ne.s32.totalorder %s262_s5, %s175_s10  ;;  %p179_p6 = scmp.lt.u32.totalorder %s175_s10, %s262_s5 }
 0x180   :  { %p181_p7 = pnand %p179_p6, %p176_p5 }
 0x182   :  { %184 = shalt.err (!%p181_p7)
}
 0x183   :  { %148 = dma.vmem_to_hbm [thread:$0]  %s146_s4, 16, %s262_s5, [#allocation3]  }
 0x184   :  { %185 = dma.done.wait [#allocation3], 16  }
 0x185   :  { %186 = vsyncadd [#allocation3], 4294967280 }
 0x186   :  { %154 = vsyncpa [#allocation3], 1 }

</bundles_post_ra>
